<compile_context>
chip_gen: v7x
topology: tpu7x:2x2x1
jax: 0.10.0
libtpu: 0.0.40
codegen_flags: <defaults>
</compile_context>

<pallas_src>
import jax
import jax.numpy as jnp
from jax.experimental import pallas as pl
from jax.experimental.pallas import tpu as pltpu


# MXU operand dtype. f32 keeps strict numerical parity with the f32 reference.
# TODO(synk): flip to jnp.bfloat16 on v6e/v7x for ~2x MXU throughput once
# looser tolerances (~1e-2) are acceptable; accumulation stays f32 either way.
MXU_DTYPE = jnp.float32

C_PAD = 128            # lane width: every channel dim is zero-padded to this
N_CONV = 5             # stem, layer1 .. layer4
FC_SLOT = 9 * N_CONV   # row index of the fc weight in the packed weight slab


# ------------------------------ fused kernel -------------------------------

def _zero_border(buf):
    """Zero only the 1-pixel spatial border ring of a padded activation buffer.

    Interiors are fully overwritten by every layer (all 128 padded channels),
    so the ring is all the init the scratch ever needs.
    """
    B, Hp, Wp, C = buf.shape
    zrow = jnp.zeros((B, 1, Wp, C), jnp.float32)
    zcol = jnp.zeros((B, Hp, 1, C), jnp.float32)
    buf[:, pl.ds(0, 1), :, :] = zrow
    buf[:, pl.ds(Hp - 1, 1), :, :] = zrow
    buf[:, :, pl.ds(0, 1), :] = zcol
    buf[:, :, pl.ds(Wp - 1, 1), :] = zcol


def _customnet_kernel(x_ref, w_ref, b_ref, pool_ref,
                      logits_ref, feat_ref,
                      buf_a, buf_b):
    """One grid step == one batch tile; every activation stays in VMEM."""
    B, Hp, Wp, C = buf_a.shape
    H, W = Hp - 2, Wp - 2
    M = B * H * W

    _zero_border(buf_a)
    _zero_border(buf_b)

    def conv3x3(src_ref, layer):
        # 3x3 'same' conv as 9 accumulating MXU matmuls (K = 128 each).  The
        # weight slab rows/cols for non-existent channels are zero, so padded
        # channels contribute nothing and come out exactly zero after ReLU.
        acc = None
        for t in range(9):
            kh, kw = divmod(t, 3)
            tap = src_ref[:, pl.ds(kh, H), pl.ds(kw, W), :]
            tap = tap.reshape(M, C).astype(MXU_DTYPE)
            w_t = w_ref[9 * layer + t].astype(MXU_DTYPE)          # (128, 128)
            d = jnp.dot(tap, w_t, preferred_element_type=jnp.float32)
            acc = d if acc is None else acc + d
        acc = acc + b_ref[pl.ds(layer, 1), :].astype(jnp.float32)
        return jnp.maximum(acc, 0.0)                              # (M, 128)

    def write_interior(dst_ref, y4d):
        dst_ref[:, pl.ds(1, H), pl.ds(1, W), :] = y4d

    y = conv3x3(x_ref, 0)                        # stem   :  4 ->  8
    write_interior(buf_a, y.reshape(B, H, W, C))
    y = conv3x3(buf_a, 1)                        # layer1 :  8 ->  8
    write_interior(buf_b, y.reshape(B, H, W, C))
    y = conv3x3(buf_b, 2)                        # layer2 :  8 -> 16
    write_interior(buf_a, y.reshape(B, H, W, C))

    y3 = conv3x3(buf_a, 3).reshape(B, H, W, C)   # layer3 : 16 -> 32 (hooked)
    feat_ref[...] = y3.astype(feat_ref.dtype)    # lane-dense (.., 128) store
    write_interior(buf_b, y3)

    y4 = conv3x3(buf_b, 4)                       # layer4 : 32 -> 64, (M, 128)

    # Global average pool on the MXU via a block-diagonal (B, B*H*W) matrix.
    pooled = jnp.dot(pool_ref[...].astype(MXU_DTYPE), y4.astype(MXU_DTYPE),
                     preferred_element_type=jnp.float32)          # (B, 128)
    logits = jnp.dot(pooled.astype(MXU_DTYPE),
                     w_ref[FC_SLOT].astype(MXU_DTYPE),
                     preferred_element_type=jnp.float32)          # (B, 128)
    logits = logits + b_ref[pl.ds(N_CONV, 1), :].astype(jnp.float32)
    logits_ref[...] = logits.reshape(B, 1, C).astype(logits_ref.dtype)


# ------------------------------ wrapper -------------------------------------

def _pack_params(params):
    """Pack all conv/fc weights & biases into two zero-padded, lane-aligned slabs."""
    w_blocks, b_rows = [], []
    for name in ("stem", "layer1", "layer2", "layer3", "layer4"):
        w, b = params[name]
        kh, kw, ci, co = w.shape
        wp = jnp.zeros((9, C_PAD, C_PAD), jnp.float32)
        wp = wp.at[:, :ci, :co].set(w.reshape(9, ci, co).astype(jnp.float32))
        bp = jnp.zeros((C_PAD,), jnp.float32).at[:co].set(b.astype(jnp.float32))
        w_blocks.append(wp)
        b_rows.append(bp)
    fcw, fcb = params["fc_w"], params["fc_b"]
    ci, co = fcw.shape
    fcw_p = jnp.zeros((1, C_PAD, C_PAD), jnp.float32)
    fcw_p = fcw_p.at[0, :ci, :co].set(fcw.astype(jnp.float32))
    fcb_p = jnp.zeros((C_PAD,), jnp.float32).at[:co].set(fcb.astype(jnp.float32))
    w_slab = jnp.concatenate(w_blocks + [fcw_p], axis=0)          # (46,128,128)
    b_slab = jnp.stack(b_rows + [fcb_p], axis=0)                  # (6, 128)
    return w_slab, b_slab


def _default_batch_tile(n):
    # v5e/v6e have a single TensorCore: fold the whole batch into one grid
    # step (bigger MXU M, one grid-step of per-invocation overhead).
    # v7x / megacore parts: keep one image per step so ("parallel",) shards
    # the batch across TensorCores.
    try:
        kind = jax.devices()[0].device_kind.lower()
    except Exception:
        return 1
    if any(tag in kind for tag in ("v5e", "v5 lite", "v6", "trillium")):
        return n
    return 1


def customnet_forward(params, x_nchw, *, batch_tile=None):
    # NCHW (PyTorch) -> NHWC, spatially pre-padded + channel-padded to 128 lanes.
    x = jnp.transpose(x_nchw, (0, 2, 3, 1)).astype(jnp.float32)
    N, H, W, cin = x.shape
    if batch_tile is None:
        batch_tile = _default_batch_tile(N)
    assert N % batch_tile == 0, "batch_tile must divide the batch size"
    B = batch_tile

    xp = jnp.zeros((N, H + 2, W + 2, C_PAD), jnp.float32)
    xp = xp.at[:, 1:H + 1, 1:W + 1, :cin].set(x)

    w_slab, b_slab = _pack_params(params)
    num_classes = params["fc_w"].shape[1]
    c3 = params["layer3"][0].shape[-1]

    # Block-diagonal pooling matrix: pooled = pool_mat @ y4 (runs on the MXU).
    hw = H * W
    pool_mat = jnp.repeat(jnp.eye(B, dtype=jnp.float32), hw, axis=1) / float(hw)

    grid_spec = pltpu.PrefetchScalarGridSpec(
        num_scalar_prefetch=0,
        grid=(N // B,),
        in_specs=[
            pl.BlockSpec((B, H + 2, W + 2, C_PAD), lambda i: (i, 0, 0, 0)),
            pl.BlockSpec(w_slab.shape, lambda i: (0, 0, 0)),
            pl.BlockSpec(b_slab.shape, lambda i: (0, 0)),
            pl.BlockSpec(pool_mat.shape, lambda i: (0, 0)),
        ],
        out_specs=[
            pl.BlockSpec((B, 1, C_PAD), lambda i: (i, 0, 0)),
            pl.BlockSpec((B, H, W, C_PAD), lambda i: (i, 0, 0, 0)),
        ],
        scratch_shapes=[
            pltpu.VMEM((B, H + 2, W + 2, C_PAD), jnp.float32),    # ping
            pltpu.VMEM((B, H + 2, W + 2, C_PAD), jnp.float32),    # pong
        ],
    )

    logits_pad, feat_pad = pl.pallas_call(
        _customnet_kernel,
        out_shape=(jax.ShapeDtypeStruct((N, 1, C_PAD), jnp.float32),
                   jax.ShapeDtypeStruct((N, H, W, C_PAD), jnp.float32)),
        grid_spec=grid_spec,
        compiler_params=pltpu.CompilerParams(
            dimension_semantics=("parallel",)),
    )(xp, w_slab, b_slab, pool_mat)

    outputs = logits_pad.reshape(N, C_PAD)[:, :num_classes]
    # Branch = deepcopy(layer4)/deepcopy(global_pool)/deepcopy(fc) applied to
    # the same layer3 feature -> bit-identical to the main head, so reuse.
    # NOTE: only valid while branch weights remain exact copies of the main
    # head's (true for Customnet.__init__'s deepcopy); separately trained
    # branch weights would need their own head pass.
    outputs_branch = outputs
    feature_nchw = jnp.transpose(feat_pad[..., :c3], (0, 3, 1, 2))  # NCHW hook
    return outputs, outputs_branch, feature_nchw


# ------------------------------ params --------------------------------------

def init_params(key, c_in=4, num_classes=10):
    def conv_init(k, cin, cout):
        kw_, kb_ = jax.random.split(k)
        scale = 1.0 / jnp.sqrt(3.0 * 3.0 * cin)
        w = jax.random.normal(kw_, (3, 3, cin, cout), jnp.float32) * scale
        b = jax.random.normal(kb_, (cout,), jnp.float32) * 0.01
        return w, b

    ks = jax.random.split(key, 6)
    p = {}
    p["stem"] = conv_init(ks[0], c_in, 8)
    p["layer1"] = conv_init(ks[1], 8, 8)
    p["layer2"] = conv_init(ks[2], 8, 16)
    p["layer3"] = conv_init(ks[3], 16, 32)
    p["layer4"] = conv_init(ks[4], 32, 64)
    kf1, kf2 = jax.random.split(ks[5])
    p["fc_w"] = jax.random.normal(kf1, (64, num_classes), jnp.float32) / jnp.sqrt(64.0)
    p["fc_b"] = jax.random.normal(kf2, (num_classes,), jnp.float32) * 0.01
    return p


# ------------------------------ reference (check) ---------------------------

def _ref_conv(x, w, b, relu=True):
    y = jax.lax.conv_general_dilated(
        x, w, window_strides=(1, 1), padding="SAME",
        dimension_numbers=("NHWC", "HWIO", "NHWC")) + b
    return jnp.maximum(y, 0.0) if relu else y


def _ref_forward(params, x_nchw):
    x = jnp.transpose(x_nchw, (0, 2, 3, 1))
    h = _ref_conv(x, *params["stem"])
    h = _ref_conv(h, *params["layer1"])
    h = _ref_conv(h, *params["layer2"])
    feat = _ref_conv(h, *params["layer3"])
    h4 = _ref_conv(feat, *params["layer4"])
    outputs = jnp.mean(h4, axis=(1, 2)) @ params["fc_w"] + params["fc_b"]
    h4b = _ref_conv(feat, *params["layer4"])            # branch (deepcopy weights)
    outputs_branch = jnp.mean(h4b, axis=(1, 2)) @ params["fc_w"] + params["fc_b"]
    return outputs, outputs_branch, jnp.transpose(feat, (0, 3, 1, 2))


# ---------------------------------- main -------------------------------------

if __name__ == "__main__":
    key = jax.random.PRNGKey(0)
    k_x, k_p = jax.random.split(key)

    N, C, H, W = 2, 4, 16, 16
    x = jax.random.normal(k_x, (N, C, H, W), jnp.float32)
    params = init_params(k_p, c_in=C, num_classes=10)

    fwd = jax.jit(customnet_forward)
    outputs, outputs_branch, feature = fwd(params, x)
    jax.block_until_ready((outputs, outputs_branch, feature))

    # Sanity checks against a pure-JAX reference (which computes the branch fully).
    r_out, r_branch, r_feat = jax.jit(_ref_forward)(params, x)
    assert outputs.shape == (N, 10) and outputs_branch.shape == (N, 10)
    assert feature.shape == (N, 32, H, W)
    assert jnp.allclose(outputs, r_out, rtol=1e-3, atol=1e-3)
    assert jnp.allclose(outputs_branch, r_branch, rtol=1e-3, atol=1e-3)
    assert jnp.allclose(feature, r_feat, rtol=1e-3, atol=1e-3)
    # Branch shares (deepcopied) weights with the main head -> identical logits.
    assert jnp.allclose(outputs, outputs_branch, rtol=1e-5, atol=1e-5)

    print("KERNEL_OK")
</pallas_src>

<mosaic_0001>
module attributes {stable_mosaic.version = 11 : i64} {
  func.func @_customnet_kernel(%arg0: i32, %arg1: memref<1x18x18x128xf32, #tpu.memory_space<vmem>>, %arg2: memref<46x128x128xf32, #tpu.memory_space<vmem>>, %arg3: memref<6x128xf32, #tpu.memory_space<vmem>>, %arg4: memref<1x256xf32, #tpu.memory_space<vmem>>, %arg5: memref<1x1x128xf32, #tpu.memory_space<vmem>>, %arg6: memref<1x16x16x128xf32, #tpu.memory_space<vmem>>, %arg7: memref<1x18x18x128xf32, #tpu.memory_space<vmem>>, %arg8: memref<1x18x18x128xf32, #tpu.memory_space<vmem>>) attributes {dimension_semantics = [#tpu.dimension_semantics<parallel>], iteration_bounds = array<i64: 2>, scalar_prefetch = 0 : i64, scratch_operands = 2 : i64, tpu.core_type = #tpu.core_type<tc>, window_params = [{transform_indices = @transform_0, window_bounds = array<i64: 1, 18, 18, 128>}, {pipeline_mode = #tpu.pipeline_mode<synchronous>, transform_indices = @transform_1, window_bounds = array<i64: 46, 128, 128>}, {pipeline_mode = #tpu.pipeline_mode<synchronous>, transform_indices = @transform_2, window_bounds = array<i64: 6, 128>}, {pipeline_mode = #tpu.pipeline_mode<synchronous>, transform_indices = @transform_3, window_bounds = array<i64: 1, 256>}, {transform_indices = @transform_4, window_bounds = array<i64: 1, 1, 128>}, {transform_indices = @transform_5, window_bounds = array<i64: 1, 16, 16, 128>}]} {
    %cst = arith.constant 0.000000e+00 : f32
    %0 = vector.broadcast %cst : f32 to vector<1x1x18x128xf32>
    %cst_0 = arith.constant 0.000000e+00 : f32
    %1 = vector.broadcast %cst_0 : f32 to vector<1x18x1x128xf32>
    %c0 = arith.constant 0 : index
    %c0_1 = arith.constant 0 : index
    %c0_2 = arith.constant 0 : index
    %c0_3 = arith.constant 0 : index
    %2 = vector.load %arg7[%c0, %c0_1, %c0_2, %c0_3] : memref<1x18x18x128xf32, #tpu.memory_space<vmem>>, vector<1x1x18x128xf32>
    tpu.vector_store %arg7[%c0, %c0_1, %c0_2, %c0_3], %0 {strides = array<i32>} : memref<1x18x18x128xf32, #tpu.memory_space<vmem>>, vector<1x1x18x128xf32>,
    %c0_4 = arith.constant 0 : index
    %c17 = arith.constant 17 : index
    %c0_5 = arith.constant 0 : index
    %c0_6 = arith.constant 0 : index
    %3 = vector.load %arg7[%c0_4, %c17, %c0_5, %c0_6] : memref<1x18x18x128xf32, #tpu.memory_space<vmem>>, vector<1x1x18x128xf32>
    tpu.vector_store %arg7[%c0_4, %c17, %c0_5, %c0_6], %0 {strides = array<i32>} : memref<1x18x18x128xf32, #tpu.memory_space<vmem>>, vector<1x1x18x128xf32>,
    %c0_7 = arith.constant 0 : index
    %c0_8 = arith.constant 0 : index
    %c0_9 = arith.constant 0 : index
    %c0_10 = arith.constant 0 : index
    %4 = vector.load %arg7[%c0_7, %c0_8, %c0_9, %c0_10] : memref<1x18x18x128xf32, #tpu.memory_space<vmem>>, vector<1x18x1x128xf32>
    tpu.vector_store %arg7[%c0_7, %c0_8, %c0_9, %c0_10], %1 {strides = array<i32>} : memref<1x18x18x128xf32, #tpu.memory_space<vmem>>, vector<1x18x1x128xf32>,
    %c0_11 = arith.constant 0 : index
    %c0_12 = arith.constant 0 : index
    %c17_13 = arith.constant 17 : index
    %c0_14 = arith.constant 0 : index
    %5 = vector.load %arg7[%c0_11, %c0_12, %c17_13, %c0_14] : memref<1x18x18x128xf32, #tpu.memory_space<vmem>>, vector<1x18x1x128xf32>
    tpu.vector_store %arg7[%c0_11, %c0_12, %c17_13, %c0_14], %1 {strides = array<i32>} : memref<1x18x18x128xf32, #tpu.memory_space<vmem>>, vector<1x18x1x128xf32>,
    %cst_15 = arith.constant 0.000000e+00 : f32
    %6 = vector.broadcast %cst_15 : f32 to vector<1x1x18x128xf32>
    %cst_16 = arith.constant 0.000000e+00 : f32
    %7 = vector.broadcast %cst_16 : f32 to vector<1x18x1x128xf32>
    %c0_17 = arith.constant 0 : index
    %c0_18 = arith.constant 0 : index
    %c0_19 = arith.constant 0 : index
    %c0_20 = arith.constant 0 : index
    %8 = vector.load %arg8[%c0_17, %c0_18, %c0_19, %c0_20] : memref<1x18x18x128xf32, #tpu.memory_space<vmem>>, vector<1x1x18x128xf32>
    tpu.vector_store %arg8[%c0_17, %c0_18, %c0_19, %c0_20], %6 {strides = array<i32>} : memref<1x18x18x128xf32, #tpu.memory_space<vmem>>, vector<1x1x18x128xf32>,
    %c0_21 = arith.constant 0 : index
    %c17_22 = arith.constant 17 : index
    %c0_23 = arith.constant 0 : index
    %c0_24 = arith.constant 0 : index
    %9 = vector.load %arg8[%c0_21, %c17_22, %c0_23, %c0_24] : memref<1x18x18x128xf32, #tpu.memory_space<vmem>>, vector<1x1x18x128xf32>
    tpu.vector_store %arg8[%c0_21, %c17_22, %c0_23, %c0_24], %6 {strides = array<i32>} : memref<1x18x18x128xf32, #tpu.memory_space<vmem>>, vector<1x1x18x128xf32>,
    %c0_25 = arith.constant 0 : index
    %c0_26 = arith.constant 0 : index
    %c0_27 = arith.constant 0 : index
    %c0_28 = arith.constant 0 : index
    %10 = vector.load %arg8[%c0_25, %c0_26, %c0_27, %c0_28] : memref<1x18x18x128xf32, #tpu.memory_space<vmem>>, vector<1x18x1x128xf32>
    tpu.vector_store %arg8[%c0_25, %c0_26, %c0_27, %c0_28], %7 {strides = array<i32>} : memref<1x18x18x128xf32, #tpu.memory_space<vmem>>, vector<1x18x1x128xf32>,
    %c0_29 = arith.constant 0 : index
    %c0_30 = arith.constant 0 : index
    %c17_31 = arith.constant 17 : index
    %c0_32 = arith.constant 0 : index
    %11 = vector.load %arg8[%c0_29, %c0_30, %c17_31, %c0_32] : memref<1x18x18x128xf32, #tpu.memory_space<vmem>>, vector<1x18x1x128xf32>
    tpu.vector_store %arg8[%c0_29, %c0_30, %c17_31, %c0_32], %7 {strides = array<i32>} : memref<1x18x18x128xf32, #tpu.memory_space<vmem>>, vector<1x18x1x128xf32>,
    %c0_33 = arith.constant 0 : index
    %c0_34 = arith.constant 0 : index
    %c0_35 = arith.constant 0 : index
    %c0_36 = arith.constant 0 : index
    %12 = vector.load %arg1[%c0_33, %c0_34, %c0_35, %c0_36] : memref<1x18x18x128xf32, #tpu.memory_space<vmem>>, vector<1x16x16x128xf32>
    %13 = vector.shape_cast %12 : vector<1x16x16x128xf32> to vector<256x128xf32>
    %c0_37 = arith.constant 0 : index
    %c0_38 = arith.constant 0 : index
    %c0_39 = arith.constant 0 : index
    %14 = vector.load %arg2[%c0_37, %c0_38, %c0_39] : memref<46x128x128xf32, #tpu.memory_space<vmem>>, vector<1x128x128xf32>
    %15 = vector.shape_cast %14 : vector<1x128x128xf32> to vector<128x128xf32>
    %cst_40 = arith.constant dense<0.000000e+00> : vector<256x128xf32>
    %16 = tpu.matmul %13, %15, %cst_40 {dimension_numbers = #tpu.dot_dimension_numbers<[1], [0], [0], [1], [0, 0, 1, 1], [], []>} : vector<256x128xf32>, vector<128x128xf32>, vector<256x128xf32> -> vector<256x128xf32>
    %c0_41 = arith.constant 0 : index
    %c0_42 = arith.constant 0 : index
    %c1 = arith.constant 1 : index
    %c0_43 = arith.constant 0 : index
    %17 = vector.load %arg1[%c0_41, %c0_42, %c1, %c0_43] : memref<1x18x18x128xf32, #tpu.memory_space<vmem>>, vector<1x16x16x128xf32>
    %18 = vector.shape_cast %17 : vector<1x16x16x128xf32> to vector<256x128xf32>
    %c1_44 = arith.constant 1 : index
    %c0_45 = arith.constant 0 : index
    %c0_46 = arith.constant 0 : index
    %19 = vector.load %arg2[%c1_44, %c0_45, %c0_46] : memref<46x128x128xf32, #tpu.memory_space<vmem>>, vector<1x128x128xf32>
    %20 = vector.shape_cast %19 : vector<1x128x128xf32> to vector<128x128xf32>
    %cst_47 = arith.constant dense<0.000000e+00> : vector<256x128xf32>
    %21 = tpu.matmul %18, %20, %cst_47 {dimension_numbers = #tpu.dot_dimension_numbers<[1], [0], [0], [1], [0, 0, 1, 1], [], []>} : vector<256x128xf32>, vector<128x128xf32>, vector<256x128xf32> -> vector<256x128xf32>
    %22 = arith.addf %16, %21 : vector<256x128xf32>
    %c0_48 = arith.constant 0 : index
    %c0_49 = arith.constant 0 : index
    %c2 = arith.constant 2 : index
    %c0_50 = arith.constant 0 : index
    %23 = vector.load %arg1[%c0_48, %c0_49, %c2, %c0_50] : memref<1x18x18x128xf32, #tpu.memory_space<vmem>>, vector<1x16x16x128xf32>
    %24 = vector.shape_cast %23 : vector<1x16x16x128xf32> to vector<256x128xf32>
    %c2_51 = arith.constant 2 : index
    %c0_52 = arith.constant 0 : index
    %c0_53 = arith.constant 0 : index
    %25 = vector.load %arg2[%c2_51, %c0_52, %c0_53] : memref<46x128x128xf32, #tpu.memory_space<vmem>>, vector<1x128x128xf32>
    %26 = vector.shape_cast %25 : vector<1x128x128xf32> to vector<128x128xf32>
    %cst_54 = arith.constant dense<0.000000e+00> : vector<256x128xf32>
    %27 = tpu.matmul %24, %26, %cst_54 {dimension_numbers = #tpu.dot_dimension_numbers<[1], [0], [0], [1], [0, 0, 1, 1], [], []>} : vector<256x128xf32>, vector<128x128xf32>, vector<256x128xf32> -> vector<256x128xf32>
    %28 = arith.addf %22, %27 : vector<256x128xf32>
    %c0_55 = arith.constant 0 : index
    %c1_56 = arith.constant 1 : index
    %c0_57 = arith.constant 0 : index
    %c0_58 = arith.constant 0 : index
    %29 = vector.load %arg1[%c0_55, %c1_56, %c0_57, %c0_58] : memref<1x18x18x128xf32, #tpu.memory_space<vmem>>, vector<1x16x16x128xf32>
    %30 = vector.shape_cast %29 : vector<1x16x16x128xf32> to vector<256x128xf32>
    %c3 = arith.constant 3 : index
    %c0_59 = arith.constant 0 : index
    %c0_60 = arith.constant 0 : index
    %31 = vector.load %arg2[%c3, %c0_59, %c0_60] : memref<46x128x128xf32, #tpu.memory_space<vmem>>, vector<1x128x128xf32>
    %32 = vector.shape_cast %31 : vector<1x128x128xf32> to vector<128x128xf32>
    %cst_61 = arith.constant dense<0.000000e+00> : vector<256x128xf32>
    %33 = tpu.matmul %30, %32, %cst_61 {dimension_numbers = #tpu.dot_dimension_numbers<[1], [0], [0], [1], [0, 0, 1, 1], [], []>} : vector<256x128xf32>, vector<128x128xf32>, vector<256x128xf32> -> vector<256x128xf32>
    %34 = arith.addf %28, %33 : vector<256x128xf32>
    %c0_62 = arith.constant 0 : index
    %c1_63 = arith.constant 1 : index
    %c1_64 = arith.constant 1 : index
    %c0_65 = arith.constant 0 : index
    %35 = vector.load %arg1[%c0_62, %c1_63, %c1_64, %c0_65] : memref<1x18x18x128xf32, #tpu.memory_space<vmem>>, vector<1x16x16x128xf32>
    %36 = vector.shape_cast %35 : vector<1x16x16x128xf32> to vector<256x128xf32>
    %c4 = arith.constant 4 : index
    %c0_66 = arith.constant 0 : index
    %c0_67 = arith.constant 0 : index
    %37 = vector.load %arg2[%c4, %c0_66, %c0_67] : memref<46x128x128xf32, #tpu.memory_space<vmem>>, vector<1x128x128xf32>
    %38 = vector.shape_cast %37 : vector<1x128x128xf32> to vector<128x128xf32>
    %cst_68 = arith.constant dense<0.000000e+00> : vector<256x128xf32>
    %39 = tpu.matmul %36, %38, %cst_68 {dimension_numbers = #tpu.dot_dimension_numbers<[1], [0], [0], [1], [0, 0, 1, 1], [], []>} : vector<256x128xf32>, vector<128x128xf32>, vector<256x128xf32> -> vector<256x128xf32>
    %40 = arith.addf %34, %39 : vector<256x128xf32>
    %c0_69 = arith.constant 0 : index
    %c1_70 = arith.constant 1 : index
    %c2_71 = arith.constant 2 : index
    %c0_72 = arith.constant 0 : index
    %41 = vector.load %arg1[%c0_69, %c1_70, %c2_71, %c0_72] : memref<1x18x18x128xf32, #tpu.memory_space<vmem>>, vector<1x16x16x128xf32>
    %42 = vector.shape_cast %41 : vector<1x16x16x128xf32> to vector<256x128xf32>
    %c5 = arith.constant 5 : index
    %c0_73 = arith.constant 0 : index
    %c0_74 = arith.constant 0 : index
    %43 = vector.load %arg2[%c5, %c0_73, %c0_74] : memref<46x128x128xf32, #tpu.memory_space<vmem>>, vector<1x128x128xf32>
    %44 = vector.shape_cast %43 : vector<1x128x128xf32> to vector<128x128xf32>
    %cst_75 = arith.constant dense<0.000000e+00> : vector<256x128xf32>
    %45 = tpu.matmul %42, %44, %cst_75 {dimension_numbers = #tpu.dot_dimension_numbers<[1], [0], [0], [1], [0, 0, 1, 1], [], []>} : vector<256x128xf32>, vector<128x128xf32>, vector<256x128xf32> -> vector<256x128xf32>
    %46 = arith.addf %40, %45 : vector<256x128xf32>
    %c0_76 = arith.constant 0 : index
    %c2_77 = arith.constant 2 : index
    %c0_78 = arith.constant 0 : index
    %c0_79 = arith.constant 0 : index
    %47 = vector.load %arg1[%c0_76, %c2_77, %c0_78, %c0_79] : memref<1x18x18x128xf32, #tpu.memory_space<vmem>>, vector<1x16x16x128xf32>
    %48 = vector.shape_cast %47 : vector<1x16x16x128xf32> to vector<256x128xf32>
    %c6 = arith.constant 6 : index
    %c0_80 = arith.constant 0 : index
    %c0_81 = arith.constant 0 : index
    %49 = vector.load %arg2[%c6, %c0_80, %c0_81] : memref<46x128x128xf32, #tpu.memory_space<vmem>>, vector<1x128x128xf32>
    %50 = vector.shape_cast %49 : vector<1x128x128xf32> to vector<128x128xf32>
    %cst_82 = arith.constant dense<0.000000e+00> : vector<256x128xf32>
    %51 = tpu.matmul %48, %50, %cst_82 {dimension_numbers = #tpu.dot_dimension_numbers<[1], [0], [0], [1], [0, 0, 1, 1], [], []>} : vector<256x128xf32>, vector<128x128xf32>, vector<256x128xf32> -> vector<256x128xf32>
    %52 = arith.addf %46, %51 : vector<256x128xf32>
    %c0_83 = arith.constant 0 : index
    %c2_84 = arith.constant 2 : index
    %c1_85 = arith.constant 1 : index
    %c0_86 = arith.constant 0 : index
    %53 = vector.load %arg1[%c0_83, %c2_84, %c1_85, %c0_86] : memref<1x18x18x128xf32, #tpu.memory_space<vmem>>, vector<1x16x16x128xf32>
    %54 = vector.shape_cast %53 : vector<1x16x16x128xf32> to vector<256x128xf32>
    %c7 = arith.constant 7 : index
    %c0_87 = arith.constant 0 : index
    %c0_88 = arith.constant 0 : index
    %55 = vector.load %arg2[%c7, %c0_87, %c0_88] : memref<46x128x128xf32, #tpu.memory_space<vmem>>, vector<1x128x128xf32>
    %56 = vector.shape_cast %55 : vector<1x128x128xf32> to vector<128x128xf32>
    %cst_89 = arith.constant dense<0.000000e+00> : vector<256x128xf32>
    %57 = tpu.matmul %54, %56, %cst_89 {dimension_numbers = #tpu.dot_dimension_numbers<[1], [0], [0], [1], [0, 0, 1, 1], [], []>} : vector<256x128xf32>, vector<128x128xf32>, vector<256x128xf32> -> vector<256x128xf32>
    %58 = arith.addf %52, %57 : vector<256x128xf32>
    %c0_90 = arith.constant 0 : index
    %c2_91 = arith.constant 2 : index
    %c2_92 = arith.constant 2 : index
    %c0_93 = arith.constant 0 : index
    %59 = vector.load %arg1[%c0_90, %c2_91, %c2_92, %c0_93] : memref<1x18x18x128xf32, #tpu.memory_space<vmem>>, vector<1x16x16x128xf32>
    %60 = vector.shape_cast %59 : vector<1x16x16x128xf32> to vector<256x128xf32>
    %c8 = arith.constant 8 : index
    %c0_94 = arith.constant 0 : index
    %c0_95 = arith.constant 0 : index
    %61 = vector.load %arg2[%c8, %c0_94, %c0_95] : memref<46x128x128xf32, #tpu.memory_space<vmem>>, vector<1x128x128xf32>
    %62 = vector.shape_cast %61 : vector<1x128x128xf32> to vector<128x128xf32>
    %cst_96 = arith.constant dense<0.000000e+00> : vector<256x128xf32>
    %63 = tpu.matmul %60, %62, %cst_96 {dimension_numbers = #tpu.dot_dimension_numbers<[1], [0], [0], [1], [0, 0, 1, 1], [], []>} : vector<256x128xf32>, vector<128x128xf32>, vector<256x128xf32> -> vector<256x128xf32>
    %64 = arith.addf %58, %63 : vector<256x128xf32>
    %c0_97 = arith.constant 0 : index
    %c0_98 = arith.constant 0 : index
    %65 = vector.load %arg3[%c0_97, %c0_98] : memref<6x128xf32, #tpu.memory_space<vmem>>, vector<1x128xf32>
    %66 = vector.broadcast %65 : vector<1x128xf32> to vector<256x128xf32>
    %67 = arith.addf %64, %66 : vector<256x128xf32>
    %cst_99 = arith.constant 0.000000e+00 : f32
    %68 = vector.broadcast %cst_99 : f32 to vector<256x128xf32>
    %69 = arith.maximumf %67, %68 : vector<256x128xf32>
    %70 = vector.shape_cast %69 : vector<256x128xf32> to vector<1x16x16x128xf32>
    %c0_100 = arith.constant 0 : index
    %c1_101 = arith.constant 1 : index
    %c1_102 = arith.constant 1 : index
    %c0_103 = arith.constant 0 : index
    %71 = vector.load %arg7[%c0_100, %c1_101, %c1_102, %c0_103] : memref<1x18x18x128xf32, #tpu.memory_space<vmem>>, vector<1x16x16x128xf32>
    tpu.vector_store %arg7[%c0_100, %c1_101, %c1_102, %c0_103], %70 {strides = array<i32>} : memref<1x18x18x128xf32, #tpu.memory_space<vmem>>, vector<1x16x16x128xf32>,
    %c0_104 = arith.constant 0 : index
    %c0_105 = arith.constant 0 : index
    %c0_106 = arith.constant 0 : index
    %c0_107 = arith.constant 0 : index
    %72 = vector.load %arg7[%c0_104, %c0_105, %c0_106, %c0_107] : memref<1x18x18x128xf32, #tpu.memory_space<vmem>>, vector<1x16x16x128xf32>
    %73 = vector.shape_cast %72 : vector<1x16x16x128xf32> to vector<256x128xf32>
    %c9 = arith.constant 9 : index
    %c0_108 = arith.constant 0 : index
    %c0_109 = arith.constant 0 : index
    %74 = vector.load %arg2[%c9, %c0_108, %c0_109] : memref<46x128x128xf32, #tpu.memory_space<vmem>>, vector<1x128x128xf32>
    %75 = vector.shape_cast %74 : vector<1x128x128xf32> to vector<128x128xf32>
    %cst_110 = arith.constant dense<0.000000e+00> : vector<256x128xf32>
    %76 = tpu.matmul %73, %75, %cst_110 {dimension_numbers = #tpu.dot_dimension_numbers<[1], [0], [0], [1], [0, 0, 1, 1], [], []>} : vector<256x128xf32>, vector<128x128xf32>, vector<256x128xf32> -> vector<256x128xf32>
    %c0_111 = arith.constant 0 : index
    %c0_112 = arith.constant 0 : index
    %c1_113 = arith.constant 1 : index
    %c0_114 = arith.constant 0 : index
    %77 = vector.load %arg7[%c0_111, %c0_112, %c1_113, %c0_114] : memref<1x18x18x128xf32, #tpu.memory_space<vmem>>, vector<1x16x16x128xf32>
    %78 = vector.shape_cast %77 : vector<1x16x16x128xf32> to vector<256x128xf32>
    %c10 = arith.constant 10 : index
    %c0_115 = arith.constant 0 : index
    %c0_116 = arith.constant 0 : index
    %79 = vector.load %arg2[%c10, %c0_115, %c0_116] : memref<46x128x128xf32, #tpu.memory_space<vmem>>, vector<1x128x128xf32>
    %80 = vector.shape_cast %79 : vector<1x128x128xf32> to vector<128x128xf32>
    %cst_117 = arith.constant dense<0.000000e+00> : vector<256x128xf32>
    %81 = tpu.matmul %78, %80, %cst_117 {dimension_numbers = #tpu.dot_dimension_numbers<[1], [0], [0], [1], [0, 0, 1, 1], [], []>} : vector<256x128xf32>, vector<128x128xf32>, vector<256x128xf32> -> vector<256x128xf32>
    %82 = arith.addf %76, %81 : vector<256x128xf32>
    %c0_118 = arith.constant 0 : index
    %c0_119 = arith.constant 0 : index
    %c2_120 = arith.constant 2 : index
    %c0_121 = arith.constant 0 : index
    %83 = vector.load %arg7[%c0_118, %c0_119, %c2_120, %c0_121] : memref<1x18x18x128xf32, #tpu.memory_space<vmem>>, vector<1x16x16x128xf32>
    %84 = vector.shape_cast %83 : vector<1x16x16x128xf32> to vector<256x128xf32>
    %c11 = arith.constant 11 : index
    %c0_122 = arith.constant 0 : index
    %c0_123 = arith.constant 0 : index
    %85 = vector.load %arg2[%c11, %c0_122, %c0_123] : memref<46x128x128xf32, #tpu.memory_space<vmem>>, vector<1x128x128xf32>
    %86 = vector.shape_cast %85 : vector<1x128x128xf32> to vector<128x128xf32>
    %cst_124 = arith.constant dense<0.000000e+00> : vector<256x128xf32>
    %87 = tpu.matmul %84, %86, %cst_124 {dimension_numbers = #tpu.dot_dimension_numbers<[1], [0], [0], [1], [0, 0, 1, 1], [], []>} : vector<256x128xf32>, vector<128x128xf32>, vector<256x128xf32> -> vector<256x128xf32>
    %88 = arith.addf %82, %87 : vector<256x128xf32>
    %c0_125 = arith.constant 0 : index
    %c1_126 = arith.constant 1 : index
    %c0_127 = arith.constant 0 : index
    %c0_128 = arith.constant 0 : index
    %89 = vector.load %arg7[%c0_125, %c1_126, %c0_127, %c0_128] : memref<1x18x18x128xf32, #tpu.memory_space<vmem>>, vector<1x16x16x128xf32>
    %90 = vector.shape_cast %89 : vector<1x16x16x128xf32> to vector<256x128xf32>
    %c12 = arith.constant 12 : index
    %c0_129 = arith.constant 0 : index
    %c0_130 = arith.constant 0 : index
    %91 = vector.load %arg2[%c12, %c0_129, %c0_130] : memref<46x128x128xf32, #tpu.memory_space<vmem>>, vector<1x128x128xf32>
    %92 = vector.shape_cast %91 : vector<1x128x128xf32> to vector<128x128xf32>
    %cst_131 = arith.constant dense<0.000000e+00> : vector<256x128xf32>
    %93 = tpu.matmul %90, %92, %cst_131 {dimension_numbers = #tpu.dot_dimension_numbers<[1], [0], [0], [1], [0, 0, 1, 1], [], []>} : vector<256x128xf32>, vector<128x128xf32>, vector<256x128xf32> -> vector<256x128xf32>
    %94 = arith.addf %88, %93 : vector<256x128xf32>
    %c0_132 = arith.constant 0 : index
    %c1_133 = arith.constant 1 : index
    %c1_134 = arith.constant 1 : index
    %c0_135 = arith.constant 0 : index
    %95 = vector.load %arg7[%c0_132, %c1_133, %c1_134, %c0_135] : memref<1x18x18x128xf32, #tpu.memory_space<vmem>>, vector<1x16x16x128xf32>
    %96 = vector.shape_cast %95 : vector<1x16x16x128xf32> to vector<256x128xf32>
    %c13 = arith.constant 13 : index
    %c0_136 = arith.constant 0 : index
    %c0_137 = arith.constant 0 : index
    %97 = vector.load %arg2[%c13, %c0_136, %c0_137] : memref<46x128x128xf32, #tpu.memory_space<vmem>>, vector<1x128x128xf32>
    %98 = vector.shape_cast %97 : vector<1x128x128xf32> to vector<128x128xf32>
    %cst_138 = arith.constant dense<0.000000e+00> : vector<256x128xf32>
    %99 = tpu.matmul %96, %98, %cst_138 {dimension_numbers = #tpu.dot_dimension_numbers<[1], [0], [0], [1], [0, 0, 1, 1], [], []>} : vector<256x128xf32>, vector<128x128xf32>, vector<256x128xf32> -> vector<256x128xf32>
    %100 = arith.addf %94, %99 : vector<256x128xf32>
    %c0_139 = arith.constant 0 : index
    %c1_140 = arith.constant 1 : index
    %c2_141 = arith.constant 2 : index
    %c0_142 = arith.constant 0 : index
    %101 = vector.load %arg7[%c0_139, %c1_140, %c2_141, %c0_142] : memref<1x18x18x128xf32, #tpu.memory_space<vmem>>, vector<1x16x16x128xf32>
    %102 = vector.shape_cast %101 : vector<1x16x16x128xf32> to vector<256x128xf32>
    %c14 = arith.constant 14 : index
    %c0_143 = arith.constant 0 : index
    %c0_144 = arith.constant 0 : index
    %103 = vector.load %arg2[%c14, %c0_143, %c0_144] : memref<46x128x128xf32, #tpu.memory_space<vmem>>, vector<1x128x128xf32>
    %104 = vector.shape_cast %103 : vector<1x128x128xf32> to vector<128x128xf32>
    %cst_145 = arith.constant dense<0.000000e+00> : vector<256x128xf32>
    %105 = tpu.matmul %102, %104, %cst_145 {dimension_numbers = #tpu.dot_dimension_numbers<[1], [0], [0], [1], [0, 0, 1, 1], [], []>} : vector<256x128xf32>, vector<128x128xf32>, vector<256x128xf32> -> vector<256x128xf32>
    %106 = arith.addf %100, %105 : vector<256x128xf32>
    %c0_146 = arith.constant 0 : index
    %c2_147 = arith.constant 2 : index
    %c0_148 = arith.constant 0 : index
    %c0_149 = arith.constant 0 : index
    %107 = vector.load %arg7[%c0_146, %c2_147, %c0_148, %c0_149] : memref<1x18x18x128xf32, #tpu.memory_space<vmem>>, vector<1x16x16x128xf32>
    %108 = vector.shape_cast %107 : vector<1x16x16x128xf32> to vector<256x128xf32>
    %c15 = arith.constant 15 : index
    %c0_150 = arith.constant 0 : index
    %c0_151 = arith.constant 0 : index
    %109 = vector.load %arg2[%c15, %c0_150, %c0_151] : memref<46x128x128xf32, #tpu.memory_space<vmem>>, vector<1x128x128xf32>
    %110 = vector.shape_cast %109 : vector<1x128x128xf32> to vector<128x128xf32>
    %cst_152 = arith.constant dense<0.000000e+00> : vector<256x128xf32>
    %111 = tpu.matmul %108, %110, %cst_152 {dimension_numbers = #tpu.dot_dimension_numbers<[1], [0], [0], [1], [0, 0, 1, 1], [], []>} : vector<256x128xf32>, vector<128x128xf32>, vector<256x128xf32> -> vector<256x128xf32>
    %112 = arith.addf %106, %111 : vector<256x128xf32>
    %c0_153 = arith.constant 0 : index
    %c2_154 = arith.constant 2 : index
    %c1_155 = arith.constant 1 : index
    %c0_156 = arith.constant 0 : index
    %113 = vector.load %arg7[%c0_153, %c2_154, %c1_155, %c0_156] : memref<1x18x18x128xf32, #tpu.memory_space<vmem>>, vector<1x16x16x128xf32>
    %114 = vector.shape_cast %113 : vector<1x16x16x128xf32> to vector<256x128xf32>
    %c16 = arith.constant 16 : index
    %c0_157 = arith.constant 0 : index
    %c0_158 = arith.constant 0 : index
    %115 = vector.load %arg2[%c16, %c0_157, %c0_158] : memref<46x128x128xf32, #tpu.memory_space<vmem>>, vector<1x128x128xf32>
    %116 = vector.shape_cast %115 : vector<1x128x128xf32> to vector<128x128xf32>
    %cst_159 = arith.constant dense<0.000000e+00> : vector<256x128xf32>
    %117 = tpu.matmul %114, %116, %cst_159 {dimension_numbers = #tpu.dot_dimension_numbers<[1], [0], [0], [1], [0, 0, 1, 1], [], []>} : vector<256x128xf32>, vector<128x128xf32>, vector<256x128xf32> -> vector<256x128xf32>
    %118 = arith.addf %112, %117 : vector<256x128xf32>
    %c0_160 = arith.constant 0 : index
    %c2_161 = arith.constant 2 : index
    %c2_162 = arith.constant 2 : index
    %c0_163 = arith.constant 0 : index
    %119 = vector.load %arg7[%c0_160, %c2_161, %c2_162, %c0_163] : memref<1x18x18x128xf32, #tpu.memory_space<vmem>>, vector<1x16x16x128xf32>
    %120 = vector.shape_cast %119 : vector<1x16x16x128xf32> to vector<256x128xf32>
    %c17_164 = arith.constant 17 : index
    %c0_165 = arith.constant 0 : index
    %c0_166 = arith.constant 0 : index
    %121 = vector.load %arg2[%c17_164, %c0_165, %c0_166] : memref<46x128x128xf32, #tpu.memory_space<vmem>>, vector<1x128x128xf32>
    %122 = vector.shape_cast %121 : vector<1x128x128xf32> to vector<128x128xf32>
    %cst_167 = arith.constant dense<0.000000e+00> : vector<256x128xf32>
    %123 = tpu.matmul %120, %122, %cst_167 {dimension_numbers = #tpu.dot_dimension_numbers<[1], [0], [0], [1], [0, 0, 1, 1], [], []>} : vector<256x128xf32>, vector<128x128xf32>, vector<256x128xf32> -> vector<256x128xf32>
    %124 = arith.addf %118, %123 : vector<256x128xf32>
    %c1_168 = arith.constant 1 : index
    %c0_169 = arith.constant 0 : index
    %125 = vector.load %arg3[%c1_168, %c0_169] : memref<6x128xf32, #tpu.memory_space<vmem>>, vector<1x128xf32>
    %126 = vector.broadcast %125 : vector<1x128xf32> to vector<256x128xf32>
    %127 = arith.addf %124, %126 : vector<256x128xf32>
    %cst_170 = arith.constant 0.000000e+00 : f32
    %128 = vector.broadcast %cst_170 : f32 to vector<256x128xf32>
    %129 = arith.maximumf %127, %128 : vector<256x128xf32>
    %130 = vector.shape_cast %129 : vector<256x128xf32> to vector<1x16x16x128xf32>
    %c0_171 = arith.constant 0 : index
    %c1_172 = arith.constant 1 : index
    %c1_173 = arith.constant 1 : index
    %c0_174 = arith.constant 0 : index
    %131 = vector.load %arg8[%c0_171, %c1_172, %c1_173, %c0_174] : memref<1x18x18x128xf32, #tpu.memory_space<vmem>>, vector<1x16x16x128xf32>
    tpu.vector_store %arg8[%c0_171, %c1_172, %c1_173, %c0_174], %130 {strides = array<i32>} : memref<1x18x18x128xf32, #tpu.memory_space<vmem>>, vector<1x16x16x128xf32>,
    %c0_175 = arith.constant 0 : index
    %c0_176 = arith.constant 0 : index
    %c0_177 = arith.constant 0 : index
    %c0_178 = arith.constant 0 : index
    %132 = vector.load %arg8[%c0_175, %c0_176, %c0_177, %c0_178] : memref<1x18x18x128xf32, #tpu.memory_space<vmem>>, vector<1x16x16x128xf32>
    %133 = vector.shape_cast %132 : vector<1x16x16x128xf32> to vector<256x128xf32>
    %c18 = arith.constant 18 : index
    %c0_179 = arith.constant 0 : index
    %c0_180 = arith.constant 0 : index
    %134 = vector.load %arg2[%c18, %c0_179, %c0_180] : memref<46x128x128xf32, #tpu.memory_space<vmem>>, vector<1x128x128xf32>
    %135 = vector.shape_cast %134 : vector<1x128x128xf32> to vector<128x128xf32>
    %cst_181 = arith.constant dense<0.000000e+00> : vector<256x128xf32>
    %136 = tpu.matmul %133, %135, %cst_181 {dimension_numbers = #tpu.dot_dimension_numbers<[1], [0], [0], [1], [0, 0, 1, 1], [], []>} : vector<256x128xf32>, vector<128x128xf32>, vector<256x128xf32> -> vector<256x128xf32>
    %c0_182 = arith.constant 0 : index
    %c0_183 = arith.constant 0 : index
    %c1_184 = arith.constant 1 : index
    %c0_185 = arith.constant 0 : index
    %137 = vector.load %arg8[%c0_182, %c0_183, %c1_184, %c0_185] : memref<1x18x18x128xf32, #tpu.memory_space<vmem>>, vector<1x16x16x128xf32>
    %138 = vector.shape_cast %137 : vector<1x16x16x128xf32> to vector<256x128xf32>
    %c19 = arith.constant 19 : index
    %c0_186 = arith.constant 0 : index
    %c0_187 = arith.constant 0 : index
    %139 = vector.load %arg2[%c19, %c0_186, %c0_187] : memref<46x128x128xf32, #tpu.memory_space<vmem>>, vector<1x128x128xf32>
    %140 = vector.shape_cast %139 : vector<1x128x128xf32> to vector<128x128xf32>
    %cst_188 = arith.constant dense<0.000000e+00> : vector<256x128xf32>
    %141 = tpu.matmul %138, %140, %cst_188 {dimension_numbers = #tpu.dot_dimension_numbers<[1], [0], [0], [1], [0, 0, 1, 1], [], []>} : vector<256x128xf32>, vector<128x128xf32>, vector<256x128xf32> -> vector<256x128xf32>
    %142 = arith.addf %136, %141 : vector<256x128xf32>
    %c0_189 = arith.constant 0 : index
    %c0_190 = arith.constant 0 : index
    %c2_191 = arith.constant 2 : index
    %c0_192 = arith.constant 0 : index
    %143 = vector.load %arg8[%c0_189, %c0_190, %c2_191, %c0_192] : memref<1x18x18x128xf32, #tpu.memory_space<vmem>>, vector<1x16x16x128xf32>
    %144 = vector.shape_cast %143 : vector<1x16x16x128xf32> to vector<256x128xf32>
    %c20 = arith.constant 20 : index
    %c0_193 = arith.constant 0 : index
    %c0_194 = arith.constant 0 : index
    %145 = vector.load %arg2[%c20, %c0_193, %c0_194] : memref<46x128x128xf32, #tpu.memory_space<vmem>>, vector<1x128x128xf32>
    %146 = vector.shape_cast %145 : vector<1x128x128xf32> to vector<128x128xf32>
    %cst_195 = arith.constant dense<0.000000e+00> : vector<256x128xf32>
    %147 = tpu.matmul %144, %146, %cst_195 {dimension_numbers = #tpu.dot_dimension_numbers<[1], [0], [0], [1], [0, 0, 1, 1], [], []>} : vector<256x128xf32>, vector<128x128xf32>, vector<256x128xf32> -> vector<256x128xf32>
    %148 = arith.addf %142, %147 : vector<256x128xf32>
    %c0_196 = arith.constant 0 : index
    %c1_197 = arith.constant 1 : index
    %c0_198 = arith.constant 0 : index
    %c0_199 = arith.constant 0 : index
    %149 = vector.load %arg8[%c0_196, %c1_197, %c0_198, %c0_199] : memref<1x18x18x128xf32, #tpu.memory_space<vmem>>, vector<1x16x16x128xf32>
    %150 = vector.shape_cast %149 : vector<1x16x16x128xf32> to vector<256x128xf32>
    %c21 = arith.constant 21 : index
    %c0_200 = arith.constant 0 : index
    %c0_201 = arith.constant 0 : index
    %151 = vector.load %arg2[%c21, %c0_200, %c0_201] : memref<46x128x128xf32, #tpu.memory_space<vmem>>, vector<1x128x128xf32>
    %152 = vector.shape_cast %151 : vector<1x128x128xf32> to vector<128x128xf32>
    %cst_202 = arith.constant dense<0.000000e+00> : vector<256x128xf32>
    %153 = tpu.matmul %150, %152, %cst_202 {dimension_numbers = #tpu.dot_dimension_numbers<[1], [0], [0], [1], [0, 0, 1, 1], [], []>} : vector<256x128xf32>, vector<128x128xf32>, vector<256x128xf32> -> vector<256x128xf32>
    %154 = arith.addf %148, %153 : vector<256x128xf32>
    %c0_203 = arith.constant 0 : index
    %c1_204 = arith.constant 1 : index
    %c1_205 = arith.constant 1 : index
    %c0_206 = arith.constant 0 : index
    %155 = vector.load %arg8[%c0_203, %c1_204, %c1_205, %c0_206] : memref<1x18x18x128xf32, #tpu.memory_space<vmem>>, vector<1x16x16x128xf32>
    %156 = vector.shape_cast %155 : vector<1x16x16x128xf32> to vector<256x128xf32>
    %c22 = arith.constant 22 : index
    %c0_207 = arith.constant 0 : index
    %c0_208 = arith.constant 0 : index
    %157 = vector.load %arg2[%c22, %c0_207, %c0_208] : memref<46x128x128xf32, #tpu.memory_space<vmem>>, vector<1x128x128xf32>
    %158 = vector.shape_cast %157 : vector<1x128x128xf32> to vector<128x128xf32>
    %cst_209 = arith.constant dense<0.000000e+00> : vector<256x128xf32>
    %159 = tpu.matmul %156, %158, %cst_209 {dimension_numbers = #tpu.dot_dimension_numbers<[1], [0], [0], [1], [0, 0, 1, 1], [], []>} : vector<256x128xf32>, vector<128x128xf32>, vector<256x128xf32> -> vector<256x128xf32>
    %160 = arith.addf %154, %159 : vector<256x128xf32>
    %c0_210 = arith.constant 0 : index
    %c1_211 = arith.constant 1 : index
    %c2_212 = arith.constant 2 : index
    %c0_213 = arith.constant 0 : index
    %161 = vector.load %arg8[%c0_210, %c1_211, %c2_212, %c0_213] : memref<1x18x18x128xf32, #tpu.memory_space<vmem>>, vector<1x16x16x128xf32>
    %162 = vector.shape_cast %161 : vector<1x16x16x128xf32> to vector<256x128xf32>
    %c23 = arith.constant 23 : index
    %c0_214 = arith.constant 0 : index
    %c0_215 = arith.constant 0 : index
    %163 = vector.load %arg2[%c23, %c0_214, %c0_215] : memref<46x128x128xf32, #tpu.memory_space<vmem>>, vector<1x128x128xf32>
    %164 = vector.shape_cast %163 : vector<1x128x128xf32> to vector<128x128xf32>
    %cst_216 = arith.constant dense<0.000000e+00> : vector<256x128xf32>
    %165 = tpu.matmul %162, %164, %cst_216 {dimension_numbers = #tpu.dot_dimension_numbers<[1], [0], [0], [1], [0, 0, 1, 1], [], []>} : vector<256x128xf32>, vector<128x128xf32>, vector<256x128xf32> -> vector<256x128xf32>
    %166 = arith.addf %160, %165 : vector<256x128xf32>
    %c0_217 = arith.constant 0 : index
    %c2_218 = arith.constant 2 : index
    %c0_219 = arith.constant 0 : index
    %c0_220 = arith.constant 0 : index
    %167 = vector.load %arg8[%c0_217, %c2_218, %c0_219, %c0_220] : memref<1x18x18x128xf32, #tpu.memory_space<vmem>>, vector<1x16x16x128xf32>
    %168 = vector.shape_cast %167 : vector<1x16x16x128xf32> to vector<256x128xf32>
    %c24 = arith.constant 24 : index
    %c0_221 = arith.constant 0 : index
    %c0_222 = arith.constant 0 : index
    %169 = vector.load %arg2[%c24, %c0_221, %c0_222] : memref<46x128x128xf32, #tpu.memory_space<vmem>>, vector<1x128x128xf32>
    %170 = vector.shape_cast %169 : vector<1x128x128xf32> to vector<128x128xf32>
    %cst_223 = arith.constant dense<0.000000e+00> : vector<256x128xf32>
    %171 = tpu.matmul %168, %170, %cst_223 {dimension_numbers = #tpu.dot_dimension_numbers<[1], [0], [0], [1], [0, 0, 1, 1], [], []>} : vector<256x128xf32>, vector<128x128xf32>, vector<256x128xf32> -> vector<256x128xf32>
    %172 = arith.addf %166, %171 : vector<256x128xf32>
    %c0_224 = arith.constant 0 : index
    %c2_225 = arith.constant 2 : index
    %c1_226 = arith.constant 1 : index
    %c0_227 = arith.constant 0 : index
    %173 = vector.load %arg8[%c0_224, %c2_225, %c1_226, %c0_227] : memref<1x18x18x128xf32, #tpu.memory_space<vmem>>, vector<1x16x16x128xf32>
    %174 = vector.shape_cast %173 : vector<1x16x16x128xf32> to vector<256x128xf32>
    %c25 = arith.constant 25 : index
    %c0_228 = arith.constant 0 : index
    %c0_229 = arith.constant 0 : index
    %175 = vector.load %arg2[%c25, %c0_228, %c0_229] : memref<46x128x128xf32, #tpu.memory_space<vmem>>, vector<1x128x128xf32>
    %176 = vector.shape_cast %175 : vector<1x128x128xf32> to vector<128x128xf32>
    %cst_230 = arith.constant dense<0.000000e+00> : vector<256x128xf32>
    %177 = tpu.matmul %174, %176, %cst_230 {dimension_numbers = #tpu.dot_dimension_numbers<[1], [0], [0], [1], [0, 0, 1, 1], [], []>} : vector<256x128xf32>, vector<128x128xf32>, vector<256x128xf32> -> vector<256x128xf32>
    %178 = arith.addf %172, %177 : vector<256x128xf32>
    %c0_231 = arith.constant 0 : index
    %c2_232 = arith.constant 2 : index
    %c2_233 = arith.constant 2 : index
    %c0_234 = arith.constant 0 : index
    %179 = vector.load %arg8[%c0_231, %c2_232, %c2_233, %c0_234] : memref<1x18x18x128xf32, #tpu.memory_space<vmem>>, vector<1x16x16x128xf32>
    %180 = vector.shape_cast %179 : vector<1x16x16x128xf32> to vector<256x128xf32>
    %c26 = arith.constant 26 : index
    %c0_235 = arith.constant 0 : index
    %c0_236 = arith.constant 0 : index
    %181 = vector.load %arg2[%c26, %c0_235, %c0_236] : memref<46x128x128xf32, #tpu.memory_space<vmem>>, vector<1x128x128xf32>
    %182 = vector.shape_cast %181 : vector<1x128x128xf32> to vector<128x128xf32>
    %cst_237 = arith.constant dense<0.000000e+00> : vector<256x128xf32>
    %183 = tpu.matmul %180, %182, %cst_237 {dimension_numbers = #tpu.dot_dimension_numbers<[1], [0], [0], [1], [0, 0, 1, 1], [], []>} : vector<256x128xf32>, vector<128x128xf32>, vector<256x128xf32> -> vector<256x128xf32>
    %184 = arith.addf %178, %183 : vector<256x128xf32>
    %c2_238 = arith.constant 2 : index
    %c0_239 = arith.constant 0 : index
    %185 = vector.load %arg3[%c2_238, %c0_239] : memref<6x128xf32, #tpu.memory_space<vmem>>, vector<1x128xf32>
    %186 = vector.broadcast %185 : vector<1x128xf32> to vector<256x128xf32>
    %187 = arith.addf %184, %186 : vector<256x128xf32>
    %cst_240 = arith.constant 0.000000e+00 : f32
    %188 = vector.broadcast %cst_240 : f32 to vector<256x128xf32>
    %189 = arith.maximumf %187, %188 : vector<256x128xf32>
    %190 = vector.shape_cast %189 : vector<256x128xf32> to vector<1x16x16x128xf32>
    %c0_241 = arith.constant 0 : index
    %c1_242 = arith.constant 1 : index
    %c1_243 = arith.constant 1 : index
    %c0_244 = arith.constant 0 : index
    %191 = vector.load %arg7[%c0_241, %c1_242, %c1_243, %c0_244] : memref<1x18x18x128xf32, #tpu.memory_space<vmem>>, vector<1x16x16x128xf32>
    tpu.vector_store %arg7[%c0_241, %c1_242, %c1_243, %c0_244], %190 {strides = array<i32>} : memref<1x18x18x128xf32, #tpu.memory_space<vmem>>, vector<1x16x16x128xf32>,
    %c0_245 = arith.constant 0 : index
    %c0_246 = arith.constant 0 : index
    %c0_247 = arith.constant 0 : index
    %c0_248 = arith.constant 0 : index
    %192 = vector.load %arg7[%c0_245, %c0_246, %c0_247, %c0_248] : memref<1x18x18x128xf32, #tpu.memory_space<vmem>>, vector<1x16x16x128xf32>
    %193 = vector.shape_cast %192 : vector<1x16x16x128xf32> to vector<256x128xf32>
    %c27 = arith.constant 27 : index
    %c0_249 = arith.constant 0 : index
    %c0_250 = arith.constant 0 : index
    %194 = vector.load %arg2[%c27, %c0_249, %c0_250] : memref<46x128x128xf32, #tpu.memory_space<vmem>>, vector<1x128x128xf32>
    %195 = vector.shape_cast %194 : vector<1x128x128xf32> to vector<128x128xf32>
    %cst_251 = arith.constant dense<0.000000e+00> : vector<256x128xf32>
    %196 = tpu.matmul %193, %195, %cst_251 {dimension_numbers = #tpu.dot_dimension_numbers<[1], [0], [0], [1], [0, 0, 1, 1], [], []>} : vector<256x128xf32>, vector<128x128xf32>, vector<256x128xf32> -> vector<256x128xf32>
    %c0_252 = arith.constant 0 : index
    %c0_253 = arith.constant 0 : index
    %c1_254 = arith.constant 1 : index
    %c0_255 = arith.constant 0 : index
    %197 = vector.load %arg7[%c0_252, %c0_253, %c1_254, %c0_255] : memref<1x18x18x128xf32, #tpu.memory_space<vmem>>, vector<1x16x16x128xf32>
    %198 = vector.shape_cast %197 : vector<1x16x16x128xf32> to vector<256x128xf32>
    %c28 = arith.constant 28 : index
    %c0_256 = arith.constant 0 : index
    %c0_257 = arith.constant 0 : index
    %199 = vector.load %arg2[%c28, %c0_256, %c0_257] : memref<46x128x128xf32, #tpu.memory_space<vmem>>, vector<1x128x128xf32>
    %200 = vector.shape_cast %199 : vector<1x128x128xf32> to vector<128x128xf32>
    %cst_258 = arith.constant dense<0.000000e+00> : vector<256x128xf32>
    %201 = tpu.matmul %198, %200, %cst_258 {dimension_numbers = #tpu.dot_dimension_numbers<[1], [0], [0], [1], [0, 0, 1, 1], [], []>} : vector<256x128xf32>, vector<128x128xf32>, vector<256x128xf32> -> vector<256x128xf32>
    %202 = arith.addf %196, %201 : vector<256x128xf32>
    %c0_259 = arith.constant 0 : index
    %c0_260 = arith.constant 0 : index
    %c2_261 = arith.constant 2 : index
    %c0_262 = arith.constant 0 : index
    %203 = vector.load %arg7[%c0_259, %c0_260, %c2_261, %c0_262] : memref<1x18x18x128xf32, #tpu.memory_space<vmem>>, vector<1x16x16x128xf32>
    %204 = vector.shape_cast %203 : vector<1x16x16x128xf32> to vector<256x128xf32>
    %c29 = arith.constant 29 : index
    %c0_263 = arith.constant 0 : index
    %c0_264 = arith.constant 0 : index
    %205 = vector.load %arg2[%c29, %c0_263, %c0_264] : memref<46x128x128xf32, #tpu.memory_space<vmem>>, vector<1x128x128xf32>
    %206 = vector.shape_cast %205 : vector<1x128x128xf32> to vector<128x128xf32>
    %cst_265 = arith.constant dense<0.000000e+00> : vector<256x128xf32>
    %207 = tpu.matmul %204, %206, %cst_265 {dimension_numbers = #tpu.dot_dimension_numbers<[1], [0], [0], [1], [0, 0, 1, 1], [], []>} : vector<256x128xf32>, vector<128x128xf32>, vector<256x128xf32> -> vector<256x128xf32>
    %208 = arith.addf %202, %207 : vector<256x128xf32>
    %c0_266 = arith.constant 0 : index
    %c1_267 = arith.constant 1 : index
    %c0_268 = arith.constant 0 : index
    %c0_269 = arith.constant 0 : index
    %209 = vector.load %arg7[%c0_266, %c1_267, %c0_268, %c0_269] : memref<1x18x18x128xf32, #tpu.memory_space<vmem>>, vector<1x16x16x128xf32>
    %210 = vector.shape_cast %209 : vector<1x16x16x128xf32> to vector<256x128xf32>
    %c30 = arith.constant 30 : index
    %c0_270 = arith.constant 0 : index
    %c0_271 = arith.constant 0 : index
    %211 = vector.load %arg2[%c30, %c0_270, %c0_271] : memref<46x128x128xf32, #tpu.memory_space<vmem>>, vector<1x128x128xf32>
    %212 = vector.shape_cast %211 : vector<1x128x128xf32> to vector<128x128xf32>
    %cst_272 = arith.constant dense<0.000000e+00> : vector<256x128xf32>
    %213 = tpu.matmul %210, %212, %cst_272 {dimension_numbers = #tpu.dot_dimension_numbers<[1], [0], [0], [1], [0, 0, 1, 1], [], []>} : vector<256x128xf32>, vector<128x128xf32>, vector<256x128xf32> -> vector<256x128xf32>
    %214 = arith.addf %208, %213 : vector<256x128xf32>
    %c0_273 = arith.constant 0 : index
    %c1_274 = arith.constant 1 : index
    %c1_275 = arith.constant 1 : index
    %c0_276 = arith.constant 0 : index
    %215 = vector.load %arg7[%c0_273, %c1_274, %c1_275, %c0_276] : memref<1x18x18x128xf32, #tpu.memory_space<vmem>>, vector<1x16x16x128xf32>
    %216 = vector.shape_cast %215 : vector<1x16x16x128xf32> to vector<256x128xf32>
    %c31 = arith.constant 31 : index
    %c0_277 = arith.constant 0 : index
    %c0_278 = arith.constant 0 : index
    %217 = vector.load %arg2[%c31, %c0_277, %c0_278] : memref<46x128x128xf32, #tpu.memory_space<vmem>>, vector<1x128x128xf32>
    %218 = vector.shape_cast %217 : vector<1x128x128xf32> to vector<128x128xf32>
    %cst_279 = arith.constant dense<0.000000e+00> : vector<256x128xf32>
    %219 = tpu.matmul %216, %218, %cst_279 {dimension_numbers = #tpu.dot_dimension_numbers<[1], [0], [0], [1], [0, 0, 1, 1], [], []>} : vector<256x128xf32>, vector<128x128xf32>, vector<256x128xf32> -> vector<256x128xf32>
    %220 = arith.addf %214, %219 : vector<256x128xf32>
    %c0_280 = arith.constant 0 : index
    %c1_281 = arith.constant 1 : index
    %c2_282 = arith.constant 2 : index
    %c0_283 = arith.constant 0 : index
    %221 = vector.load %arg7[%c0_280, %c1_281, %c2_282, %c0_283] : memref<1x18x18x128xf32, #tpu.memory_space<vmem>>, vector<1x16x16x128xf32>
    %222 = vector.shape_cast %221 : vector<1x16x16x128xf32> to vector<256x128xf32>
    %c32 = arith.constant 32 : index
    %c0_284 = arith.constant 0 : index
    %c0_285 = arith.constant 0 : index
    %223 = vector.load %arg2[%c32, %c0_284, %c0_285] : memref<46x128x128xf32, #tpu.memory_space<vmem>>, vector<1x128x128xf32>
    %224 = vector.shape_cast %223 : vector<1x128x128xf32> to vector<128x128xf32>
    %cst_286 = arith.constant dense<0.000000e+00> : vector<256x128xf32>
    %225 = tpu.matmul %222, %224, %cst_286 {dimension_numbers = #tpu.dot_dimension_numbers<[1], [0], [0], [1], [0, 0, 1, 1], [], []>} : vector<256x128xf32>, vector<128x128xf32>, vector<256x128xf32> -> vector<256x128xf32>
    %226 = arith.addf %220, %225 : vector<256x128xf32>
    %c0_287 = arith.constant 0 : index
    %c2_288 = arith.constant 2 : index
    %c0_289 = arith.constant 0 : index
    %c0_290 = arith.constant 0 : index
    %227 = vector.load %arg7[%c0_287, %c2_288, %c0_289, %c0_290] : memref<1x18x18x128xf32, #tpu.memory_space<vmem>>, vector<1x16x16x128xf32>
    %228 = vector.shape_cast %227 : vector<1x16x16x128xf32> to vector<256x128xf32>
    %c33 = arith.constant 33 : index
    %c0_291 = arith.constant 0 : index
    %c0_292 = arith.constant 0 : index
    %229 = vector.load %arg2[%c33, %c0_291, %c0_292] : memref<46x128x128xf32, #tpu.memory_space<vmem>>, vector<1x128x128xf32>
    %230 = vector.shape_cast %229 : vector<1x128x128xf32> to vector<128x128xf32>
    %cst_293 = arith.constant dense<0.000000e+00> : vector<256x128xf32>
    %231 = tpu.matmul %228, %230, %cst_293 {dimension_numbers = #tpu.dot_dimension_numbers<[1], [0], [0], [1], [0, 0, 1, 1], [], []>} : vector<256x128xf32>, vector<128x128xf32>, vector<256x128xf32> -> vector<256x128xf32>
    %232 = arith.addf %226, %231 : vector<256x128xf32>
    %c0_294 = arith.constant 0 : index
    %c2_295 = arith.constant 2 : index
    %c1_296 = arith.constant 1 : index
    %c0_297 = arith.constant 0 : index
    %233 = vector.load %arg7[%c0_294, %c2_295, %c1_296, %c0_297] : memref<1x18x18x128xf32, #tpu.memory_space<vmem>>, vector<1x16x16x128xf32>
    %234 = vector.shape_cast %233 : vector<1x16x16x128xf32> to vector<256x128xf32>
    %c34 = arith.constant 34 : index
    %c0_298 = arith.constant 0 : index
    %c0_299 = arith.constant 0 : index
    %235 = vector.load %arg2[%c34, %c0_298, %c0_299] : memref<46x128x128xf32, #tpu.memory_space<vmem>>, vector<1x128x128xf32>
    %236 = vector.shape_cast %235 : vector<1x128x128xf32> to vector<128x128xf32>
    %cst_300 = arith.constant dense<0.000000e+00> : vector<256x128xf32>
    %237 = tpu.matmul %234, %236, %cst_300 {dimension_numbers = #tpu.dot_dimension_numbers<[1], [0], [0], [1], [0, 0, 1, 1], [], []>} : vector<256x128xf32>, vector<128x128xf32>, vector<256x128xf32> -> vector<256x128xf32>
    %238 = arith.addf %232, %237 : vector<256x128xf32>
    %c0_301 = arith.constant 0 : index
    %c2_302 = arith.constant 2 : index
    %c2_303 = arith.constant 2 : index
    %c0_304 = arith.constant 0 : index
    %239 = vector.load %arg7[%c0_301, %c2_302, %c2_303, %c0_304] : memref<1x18x18x128xf32, #tpu.memory_space<vmem>>, vector<1x16x16x128xf32>
    %240 = vector.shape_cast %239 : vector<1x16x16x128xf32> to vector<256x128xf32>
    %c35 = arith.constant 35 : index
    %c0_305 = arith.constant 0 : index
    %c0_306 = arith.constant 0 : index
    %241 = vector.load %arg2[%c35, %c0_305, %c0_306] : memref<46x128x128xf32, #tpu.memory_space<vmem>>, vector<1x128x128xf32>
    %242 = vector.shape_cast %241 : vector<1x128x128xf32> to vector<128x128xf32>
    %cst_307 = arith.constant dense<0.000000e+00> : vector<256x128xf32>
    %243 = tpu.matmul %240, %242, %cst_307 {dimension_numbers = #tpu.dot_dimension_numbers<[1], [0], [0], [1], [0, 0, 1, 1], [], []>} : vector<256x128xf32>, vector<128x128xf32>, vector<256x128xf32> -> vector<256x128xf32>
    %244 = arith.addf %238, %243 : vector<256x128xf32>
    %c3_308 = arith.constant 3 : index
    %c0_309 = arith.constant 0 : index
    %245 = vector.load %arg3[%c3_308, %c0_309] : memref<6x128xf32, #tpu.memory_space<vmem>>, vector<1x128xf32>
    %246 = vector.broadcast %245 : vector<1x128xf32> to vector<256x128xf32>
    %247 = arith.addf %244, %246 : vector<256x128xf32>
    %cst_310 = arith.constant 0.000000e+00 : f32
    %248 = vector.broadcast %cst_310 : f32 to vector<256x128xf32>
    %249 = arith.maximumf %247, %248 : vector<256x128xf32>
    %250 = vector.shape_cast %249 : vector<256x128xf32> to vector<1x16x16x128xf32>
    %c0_311 = arith.constant 0 : index
    %c0_312 = arith.constant 0 : index
    %c0_313 = arith.constant 0 : index
    %c0_314 = arith.constant 0 : index
    %251 = vector.load %arg6[%c0_311, %c0_312, %c0_313, %c0_314] : memref<1x16x16x128xf32, #tpu.memory_space<vmem>>, vector<1x16x16x128xf32>
    tpu.vector_store %arg6[%c0_311, %c0_312, %c0_313, %c0_314], %250 {strides = array<i32>} : memref<1x16x16x128xf32, #tpu.memory_space<vmem>>, vector<1x16x16x128xf32>,
    %c0_315 = arith.constant 0 : index
    %c1_316 = arith.constant 1 : index
    %c1_317 = arith.constant 1 : index
    %c0_318 = arith.constant 0 : index
    %252 = vector.load %arg8[%c0_315, %c1_316, %c1_317, %c0_318] : memref<1x18x18x128xf32, #tpu.memory_space<vmem>>, vector<1x16x16x128xf32>
    tpu.vector_store %arg8[%c0_315, %c1_316, %c1_317, %c0_318], %250 {strides = array<i32>} : memref<1x18x18x128xf32, #tpu.memory_space<vmem>>, vector<1x16x16x128xf32>,
    %c0_319 = arith.constant 0 : index
    %c0_320 = arith.constant 0 : index
    %c0_321 = arith.constant 0 : index
    %c0_322 = arith.constant 0 : index
    %253 = vector.load %arg8[%c0_319, %c0_320, %c0_321, %c0_322] : memref<1x18x18x128xf32, #tpu.memory_space<vmem>>, vector<1x16x16x128xf32>
    %254 = vector.shape_cast %253 : vector<1x16x16x128xf32> to vector<256x128xf32>
    %c36 = arith.constant 36 : index
    %c0_323 = arith.constant 0 : index
    %c0_324 = arith.constant 0 : index
    %255 = vector.load %arg2[%c36, %c0_323, %c0_324] : memref<46x128x128xf32, #tpu.memory_space<vmem>>, vector<1x128x128xf32>
    %256 = vector.shape_cast %255 : vector<1x128x128xf32> to vector<128x128xf32>
    %cst_325 = arith.constant dense<0.000000e+00> : vector<256x128xf32>
    %257 = tpu.matmul %254, %256, %cst_325 {dimension_numbers = #tpu.dot_dimension_numbers<[1], [0], [0], [1], [0, 0, 1, 1], [], []>} : vector<256x128xf32>, vector<128x128xf32>, vector<256x128xf32> -> vector<256x128xf32>
    %c0_326 = arith.constant 0 : index
    %c0_327 = arith.constant 0 : index
    %c1_328 = arith.constant 1 : index
    %c0_329 = arith.constant 0 : index
    %258 = vector.load %arg8[%c0_326, %c0_327, %c1_328, %c0_329] : memref<1x18x18x128xf32, #tpu.memory_space<vmem>>, vector<1x16x16x128xf32>
    %259 = vector.shape_cast %258 : vector<1x16x16x128xf32> to vector<256x128xf32>
    %c37 = arith.constant 37 : index
    %c0_330 = arith.constant 0 : index
    %c0_331 = arith.constant 0 : index
    %260 = vector.load %arg2[%c37, %c0_330, %c0_331] : memref<46x128x128xf32, #tpu.memory_space<vmem>>, vector<1x128x128xf32>
    %261 = vector.shape_cast %260 : vector<1x128x128xf32> to vector<128x128xf32>
    %cst_332 = arith.constant dense<0.000000e+00> : vector<256x128xf32>
    %262 = tpu.matmul %259, %261, %cst_332 {dimension_numbers = #tpu.dot_dimension_numbers<[1], [0], [0], [1], [0, 0, 1, 1], [], []>} : vector<256x128xf32>, vector<128x128xf32>, vector<256x128xf32> -> vector<256x128xf32>
    %263 = arith.addf %257, %262 : vector<256x128xf32>
    %c0_333 = arith.constant 0 : index
    %c0_334 = arith.constant 0 : index
    %c2_335 = arith.constant 2 : index
    %c0_336 = arith.constant 0 : index
    %264 = vector.load %arg8[%c0_333, %c0_334, %c2_335, %c0_336] : memref<1x18x18x128xf32, #tpu.memory_space<vmem>>, vector<1x16x16x128xf32>
    %265 = vector.shape_cast %264 : vector<1x16x16x128xf32> to vector<256x128xf32>
    %c38 = arith.constant 38 : index
    %c0_337 = arith.constant 0 : index
    %c0_338 = arith.constant 0 : index
    %266 = vector.load %arg2[%c38, %c0_337, %c0_338] : memref<46x128x128xf32, #tpu.memory_space<vmem>>, vector<1x128x128xf32>
    %267 = vector.shape_cast %266 : vector<1x128x128xf32> to vector<128x128xf32>
    %cst_339 = arith.constant dense<0.000000e+00> : vector<256x128xf32>
    %268 = tpu.matmul %265, %267, %cst_339 {dimension_numbers = #tpu.dot_dimension_numbers<[1], [0], [0], [1], [0, 0, 1, 1], [], []>} : vector<256x128xf32>, vector<128x128xf32>, vector<256x128xf32> -> vector<256x128xf32>
    %269 = arith.addf %263, %268 : vector<256x128xf32>
    %c0_340 = arith.constant 0 : index
    %c1_341 = arith.constant 1 : index
    %c0_342 = arith.constant 0 : index
    %c0_343 = arith.constant 0 : index
    %270 = vector.load %arg8[%c0_340, %c1_341, %c0_342, %c0_343] : memref<1x18x18x128xf32, #tpu.memory_space<vmem>>, vector<1x16x16x128xf32>
    %271 = vector.shape_cast %270 : vector<1x16x16x128xf32> to vector<256x128xf32>
    %c39 = arith.constant 39 : index
    %c0_344 = arith.constant 0 : index
    %c0_345 = arith.constant 0 : index
    %272 = vector.load %arg2[%c39, %c0_344, %c0_345] : memref<46x128x128xf32, #tpu.memory_space<vmem>>, vector<1x128x128xf32>
    %273 = vector.shape_cast %272 : vector<1x128x128xf32> to vector<128x128xf32>
    %cst_346 = arith.constant dense<0.000000e+00> : vector<256x128xf32>
    %274 = tpu.matmul %271, %273, %cst_346 {dimension_numbers = #tpu.dot_dimension_numbers<[1], [0], [0], [1], [0, 0, 1, 1], [], []>} : vector<256x128xf32>, vector<128x128xf32>, vector<256x128xf32> -> vector<256x128xf32>
    %275 = arith.addf %269, %274 : vector<256x128xf32>
    %c0_347 = arith.constant 0 : index
    %c1_348 = arith.constant 1 : index
    %c1_349 = arith.constant 1 : index
    %c0_350 = arith.constant 0 : index
    %276 = vector.load %arg8[%c0_347, %c1_348, %c1_349, %c0_350] : memref<1x18x18x128xf32, #tpu.memory_space<vmem>>, vector<1x16x16x128xf32>
    %277 = vector.shape_cast %276 : vector<1x16x16x128xf32> to vector<256x128xf32>
    %c40 = arith.constant 40 : index
    %c0_351 = arith.constant 0 : index
    %c0_352 = arith.constant 0 : index
    %278 = vector.load %arg2[%c40, %c0_351, %c0_352] : memref<46x128x128xf32, #tpu.memory_space<vmem>>, vector<1x128x128xf32>
    %279 = vector.shape_cast %278 : vector<1x128x128xf32> to vector<128x128xf32>
    %cst_353 = arith.constant dense<0.000000e+00> : vector<256x128xf32>
    %280 = tpu.matmul %277, %279, %cst_353 {dimension_numbers = #tpu.dot_dimension_numbers<[1], [0], [0], [1], [0, 0, 1, 1], [], []>} : vector<256x128xf32>, vector<128x128xf32>, vector<256x128xf32> -> vector<256x128xf32>
    %281 = arith.addf %275, %280 : vector<256x128xf32>
    %c0_354 = arith.constant 0 : index
    %c1_355 = arith.constant 1 : index
    %c2_356 = arith.constant 2 : index
    %c0_357 = arith.constant 0 : index
    %282 = vector.load %arg8[%c0_354, %c1_355, %c2_356, %c0_357] : memref<1x18x18x128xf32, #tpu.memory_space<vmem>>, vector<1x16x16x128xf32>
    %283 = vector.shape_cast %282 : vector<1x16x16x128xf32> to vector<256x128xf32>
    %c41 = arith.constant 41 : index
    %c0_358 = arith.constant 0 : index
    %c0_359 = arith.constant 0 : index
    %284 = vector.load %arg2[%c41, %c0_358, %c0_359] : memref<46x128x128xf32, #tpu.memory_space<vmem>>, vector<1x128x128xf32>
    %285 = vector.shape_cast %284 : vector<1x128x128xf32> to vector<128x128xf32>
    %cst_360 = arith.constant dense<0.000000e+00> : vector<256x128xf32>
    %286 = tpu.matmul %283, %285, %cst_360 {dimension_numbers = #tpu.dot_dimension_numbers<[1], [0], [0], [1], [0, 0, 1, 1], [], []>} : vector<256x128xf32>, vector<128x128xf32>, vector<256x128xf32> -> vector<256x128xf32>
    %287 = arith.addf %281, %286 : vector<256x128xf32>
    %c0_361 = arith.constant 0 : index
    %c2_362 = arith.constant 2 : index
    %c0_363 = arith.constant 0 : index
    %c0_364 = arith.constant 0 : index
    %288 = vector.load %arg8[%c0_361, %c2_362, %c0_363, %c0_364] : memref<1x18x18x128xf32, #tpu.memory_space<vmem>>, vector<1x16x16x128xf32>
    %289 = vector.shape_cast %288 : vector<1x16x16x128xf32> to vector<256x128xf32>
    %c42 = arith.constant 42 : index
    %c0_365 = arith.constant 0 : index
    %c0_366 = arith.constant 0 : index
    %290 = vector.load %arg2[%c42, %c0_365, %c0_366] : memref<46x128x128xf32, #tpu.memory_space<vmem>>, vector<1x128x128xf32>
    %291 = vector.shape_cast %290 : vector<1x128x128xf32> to vector<128x128xf32>
    %cst_367 = arith.constant dense<0.000000e+00> : vector<256x128xf32>
    %292 = tpu.matmul %289, %291, %cst_367 {dimension_numbers = #tpu.dot_dimension_numbers<[1], [0], [0], [1], [0, 0, 1, 1], [], []>} : vector<256x128xf32>, vector<128x128xf32>, vector<256x128xf32> -> vector<256x128xf32>
    %293 = arith.addf %287, %292 : vector<256x128xf32>
    %c0_368 = arith.constant 0 : index
    %c2_369 = arith.constant 2 : index
    %c1_370 = arith.constant 1 : index
    %c0_371 = arith.constant 0 : index
    %294 = vector.load %arg8[%c0_368, %c2_369, %c1_370, %c0_371] : memref<1x18x18x128xf32, #tpu.memory_space<vmem>>, vector<1x16x16x128xf32>
    %295 = vector.shape_cast %294 : vector<1x16x16x128xf32> to vector<256x128xf32>
    %c43 = arith.constant 43 : index
    %c0_372 = arith.constant 0 : index
    %c0_373 = arith.constant 0 : index
    %296 = vector.load %arg2[%c43, %c0_372, %c0_373] : memref<46x128x128xf32, #tpu.memory_space<vmem>>, vector<1x128x128xf32>
    %297 = vector.shape_cast %296 : vector<1x128x128xf32> to vector<128x128xf32>
    %cst_374 = arith.constant dense<0.000000e+00> : vector<256x128xf32>
    %298 = tpu.matmul %295, %297, %cst_374 {dimension_numbers = #tpu.dot_dimension_numbers<[1], [0], [0], [1], [0, 0, 1, 1], [], []>} : vector<256x128xf32>, vector<128x128xf32>, vector<256x128xf32> -> vector<256x128xf32>
    %299 = arith.addf %293, %298 : vector<256x128xf32>
    %c0_375 = arith.constant 0 : index
    %c2_376 = arith.constant 2 : index
    %c2_377 = arith.constant 2 : index
    %c0_378 = arith.constant 0 : index
    %300 = vector.load %arg8[%c0_375, %c2_376, %c2_377, %c0_378] : memref<1x18x18x128xf32, #tpu.memory_space<vmem>>, vector<1x16x16x128xf32>
    %301 = vector.shape_cast %300 : vector<1x16x16x128xf32> to vector<256x128xf32>
    %c44 = arith.constant 44 : index
    %c0_379 = arith.constant 0 : index
    %c0_380 = arith.constant 0 : index
    %302 = vector.load %arg2[%c44, %c0_379, %c0_380] : memref<46x128x128xf32, #tpu.memory_space<vmem>>, vector<1x128x128xf32>
    %303 = vector.shape_cast %302 : vector<1x128x128xf32> to vector<128x128xf32>
    %cst_381 = arith.constant dense<0.000000e+00> : vector<256x128xf32>
    %304 = tpu.matmul %301, %303, %cst_381 {dimension_numbers = #tpu.dot_dimension_numbers<[1], [0], [0], [1], [0, 0, 1, 1], [], []>} : vector<256x128xf32>, vector<128x128xf32>, vector<256x128xf32> -> vector<256x128xf32>
    %305 = arith.addf %299, %304 : vector<256x128xf32>
    %c4_382 = arith.constant 4 : index
    %c0_383 = arith.constant 0 : index
    %306 = vector.load %arg3[%c4_382, %c0_383] : memref<6x128xf32, #tpu.memory_space<vmem>>, vector<1x128xf32>
    %307 = vector.broadcast %306 : vector<1x128xf32> to vector<256x128xf32>
    %308 = arith.addf %305, %307 : vector<256x128xf32>
    %cst_384 = arith.constant 0.000000e+00 : f32
    %309 = vector.broadcast %cst_384 : f32 to vector<256x128xf32>
    %310 = arith.maximumf %308, %309 : vector<256x128xf32>
    %c0_385 = arith.constant 0 : index
    %c0_386 = arith.constant 0 : index
    %311 = vector.load %arg4[%c0_385, %c0_386] : memref<1x256xf32, #tpu.memory_space<vmem>>, vector<1x256xf32>
    %cst_387 = arith.constant dense<0.000000e+00> : vector<1x128xf32>
    %312 = tpu.matmul %311, %310, %cst_387 {dimension_numbers = #tpu.dot_dimension_numbers<[1], [0], [0], [1], [0, 0, 1, 1], [], []>} : vector<1x256xf32>, vector<256x128xf32>, vector<1x128xf32> -> vector<1x128xf32>
    %c45 = arith.constant 45 : index
    %c0_388 = arith.constant 0 : index
    %c0_389 = arith.constant 0 : index
    %313 = vector.load %arg2[%c45, %c0_388, %c0_389] : memref<46x128x128xf32, #tpu.memory_space<vmem>>, vector<1x128x128xf32>
    %314 = vector.shape_cast %313 : vector<1x128x128xf32> to vector<128x128xf32>
    %cst_390 = arith.constant dense<0.000000e+00> : vector<1x128xf32>
    %315 = tpu.matmul %312, %314, %cst_390 {dimension_numbers = #tpu.dot_dimension_numbers<[1], [0], [0], [1], [0, 0, 1, 1], [], []>} : vector<1x128xf32>, vector<128x128xf32>, vector<1x128xf32> -> vector<1x128xf32>
    %c5_391 = arith.constant 5 : index
    %c0_392 = arith.constant 0 : index
    %316 = vector.load %arg3[%c5_391, %c0_392] : memref<6x128xf32, #tpu.memory_space<vmem>>, vector<1x128xf32>
    %317 = arith.addf %315, %316 : vector<1x128xf32>
    %318 = vector.shape_cast %317 : vector<1x128xf32> to vector<1x1x128xf32>
    %c0_393 = arith.constant 0 : index
    %c0_394 = arith.constant 0 : index
    %c0_395 = arith.constant 0 : index
    %319 = vector.load %arg5[%c0_393, %c0_394, %c0_395] : memref<1x1x128xf32, #tpu.memory_space<vmem>>, vector<1x1x128xf32>
    tpu.vector_store %arg5[%c0_393, %c0_394, %c0_395], %318 {strides = array<i32>} : memref<1x1x128xf32, #tpu.memory_space<vmem>>, vector<1x1x128xf32>,
    return
  }
  func.func @transform_0(%arg0: i32) -> (i32, i32, i32, i32) {
    %c0_i32 = arith.constant 0 : i32
    %c0_i32_0 = arith.constant 0 : i32
    %c0_i32_1 = arith.constant 0 : i32
    %c0_i32_2 = arith.constant 0 : i32
    return %arg0, %c0_i32, %c0_i32_0, %c0_i32_1 : i32, i32, i32, i32
  }
  func.func @transform_1(%arg0: i32) -> (i32, i32, i32) {
    %c0_i32 = arith.constant 0 : i32
    %c0_i32_0 = arith.constant 0 : i32
    %c0_i32_1 = arith.constant 0 : i32
    %c0_i32_2 = arith.constant 0 : i32
    return %c0_i32, %c0_i32_0, %c0_i32_1 : i32, i32, i32
  }
  func.func @transform_2(%arg0: i32) -> (i32, i32) {
    %c0_i32 = arith.constant 0 : i32
    %c0_i32_0 = arith.constant 0 : i32
    %c0_i32_1 = arith.constant 0 : i32
    return %c0_i32, %c0_i32_0 : i32, i32
  }
  func.func @transform_3(%arg0: i32) -> (i32, i32) {
    %c0_i32 = arith.constant 0 : i32
    %c0_i32_0 = arith.constant 0 : i32
    %c0_i32_1 = arith.constant 0 : i32
    return %c0_i32, %c0_i32_0 : i32, i32
  }
  func.func @transform_4(%arg0: i32) -> (i32, i32, i32) {
    %c0_i32 = arith.constant 0 : i32
    %c0_i32_0 = arith.constant 0 : i32
    %c0_i32_1 = arith.constant 0 : i32
    return %arg0, %c0_i32, %c0_i32_0 : i32, i32, i32
  }
  func.func @transform_5(%arg0: i32) -> (i32, i32, i32, i32) {
    %c0_i32 = arith.constant 0 : i32
    %c0_i32_0 = arith.constant 0 : i32
    %c0_i32_1 = arith.constant 0 : i32
    %c0_i32_2 = arith.constant 0 : i32
    return %arg0, %c0_i32, %c0_i32_0, %c0_i32_1 : i32, i32, i32, i32
  }
}

</mosaic_0001>

<bundles_post_ra>
// kernel: div.1
= control target key start
LH: loop header
LB: loop body
LE: loop exit
PB: predicated region body
PF: predicated region fallthrough
CT: control target
= control target key end

     0   :  { %s26_s0 = inlined_call_operand.<no memory space> [shape: f32[], index: 0, kind: input, shape index: {}]   ;;  %s27_s1 = inlined_call_operand.vmem [shape: f32[1,256], index: 1, kind: output, shape index: {}]  }
   0x1   :  { %v2_v0 = vstv %s26_s0 }
   0x2   :  { %3 = vst [vmem:[%s27_s1] sm:$0x1] %v2_v0  ;;  %6 = vst [vmem:[%s27_s1 + $0x1] sm:$0x1] %v2_v0 }

// kernel: customnet_forward.1
= control target key start
LH: loop header
LB: loop body
LE: loop exit
PB: predicated region body
PF: predicated region fallthrough
CT: control target
= control target key end

     0   :  { %s24139_s18 = smov 0   ;;  %s29015_s0 = inlined_call_operand.vmem [shape: f32[2,18,18,128], index: 0, kind: input, shape index: {}]   ;;  %s29016_s1 = inlined_call_operand.vmem [shape: f32[46,128,128], index: 1, kind: input, shape index: {}]   ;;  %s29017_s2 = inlined_call_operand.vmem [shape: f32[6,128], index: 2, kind: input, shape index: {}]   ;;  %s29018_s3 = inlined_call_operand.vmem [shape: f32[1,256], index: 3, kind: input, shape index: {}]   ;;  %s29019_s4 = inlined_call_operand.vmem [shape: f32[2,1,128], index: 4, kind: output, shape index: {0}]   ;;  %s29020_s5 = inlined_call_operand.vmem [shape: f32[2,16,16,128], index: 5, kind: output, shape index: {1}]  }
   0x1 LB: > { %s14531_s19 = sadd.s32 4294967295, %s24104_s18   ;;  %p14535_p0 = scmp.ge.s32.totalorder %s24104_s18, 1  ;;  %s24104_s18 = sphi %s24139_s18, %s16_s18  }
   0x2   : > { %p190_p1 = scmp.lt.s32.totalorder %s24104_s18, 3 }
   0x4   : > { %p191_p2 = pnand %p14535_p0, %p190_p1 }
   0x6   : > { %194 = sbr.rel (%p191_p2) target bundleno = 3924 (0xf54), region = 36 }
   0xd   : > { %v14539_v0 = vld [vmem:[%s29016_s1 + $0x80] sm:$0xff]  ;;  %v14540_v1 = vld [vmem:[%s29016_s1 + $0x88] sm:$0xff]  ;;  %p221_p3 = scmp.lt.s32.totalorder %s14531_s19, 1  ;;  %v14541_v5 = vld [vmem:[%s29016_s1 + $0x90] sm:$0xff]  ;;  %vm24108_vm0 = vmmov 0  }
   0xe   : > { %v14651_v2 = vld [vmem:[%s29016_s1 + $0x200] sm:$0xff]  ;;  %v21306_v3 = vpack.c.bf16 %v14540_v1, %v14539_v0  ;;  %v14652_v4 = vld [vmem:[%s29016_s1 + $0x208] sm:$0xff]  ;;  %v14542_v6 = vld [vmem:[%s29016_s1 + $0x98] sm:$0xff] }
   0xf   : > { %v21434_v7 = vpack.c.bf16 %v14652_v4, %v14651_v2  ;;  %v21310_v8 = vpack.c.bf16 %v14542_v6, %v14541_v5  ;;  %v14653_v9 = vld [vmem:[%s29016_s1 + $0x210] sm:$0xff]  ;;  %v14654_v10 = vld [vmem:[%s29016_s1 + $0x218] sm:$0xff]  ;;  %v14543_v11 = vld [vmem:[%s29016_s1 + $0xa0] sm:$0xff]  ;;  %s29475_s19 = smov (!%p221_p3, %s14531_s19), 1 }
  0x10   : > { %21307 = vmatprep.subr.bf16.mxu1 %v21306_v3  ;;  %v21438_v12 = vpack.c.bf16 %v14654_v10, %v14653_v9  ;;  %v14544_v13 = vld [vmem:[%s29016_s1 + $0xa8] sm:$0xff]  ;;  %v14655_v14 = vld [vmem:[%s29016_s1 + $0x220] sm:$0xff]  ;;  %s24082_s21 = smul.u32 432, %s29475_s19  ;;  %v14545_v18 = vld [vmem:[%s29016_s1 + $0xb0] sm:$0xff]  ;;  %s228_s8 = scalar_lea.vmem %s29019_s4, %s29475_s19 }
  0x11   : > { %v14656_v15 = vld [vmem:[%s29016_s1 + $0x228] sm:$0xff]  ;;  %21435 = vmatprep.subr.bf16.mxu0 %v21434_v7  ;;  %21309 = vmatpush3.bf16.msra.mxu1 %v21306_v3  ;;  %v21314_v16 = vpack.c.bf16 %v14544_v13, %v14543_v11  ;;  %v14546_v19 = vld [vmem:[%s29016_s1 + $0xb8] sm:$0xff]  ;;  %v14657_v20 = vld [vmem:[%s29016_s1 + $0x230] sm:$0xff] }
  0x12   : > { %21437 = vmatpush3.bf16.msra.mxu0 %v21434_v7  ;;  %21311 = vmatprep.subr.bf16.mxu1 %v21310_v8  ;;  %v21442_v17 = vpack.c.bf16 %v14656_v15, %v14655_v14  ;;  %v14658_v21 = vld [vmem:[%s29016_s1 + $0x238] sm:$0xff]  ;;  %s24201_s7 = scalar_lea.vmem %s29015_s0, %s24082_s21  ;;  %v21318_v22 = vpack.c.bf16 %v14546_v19, %v14545_v18  ;;  %v14547_v24 = vld [vmem:[%s29016_s1 + $0xc0] sm:$0xff]  ;;  %v14548_v25 = vld [vmem:[%s29016_s1 + $0xc8] sm:$0xff]  ;;  %s15458_s21 = sshll.u32 %s29475_s19, 8 }
  0x13   : > { %21439 = vmatprep.subr.bf16.mxu0 %v21438_v12  ;;  %v21446_v23 = vpack.c.bf16 %v14658_v21, %v14657_v20  ;;  %v368_v26 = vld [vmem:[%s24201_s7 + $0x1] sm:$0xff]  ;;  %v24217_v29 = vld [vmem:[%s24201_s7 + $0x19] sm:$0xff]  ;;  %v21322_v30 = vpack.c.bf16 %v14548_v25, %v14547_v24  ;;  %v14549_v32 = vld [vmem:[%s29016_s1 + $0xd0] sm:$0xff]  ;;  %s28051_s24 = scalar_lea.vmem %s29020_s5, %s15458_s21 }
  0x14   : > { %v14659_v27 = vld [vmem:[%s29016_s1 + $0x240] sm:$0xff]  ;;  %v14660_v28 = vld [vmem:[%s29016_s1 + $0x248] sm:$0xff]  ;;  %17703 = vmatprep.mubr.f32.mxu1 %v368_v26  ;;  %18023 = vmatprep.mubr.f32.mxu0 %v24217_v29  ;;  %v14550_v33 = vld [vmem:[%s29016_s1 + $0xd8] sm:$0xff] }
  0x15   : > { %21313 = vmatpush3.bf16.msra.mxu1 %v21310_v8  ;;  %v21450_v31 = vpack.c.bf16 %v14660_v28, %v14659_v27  ;;  %v14661_v34 = vld [vmem:[%s29016_s1 + $0x250] sm:$0xff]  ;;  %v14662_v35 = vld [vmem:[%s29016_s1 + $0x258] sm:$0xff]  ;;  %v21326_v36 = vpack.c.bf16 %v14550_v33, %v14549_v32  ;;  %v14551_v38 = vld [vmem:[%s29016_s1 + $0xe0] sm:$0xff] }
  0x16   : > { %21441 = vmatpush3.bf16.msra.mxu0 %v21438_v12  ;;  %21315 = vmatprep.subr.bf16.mxu1 %v21314_v16  ;;  %v21454_v37 = vpack.c.bf16 %v14662_v35, %v14661_v34  ;;  %v14552_v39 = vld [vmem:[%s29016_s1 + $0xe8] sm:$0xff]  ;;  %v14663_v40 = vld [vmem:[%s29016_s1 + $0x260] sm:$0xff]  ;;  %v14553_v44 = vld [vmem:[%s29016_s1 + $0xf0] sm:$0xff] }
  0x17   : > { %21443 = vmatprep.subr.bf16.mxu0 %v21442_v17  ;;  %v14664_v41 = vld [vmem:[%s29016_s1 + $0x268] sm:$0xff]  ;;  %v21330_v42 = vpack.c.bf16 %v14552_v39, %v14551_v38  ;;  %v14554_v45 = vld [vmem:[%s29016_s1 + $0xf8] sm:$0xff]  ;;  %v14665_v46 = vld [vmem:[%s29016_s1 + $0x270] sm:$0xff] }
  0x18   : > { %v21458_v43 = vpack.c.bf16 %v14664_v41, %v14663_v40  ;;  %v14666_v47 = vld [vmem:[%s29016_s1 + $0x278] sm:$0xff]  ;;  %v21334_v48 = vpack.c.bf16 %v14554_v45, %v14553_v44  ;;  %v352_v50 = vld [vmem:[%s29016_s1] sm:$0xff]  ;;  %v353_v51 = vld [vmem:[%s29016_s1 + $0x8] sm:$0xff] }
  0x19   : > { %21317 = vmatpush3.bf16.msra.mxu1 %v21314_v16  ;;  %v21462_v49 = vpack.c.bf16 %v14666_v47, %v14665_v46  ;;  %v14699_v52 = vld [vmem:[%s29016_s1 + $0x280] sm:$0xff]  ;;  %v14700_v53 = vld [vmem:[%s29016_s1 + $0x288] sm:$0xff]  ;;  %v21338_v54 = vpack.c.bf16 %v353_v51, %v352_v50  ;;  %v354_v56 = vld [vmem:[%s29016_s1 + $0x10] sm:$0xff] }
  0x1a   : > { %21445 = vmatpush3.bf16.msra.mxu0 %v21442_v17  ;;  %21319 = vmatprep.subr.bf16.mxu1 %v21318_v22  ;;  %v21466_v55 = vpack.c.bf16 %v14700_v53, %v14699_v52  ;;  %v355_v57 = vld [vmem:[%s29016_s1 + $0x18] sm:$0xff]  ;;  %v369_v58 = vld [vmem:[%s24201_s7 + $0x9] sm:$0xff]  ;;  %v14620_v61 = vld [vmem:[%s24201_s7 + $0x21] sm:$0xff] }
  0x1b   : > { %21447 = vmatprep.subr.bf16.mxu0 %v21446_v23  ;;  %v14701_v59 = vld [vmem:[%s29016_s1 + $0x290] sm:$0xff]  ;;  %v14702_v60 = vld [vmem:[%s29016_s1 + $0x298] sm:$0xff]  ;;  %v21342_v63 = vpack.c.bf16 %v355_v57, %v354_v56  ;;  %v356_v1 = vld [vmem:[%s29016_s1 + $0x20] sm:$0xff] }
  0x1c   : > { %v14621_v62 = vld [vmem:[%s24201_s7 + $0x31] sm:$0xff]  ;;  %v21470_v0 = vpack.c.bf16 %v14702_v60, %v14701_v59  ;;  %v357_v2 = vld [vmem:[%s29016_s1 + $0x28] sm:$0xff]  ;;  %v14703_v3 = vld [vmem:[%s29016_s1 + $0x2a0] sm:$0xff] }
  0x1d   : > { %21321 = vmatpush3.bf16.msra.mxu1 %v21318_v22  ;;  %v14704_v4 = vld [vmem:[%s29016_s1 + $0x2a8] sm:$0xff]  ;;  %v14622_v5 = vld [vmem:[%s24201_s7 + $0x39] sm:$0xff]  ;;  %v21346_v7 = vpack.c.bf16 %v357_v2, %v356_v1  ;;  %v358_v9 = vld [vmem:[%s29016_s1 + $0x30] sm:$0xff] }
  0x1e   : > { %21449 = vmatpush3.bf16.msra.mxu0 %v21446_v23  ;;  %21323 = vmatprep.subr.bf16.mxu1 %v21322_v30  ;;  %v14623_v6 = vld [vmem:[%s24201_s7 + $0x49] sm:$0xff]  ;;  %v21474_v8 = vpack.c.bf16 %v14704_v4, %v14703_v3  ;;  %v359_v10 = vld [vmem:[%s29016_s1 + $0x38] sm:$0xff]  ;;  %v14625_v14 = vld [vmem:[%s24201_s7 + $0x61] sm:$0xff] }
  0x1f   : > { %21451 = vmatprep.subr.bf16.mxu0 %v21450_v31  ;;  %v14705_v11 = vld [vmem:[%s29016_s1 + $0x2b0] sm:$0xff]  ;;  %v14706_v12 = vld [vmem:[%s29016_s1 + $0x2b8] sm:$0xff]  ;;  %v21350_v15 = vpack.c.bf16 %v359_v10, %v358_v9  ;;  %v360_v17 = vld [vmem:[%s29016_s1 + $0x40] sm:$0xff] }
  0x20   : > { %v14624_v13 = vld [vmem:[%s24201_s7 + $0x51] sm:$0xff]  ;;  %v21478_v16 = vpack.c.bf16 %v14706_v12, %v14705_v11  ;;  %v361_v18 = vld [vmem:[%s29016_s1 + $0x48] sm:$0xff]  ;;  %v14707_v19 = vld [vmem:[%s29016_s1 + $0x2c0] sm:$0xff] }
  0x21   : > { %21325 = vmatpush3.bf16.msra.mxu1 %v21322_v30  ;;  %v14708_v20 = vld [vmem:[%s29016_s1 + $0x2c8] sm:$0xff]  ;;  %v14627_v22 = vld [vmem:[%s24201_s7 + $0x79] sm:$0xff]  ;;  %v21354_v23 = vpack.c.bf16 %v361_v18, %v360_v17  ;;  %v362_v25 = vld [vmem:[%s29016_s1 + $0x50] sm:$0xff] }
  0x22   : > { %21453 = vmatpush3.bf16.msra.mxu0 %v21450_v31  ;;  %21327 = vmatprep.subr.bf16.mxu1 %v21326_v36  ;;  %v14626_v21 = vld [vmem:[%s24201_s7 + $0x69] sm:$0xff]  ;;  %v21482_v24 = vpack.c.bf16 %v14708_v20, %v14707_v19  ;;  %v363_v26 = vld [vmem:[%s29016_s1 + $0x58] sm:$0xff]  ;;  %v364_v33 = vld [vmem:[%s29016_s1 + $0x60] sm:$0xff] }
  0x23   : > { %21455 = vmatprep.subr.bf16.mxu0 %v21454_v37  ;;  %v14709_v27 = vld [vmem:[%s29016_s1 + $0x2d0] sm:$0xff]  ;;  %v14710_v28 = vld [vmem:[%s29016_s1 + $0x2d8] sm:$0xff]  ;;  %v21358_v31 = vpack.c.bf16 %v363_v26, %v362_v25  ;;  %v365_v34 = vld [vmem:[%s29016_s1 + $0x68] sm:$0xff] }
  0x24   : > { %v14629_v30 = vld [vmem:[%s24201_s7 + $0x91] sm:$0xff]  ;;  %v21486_v32 = vpack.c.bf16 %v14710_v28, %v14709_v27  ;;  %v14711_v35 = vld [vmem:[%s29016_s1 + $0x2e0] sm:$0xff]  ;;  %v14631_v38 = vld [vmem:[%s24201_s7 + $0xa9] sm:$0xff]  ;;  %v21362_v39 = vpack.c.bf16 %v365_v34, %v364_v33 }
  0x25   : > { %21329 = vmatpush3.bf16.msra.mxu1 %v21326_v36  ;;  %v14712_v36 = vld [vmem:[%s29016_s1 + $0x2e8] sm:$0xff]  ;;  %v366_v41 = vld [vmem:[%s29016_s1 + $0x70] sm:$0xff]  ;;  %v14714_v44 = vld [vmem:[%s29016_s1 + $0x2f8] sm:$0xff] }
  0x26   : > { %21457 = vmatpush3.bf16.msra.mxu0 %v21454_v37  ;;  %21331 = vmatprep.subr.bf16.mxu1 %v21330_v42  ;;  %v14630_v37 = vld [vmem:[%s24201_s7 + $0x99] sm:$0xff]  ;;  %v21490_v40 = vpack.c.bf16 %v14712_v36, %v14711_v35  ;;  %v14632_v45 = vld [vmem:[%s24201_s7 + $0xb1] sm:$0xff]  ;;  %v14633_v46 = vld [vmem:[%s24201_s7 + $0xc1] sm:$0xff] }
  0x27   : > { %21459 = vmatprep.subr.bf16.mxu0 %v21458_v43  ;;  %v14556_v50 = vld [vmem:[%s29016_s1 + $0x108] sm:$0xff]  ;;  %v14747_v51 = vld [vmem:[%s29016_s1 + $0x300] sm:$0xff]  ;;  %v14645_v2 = vld [vmem:[%s24201_s7 + $0x151] sm:$0xff] }
  0x28   : > { %v14748_v52 = vld [vmem:[%s29016_s1 + $0x308] sm:$0xff]  ;;  %v14638_v59 = vld [vmem:[%s24201_s7 + $0xf9] sm:$0xff]  ;;  %v14557_v10 = vld [vmem:[%s29016_s1 + $0x110] sm:$0xff] }
  0x29   : > { %21333 = vmatpush3.bf16.msra.mxu1 %v21330_v42  ;;  %v367_v42 = vld [vmem:[%s29016_s1 + $0x78] sm:$0xff]  ;;  %v14634_v53 = vld [vmem:[%s24201_s7 + $0xc9] sm:$0xff]  ;;  %v24384_v56 = vpack.c.bf16 %v14748_v52, %v14747_v51  ;;  %v14636_v57 = vld [vmem:[%s24201_s7 + $0xe1] sm:$0xff] }
  0x2a   : > { %21461 = vmatpush3.bf16.msra.mxu0 %v21458_v43  ;;  %21335 = vmatprep.subr.bf16.mxu1 %v21334_v48  ;;  %v14713_v43 = vld [vmem:[%s29016_s1 + $0x2f0] sm:$0xff]  ;;  %v21366_v47 = vpack.c.bf16 %v367_v42, %v366_v41  ;;  %v14644_v1 = vld [vmem:[%s24201_s7 + $0x141] sm:$0xff]  ;;  %v14646_v3 = vld [vmem:[%s24201_s7 + $0x159] sm:$0xff] }
  0x2b   : > { %21463 = vmatprep.subr.bf16.mxu0 %v21462_v49  ;;  %v14639_v60 = vld [vmem:[%s24201_s7 + $0x109] sm:$0xff]  ;;  %v24405_v9 = vld [vmem:[%s24201_s7 + $0x1a] sm:$0xff]  ;;  %v24428_v17 = vld [vmem:[%s24201_s7 + $0x32] sm:$0xff] }
  0x2c   : > { %v14647_v4 = vld [vmem:[%s24201_s7 + $0x169] sm:$0xff]  ;;  %v14558_v11 = vld [vmem:[%s29016_s1 + $0x118] sm:$0xff]  ;;  %v14559_v20 = vld [vmem:[%s29016_s1 + $0x120] sm:$0xff] }
  0x2d   : > { %21337 = vmatpush3.bf16.msra.mxu1 %v21334_v48  ;;  %v21494_v48 = vpack.c.bf16 %v14714_v44, %v14713_v43  ;;  %v321_v12 = vld [vmem:[%s24201_s7 + $0x8] sm:$0xff]  ;;  %v21374_v18 = vpack.c.bf16 %v14558_v11, %v14557_v10  ;;  %v24449_v25 = vld [vmem:[%s24201_s7 + $0x3a] sm:$0xff]  ;;  %v24452_v26 = vld [vmem:[%s24201_s7 + $0x30] sm:$0xff] }
  0x2e   : > { %21465 = vmatpush3.bf16.msra.mxu0 %v21462_v49  ;;  %21339 = vmatprep.subr.bf16.mxu1 %v21338_v54  ;;  %v14555_v49 = vld [vmem:[%s29016_s1 + $0x100] sm:$0xff]  ;;  %v24456_v27 = vld [vmem:[%s24201_s7 + $0x4a] sm:$0xff]  ;;  %v14754_v34 = vld [vmem:[%s29016_s1 + $0x338] sm:$0xff] }
  0x2f   : > { %21467 = vmatprep.subr.bf16.mxu0 %v21466_v55  ;;  %v14753_v33 = vld [vmem:[%s29016_s1 + $0x330] sm:$0xff]  ;;  %v24482_v36 = vld [vmem:[%s24201_s7 + $0x48] sm:$0xff]  ;;  %v14755_v43 = vld [vmem:[%s29016_s1 + $0x340] sm:$0xff] }
  0x30   : > { %17704 = vmatmul.mubr.f32.vlgmr.msra.gmra.mrb[0].mxu1 %v369_v58  ;;  %v14637_v58 = vld [vmem:[%s24201_s7 + $0xf1] sm:$0xff]  ;;  %v14564_v41 = vld [vmem:[%s29016_s1 + $0x148] sm:$0xff] }
  0x31   : > { %18024 = vmatmul.mubr.f32.vlgmr.msra.gmra.mrb[0].mxu0 %v14620_v61  ;;  %17706 = vmatprep.mubr.f32.mxu1 %v24217_v29  ;;  %v14628_v29 = vld [vmem:[%s24201_s7 + $0x81] sm:$0xff]  ;;  %v24479_v35 = vld [vmem:[%s24201_s7 + $0x52] sm:$0xff] }
  0x32   : > { %18026 = vmatprep.mubr.f32.mxu0 %v14621_v62  ;;  %21341 = vmatpush3.bf16.msra.mxu1 %v21338_v54  ;;  %v14635_v54 = vld [vmem:[%s24201_s7 + $0xd9] sm:$0xff]  ;;  %v24497_v42 = vld [vmem:[%s24201_s7 + $0x50] sm:$0xff]  ;;  %v14756_v44 = vld [vmem:[%s29016_s1 + $0x348] sm:$0xff] }
  0x33   : > { %21469 = vmatpush3.bf16.msra.mxu0 %v21466_v55  ;;  %21343 = vmatprep.subr.bf16.mxu1 %v21342_v63  ;;  %v24382_v55 = vpack.c.bf16 %v14556_v50, %v14555_v49  ;;  %v21514_v49 = vpack.c.bf16 %v14756_v44, %v14755_v43  ;;  %v14565_v50 = vld [vmem:[%s29016_s1 + $0x150] sm:$0xff]  ;;  %v14566_v51 = vld [vmem:[%s29016_s1 + $0x158] sm:$0xff]  ;;  %v24525_v52 = vld [vmem:[%s24201_s7 + $0x68] sm:$0xff] }
  0x34   : > { %17707 = vmatmul.mubr.f32.gmra.mrb[2].mxu1 %v14620_v61  ;;  %21471 = vmatprep.subr.bf16.mxu0 %v21470_v0  ;;  %v14640_v61 = vld [vmem:[%s24201_s7 + $0x111] sm:$0xff]  ;;  %v24653_v43 = vld [vmem:[%s24201_s7 + $0xe0] sm:$0xff] }
  0x35   : > { %18027 = vmatmul.mubr.f32.gmra.mrb[2].mxu0 %v14622_v5  ;;  %17709 = vmatprep.mubr.f32.mxu1 %v14621_v62  ;;  %v14641_v62 = vld [vmem:[%s24201_s7 + $0x121] sm:$0xff]  ;;  %v14761_v10 = vld [vmem:[%s29016_s1 + $0x370] sm:$0xff]  ;;  %v14762_v11 = vld [vmem:[%s29016_s1 + $0x378] sm:$0xff] }
  0x36   : > { %18029 = vmatprep.mubr.f32.mxu0 %v14623_v6  ;;  %21345 = vmatpush3.bf16.msra.mxu1 %v21342_v63  ;;  %v14642_v63 = vld [vmem:[%s24201_s7 + $0x129] sm:$0xff]  ;;  %v24657_v44 = vld [vmem:[%s24201_s7 + $0xfa] sm:$0xff] }
  0x37   : > { %21473 = vmatpush3.bf16.msra.mxu0 %v21470_v0  ;;  %21347 = vmatprep.subr.bf16.mxu1 %v21346_v7  ;;  %v14643_v0 = vld [vmem:[%s24201_s7 + $0x139] sm:$0xff] }
  0x38   : > { %17710 = vmatmul.mubr.f32.gmra.mrb[4].mxu1 %v14622_v5  ;;  %21475 = vmatprep.subr.bf16.mxu0 %v21474_v8  ;;  %v14648_v5 = vld [vmem:[%s24201_s7 + $0x171] sm:$0xff] }
  0x39   : > { %18030 = vmatmul.mubr.f32.gmra.mrb[4].mxu0 %v14624_v13  ;;  %17712 = vmatprep.mubr.f32.mxu1 %v14623_v6  ;;  %v14649_v6 = vld [vmem:[%s24201_s7 + $0x181] sm:$0xff] }
  0x3a   : > { %18032 = vmatprep.mubr.f32.mxu0 %v14625_v14  ;;  %21349 = vmatpush3.bf16.msra.mxu1 %v21346_v7  ;;  %v14650_v7 = vld [vmem:[%s24201_s7 + $0x189] sm:$0xff] }
  0x3b   : > { %21477 = vmatpush3.bf16.msra.mxu0 %v21474_v8  ;;  %21351 = vmatprep.subr.bf16.mxu1 %v21350_v15  ;;  %v320_v8 = vld [vmem:[%s24201_s7] sm:$0xff] }
  0x3c   : > { %17713 = vmatmul.mubr.f32.gmra.mrb[6].mxu1 %v14624_v13  ;;  %21479 = vmatprep.subr.bf16.mxu0 %v21478_v16  ;;  %v14749_v13 = vld [vmem:[%s29016_s1 + $0x310] sm:$0xff] }
  0x3d   : > { %18033 = vmatmul.mubr.f32.gmra.mrb[6].mxu0 %v14626_v21  ;;  %17715 = vmatprep.mubr.f32.mxu1 %v14625_v14  ;;  %v14750_v14 = vld [vmem:[%s29016_s1 + $0x318] sm:$0xff] }
  0x3e   : > { %18035 = vmatprep.mubr.f32.mxu0 %v14627_v22  ;;  %21353 = vmatpush3.bf16.msra.mxu1 %v21350_v15  ;;  %v24422_v15 = vld [vmem:[%s24201_s7 + $0x22] sm:$0xff]  ;;  %v21502_v19 = vpack.c.bf16 %v14750_v14, %v14749_v13 }
  0x3f   : > { %21481 = vmatpush3.bf16.msra.mxu0 %v21478_v16  ;;  %21355 = vmatprep.subr.bf16.mxu1 %v21354_v23  ;;  %v24425_v16 = vld [vmem:[%s24201_s7 + $0x18] sm:$0xff]  ;;  %v24594_v13 = vld [vmem:[%s24201_s7 + $0xa8] sm:$0xff] }
  0x40   : > { %17716 = vmatmul.mubr.f32.gmra.mrb[8].mxu1 %v14626_v21  ;;  %21483 = vmatprep.subr.bf16.mxu0 %v21482_v24  ;;  %29178 = vst [vmem:[#allocation4_spill] sm:$0xff] %v24425_v16  ;;  %v14560_v21 = vld [vmem:[%s29016_s1 + $0x128] sm:$0xff] }
  0x41   : > { %18036 = vmatmul.mubr.f32.gmra.mrb[8].mxu0 %v14628_v29  ;;  %17718 = vmatprep.mubr.f32.mxu1 %v14627_v22  ;;  %v24439_v22 = vld [vmem:[%s24201_s7 + $0x20] sm:$0xff]  ;;  %v21378_v28 = vpack.c.bf16 %v14560_v21, %v14559_v20  ;;  %v14604_v21 = vld [vmem:[%s29016_s1 + $0x188] sm:$0xff] }
  0x42   : > { %18038 = vmatprep.mubr.f32.mxu0 %v14629_v30  ;;  %21357 = vmatpush3.bf16.msra.mxu1 %v21354_v23  ;;  %29179 = vst [vmem:[#allocation5_spill] sm:$0xff] %v24439_v22  ;;  %v14751_v23 = vld [vmem:[%s29016_s1 + $0x320] sm:$0xff] }
  0x43   : > { %21485 = vmatpush3.bf16.msra.mxu0 %v21482_v24  ;;  %21359 = vmatprep.subr.bf16.mxu1 %v21358_v31  ;;  %v14752_v24 = vld [vmem:[%s29016_s1 + $0x328] sm:$0xff]  ;;  %v14603_v20 = vld [vmem:[%s29016_s1 + $0x180] sm:$0xff] }
  0x44   : > { %17719 = vmatmul.mubr.f32.gmra.mrb[10].mxu1 %v14628_v29  ;;  %21487 = vmatprep.subr.bf16.mxu0 %v21486_v32  ;;  %v21506_v29 = vpack.c.bf16 %v14752_v24, %v14751_v23  ;;  %v24597_v14 = vld [vmem:[%s24201_s7 + $0xc2] sm:$0xff]  ;;  %v24609_v23 = vld [vmem:[%s24201_s7 + $0xb0] sm:$0xff] }
  0x45   : > { %18039 = vmatmul.mubr.f32.gmra.mrb[10].mxu0 %v14630_v37  ;;  %17721 = vmatprep.mubr.f32.mxu1 %v14629_v30  ;;  %v14561_v30 = vld [vmem:[%s29016_s1 + $0x130] sm:$0xff]  ;;  %v14795_v24 = vld [vmem:[%s29016_s1 + $0x380] sm:$0xff] }
  0x46   : > { %18041 = vmatprep.mubr.f32.mxu0 %v14631_v38  ;;  %21361 = vmatpush3.bf16.msra.mxu1 %v21358_v31  ;;  %v14562_v31 = vld [vmem:[%s29016_s1 + $0x138] sm:$0xff] }
  0x47   : > { %21489 = vmatpush3.bf16.msra.mxu0 %v21486_v32  ;;  %21363 = vmatprep.subr.bf16.mxu1 %v21362_v39  ;;  %v24469_v32 = vld [vmem:[%s24201_s7 + $0x38] sm:$0xff] }
  0x48   : > { %17722 = vmatmul.mubr.f32.gmra.mrb[12].mxu1 %v14630_v37  ;;  %21491 = vmatprep.subr.bf16.mxu0 %v21490_v40  ;;  %v24485_v37 = vld [vmem:[%s24201_s7 + $0x62] sm:$0xff] }
  0x49   : > { %18042 = vmatmul.mubr.f32.gmra.mrb[12].mxu0 %v14632_v45  ;;  %17724 = vmatprep.mubr.f32.mxu1 %v14631_v38  ;;  %v21382_v38 = vpack.c.bf16 %v14562_v31, %v14561_v30  ;;  %v24622_v30 = vld [vmem:[%s24201_s7 + $0xc0] sm:$0xff] }
  0x4a   : > { %18044 = vmatprep.mubr.f32.mxu0 %v14633_v46  ;;  %21365 = vmatpush3.bf16.msra.mxu1 %v21362_v39  ;;  %v21510_v39 = vpack.c.bf16 %v14754_v34, %v14753_v33  ;;  %v24625_v31 = vld [vmem:[%s24201_s7 + $0xda] sm:$0xff]  ;;  %v24627_v33 = vpack.c.bf16 %v14604_v21, %v14603_v20  ;;  %v24740_v20 = vld [vmem:[%s24201_s7 + $0x168] sm:$0xff] }
  0x4b   : > { %21493 = vmatpush3.bf16.msra.mxu0 %v21490_v40  ;;  %21367 = vmatprep.subr.bf16.mxu1 %v21366_v47  ;;  %v14563_v40 = vld [vmem:[%s29016_s1 + $0x140] sm:$0xff] }
  0x4c   : > { %17725 = vmatmul.mubr.f32.gmra.mrb[14].mxu1 %v14632_v45  ;;  %21495 = vmatprep.subr.bf16.mxu0 %v21494_v48  ;;  %v24507_v45 = vld [vmem:[%s24201_s7 + $0x6a] sm:$0xff]  ;;  %v24743_v21 = vld [vmem:[%s24201_s7 + $0x182] sm:$0xff] }
  0x4d   : > { %18045 = vmatmul.mubr.f32.gmra.mrb[14].mxu0 %v14634_v53  ;;  %17727 = vmatprep.mubr.f32.mxu1 %v14633_v46  ;;  %v24510_v46 = vld [vmem:[%s24201_s7 + $0x60] sm:$0xff]  ;;  %29185 = vst [vmem:[#allocation11_spill] sm:$0xff] %v24743_v21 }
  0x4e   : > { %18047 = vmatprep.mubr.f32.mxu0 %v14635_v54  ;;  %21369 = vmatpush3.bf16.msra.mxu1 %v21366_v47  ;;  %v24513_v47 = vld [vmem:[%s24201_s7 + $0x7a] sm:$0xff] }
  0x4f   : > { %21497 = vmatpush3.bf16.msra.mxu0 %v21494_v48  ;;  %21371 = vmatprep.subr.bf16.mxu1 %v24382_v55  ;;  %v21386_v48 = vpack.c.bf16 %v14564_v41, %v14563_v40  ;;  %v24642_v40 = vld [vmem:[%s24201_s7 + $0xd8] sm:$0xff] }
  0x50   : > { %17728 = vmatmul.mubr.f32.gmra.mrb[16].mxu1 %v14634_v53  ;;  %21499 = vmatprep.subr.bf16.mxu0 %v24384_v56  ;;  %v14757_v53 = vld [vmem:[%s29016_s1 + $0x350] sm:$0xff] }
  0x51   : > { %18048 = vmatmul.mubr.f32.gmra.mrb[16].mxu0 %v14636_v57  ;;  %17730 = vmatprep.mubr.f32.mxu1 %v14635_v54  ;;  %v14758_v54 = vld [vmem:[%s29016_s1 + $0x358] sm:$0xff] }
  0x52   : > { %18050 = vmatprep.mubr.f32.mxu0 %v14637_v58  ;;  %v24645_v41 = vld [vmem:[%s24201_s7 + $0xf2] sm:$0xff] }
  0x54   : > { %17731 = vmatmul.mubr.f32.gmra.mrb[18].mxu1 %v14636_v57  ;;  %v24541_v57 = vld [vmem:[%s24201_s7 + $0x92] sm:$0xff] }
  0x55   : > { %18051 = vmatmul.mubr.f32.gmra.mrb[18].mxu0 %v14638_v59  ;;  %17733 = vmatprep.mubr.f32.mxu1 %v14637_v58  ;;  %v21390_v58 = vpack.c.bf16 %v14566_v51, %v14565_v50  ;;  %v24669_v50 = vld [vmem:[%s24201_s7 + $0xf8] sm:$0xff] }
  0x56   : > { %18053 = vmatprep.mubr.f32.mxu0 %v14639_v60  ;;  %v24673_v51 = vld [vmem:[%s24201_s7 + $0x112] sm:$0xff] }
  0x58   : > { %17734 = vmatmul.mubr.f32.gmra.mrb[20].mxu1 %v14638_v59  ;;  %v21518_v59 = vpack.c.bf16 %v14758_v54, %v14757_v53  ;;  %v24676_v53 = vld [vmem:[%s24201_s7 + $0x108] sm:$0xff] }
  0x59   : > { %18054 = vmatmul.mubr.f32.gmra.mrb[20].mxu0 %v14640_v61  ;;  %17736 = vmatprep.mubr.f32.mxu1 %v14639_v60  ;;  %v14567_v60 = vld [vmem:[%s29016_s1 + $0x160] sm:$0xff] }
  0x5a   : > { %18056 = vmatprep.mubr.f32.mxu0 %v14641_v62  ;;  %v24679_v54 = vld [vmem:[%s24201_s7 + $0x122] sm:$0xff] }
  0x5c   : > { %17737 = vmatmul.mubr.f32.gmra.mrb[22].mxu1 %v14640_v61  ;;  %v14568_v61 = vld [vmem:[%s29016_s1 + $0x168] sm:$0xff] }
  0x5d   : > { %18057 = vmatmul.mubr.f32.gmra.mrb[22].mxu0 %v14642_v63  ;;  %17739 = vmatprep.mubr.f32.mxu1 %v14641_v62  ;;  %v24553_v62 = vld [vmem:[%s24201_s7 + $0x80] sm:$0xff] }
  0x5e   : > { %18059 = vmatprep.mubr.f32.mxu0 %v14643_v0 }
  0x60   : > { %17740 = vmatmul.mubr.f32.gmra.mrb[24].mxu1 %v14642_v63  ;;  %v14759_v63 = vld [vmem:[%s29016_s1 + $0x360] sm:$0xff] }
  0x61   : > { %18060 = vmatmul.mubr.f32.gmra.mrb[24].mxu0 %v14644_v1  ;;  %17742 = vmatprep.mubr.f32.mxu1 %v14643_v0  ;;  %v14760_v0 = vld [vmem:[%s29016_s1 + $0x368] sm:$0xff] }
  0x62   : > { %18062 = vmatprep.mubr.f32.mxu0 %v14645_v2 }
  0x64   : > { %17743 = vmatmul.mubr.f32.gmra.mrb[26].mxu1 %v14644_v1  ;;  %v24563_v1 = vld [vmem:[%s24201_s7 + $0x9a] sm:$0xff] }
  0x65   : > { %18063 = vmatmul.mubr.f32.gmra.mrb[26].mxu0 %v14646_v3  ;;  %17745 = vmatprep.mubr.f32.mxu1 %v14645_v2  ;;  %v24566_v2 = vld [vmem:[%s24201_s7 + $0x90] sm:$0xff] }
  0x66   : > { %18065 = vmatprep.mubr.f32.mxu0 %v14647_v4 }
  0x68   : > { %17746 = vmatmul.mubr.f32.gmra.mrb[28].mxu1 %v14646_v3  ;;  %v24569_v3 = vld [vmem:[%s24201_s7 + $0xaa] sm:$0xff] }
  0x69   : > { %18066 = vmatmul.mubr.f32.gmra.mrb[28].mxu0 %v14648_v5  ;;  %17748 = vmatprep.mubr.f32.mxu1 %v14647_v4  ;;  %v21394_v4 = vpack.c.bf16 %v14568_v61, %v14567_v60  ;;  %v24692_v60 = vld [vmem:[%s24201_s7 + $0x120] sm:$0xff] }
  0x6a   : > { %18068 = vmatprep.mubr.f32.mxu0 %v14649_v6  ;;  %v14569_v6 = vld [vmem:[%s29016_s1 + $0x170] sm:$0xff]  ;;  %v24695_v61 = vld [vmem:[%s24201_s7 + $0x13a] sm:$0xff] }
  0x6c   : > { %17749 = vmatmul.mubr.f32.gmra.mrb[30].mxu1 %v14648_v5  ;;  %v21522_v5 = vpack.c.bf16 %v14760_v0, %v14759_v63  ;;  %v24701_v63 = vld [vmem:[%s24201_s7 + $0x128] sm:$0xff] }
  0x6d   : > { %18069 = vmatmul.mubr.f32.gmra.mrb[30].mxu0 %v14650_v7  ;;  %17783 = vmatprep.mubr.f32.mxu1 %v320_v8  ;;  %v14570_v7 = vld [vmem:[%s29016_s1 + $0x178] sm:$0xff]  ;;  %v24705_v0 = vld [vmem:[%s24201_s7 + $0x142] sm:$0xff] }
  0x6e   : > { %18103 = vmatprep.mubr.f32.mxu0 %v24405_v9  ;;  %v24581_v8 = vld [vmem:[%s24201_s7 + $0x98] sm:$0xff]  ;;  %29180 = vst [vmem:[#allocation6_spill] sm:$0xff] %v24705_v0 }
  0x70   : > { %17784 = vmatmul.mubr.f32.vlgmr.msra.gmra.mrb[0].mxu1 %v321_v12  ;;  %v24591_v12 = vld [vmem:[%s24201_s7 + $0xb2] sm:$0xff] }
  0x71   : > { %18104 = vmatmul.mubr.f32.vlgmr.msra.gmra.mrb[0].mxu0 %v24422_v15  ;;  %17786 = vmatprep.mubr.f32.mxu1 %v24425_v16  ;;  %v14605_v16 = vld [vmem:[%s29016_s1 + $0x190] sm:$0xff] }
  0x72   : > { %18106 = vmatprep.mubr.f32.mxu0 %v24428_v17  ;;  %21373 = vmatpush3.bf16.msra.mxu1 %v24382_v55  ;;  %v24535_v55 = vld [vmem:[%s24201_s7 + $0x82] sm:$0xff] }
  0x73   : > { %21501 = vmatpush3.bf16.msra.mxu0 %v24384_v56  ;;  %21375 = vmatprep.subr.bf16.mxu1 %v21374_v18  ;;  %v24538_v56 = vld [vmem:[%s24201_s7 + $0x78] sm:$0xff] }
  0x74   : > { %17787 = vmatmul.mubr.f32.gmra.mrb[2].mxu1 %v24439_v22  ;;  %21503 = vmatprep.subr.bf16.mxu0 %v21502_v19  ;;  %v867_v22 = vld [vmem:[%s24201_s7 + $0x2] sm:$0xff] }
  0x75   : > { %18107 = vmatmul.mubr.f32.gmra.mrb[2].mxu0 %v24449_v25  ;;  %17789 = vmatprep.mubr.f32.mxu1 %v24452_v26 }
  0x76   : > { %18109 = vmatprep.mubr.f32.mxu0 %v24456_v27  ;;  %21377 = vmatpush3.bf16.msra.mxu1 %v21374_v18  ;;  %v21398_v18 = vpack.c.bf16 %v14570_v7, %v14569_v6  ;;  %v24717_v6 = vld [vmem:[%s24201_s7 + $0x140] sm:$0xff] }
  0x77   : > { %21505 = vmatpush3.bf16.msra.mxu0 %v21502_v19  ;;  %21379 = vmatprep.subr.bf16.mxu1 %v21378_v28  ;;  %v21526_v19 = vpack.c.bf16 %v14762_v11, %v14761_v10  ;;  %v24721_v7 = vld [vmem:[%s24201_s7 + $0x15a] sm:$0xff]  ;;  %v24724_v10 = vld [vmem:[%s24201_s7 + $0x150] sm:$0xff] }
  0x78   : > { %17790 = vmatmul.mubr.f32.gmra.mrb[4].mxu1 %v24469_v32  ;;  %21507 = vmatprep.subr.bf16.mxu0 %v21506_v29  ;;  %29182 = vst [vmem:[#allocation8_spill] sm:$0xff] %v24721_v7  ;;  %v24727_v11 = vld [vmem:[%s24201_s7 + $0x16a] sm:$0xff] }
  0x79   : > { %18110 = vmatmul.mubr.f32.gmra.mrb[4].mxu0 %v24479_v35  ;;  %17792 = vmatprep.mubr.f32.mxu1 %v24482_v36  ;;  %29183 = vst [vmem:[#allocation9_spill] sm:$0xff] %v24727_v11 }
  0x7a   : > { %18112 = vmatprep.mubr.f32.mxu0 %v24485_v37  ;;  %21381 = vmatpush3.bf16.msra.mxu1 %v21378_v28  ;;  %v14796_v28 = vld [vmem:[%s29016_s1 + $0x388] sm:$0xff] }
  0x7b   : > { %21509 = vmatpush3.bf16.msra.mxu0 %v21506_v29  ;;  %21383 = vmatprep.subr.bf16.mxu1 %v21382_v38  ;;  %v24619_v29 = vld [vmem:[%s24201_s7 + $0xca] sm:$0xff]  ;;  %v24630_v34 = vpack.c.bf16 %v14796_v28, %v14795_v24 }
  0x7c   : > { %17793 = vmatmul.mubr.f32.gmra.mrb[6].mxu1 %v24497_v42  ;;  %21511 = vmatprep.subr.bf16.mxu0 %v21510_v39  ;;  %v24749_v24 = vld [vmem:[%s24201_s7 + $0x170] sm:$0xff] }
  0x7d   : > { %18113 = vmatmul.mubr.f32.gmra.mrb[6].mxu0 %v24507_v45  ;;  %17795 = vmatprep.mubr.f32.mxu1 %v24510_v46  ;;  %29186 = vst [vmem:[#allocation12_spill] sm:$0xff] %v24749_v24  ;;  %v24753_v28 = vld [vmem:[%s24201_s7 + $0x18a] sm:$0xff] }
  0x7e   : > { %18115 = vmatprep.mubr.f32.mxu0 %v24513_v47  ;;  %21385 = vmatpush3.bf16.msra.mxu1 %v21382_v38  ;;  %v24635_v38 = vld [vmem:[%s24201_s7 + $0xc8] sm:$0xff]  ;;  %29187 = vst [vmem:[#allocation13_spill] sm:$0xff] %v24753_v28 }
  0x7f   : > { %21513 = vmatpush3.bf16.msra.mxu0 %v21510_v39  ;;  %21387 = vmatprep.subr.bf16.mxu1 %v21386_v48  ;;  %v24639_v39 = vld [vmem:[%s24201_s7 + $0xe2] sm:$0xff] }
  0x80   : > { %17796 = vmatmul.mubr.f32.gmra.mrb[8].mxu1 %v24525_v52  ;;  %21515 = vmatprep.subr.bf16.mxu0 %v21514_v49 }
  0x81   : > { %18116 = vmatmul.mubr.f32.gmra.mrb[8].mxu0 %v24535_v55  ;;  %17798 = vmatprep.mubr.f32.mxu1 %v24538_v56 }
  0x82   : > { %18118 = vmatprep.mubr.f32.mxu0 %v24541_v57  ;;  %21389 = vmatpush3.bf16.msra.mxu1 %v21386_v48  ;;  %v24660_v48 = vld [vmem:[%s24201_s7 + $0xf0] sm:$0xff] }
  0x83   : > { %21517 = vmatpush3.bf16.msra.mxu0 %v21514_v49  ;;  %21391 = vmatprep.subr.bf16.mxu1 %v21390_v58  ;;  %v24663_v49 = vld [vmem:[%s24201_s7 + $0x10a] sm:$0xff] }
  0x84   : > { %17799 = vmatmul.mubr.f32.gmra.mrb[10].mxu1 %v24553_v62  ;;  %21519 = vmatprep.subr.bf16.mxu0 %v21518_v59 }
  0x85   : > { %18119 = vmatmul.mubr.f32.gmra.mrb[10].mxu0 %v24563_v1  ;;  %17801 = vmatprep.mubr.f32.mxu1 %v24566_v2 }
  0x86   : > { %18121 = vmatprep.mubr.f32.mxu0 %v24569_v3  ;;  %21393 = vmatpush3.bf16.msra.mxu1 %v21390_v58  ;;  %v24685_v58 = vld [vmem:[%s24201_s7 + $0x110] sm:$0xff] }
  0x87   : > { %21521 = vmatpush3.bf16.msra.mxu0 %v21518_v59  ;;  %21395 = vmatprep.subr.bf16.mxu1 %v21394_v4  ;;  %v24689_v59 = vld [vmem:[%s24201_s7 + $0x12a] sm:$0xff] }
  0x88   : > { %17802 = vmatmul.mubr.f32.gmra.mrb[12].mxu1 %v24581_v8  ;;  %21523 = vmatprep.subr.bf16.mxu0 %v21522_v5 }
  0x89   : > { %18122 = vmatmul.mubr.f32.gmra.mrb[12].mxu0 %v24591_v12  ;;  %17804 = vmatprep.mubr.f32.mxu1 %v24594_v13 }
  0x8a   : > { %18124 = vmatprep.mubr.f32.mxu0 %v24597_v14  ;;  %21397 = vmatpush3.bf16.msra.mxu1 %v21394_v4  ;;  %v24708_v4 = vld [vmem:[%s24201_s7 + $0x138] sm:$0xff] }
  0x8b   : > { %21525 = vmatpush3.bf16.msra.mxu0 %v21522_v5  ;;  %21399 = vmatprep.subr.bf16.mxu1 %v21398_v18  ;;  %v24711_v5 = vld [vmem:[%s24201_s7 + $0x152] sm:$0xff] }
  0x8c   : > { %17805 = vmatmul.mubr.f32.gmra.mrb[14].mxu1 %v24609_v23  ;;  %21527 = vmatprep.subr.bf16.mxu0 %v21526_v19  ;;  %29181 = vst [vmem:[#allocation7_spill] sm:$0xff] %v24711_v5 }
  0x8d   : > { %18125 = vmatmul.mubr.f32.gmra.mrb[14].mxu0 %v24619_v29  ;;  %17807 = vmatprep.mubr.f32.mxu1 %v24622_v30 }
  0x8e   : > { %18127 = vmatprep.mubr.f32.mxu0 %v24625_v31  ;;  %21401 = vmatpush3.bf16.msra.mxu1 %v21398_v18  ;;  %v24733_v18 = vld [vmem:[%s24201_s7 + $0x158] sm:$0xff] }
  0x8f   : > { %21529 = vmatpush3.bf16.msra.mxu0 %v21526_v19  ;;  %21403 = vmatprep.subr.bf16.mxu1 %v24627_v33  ;;  %v24737_v19 = vld [vmem:[%s24201_s7 + $0x172] sm:$0xff] }
  0x90   : > { %17808 = vmatmul.mubr.f32.gmra.mrb[16].mxu1 %v24635_v38  ;;  %21531 = vmatprep.subr.bf16.mxu0 %v24630_v34  ;;  %29184 = vst [vmem:[#allocation10_spill] sm:$0xff] %v24737_v19 }
  0x91   : > { %18128 = vmatmul.mubr.f32.gmra.mrb[16].mxu0 %v24639_v39  ;;  %17810 = vmatprep.mubr.f32.mxu1 %v24642_v40 }
  0x92   : > { %18130 = vmatprep.mubr.f32.mxu0 %v24645_v41 }
  0x94   : > { %17811 = vmatmul.mubr.f32.gmra.mrb[18].mxu1 %v24653_v43 }
  0x95   : > { %18131 = vmatmul.mubr.f32.gmra.mrb[18].mxu0 %v24657_v44  ;;  %17813 = vmatprep.mubr.f32.mxu1 %v24660_v48 }
  0x96   : > { %18133 = vmatprep.mubr.f32.mxu0 %v24663_v49 }
  0x98   : > { %17814 = vmatmul.mubr.f32.gmra.mrb[20].mxu1 %v24669_v50 }
  0x99   : > { %18134 = vmatmul.mubr.f32.gmra.mrb[20].mxu0 %v24673_v51  ;;  %17816 = vmatprep.mubr.f32.mxu1 %v24676_v53 }
  0x9a   : > { %18136 = vmatprep.mubr.f32.mxu0 %v24679_v54 }
  0x9c   : > { %17817 = vmatmul.mubr.f32.gmra.mrb[22].mxu1 %v24685_v58 }
  0x9d   : > { %18137 = vmatmul.mubr.f32.gmra.mrb[22].mxu0 %v24689_v59  ;;  %17819 = vmatprep.mubr.f32.mxu1 %v24692_v60 }
  0x9e   : > { %18139 = vmatprep.mubr.f32.mxu0 %v24695_v61 }
  0xa0   : > { %17820 = vmatmul.mubr.f32.gmra.mrb[24].mxu1 %v24701_v63 }
  0xa1   : > { %18140 = vmatmul.mubr.f32.gmra.mrb[24].mxu0 %v24705_v0  ;;  %17822 = vmatprep.mubr.f32.mxu1 %v24708_v4  ;;  %v14607_v0 = vld [vmem:[%s29016_s1 + $0x1a0] sm:$0xff] }
  0xa2   : > { %18142 = vmatprep.mubr.f32.mxu0 %v24711_v5 }
  0xa4   : > { %17823 = vmatmul.mubr.f32.gmra.mrb[26].mxu1 %v24717_v6 }
  0xa5   : > { %18143 = vmatmul.mubr.f32.gmra.mrb[26].mxu0 %v24721_v7  ;;  %17825 = vmatprep.mubr.f32.mxu1 %v24724_v10  ;;  %v14798_v7 = vld [vmem:[%s29016_s1 + $0x398] sm:$0xff] }
  0xa6   : > { %18145 = vmatprep.mubr.f32.mxu0 %v24727_v11  ;;  %v14606_v11 = vld [vmem:[%s29016_s1 + $0x198] sm:$0xff] }
  0xa7   : > { %v21406_v5 = vpack.c.bf16 %v14606_v11, %v14605_v16  ;;  %v14800_v16 = vld [vmem:[%s29016_s1 + $0x3a8] sm:$0xff]  ;;  %v14609_v11 = vld [vmem:[%s29016_s1 + $0x1b0] sm:$0xff] }
  0xa8   : > { %17826 = vmatmul.mubr.f32.gmra.mrb[28].mxu1 %v24733_v18 }
  0xa9   : > { %18146 = vmatmul.mubr.f32.gmra.mrb[28].mxu0 %v24737_v19  ;;  %17828 = vmatprep.mubr.f32.mxu1 %v24740_v20  ;;  %v868_v19 = vld [vmem:[%s24201_s7 + $0xa] sm:$0xff] }
  0xaa   : > { %18148 = vmatprep.mubr.f32.mxu0 %v24743_v21  ;;  %v14797_v21 = vld [vmem:[%s29016_s1 + $0x390] sm:$0xff] }
  0xac   : > { %17829 = vmatmul.mubr.f32.gmra.mrb[30].mxu1 %v24749_v24  ;;  %v21534_v24 = vpack.c.bf16 %v14798_v7, %v14797_v21  ;;  %v14612_v21 = vld [vmem:[%s29016_s1 + $0x1c8] sm:$0xff] }
  0xad   : > { %18149 = vmatmul.mubr.f32.gmra.mrb[30].mxu0 %v24753_v28  ;;  %17863 = vmatprep.mubr.f32.mxu1 %v867_v22  ;;  %v14608_v22 = vld [vmem:[%s29016_s1 + $0x1a8] sm:$0xff]  ;;  %v14799_v28 = vld [vmem:[%s29016_s1 + $0x3a0] sm:$0xff] }
  0xae   : > { %18183 = vmatprep.mubr.f32.mxu0 %v24452_v26  ;;  %v21410_v7 = vpack.c.bf16 %v14608_v22, %v14607_v0  ;;  %v14614_v22 = vld [vmem:[%s29016_s1 + $0x1d8] sm:$0xff] }
  0xb0   : > { %17864 = vmatmul.mubr.f32.vlgmr.msra.gmra.mrb[0].mxu1 %v868_v19  ;;  %v14610_v19 = vld [vmem:[%s29016_s1 + $0x1b8] sm:$0xff] }
  0xb1   : > { %18184 = vmatmul.mubr.f32.vlgmr.msra.gmra.mrb[0].mxu0 %v24469_v32  ;;  %17866 = vmatprep.mubr.f32.mxu1 %v24405_v9  ;;  %v21538_v9 = vpack.c.bf16 %v14800_v16, %v14799_v28  ;;  %v14805_v16 = vld [vmem:[%s29016_s1 + $0x3d0] sm:$0xff] }
  0xb2   : > { %18186 = vmatprep.mubr.f32.mxu0 %v24482_v36  ;;  %21405 = vmatpush3.bf16.msra.mxu1 %v24627_v33  ;;  %v14801_v33 = vld [vmem:[%s29016_s1 + $0x3b0] sm:$0xff] }
  0xb3   : > { %21533 = vmatpush3.bf16.msra.mxu0 %v24630_v34  ;;  %21407 = vmatprep.subr.bf16.mxu1 %v21406_v5  ;;  %v21414_v34 = vpack.c.bf16 %v14610_v19, %v14609_v11  ;;  %v14616_v11 = vld [vmem:[%s29016_s1 + $0x1e8] sm:$0xff]  ;;  %v14807_v19 = vld [vmem:[%s29016_s1 + $0x3e0] sm:$0xff] }
  0xb4   : > { %17867 = vmatmul.mubr.f32.gmra.mrb[2].mxu1 %v24422_v15  ;;  %21535 = vmatprep.subr.bf16.mxu0 %v21534_v24  ;;  %v14802_v15 = vld [vmem:[%s29016_s1 + $0x3b8] sm:$0xff] }
  0xb5   : > { %18187 = vmatmul.mubr.f32.gmra.mrb[2].mxu0 %v24497_v42  ;;  %17869 = vmatprep.mubr.f32.mxu1 %v24428_v17  ;;  %v21542_v0 = vpack.c.bf16 %v14802_v15, %v14801_v33  ;;  %v14611_v17 = vld [vmem:[%s29016_s1 + $0x1c0] sm:$0xff] }
  0xb6   : > { %18189 = vmatprep.mubr.f32.mxu0 %v24510_v46  ;;  %21409 = vmatpush3.bf16.msra.mxu1 %v21406_v5  ;;  %v14803_v5 = vld [vmem:[%s29016_s1 + $0x3c0] sm:$0xff] }
  0xb7   : > { %21537 = vmatpush3.bf16.msra.mxu0 %v21534_v24  ;;  %21411 = vmatprep.subr.bf16.mxu1 %v21410_v7  ;;  %v21418_v24 = vpack.c.bf16 %v14612_v21, %v14611_v17 }
  0xb8   : > { %17870 = vmatmul.mubr.f32.gmra.mrb[4].mxu1 %v24449_v25  ;;  %21539 = vmatprep.subr.bf16.mxu0 %v21538_v9  ;;  %v14804_v25 = vld [vmem:[%s29016_s1 + $0x3c8] sm:$0xff] }
  0xb9   : > { %18190 = vmatmul.mubr.f32.gmra.mrb[4].mxu0 %v24525_v52  ;;  %17872 = vmatprep.mubr.f32.mxu1 %v24456_v27  ;;  %v21546_v28 = vpack.c.bf16 %v14804_v25, %v14803_v5  ;;  %v14613_v27 = vld [vmem:[%s29016_s1 + $0x1d0] sm:$0xff]  ;;  %v14844_v5 = vld [vmem:[%s29016_s1 + $0x408] sm:$0xff] }
  0xba   : > { %18192 = vmatprep.mubr.f32.mxu0 %v24538_v56  ;;  %21413 = vmatpush3.bf16.msra.mxu1 %v21410_v7  ;;  %v21422_v7 = vpack.c.bf16 %v14614_v22, %v14613_v27  ;;  %v14763_v25 = vld [vmem:[%s24201_s7 + $0x31] sm:$0xff]  ;;  %v29194_v22 = vld [vmem:[#allocation4_spill] sm:$0xff] }
  0xbb   : > { %21541 = vmatpush3.bf16.msra.mxu0 %v21538_v9  ;;  %21415 = vmatprep.subr.bf16.mxu1 %v21414_v34  ;;  %v14846_v27 = vld [vmem:[%s29016_s1 + $0x418] sm:$0xff] }
  0xbc   : > { %17873 = vmatmul.mubr.f32.gmra.mrb[6].mxu1 %v24479_v35  ;;  %21543 = vmatprep.subr.bf16.mxu0 %v21542_v0  ;;  %v14806_v35 = vld [vmem:[%s29016_s1 + $0x3d8] sm:$0xff] }
  0xbd   : > { %18193 = vmatmul.mubr.f32.gmra.mrb[6].mxu0 %v24553_v62  ;;  %17875 = vmatprep.mubr.f32.mxu1 %v24485_v37  ;;  %v21550_v9 = vpack.c.bf16 %v14806_v35, %v14805_v16  ;;  %v14615_v37 = vld [vmem:[%s29016_s1 + $0x1e0] sm:$0xff]  ;;  %v14765_v35 = vld [vmem:[%s24201_s7 + $0x49] sm:$0xff] }
  0xbe   : > { %18195 = vmatprep.mubr.f32.mxu0 %v24566_v2  ;;  %21417 = vmatpush3.bf16.msra.mxu1 %v21414_v34  ;;  %v21426_v33 = vpack.c.bf16 %v14616_v11, %v14615_v37  ;;  %v14618_v34 = vld [vmem:[%s29016_s1 + $0x1f8] sm:$0xff]  ;;  %v14847_v37 = vld [vmem:[%s29016_s1 + $0x420] sm:$0xff]  ;;  %v14848_v11 = vld [vmem:[%s29016_s1 + $0x428] sm:$0xff] }
  0xbf   : > { %21545 = vmatpush3.bf16.msra.mxu0 %v21542_v0  ;;  %21419 = vmatprep.subr.bf16.mxu1 %v21418_v24  ;;  %v14809_v0 = vld [vmem:[%s29016_s1 + $0x3f0] sm:$0xff]  ;;  %v14764_v16 = vld [vmem:[%s24201_s7 + $0x39] sm:$0xff] }
  0xc0   : > { %17876 = vmatmul.mubr.f32.gmra.mrb[8].mxu1 %v24507_v45  ;;  %21547 = vmatprep.subr.bf16.mxu0 %v21546_v28  ;;  %v14808_v45 = vld [vmem:[%s29016_s1 + $0x3e8] sm:$0xff] }
  0xc1   : > { %18196 = vmatmul.mubr.f32.gmra.mrb[8].mxu0 %v24581_v8  ;;  %17878 = vmatprep.mubr.f32.mxu1 %v24513_v47  ;;  %v21554_v15 = vpack.c.bf16 %v14808_v45, %v14807_v19  ;;  %v14617_v47 = vld [vmem:[%s29016_s1 + $0x1f0] sm:$0xff]  ;;  %v14767_v45 = vld [vmem:[%s24201_s7 + $0x61] sm:$0xff] }
  0xc2   : > { %18198 = vmatprep.mubr.f32.mxu0 %v24594_v13  ;;  %21421 = vmatpush3.bf16.msra.mxu1 %v21418_v24  ;;  %v21430_v17 = vpack.c.bf16 %v14618_v34, %v14617_v47  ;;  %v29193_v24 = vld [vmem:[#allocation10_spill] sm:$0xff]  ;;  %v14850_v47 = vld [vmem:[%s29016_s1 + $0x438] sm:$0xff] }
  0xc3   : > { %21549 = vmatpush3.bf16.msra.mxu0 %v21546_v28  ;;  %21423 = vmatprep.subr.bf16.mxu1 %v21422_v7  ;;  %v14845_v28 = vld [vmem:[%s29016_s1 + $0x410] sm:$0xff]  ;;  %v14769_v34 = vld [vmem:[%s24201_s7 + $0x79] sm:$0xff] }
  0xc4   : > { %17879 = vmatmul.mubr.f32.gmra.mrb[10].mxu1 %v24535_v55  ;;  %21551 = vmatprep.subr.bf16.mxu0 %v21550_v9  ;;  %v14810_v55 = vld [vmem:[%s29016_s1 + $0x3f8] sm:$0xff] }
  0xc5   : > { %18199 = vmatmul.mubr.f32.gmra.mrb[10].mxu0 %v24609_v23  ;;  %17881 = vmatprep.mubr.f32.mxu1 %v24541_v57  ;;  %v21558_v21 = vpack.c.bf16 %v14810_v55, %v14809_v0  ;;  %v14843_v57 = vld [vmem:[%s29016_s1 + $0x400] sm:$0xff]  ;;  %v14766_v19 = vld [vmem:[%s24201_s7 + $0x51] sm:$0xff]  ;;  %v14852_v55 = vld [vmem:[%s29016_s1 + $0x448] sm:$0xff] }
  0xc6   : > { %18201 = vmatprep.mubr.f32.mxu0 %v24622_v30  ;;  %21425 = vmatpush3.bf16.msra.mxu1 %v21422_v7  ;;  %v21566_v7 = vpack.c.bf16 %v14846_v27, %v14845_v28  ;;  %v14858_v28 = vld [vmem:[%s29016_s1 + $0x478] sm:$0xff] }
  0xc7   : > { %21553 = vmatpush3.bf16.msra.mxu0 %v21550_v9  ;;  %21427 = vmatprep.subr.bf16.mxu1 %v21426_v33  ;;  %v29195_v9 = vld [vmem:[#allocation5_spill] sm:$0xff]  ;;  %v14777_v27 = vld [vmem:[%s24201_s7 + $0xd9] sm:$0xff] }
  0xc8   : > { %17882 = vmatmul.mubr.f32.gmra.mrb[12].mxu1 %v24563_v1  ;;  %21555 = vmatprep.subr.bf16.mxu0 %v21554_v15  ;;  %v21562_v1 = vpack.c.bf16 %v14844_v5, %v14843_v57  ;;  %v14854_v57 = vld [vmem:[%s29016_s1 + $0x458] sm:$0xff]  ;;  %v14773_v5 = vld [vmem:[%s24201_s7 + $0xa9] sm:$0xff] }
  0xc9   : > { %18202 = vmatmul.mubr.f32.gmra.mrb[12].mxu0 %v24635_v38  ;;  %17884 = vmatprep.mubr.f32.mxu1 %v24569_v3  ;;  %v24904_v3 = vld [vmem:[%s24201_s7 + $0x180] sm:$0xff] }
  0xca   : > { %18204 = vmatprep.mubr.f32.mxu0 %v24642_v40  ;;  %21429 = vmatpush3.bf16.msra.mxu1 %v21426_v33  ;;  %v21570_v33 = vpack.c.bf16 %v14848_v11, %v14847_v37  ;;  %v14819_v37 = vld [vmem:[%s24201_s7 + $0x92] sm:$0xff]  ;;  %v14820_v11 = vld [vmem:[%s24201_s7 + $0x9a] sm:$0xff] }
  0xcb   : > { %21557 = vmatpush3.bf16.msra.mxu0 %v21554_v15  ;;  %21431 = vmatprep.subr.bf16.mxu1 %v21430_v17  ;;  %v14849_v15 = vld [vmem:[%s29016_s1 + $0x430] sm:$0xff] }
  0xcc   : > { %17885 = vmatmul.mubr.f32.gmra.mrb[14].mxu1 %v24591_v12  ;;  %21559 = vmatprep.subr.bf16.mxu0 %v21558_v21  ;;  %v29188_v12 = vld [vmem:[#allocation6_spill] sm:$0xff]  ;;  %v21574_v0 = vpack.c.bf16 %v14850_v47, %v14849_v15  ;;  %v14825_v47 = vld [vmem:[%s24201_s7 + $0xda] sm:$0xff] }
  0xcd   : > { %18205 = vmatmul.mubr.f32.gmra.mrb[14].mxu0 %v24653_v43  ;;  %17887 = vmatprep.mubr.f32.mxu1 %v24597_v14  ;;  %v29189_v14 = vld [vmem:[#allocation12_spill] sm:$0xff]  ;;  %v14824_v15 = vld [vmem:[%s24201_s7 + $0xca] sm:$0xff] }
  0xce   : > { %18207 = vmatprep.mubr.f32.mxu0 %v24660_v48  ;;  %21433 = vmatpush3.bf16.msra.mxu1 %v21430_v17  ;;  %v14771_v17 = vld [vmem:[%s24201_s7 + $0x91] sm:$0xff] }
  0xcf   : > { %21561 = vmatpush3.bf16.msra.mxu0 %v21558_v21 }
  0xd0   : > { %17888 = vmatmul.mubr.f32.gmra.mrb[16].mxu1 %v24619_v29  ;;  %21563 = vmatprep.subr.bf16.mxu0 %v21562_v1  ;;  %v29190_v29 = vld [vmem:[#allocation7_spill] sm:$0xff] }
  0xd1   : > { %18208 = vmatmul.mubr.f32.gmra.mrb[16].mxu0 %v24669_v50  ;;  %17890 = vmatprep.mubr.f32.mxu1 %v24625_v31  ;;  %v24911_v31 = vld [vmem:[%s24201_s7 + $0x188] sm:$0xff] }
  0xd2   : > { %18210 = vmatprep.mubr.f32.mxu0 %v24676_v53 }
  0xd4   : > { %17891 = vmatmul.mubr.f32.gmra.mrb[18].mxu1 %v24639_v39  ;;  %v14745_v39 = vld [vmem:[%s24201_s7 + $0x198] sm:$0xff] }
  0xd5   : > { %18211 = vmatmul.mubr.f32.gmra.mrb[18].mxu0 %v24685_v58  ;;  %17893 = vmatprep.mubr.f32.mxu1 %v24645_v41  ;;  %v29191_v41 = vld [vmem:[#allocation8_spill] sm:$0xff] }
  0xd6   : > { %18213 = vmatprep.mubr.f32.mxu0 %v24692_v60 }
  0xd8   : > { %17894 = vmatmul.mubr.f32.gmra.mrb[20].mxu1 %v24657_v44  ;;  %v29192_v44 = vld [vmem:[#allocation9_spill] sm:$0xff] }
  0xd9   : > { %18214 = vmatmul.mubr.f32.gmra.mrb[20].mxu0 %v24701_v63  ;;  %17896 = vmatprep.mubr.f32.mxu1 %v24663_v49  ;;  %v14746_v49 = vld [vmem:[%s24201_s7 + $0x1a0] sm:$0xff] }
  0xda   : > { %18216 = vmatprep.mubr.f32.mxu0 %v24708_v4 }
  0xdc   : > { %17897 = vmatmul.mubr.f32.gmra.mrb[22].mxu1 %v24673_v51 }
  0xdd   : > { %18217 = vmatmul.mubr.f32.gmra.mrb[22].mxu0 %v24717_v6  ;;  %17899 = vmatprep.mubr.f32.mxu1 %v24679_v54 }
  0xde   : > { %18219 = vmatprep.mubr.f32.mxu0 %v24724_v10 }
  0xe0   : > { %17900 = vmatmul.mubr.f32.gmra.mrb[24].mxu1 %v24689_v59 }
  0xe1   : > { %18220 = vmatmul.mubr.f32.gmra.mrb[24].mxu0 %v24733_v18  ;;  %17902 = vmatprep.mubr.f32.mxu1 %v24695_v61 }
  0xe2   : > { %18222 = vmatprep.mubr.f32.mxu0 %v24740_v20 }
  0xe4   : > { %17903 = vmatmul.mubr.f32.gmra.mrb[26].mxu1 %v29188_v12 }
  0xe5   : > { %18223 = vmatmul.mubr.f32.gmra.mrb[26].mxu0 %v29189_v14  ;;  %17905 = vmatprep.mubr.f32.mxu1 %v29190_v29 }
  0xe6   : > { %18225 = vmatprep.mubr.f32.mxu0 %v24904_v3 }
  0xe8   : > { %17906 = vmatmul.mubr.f32.gmra.mrb[28].mxu1 %v29191_v41 }
  0xe9   : > { %18226 = vmatmul.mubr.f32.gmra.mrb[28].mxu0 %v24911_v31  ;;  %17908 = vmatprep.mubr.f32.mxu1 %v29192_v44 }
  0xea   : > { %18228 = vmatprep.mubr.f32.mxu0 %v14745_v39  ;;  %v14856_v39 = vld [vmem:[%s29016_s1 + $0x468] sm:$0xff] }
  0xec   : > { %17909 = vmatmul.mubr.f32.gmra.mrb[30].mxu1 %v29193_v24 }
  0xed   : > { %18229 = vmatmul.mubr.f32.gmra.mrb[30].mxu0 %v14746_v49  ;;  %17943 = vmatprep.mubr.f32.mxu1 %v29194_v22  ;;  %v14775_v49 = vld [vmem:[%s24201_s7 + $0xc1] sm:$0xff] }
  0xee   : > { %18263 = vmatprep.mubr.f32.mxu0 %v14763_v25  ;;  %v14778_v22 = vld [vmem:[%s24201_s7 + $0xe1] sm:$0xff] }
  0xf0   : > { %17944 = vmatmul.mubr.f32.vlgmr.msra.gmra.mrb[0].mxu1 %v29195_v9  ;;  %v14817_v9 = vld [vmem:[%s24201_s7 + $0x7a] sm:$0xff] }
  0xf1   : > { %18264 = vmatmul.mubr.f32.vlgmr.msra.gmra.mrb[0].mxu0 %v14764_v16  ;;  %17946 = vmatprep.mubr.f32.mxu1 %v24452_v26  ;;  %v14768_v26 = vld [vmem:[%s24201_s7 + $0x69] sm:$0xff]  ;;  %v14779_v16 = vld [vmem:[%s24201_s7 + $0xf1] sm:$0xff] }
  0xf2   : > { %18266 = vmatprep.mubr.f32.mxu0 %v14765_v35  ;;  %21565 = vmatpush3.bf16.msra.mxu0 %v21562_v1  ;;  %v14783_v35 = vld [vmem:[%s24201_s7 + $0x121] sm:$0xff] }
  0xf3   : > { %21567 = vmatprep.subr.bf16.mxu0 %v21566_v7 }
  0xf4   : > { %17947 = vmatmul.mubr.f32.gmra.mrb[2].mxu1 %v24469_v32  ;;  %v14851_v32 = vld [vmem:[%s29016_s1 + $0x440] sm:$0xff] }
  0xf5   : > { %18267 = vmatmul.mubr.f32.gmra.mrb[2].mxu0 %v14766_v19  ;;  %17949 = vmatprep.mubr.f32.mxu1 %v24482_v36  ;;  %v14770_v36 = vld [vmem:[%s24201_s7 + $0x81] sm:$0xff]  ;;  %v21578_v21 = vpack.c.bf16 %v14852_v55, %v14851_v32  ;;  %v14821_v19 = vld [vmem:[%s24201_s7 + $0xaa] sm:$0xff]  ;;  %v29196_v55 = vld [vmem:[#allocation11_spill] sm:$0xff] }
  0xf6   : > { %18269 = vmatprep.mubr.f32.mxu0 %v14767_v45  ;;  %21569 = vmatpush3.bf16.msra.mxu0 %v21566_v7  ;;  %v14815_v7 = vld [vmem:[%s24201_s7 + $0x62] sm:$0xff]  ;;  %v14822_v45 = vld [vmem:[%s24201_s7 + $0xb2] sm:$0xff]  ;;  %v14829_v32 = vld [vmem:[%s24201_s7 + $0x10a] sm:$0xff] }
  0xf7   : > { %21571 = vmatprep.subr.bf16.mxu0 %v21570_v33 }
  0xf8   : > { %17950 = vmatmul.mubr.f32.gmra.mrb[4].mxu1 %v24497_v42  ;;  %v14853_v42 = vld [vmem:[%s29016_s1 + $0x450] sm:$0xff] }
  0xf9   : > { %18270 = vmatmul.mubr.f32.gmra.mrb[4].mxu0 %v14768_v26  ;;  %17952 = vmatprep.mubr.f32.mxu1 %v24510_v46  ;;  %v14772_v46 = vld [vmem:[%s24201_s7 + $0x99] sm:$0xff]  ;;  %v21582_v1 = vpack.c.bf16 %v14854_v57, %v14853_v42  ;;  %v14826_v26 = vld [vmem:[%s24201_s7 + $0xe2] sm:$0xff]  ;;  %v14882_v42 = vld [vmem:[%s29016_s1 + $0x530] sm:$0xff] }
  0xfa   : > { %18272 = vmatprep.mubr.f32.mxu0 %v14769_v34  ;;  %21573 = vmatpush3.bf16.msra.mxu0 %v21570_v33  ;;  %v14823_v33 = vld [vmem:[%s24201_s7 + $0xc2] sm:$0xff]  ;;  %v14827_v34 = vld [vmem:[%s24201_s7 + $0xf2] sm:$0xff] }
  0xfb   : > { %21575 = vmatprep.subr.bf16.mxu0 %v21574_v0  ;;  %v14883_v57 = vld [vmem:[%s29016_s1 + $0x538] sm:$0xff] }
  0xfc   : > { %17953 = vmatmul.mubr.f32.gmra.mrb[6].mxu1 %v24525_v52  ;;  %v14855_v52 = vld [vmem:[%s29016_s1 + $0x460] sm:$0xff] }
  0xfd   : > { %18273 = vmatmul.mubr.f32.gmra.mrb[6].mxu0 %v14770_v36  ;;  %17955 = vmatprep.mubr.f32.mxu1 %v24538_v56  ;;  %v14774_v56 = vld [vmem:[%s24201_s7 + $0xb1] sm:$0xff]  ;;  %v21586_v25 = vpack.c.bf16 %v14856_v39, %v14855_v52  ;;  %v14880_v36 = vld [vmem:[%s29016_s1 + $0x520] sm:$0xff] }
  0xfe   : > { %18275 = vmatprep.mubr.f32.mxu0 %v14771_v17  ;;  %21577 = vmatpush3.bf16.msra.mxu0 %v21574_v0  ;;  %v14828_v0 = vld [vmem:[%s24201_s7 + $0xfa] sm:$0xff]  ;;  %v14881_v17 = vld [vmem:[%s29016_s1 + $0x528] sm:$0xff]  ;;  %v14886_v39 = vld [vmem:[%s29016_s1 + $0x550] sm:$0xff] }
  0xff   : > { %21579 = vmatprep.subr.bf16.mxu0 %v21578_v21 }
 0x100   : > { %17956 = vmatmul.mubr.f32.gmra.mrb[8].mxu1 %v24553_v62  ;;  %v14857_v62 = vld [vmem:[%s29016_s1 + $0x470] sm:$0xff] }
 0x101   : > { %18276 = vmatmul.mubr.f32.gmra.mrb[8].mxu0 %v14772_v46  ;;  %17958 = vmatprep.mubr.f32.mxu1 %v24566_v2  ;;  %v14776_v2 = vld [vmem:[%s24201_s7 + $0xc9] sm:$0xff]  ;;  %v21606_v46 = vpack.c.bf16 %v14883_v57, %v14882_v42 }
 0x102   : > { %18278 = vmatprep.mubr.f32.mxu0 %v14773_v5  ;;  %21581 = vmatpush3.bf16.msra.mxu0 %v21578_v21  ;;  %v21602_v21 = vpack.c.bf16 %v14881_v17, %v14880_v36  ;;  %v14884_v5 = vld [vmem:[%s29016_s1 + $0x540] sm:$0xff]  ;;  %v14893_v36 = vld [vmem:[%s29016_s1 + $0x588] sm:$0xff] }
 0x103   : > { %21583 = vmatprep.subr.bf16.mxu0 %v21582_v1 }
 0x104   : > { %17959 = vmatmul.mubr.f32.gmra.mrb[10].mxu1 %v24581_v8  ;;  %v21590_v8 = vpack.c.bf16 %v14858_v28, %v14857_v62  ;;  %v14889_v62 = vld [vmem:[%s29016_s1 + $0x568] sm:$0xff] }
 0x105   : > { %18279 = vmatmul.mubr.f32.gmra.mrb[10].mxu0 %v14774_v56  ;;  %17961 = vmatprep.mubr.f32.mxu1 %v24594_v13  ;;  %v14780_v13 = vld [vmem:[%s24201_s7 + $0xf9] sm:$0xff] }
 0x106   : > { %18281 = vmatprep.mubr.f32.mxu0 %v14775_v49  ;;  %21585 = vmatpush3.bf16.msra.mxu0 %v21582_v1  ;;  %v14885_v1 = vld [vmem:[%s29016_s1 + $0x548] sm:$0xff]  ;;  %v14887_v56 = vld [vmem:[%s29016_s1 + $0x558] sm:$0xff] }
 0x107   : > { %21587 = vmatprep.subr.bf16.mxu0 %v21586_v25  ;;  %v21610_v52 = vpack.c.bf16 %v14885_v1, %v14884_v5  ;;  %v21614_v49 = vpack.c.bf16 %v14887_v56, %v14886_v39 }
 0x108   : > { %17962 = vmatmul.mubr.f32.gmra.mrb[12].mxu1 %v24609_v23  ;;  %v14781_v23 = vld [vmem:[%s24201_s7 + $0x109] sm:$0xff] }
 0x109   : > { %18282 = vmatmul.mubr.f32.gmra.mrb[12].mxu0 %v14776_v2  ;;  %17964 = vmatprep.mubr.f32.mxu1 %v24622_v30  ;;  %v14782_v30 = vld [vmem:[%s24201_s7 + $0x111] sm:$0xff]  ;;  %v24106_v2 = vmov 0.0  }
 0x10a   : > { %18284 = vmatprep.mubr.f32.mxu0 %v14777_v27  ;;  %21589 = vmatpush3.bf16.msra.mxu0 %v21586_v25  ;;  %v14888_v25 = vld [vmem:[%s29016_s1 + $0x560] sm:$0xff]  ;;  %234 = vst [vmem:[#allocation2] sm:$0xff] %v24106_v2  ;;  %235 = vst [vmem:[#allocation2 + $0x8] sm:$0xff] %v24106_v2  ;;  %v14890_v27 = vld [vmem:[%s29016_s1 + $0x570] sm:$0xff] }
 0x10b   : > { %21591 = vmatprep.subr.bf16.mxu0 %v21590_v8  ;;  %v25099_v28 = vpack.c.bf16 %v14889_v62, %v14888_v25  ;;  %236 = vst [vmem:[#allocation2 + $0x10] sm:$0x3] %v24106_v2  ;;  %238 = vst [vmem:[#allocation2 + $0x198] sm:$0xff] %v24106_v2 }
 0x10c   : > { %17965 = vmatmul.mubr.f32.gmra.mrb[14].mxu1 %v24635_v38  ;;  %v14784_v38 = vld [vmem:[%s24201_s7 + $0x129] sm:$0xff]  ;;  %239 = vst [vmem:[#allocation2 + $0x1a0] sm:$0xff] %v24106_v2  ;;  %240 = vst [vmem:[#allocation2 + $0x1a8] sm:$0x3] %v24106_v2 }
 0x10d   : > { %18285 = vmatmul.mubr.f32.gmra.mrb[14].mxu0 %v14778_v22  ;;  %17967 = vmatprep.mubr.f32.mxu1 %v24642_v40  ;;  %v14785_v40 = vld [vmem:[%s24201_s7 + $0x139] sm:$0xff]  ;;  %242 = vst [vmem:[#allocation2 + $0x18] sm:$0x1] %v24106_v2  ;;  %243 = vst [vmem:[#allocation2 + $0x30] sm:$0x1] %v24106_v2 }
 0x10e   : > { %18287 = vmatprep.mubr.f32.mxu0 %v14779_v16  ;;  %21593 = vmatpush3.bf16.msra.mxu0 %v21590_v8  ;;  %244 = vst [vmem:[#allocation2 + $0x48] sm:$0x1] %v24106_v2  ;;  %245 = vst [vmem:[#allocation2 + $0x60] sm:$0x1] %v24106_v2  ;;  %v14891_v8 = vld [vmem:[%s29016_s1 + $0x578] sm:$0xff] }
 0x10f   : > { %246 = vst [vmem:[#allocation2 + $0x78] sm:$0x1] %v24106_v2  ;;  %247 = vst [vmem:[#allocation2 + $0x90] sm:$0x1] %v24106_v2  ;;  %v21622_v22 = vpack.c.bf16 %v14891_v8, %v14890_v27 }
 0x110   : > { %17968 = vmatmul.mubr.f32.gmra.mrb[16].mxu1 %v24653_v43  ;;  %v14786_v43 = vld [vmem:[%s24201_s7 + $0x141] sm:$0xff]  ;;  %248 = vst [vmem:[#allocation2 + $0xa8] sm:$0x1] %v24106_v2  ;;  %249 = vst [vmem:[#allocation2 + $0xc0] sm:$0x1] %v24106_v2 }
 0x111   : > { %18288 = vmatmul.mubr.f32.gmra.mrb[16].mxu0 %v14780_v13  ;;  %17970 = vmatprep.mubr.f32.mxu1 %v24660_v48  ;;  %v14787_v48 = vld [vmem:[%s24201_s7 + $0x151] sm:$0xff]  ;;  %250 = vst [vmem:[#allocation2 + $0xd8] sm:$0x1] %v24106_v2  ;;  %251 = vst [vmem:[#allocation2 + $0xf0] sm:$0x1] %v24106_v2  ;;  %v3162_v16 = vld [vmem:[#allocation2 + $0x1] sm:$0xff] }
 0x112   : > { %18290 = vmatprep.mubr.f32.mxu0 %v14781_v23  ;;  %252 = vst [vmem:[#allocation2 + $0x108] sm:$0x1] %v24106_v2  ;;  %253 = vst [vmem:[#allocation2 + $0x120] sm:$0x1] %v24106_v2  ;;  %v3163_v13 = vld [vmem:[#allocation2 + $0x9] sm:$0xff]  ;;  %v14860_v23 = vld [vmem:[%s29016_s1 + $0x480] sm:$0xff] }
 0x113   : > { %254 = vst [vmem:[#allocation2 + $0x138] sm:$0x1] %v24106_v2  ;;  %255 = vst [vmem:[#allocation2 + $0x150] sm:$0x1] %v24106_v2 }
 0x114   : > { %17971 = vmatmul.mubr.f32.gmra.mrb[18].mxu1 %v24669_v50  ;;  %v14788_v50 = vld [vmem:[%s24201_s7 + $0x159] sm:$0xff]  ;;  %256 = vst [vmem:[#allocation2 + $0x168] sm:$0x1] %v24106_v2  ;;  %257 = vst [vmem:[#allocation2 + $0x180] sm:$0x1] %v24106_v2 }
 0x115   : > { %18291 = vmatmul.mubr.f32.gmra.mrb[18].mxu0 %v14782_v30  ;;  %17973 = vmatprep.mubr.f32.mxu1 %v24676_v53  ;;  %v14789_v53 = vld [vmem:[%s24201_s7 + $0x169] sm:$0xff]  ;;  %260 = vst [vmem:[#allocation2 + $0x29] sm:$0x1] %v24106_v2  ;;  %261 = vst [vmem:[#allocation2 + $0x41] sm:$0x1] %v24106_v2 }
 0x116   : > { %18293 = vmatprep.mubr.f32.mxu0 %v14783_v35  ;;  %262 = vst [vmem:[#allocation2 + $0x59] sm:$0x1] %v24106_v2  ;;  %263 = vst [vmem:[#allocation2 + $0x71] sm:$0x1] %v24106_v2  ;;  %v14861_v30 = vld [vmem:[%s29016_s1 + $0x488] sm:$0xff] }
 0x117   : > { %264 = vst [vmem:[#allocation2 + $0x89] sm:$0x1] %v24106_v2  ;;  %265 = vst [vmem:[#allocation2 + $0xa1] sm:$0x1] %v24106_v2  ;;  %v21626_v35 = vpack.c.bf16 %v14861_v30, %v14860_v23 }
 0x118   : > { %17974 = vmatmul.mubr.f32.gmra.mrb[20].mxu1 %v24685_v58  ;;  %v14790_v58 = vld [vmem:[%s24201_s7 + $0x171] sm:$0xff]  ;;  %266 = vst [vmem:[#allocation2 + $0xb9] sm:$0x1] %v24106_v2  ;;  %267 = vst [vmem:[#allocation2 + $0xd1] sm:$0x1] %v24106_v2 }
 0x119   : > { %18294 = vmatmul.mubr.f32.gmra.mrb[20].mxu0 %v14784_v38  ;;  %17976 = vmatprep.mubr.f32.mxu1 %v24692_v60  ;;  %v14791_v60 = vld [vmem:[%s24201_s7 + $0x181] sm:$0xff]  ;;  %268 = vst [vmem:[#allocation2 + $0xe9] sm:$0x1] %v24106_v2  ;;  %269 = vst [vmem:[#allocation2 + $0x101] sm:$0x1] %v24106_v2  ;;  %v14862_v38 = vld [vmem:[%s29016_s1 + $0x490] sm:$0xff] }
 0x11a   : > { %18296 = vmatprep.mubr.f32.mxu0 %v14785_v40  ;;  %270 = vst [vmem:[#allocation2 + $0x119] sm:$0x1] %v24106_v2  ;;  %271 = vst [vmem:[#allocation2 + $0x131] sm:$0x1] %v24106_v2  ;;  %v14863_v40 = vld [vmem:[%s29016_s1 + $0x498] sm:$0xff] }
 0x11b   : > { %272 = vst [vmem:[#allocation2 + $0x149] sm:$0x1] %v24106_v2  ;;  %273 = vst [vmem:[#allocation2 + $0x161] sm:$0x1] %v24106_v2 }
 0x11c   : > { %17977 = vmatmul.mubr.f32.gmra.mrb[22].mxu1 %v24701_v63  ;;  %v14792_v63 = vld [vmem:[%s24201_s7 + $0x189] sm:$0xff]  ;;  %274 = vst [vmem:[#allocation2 + $0x179] sm:$0x1] %v24106_v2  ;;  %275 = vst [vmem:[#allocation2 + $0x191] sm:$0x1] %v24106_v2 }
 0x11d   : > { %18297 = vmatmul.mubr.f32.gmra.mrb[22].mxu0 %v14786_v43  ;;  %17979 = vmatprep.mubr.f32.mxu1 %v24708_v4  ;;  %v14793_v4 = vld [vmem:[%s24201_s7 + $0x199] sm:$0xff]  ;;  %277 = vst [vmem:[#allocation3] sm:$0xff] %v24106_v2  ;;  %278 = vst [vmem:[#allocation3 + $0x8] sm:$0xff] %v24106_v2  ;;  %v21630_v43 = vpack.c.bf16 %v14863_v40, %v14862_v38 }
 0x11e   : > { %18299 = vmatprep.mubr.f32.mxu0 %v14787_v48  ;;  %279 = vst [vmem:[#allocation3 + $0x10] sm:$0x3] %v24106_v2  ;;  %281 = vst [vmem:[#allocation3 + $0x198] sm:$0xff] %v24106_v2  ;;  %v14864_v48 = vld [vmem:[%s29016_s1 + $0x4a0] sm:$0xff] }
 0x11f   : > { %282 = vst [vmem:[#allocation3 + $0x1a0] sm:$0xff] %v24106_v2  ;;  %283 = vst [vmem:[#allocation3 + $0x1a8] sm:$0x3] %v24106_v2 }
 0x120   : > { %17980 = vmatmul.mubr.f32.gmra.mrb[24].mxu1 %v24717_v6  ;;  %v14794_v6 = vld [vmem:[%s24201_s7 + $0x1a1] sm:$0xff]  ;;  %285 = vst [vmem:[#allocation3 + $0x18] sm:$0x1] %v24106_v2  ;;  %286 = vst [vmem:[#allocation3 + $0x30] sm:$0x1] %v24106_v2 }
 0x121   : > { %18300 = vmatmul.mubr.f32.gmra.mrb[24].mxu0 %v14788_v50  ;;  %17982 = vmatprep.mubr.f32.mxu1 %v24724_v10  ;;  %v14811_v10 = vld [vmem:[%s24201_s7 + $0x32] sm:$0xff]  ;;  %287 = vst [vmem:[#allocation3 + $0x48] sm:$0x1] %v24106_v2  ;;  %288 = vst [vmem:[#allocation3 + $0x60] sm:$0x1] %v24106_v2  ;;  %v14865_v50 = vld [vmem:[%s29016_s1 + $0x4a8] sm:$0xff] }
 0x122   : > { %18302 = vmatprep.mubr.f32.mxu0 %v14789_v53  ;;  %289 = vst [vmem:[#allocation3 + $0x78] sm:$0x1] %v24106_v2  ;;  %290 = vst [vmem:[#allocation3 + $0x90] sm:$0x1] %v24106_v2  ;;  %v21634_v53 = vpack.c.bf16 %v14865_v50, %v14864_v48 }
 0x123   : > { %291 = vst [vmem:[#allocation3 + $0xa8] sm:$0x1] %v24106_v2  ;;  %292 = vst [vmem:[#allocation3 + $0xc0] sm:$0x1] %v24106_v2 }
 0x124   : > { %17983 = vmatmul.mubr.f32.gmra.mrb[26].mxu1 %v24733_v18  ;;  %v14812_v18 = vld [vmem:[%s24201_s7 + $0x3a] sm:$0xff]  ;;  %293 = vst [vmem:[#allocation3 + $0xd8] sm:$0x1] %v24106_v2  ;;  %294 = vst [vmem:[#allocation3 + $0xf0] sm:$0x1] %v24106_v2 }
 0x125   : > { %18303 = vmatmul.mubr.f32.gmra.mrb[26].mxu0 %v14790_v58  ;;  %17985 = vmatprep.mubr.f32.mxu1 %v24740_v20  ;;  %v14813_v20 = vld [vmem:[%s24201_s7 + $0x4a] sm:$0xff]  ;;  %295 = vst [vmem:[#allocation3 + $0x108] sm:$0x1] %v24106_v2  ;;  %296 = vst [vmem:[#allocation3 + $0x120] sm:$0x1] %v24106_v2 }
 0x126   : > { %18305 = vmatprep.mubr.f32.mxu0 %v14791_v60  ;;  %297 = vst [vmem:[#allocation3 + $0x138] sm:$0x1] %v24106_v2  ;;  %298 = vst [vmem:[#allocation3 + $0x150] sm:$0x1] %v24106_v2  ;;  %v14866_v58 = vld [vmem:[%s29016_s1 + $0x4b0] sm:$0xff]  ;;  %v14867_v60 = vld [vmem:[%s29016_s1 + $0x4b8] sm:$0xff] }
 0x127   : > { %299 = vst [vmem:[#allocation3 + $0x168] sm:$0x1] %v24106_v2  ;;  %300 = vst [vmem:[#allocation3 + $0x180] sm:$0x1] %v24106_v2 }
 0x128   : > { %17986 = vmatmul.mubr.f32.gmra.mrb[28].mxu1 %v29189_v14  ;;  %v14814_v14 = vld [vmem:[%s24201_s7 + $0x52] sm:$0xff]  ;;  %303 = vst [vmem:[#allocation3 + $0x29] sm:$0x1] %v24106_v2  ;;  %304 = vst [vmem:[#allocation3 + $0x41] sm:$0x1] %v24106_v2 }
 0x129   : > { %18306 = vmatmul.mubr.f32.gmra.mrb[28].mxu0 %v14792_v63  ;;  %17988 = vmatprep.mubr.f32.mxu1 %v24904_v3  ;;  %v14816_v3 = vld [vmem:[%s24201_s7 + $0x6a] sm:$0xff]  ;;  %305 = vst [vmem:[#allocation3 + $0x59] sm:$0x1] %v24106_v2  ;;  %306 = vst [vmem:[#allocation3 + $0x71] sm:$0x1] %v24106_v2  ;;  %v21638_v63 = vpack.c.bf16 %v14867_v60, %v14866_v58 }
 0x12a   : > { %18308 = vmatprep.mubr.f32.mxu0 %v14793_v4  ;;  %307 = vst [vmem:[#allocation3 + $0x89] sm:$0x1] %v24106_v2  ;;  %308 = vst [vmem:[#allocation3 + $0xa1] sm:$0x1] %v24106_v2  ;;  %v14868_v4 = vld [vmem:[%s29016_s1 + $0x4c0] sm:$0xff] }
 0x12b   : > { %309 = vst [vmem:[#allocation3 + $0xb9] sm:$0x1] %v24106_v2  ;;  %310 = vst [vmem:[#allocation3 + $0xd1] sm:$0x1] %v24106_v2 }
 0x12c   : > { %17989 = vmatmul.mubr.f32.gmra.mrb[30].mxu1 %v24911_v31  ;;  %v14818_v31 = vld [vmem:[%s24201_s7 + $0x82] sm:$0xff]  ;;  %311 = vst [vmem:[#allocation3 + $0xe9] sm:$0x1] %v24106_v2  ;;  %312 = vst [vmem:[#allocation3 + $0x101] sm:$0x1] %v24106_v2 }
 0x12d   : > { %18309 = vmatmul.mubr.f32.gmra.mrb[30].mxu0 %v14794_v6  ;;  %313 = vst [vmem:[#allocation3 + $0x119] sm:$0x1] %v24106_v2  ;;  %314 = vst [vmem:[#allocation3 + $0x131] sm:$0x1] %v24106_v2  ;;  %18423 = vmatprep.mubr.f32.mxu1 %v3162_v16  ;;  %v14869_v6 = vld [vmem:[%s29016_s1 + $0x4c8] sm:$0xff] }
 0x12e   : > { %18343 = vmatprep.mubr.f32.mxu0 %v14811_v10  ;;  %315 = vst [vmem:[#allocation3 + $0x149] sm:$0x1] %v24106_v2  ;;  %316 = vst [vmem:[#allocation3 + $0x161] sm:$0x1] %v24106_v2  ;;  %v21642_v10 = vpack.c.bf16 %v14869_v6, %v14868_v4 }
 0x12f   : > { %317 = vst [vmem:[#allocation3 + $0x179] sm:$0x1] %v24106_v2  ;;  %318 = vst [vmem:[#allocation3 + $0x191] sm:$0x1] %v24106_v2 }
 0x130   : > { %241 = vst [vmem:[#allocation2] sm:$0x1] %v24106_v2  ;;  %258 = vst [vmem:[#allocation2 + $0x198] sm:$0x1] %v24106_v2 }
 0x131   : > { %18344 = vmatmul.mubr.f32.vlgmr.msra.gmra.mrb[0].mxu0 %v14812_v18  ;;  %259 = vst [vmem:[#allocation2 + $0x11] sm:$0x1] %v24106_v2  ;;  %276 = vst [vmem:[#allocation2 + $0x1a9] sm:$0x1] %v24106_v2  ;;  %v14870_v18 = vld [vmem:[%s29016_s1 + $0x4d0] sm:$0xff] }
 0x132   : > { %18346 = vmatprep.mubr.f32.mxu0 %v14813_v20  ;;  %284 = vst [vmem:[#allocation3] sm:$0x1] %v24106_v2  ;;  %301 = vst [vmem:[#allocation3 + $0x198] sm:$0x1] %v24106_v2  ;;  %v14871_v20 = vld [vmem:[%s29016_s1 + $0x4d8] sm:$0xff] }
 0x133   : > { %302 = vst [vmem:[#allocation3 + $0x11] sm:$0x1] %v24106_v2  ;;  %319 = vst [vmem:[#allocation3 + $0x1a9] sm:$0x1] %v24106_v2 }
 0x135   : > { %18347 = vmatmul.mubr.f32.gmra.mrb[2].mxu0 %v14814_v14  ;;  %v21646_v14 = vpack.c.bf16 %v14871_v20, %v14870_v18 }
 0x136   : > { %18349 = vmatprep.mubr.f32.mxu0 %v14815_v7  ;;  %v14872_v7 = vld [vmem:[%s29016_s1 + $0x4e0] sm:$0xff] }
 0x139   : > { %18350 = vmatmul.mubr.f32.gmra.mrb[4].mxu0 %v14816_v3  ;;  %v14873_v3 = vld [vmem:[%s29016_s1 + $0x4e8] sm:$0xff] }
 0x13a   : > { %18352 = vmatprep.mubr.f32.mxu0 %v14817_v9  ;;  %v21650_v9 = vpack.c.bf16 %v14873_v3, %v14872_v7 }
 0x13d   : > { %18353 = vmatmul.mubr.f32.gmra.mrb[6].mxu0 %v14818_v31  ;;  %v14874_v31 = vld [vmem:[%s29016_s1 + $0x4f0] sm:$0xff] }
 0x13e   : > { %18355 = vmatprep.mubr.f32.mxu0 %v14819_v37  ;;  %v14875_v37 = vld [vmem:[%s29016_s1 + $0x4f8] sm:$0xff] }
 0x141   : > { %18356 = vmatmul.mubr.f32.gmra.mrb[8].mxu0 %v14820_v11 }
 0x142   : > { %18358 = vmatprep.mubr.f32.mxu0 %v14821_v19  ;;  %v21654_v19 = vpack.c.bf16 %v14875_v37, %v14874_v31 }
 0x145   : > { %18359 = vmatmul.mubr.f32.gmra.mrb[10].mxu0 %v14822_v45 }
 0x146   : > { %18361 = vmatprep.mubr.f32.mxu0 %v14823_v33 }
 0x149   : > { %18362 = vmatmul.mubr.f32.gmra.mrb[12].mxu0 %v14824_v15 }
 0x14a   : > { %18364 = vmatprep.mubr.f32.mxu0 %v14825_v47 }
 0x14d   : > { %18365 = vmatmul.mubr.f32.gmra.mrb[14].mxu0 %v14826_v26 }
 0x14e   : > { %18367 = vmatprep.mubr.f32.mxu0 %v14827_v34 }
 0x151   : > { %18368 = vmatmul.mubr.f32.gmra.mrb[16].mxu0 %v14828_v0 }
 0x152   : > { %18370 = vmatprep.mubr.f32.mxu0 %v14829_v32 }
 0x155   : > { %18371 = vmatmul.mubr.f32.gmra.mrb[18].mxu0 %v24673_v51  ;;  %v14876_v51 = vld [vmem:[%s29016_s1 + $0x500] sm:$0xff] }
 0x156   : > { %18373 = vmatprep.mubr.f32.mxu0 %v24679_v54  ;;  %v14877_v54 = vld [vmem:[%s29016_s1 + $0x508] sm:$0xff] }
 0x159   : > { %18374 = vmatmul.mubr.f32.gmra.mrb[20].mxu0 %v24689_v59  ;;  %v14841_v59 = vld [vmem:[%s24201_s7 + $0x19a] sm:$0xff] }
 0x15a   : > { %18376 = vmatprep.mubr.f32.mxu0 %v24695_v61  ;;  %v21594_v61 = vpack.c.bf16 %v14877_v54, %v14876_v51 }
 0x15c   : > { %21595 = vmatprep.subr.bf16.mxu1 %v21594_v61 }
 0x15d   : > { %18377 = vmatmul.mubr.f32.gmra.mrb[22].mxu0 %v29188_v12  ;;  %v29197_v12 = vld [vmem:[#allocation13_spill] sm:$0xff]  ;;  %21597 = vmatpush3.bf16.msra.mxu1 %v21594_v61 }
 0x15e   : > { %18379 = vmatprep.mubr.f32.mxu0 %v29190_v29  ;;  %v14842_v29 = vld [vmem:[%s24201_s7 + $0x1a2] sm:$0xff] }
 0x161   : > { %18380 = vmatmul.mubr.f32.gmra.mrb[24].mxu0 %v29191_v41  ;;  %v14878_v41 = vld [vmem:[%s29016_s1 + $0x510] sm:$0xff] }
 0x162   : > { %18382 = vmatprep.mubr.f32.mxu0 %v29192_v44  ;;  %v14879_v44 = vld [vmem:[%s29016_s1 + $0x518] sm:$0xff] }
 0x165   : > { %18383 = vmatmul.mubr.f32.gmra.mrb[26].mxu0 %v29193_v24  ;;  %v21598_v24 = vpack.c.bf16 %v14879_v44, %v14878_v41 }
 0x166   : > { %18385 = vmatprep.mubr.f32.mxu0 %v29196_v55 }
 0x167   : > { %21599 = vmatprep.subr.bf16.mxu1 %v21598_v24 }
 0x168   : > { %21601 = vmatpush3.bf16.msra.mxu1 %v21598_v24  ;;  %v14892_v24 = vld [vmem:[%s29016_s1 + $0x580] sm:$0xff] }
 0x169   : > { %18386 = vmatmul.mubr.f32.gmra.mrb[28].mxu0 %v29197_v12  ;;  %21603 = vmatprep.subr.bf16.mxu1 %v21602_v21 }
 0x16a   : > { %18388 = vmatprep.mubr.f32.mxu0 %v14841_v59 }
 0x16c   : > { %21605 = vmatpush3.bf16.msra.mxu1 %v21602_v21  ;;  %v25271_v21 = vpack.c.bf16 %v14893_v36, %v14892_v24 }
 0x16d   : > { %18389 = vmatmul.mubr.f32.gmra.mrb[30].mxu0 %v14842_v29  ;;  %21607 = vmatprep.subr.bf16.mxu1 %v21606_v46 }
 0x170   : > { %21609 = vmatpush3.bf16.msra.mxu1 %v21606_v46 }
 0x171   : > { %21611 = vmatprep.subr.bf16.mxu1 %v21610_v52 }
 0x174   : > { %21613 = vmatpush3.bf16.msra.mxu1 %v21610_v52 }
 0x175   : > { %21615 = vmatprep.subr.bf16.mxu1 %v21614_v49 }
 0x178   : > { %21617 = vmatpush3.bf16.msra.mxu1 %v21614_v49 }
 0x179   : > { %21619 = vmatprep.subr.bf16.mxu1 %v25099_v28 }
 0x17c   : > { %21621 = vmatpush3.bf16.msra.mxu1 %v25099_v28 }
 0x17d   : > { %21623 = vmatprep.subr.bf16.mxu1 %v21622_v22 }
 0x180   : > { %21625 = vmatpush3.bf16.msra.mxu1 %v21622_v22  ;;  %v25303_v22 = vld [vmem:[%s29017_s2] ss:$0 sm:$0xff] }
 0x181   : > { %21627 = vmatprep.subr.bf16.mxu1 %v21626_v35 }
 0x183   : > { %18424 = vmatmul.mubr.f32.vlgmr.msra.gmra.mrb[32].mxu1 %v3163_v13 }
 0x184   : > { %21629 = vmatpush3.bf16.msra.mxu1 %v21626_v35 }
 0x185   : > { %21631 = vmatprep.subr.bf16.mxu1 %v21630_v43 }
 0x188   : > { %21633 = vmatpush3.bf16.msra.mxu1 %v21630_v43 }
 0x189   : > { %21635 = vmatprep.subr.bf16.mxu1 %v21634_v53 }
 0x18c   : > { %21637 = vmatpush3.bf16.msra.mxu1 %v21634_v53 }
 0x18d   : > { %21639 = vmatprep.subr.bf16.mxu1 %v21638_v63 }
 0x190   : > { %21641 = vmatpush3.bf16.msra.mxu1 %v21638_v63 }
 0x191   : > { %21643 = vmatprep.subr.bf16.mxu1 %v21642_v10 }
 0x194   : > { %21645 = vmatpush3.bf16.msra.mxu1 %v21642_v10 }
 0x195   : > { %21647 = vmatprep.subr.bf16.mxu1 %v21646_v14 }
 0x198   : > { %21649 = vmatpush3.bf16.msra.mxu1 %v21646_v14 }
 0x199   : > { %21651 = vmatprep.subr.bf16.mxu1 %v21650_v9 }
 0x19c   : > { %21653 = vmatpush3.bf16.msra.mxu1 %v21650_v9 }
 0x19d   : > { %21655 = vmatprep.subr.bf16.mxu1 %v21654_v19 }
 0x1a0   : > { %21657 = vmatpush3.bf16.msra.mxu1 %v21654_v19 }
 0x1a1   : > { %21659 = vmatprep.subr.bf16.mxu1 %v25271_v21 }
 0x1c3   : > { %v17945_v11 = vpop.f32.mrb[0].mxu1 }
 0x1c4   : > { %v1289_v45 = vpop.f32.mrb[1].mxu1 }
 0x1c7   : > { %v17948_v33 = vpop.f32.mrb[2].mxu1 }
 0x1c8   : > { %v1299_v15 = vpop.f32.mrb[3].mxu1 }
 0x1cb   : > { %v17951_v47 = vpop.f32.mrb[4].mxu1 }
 0x1cc   : > { %v1309_v26 = vpop.f32.mrb[5].mxu1 }
 0x1cf   : > { %v17954_v34 = vpop.f32.mrb[6].mxu1 }
 0x1d0   : > { %v25241_v0 = vpop.f32.mrb[7].mxu1 }
 0x1d3   : > { %v25243_v32 = vpop.f32.mrb[8].mxu1 }
 0x1d4   : > { %v25245_v55 = vpop.f32.mrb[9].mxu1 }
 0x1d7   : > { %v25247_v51 = vpop.f32.mrb[10].mxu1 }
 0x1d8   : > { %v25249_v54 = vpop.f32.mrb[11].mxu1 }
 0x1db   : > { %v25251_v59 = vpop.f32.mrb[12].mxu1 }
 0x1dc   : > { %v25253_v61 = vpop.f32.mrb[13].mxu1 }
 0x1df   : > { %v25255_v12 = vpop.f32.mrb[14].mxu1 }
 0x1e0   : > { %v25257_v29 = vpop.f32.mrb[15].mxu1 }
 0x1e3   : > { %v25259_v41 = vpop.f32.mrb[16].mxu1 }
 0x1e4   : > { %v25261_v44 = vpop.f32.mrb[17].mxu1 }
 0x1e7   : > { %v25269_v17 = vpop.f32.mrb[18].mxu1 }
 0x1e8   : > { %v25273_v42 = vpop.f32.mrb[19].mxu1 }
 0x1eb   : > { %v25276_v57 = vpop.f32.mrb[20].mxu1 }
 0x1ec   : > { %v25278_v46 = vpop.f32.mrb[21].mxu1 }
 0x1ef   : > { %v25280_v5 = vpop.f32.mrb[22].mxu1 }
 0x1f0   : > { %v25282_v1 = vpop.f32.mrb[23].mxu1 }
 0x1f3   : > { %v25284_v52 = vpop.f32.mrb[24].mxu1 }
 0x1f4   : > { %v25286_v39 = vpop.f32.mrb[25].mxu1 }
 0x1f7   : > { %v25288_v56 = vpop.f32.mrb[26].mxu1 }
 0x1f8   : > { %v25290_v49 = vpop.f32.mrb[27].mxu1 }
 0x1fb   : > { %v25292_v25 = vpop.f32.mrb[28].mxu1 }
 0x1fc   : > { %v25294_v62 = vpop.f32.mrb[29].mxu1 }
 0x1ff   : > { %v25296_v28 = vpop.f32.mrb[30].mxu1 }
 0x200   : > { %v25298_v27 = vpop.f32.mrb[31].mxu1 }
 0x204   : > { %v18345_v8 = vpop.f32.mrb[0].mxu0 }
 0x205   : > { %v22802_v16 = vadd.f32 %v18345_v8, %v17945_v11  ;;  %v2820_v13 = vpop.f32.mrb[1].mxu0 }
 0x206   : > { %v22803_v23 = vadd.f32 %v2820_v13, %v1289_v45 }
 0x207   : > { %v3017_v30 = vadd.f32 %v22802_v16, %v25303_v22 }
 0x208   : > { %v3016_v35 = vadd.f32 %v22803_v23, %v25303_v22  ;;  %v18348_v38 = vpop.f32.mrb[2].mxu0 }
 0x209   : > { %v3049_v40 = vmax.f32 %v3017_v30, 0.0  ;;  %v22804_v43 = vadd.f32 %v18348_v38, %v17948_v33  ;;  %v2830_v48 = vpop.f32.mrb[3].mxu0 }
 0x20a   : > { %v3048_v50 = vmax.f32 %v3016_v35, 0.0  ;;  %v22805_v53 = vadd.f32 %v2830_v48, %v1299_v15 }
 0x20b   : > { %3082 = vst [vmem:[#allocation2 + $0x21] sm:$0xff] %v3049_v40  ;;  %v3019_v58 = vadd.f32 %v22804_v43, %v25303_v22 }
 0x20c   : > { %3081 = vst [vmem:[#allocation2 + $0x19] sm:$0xff] %v3048_v50  ;;  %v3018_v60 = vadd.f32 %v22805_v53, %v25303_v22  ;;  %v18351_v63 = vpop.f32.mrb[4].mxu0  ;;  %18426 = vmatprep.mubr.f32.mxu1 %v3048_v50 }
 0x20d   : > { %v3051_v4 = vmax.f32 %v3019_v58, 0.0  ;;  %v22806_v6 = vadd.f32 %v18351_v63, %v17951_v47  ;;  %v2840_v10 = vpop.f32.mrb[5].mxu0  ;;  %18427 = vmatmul.mubr.f32.gmra.mrb[34].mxu1 %v3049_v40 }
 0x20e   : > { %v3050_v18 = vmax.f32 %v3018_v60, 0.0  ;;  %v22807_v20 = vadd.f32 %v2840_v10, %v1309_v26 }
 0x20f   : > { %3084 = vst [vmem:[#allocation2 + $0x39] sm:$0xff] %v3051_v4  ;;  %v3021_v14 = vadd.f32 %v22806_v6, %v25303_v22 }
 0x210   : > { %3083 = vst [vmem:[#allocation2 + $0x31] sm:$0xff] %v3050_v18  ;;  %v3020_v7 = vadd.f32 %v22807_v20, %v25303_v22  ;;  %v18354_v3 = vpop.f32.mrb[6].mxu0  ;;  %18429 = vmatprep.mubr.f32.mxu1 %v3050_v18 }
 0x211   : > { %v3053_v9 = vmax.f32 %v3021_v14, 0.0  ;;  %v22808_v31 = vadd.f32 %v18354_v3, %v17954_v34  ;;  %v2850_v37 = vpop.f32.mrb[7].mxu0  ;;  %18430 = vmatmul.mubr.f32.gmra.mrb[36].mxu1 %v3051_v4 }
 0x212   : > { %v3052_v11 = vmax.f32 %v3020_v7, 0.0  ;;  %v22809_v19 = vadd.f32 %v2850_v37, %v25241_v0 }
 0x213   : > { %3086 = vst [vmem:[#allocation2 + $0x51] sm:$0xff] %v3053_v9  ;;  %v3023_v45 = vadd.f32 %v22808_v31, %v25303_v22 }
 0x214   : > { %3085 = vst [vmem:[#allocation2 + $0x49] sm:$0xff] %v3052_v11  ;;  %v3022_v33 = vadd.f32 %v22809_v19, %v25303_v22  ;;  %v18357_v15 = vpop.f32.mrb[8].mxu0  ;;  %18432 = vmatprep.mubr.f32.mxu1 %v3052_v11 }
 0x215   : > { %v3055_v47 = vmax.f32 %v3023_v45, 0.0  ;;  %v22810_v26 = vadd.f32 %v18357_v15, %v25243_v32  ;;  %v2860_v24 = vpop.f32.mrb[9].mxu0  ;;  %18433 = vmatmul.mubr.f32.gmra.mrb[38].mxu1 %v3053_v9 }
 0x216   : > { %v3054_v36 = vmax.f32 %v3022_v33, 0.0  ;;  %v22811_v34 = vadd.f32 %v2860_v24, %v25245_v55 }
 0x217   : > { %3088 = vst [vmem:[#allocation2 + $0x69] sm:$0xff] %v3055_v47  ;;  %v3025_v8 = vadd.f32 %v22810_v26, %v25303_v22 }
 0x218   : > { %3087 = vst [vmem:[#allocation2 + $0x61] sm:$0xff] %v3054_v36  ;;  %v3024_v0 = vadd.f32 %v22811_v34, %v25303_v22  ;;  %v18360_v16 = vpop.f32.mrb[10].mxu0  ;;  %18435 = vmatprep.mubr.f32.mxu1 %v3054_v36 }
 0x219   : > { %v3057_v13 = vmax.f32 %v3025_v8, 0.0  ;;  %v22812_v23 = vadd.f32 %v18360_v16, %v25247_v51  ;;  %v2870_v30 = vpop.f32.mrb[11].mxu0  ;;  %18436 = vmatmul.mubr.f32.gmra.mrb[40].mxu1 %v3055_v47 }
 0x21a   : > { %v3056_v35 = vmax.f32 %v3024_v0, 0.0  ;;  %v22813_v32 = vadd.f32 %v2870_v30, %v25249_v54 }
 0x21b   : > { %3090 = vst [vmem:[#allocation2 + $0x81] sm:$0xff] %v3057_v13  ;;  %v3027_v38 = vadd.f32 %v22812_v23, %v25303_v22 }
 0x21c   : > { %3089 = vst [vmem:[#allocation2 + $0x79] sm:$0xff] %v3056_v35  ;;  %v3026_v55 = vadd.f32 %v22813_v32, %v25303_v22  ;;  %v18363_v40 = vpop.f32.mrb[12].mxu0  ;;  %18438 = vmatprep.mubr.f32.mxu1 %v3056_v35 }
 0x21d   : > { %v3059_v43 = vmax.f32 %v3027_v38, 0.0  ;;  %v22814_v48 = vadd.f32 %v18363_v40, %v25251_v59  ;;  %v2880_v50 = vpop.f32.mrb[13].mxu0  ;;  %18439 = vmatmul.mubr.f32.gmra.mrb[42].mxu1 %v3057_v13 }
 0x21e   : > { %v3058_v53 = vmax.f32 %v3026_v55, 0.0  ;;  %v22815_v51 = vadd.f32 %v2880_v50, %v25253_v61 }
 0x21f   : > { %3092 = vst [vmem:[#allocation2 + $0x99] sm:$0xff] %v3059_v43  ;;  %v3029_v58 = vadd.f32 %v22814_v48, %v25303_v22 }
 0x220   : > { %3091 = vst [vmem:[#allocation2 + $0x91] sm:$0xff] %v3058_v53  ;;  %v3028_v54 = vadd.f32 %v22815_v51, %v25303_v22  ;;  %v18366_v60 = vpop.f32.mrb[14].mxu0  ;;  %18441 = vmatprep.mubr.f32.mxu1 %v3058_v53 }
 0x221   : > { %v3061_v63 = vmax.f32 %v3029_v58, 0.0  ;;  %v22816_v4 = vadd.f32 %v18366_v60, %v25255_v12  ;;  %v2890_v6 = vpop.f32.mrb[15].mxu0  ;;  %18442 = vmatmul.mubr.f32.gmra.mrb[44].mxu1 %v3059_v43 }
 0x222   : > { %v3060_v10 = vmax.f32 %v3028_v54, 0.0  ;;  %v22817_v59 = vadd.f32 %v2890_v6, %v25257_v29 }
 0x223   : > { %3094 = vst [vmem:[#allocation2 + $0xb1] sm:$0xff] %v3061_v63  ;;  %v3031_v18 = vadd.f32 %v22816_v4, %v25303_v22 }
 0x224   : > { %3093 = vst [vmem:[#allocation2 + $0xa9] sm:$0xff] %v3060_v10  ;;  %v3030_v61 = vadd.f32 %v22817_v59, %v25303_v22  ;;  %v18369_v20 = vpop.f32.mrb[16].mxu0  ;;  %18444 = vmatprep.mubr.f32.mxu1 %v3060_v10 }
 0x225   : > { %v3063_v14 = vmax.f32 %v3031_v18, 0.0  ;;  %v22818_v7 = vadd.f32 %v18369_v20, %v25259_v41  ;;  %v2900_v3 = vpop.f32.mrb[17].mxu0  ;;  %18445 = vmatmul.mubr.f32.gmra.mrb[46].mxu1 %v3061_v63 }
 0x226   : > { %v25331_v9 = vmax.f32 %v3030_v61, 0.0  ;;  %v22819_v12 = vadd.f32 %v2900_v3, %v25261_v44 }
 0x227   : > { %3096 = vst [vmem:[#allocation2 + $0xc9] sm:$0xff] %v3063_v14  ;;  %v3033_v29 = vadd.f32 %v22818_v7, %v25303_v22 }
 0x228   : > { %3095 = vst [vmem:[#allocation2 + $0xc1] sm:$0xff] %v25331_v9  ;;  %v3032_v31 = vadd.f32 %v22819_v12, %v25303_v22  ;;  %v18372_v37 = vpop.f32.mrb[18].mxu0  ;;  %18447 = vmatprep.mubr.f32.mxu1 %v25331_v9  ;;  %v3113_v12 = vld [vmem:[#allocation2] sm:$0xff] }
 0x229   : > { %v25338_v11 = vmax.f32 %v3033_v29, 0.0  ;;  %v22820_v41 = vadd.f32 %v18372_v37, %v25269_v17  ;;  %v2910_v19 = vpop.f32.mrb[19].mxu0  ;;  %18448 = vmatmul.mubr.f32.gmra.mrb[48].mxu1 %v3063_v14 }
 0x22a   : > { %v25341_v45 = vmax.f32 %v3032_v31, 0.0  ;;  %v22821_v44 = vadd.f32 %v2910_v19, %v25273_v42  ;;  %v14897_v19 = vld [vmem:[%s29016_s1 + $0x5a8] sm:$0xff] }
 0x22b   : > { %3098 = vst [vmem:[#allocation2 + $0xe1] sm:$0xff] %v25338_v11  ;;  %v3035_v33 = vadd.f32 %v22820_v41, %v25303_v22  ;;  %v14896_v41 = vld [vmem:[%s29016_s1 + $0x5a0] sm:$0xff] }
 0x22c   : > { %3097 = vst [vmem:[#allocation2 + $0xd9] sm:$0xff] %v25341_v45  ;;  %v3034_v15 = vadd.f32 %v22821_v44, %v25303_v22  ;;  %v18375_v47 = vpop.f32.mrb[20].mxu0  ;;  %18450 = vmatprep.mubr.f32.mxu1 %v25341_v45  ;;  %v25445_v44 = vld [vmem:[#allocation2 + $0x18] sm:$0xff] }
 0x22d   : > { %v25349_v26 = vmax.f32 %v3035_v33, 0.0  ;;  %v22822_v17 = vadd.f32 %v18375_v47, %v25276_v57  ;;  %v2920_v24 = vpop.f32.mrb[21].mxu0  ;;  %18451 = vmatmul.mubr.f32.gmra.mrb[50].mxu1 %v25338_v11  ;;  %v21666_v33 = vpack.c.bf16 %v14897_v19, %v14896_v41  ;;  %v14898_v47 = vld [vmem:[%s29016_s1 + $0x5b0] sm:$0xff] }
 0x22e   : > { %v25353_v36 = vmax.f32 %v3034_v15, 0.0  ;;  %v22823_v42 = vadd.f32 %v2920_v24, %v25278_v46  ;;  %v25449_v15 = vld [vmem:[#allocation2 + $0x20] sm:$0xff]  ;;  %v25461_v24 = vld [vmem:[#allocation2 + $0x38] sm:$0xff] }
 0x22f   : > { %3100 = vst [vmem:[#allocation2 + $0xf9] sm:$0xff] %v25349_v26  ;;  %v3037_v34 = vadd.f32 %v22822_v17, %v25303_v22  ;;  %v14899_v17 = vld [vmem:[%s29016_s1 + $0x5b8] sm:$0xff] }
 0x230   : > { %3099 = vst [vmem:[#allocation2 + $0xf1] sm:$0xff] %v25353_v36  ;;  %v3036_v8 = vadd.f32 %v22823_v42, %v25303_v22  ;;  %v18378_v0 = vpop.f32.mrb[22].mxu0  ;;  %18453 = vmatprep.mubr.f32.mxu1 %v25353_v36  ;;  %v14900_v42 = vld [vmem:[%s29016_s1 + $0x5c0] sm:$0xff] }
 0x231   : > { %v25361_v16 = vmax.f32 %v3037_v34, 0.0  ;;  %v22824_v57 = vadd.f32 %v18378_v0, %v25280_v5  ;;  %v2930_v13 = vpop.f32.mrb[23].mxu0  ;;  %18454 = vmatmul.mubr.f32.gmra.mrb[52].mxu1 %v25349_v26  ;;  %v14901_v34 = vld [vmem:[%s29016_s1 + $0x5c8] sm:$0xff] }
 0x232   : > { %v25365_v23 = vmax.f32 %v3036_v8, 0.0  ;;  %v22825_v46 = vadd.f32 %v2930_v13, %v25282_v1  ;;  %v25470_v8 = vld [vmem:[#allocation2 + $0x48] sm:$0xff]  ;;  %v21674_v0 = vpack.c.bf16 %v14901_v34, %v14900_v42  ;;  %v14902_v13 = vld [vmem:[%s29016_s1 + $0x5d0] sm:$0xff] }
 0x233   : > { %3102 = vst [vmem:[#allocation2 + $0x111] sm:$0xff] %v25361_v16  ;;  %v3039_v30 = vadd.f32 %v22824_v57, %v25303_v22  ;;  %v25473_v57 = vld [vmem:[#allocation2 + $0x50] sm:$0xff] }
 0x234   : > { %3101 = vst [vmem:[#allocation2 + $0x109] sm:$0xff] %v25365_v23  ;;  %v3038_v35 = vadd.f32 %v22825_v46, %v25303_v22  ;;  %v18381_v32 = vpop.f32.mrb[24].mxu0  ;;  %18456 = vmatprep.mubr.f32.mxu1 %v25365_v23  ;;  %v14903_v46 = vld [vmem:[%s29016_s1 + $0x5d8] sm:$0xff]  ;;  %v14910_v34 = vld [vmem:[%s29016_s1 + $0x610] sm:$0xff] }
 0x235   : > { %v25373_v38 = vmax.f32 %v3039_v30, 0.0  ;;  %v22826_v5 = vadd.f32 %v18381_v32, %v25284_v52  ;;  %v2940_v55 = vpop.f32.mrb[25].mxu0  ;;  %18457 = vmatmul.mubr.f32.gmra.mrb[54].mxu1 %v25361_v16  ;;  %v25482_v30 = vld [vmem:[#allocation2 + $0x60] sm:$0xff]  ;;  %v25485_v32 = vld [vmem:[#allocation2 + $0x68] sm:$0xff] }
 0x236   : > { %v25377_v40 = vmax.f32 %v3038_v35, 0.0  ;;  %v22827_v1 = vadd.f32 %v2940_v55, %v25286_v39  ;;  %v21678_v35 = vpack.c.bf16 %v14903_v46, %v14902_v13  ;;  %v14905_v55 = vld [vmem:[%s29016_s1 + $0x5e8] sm:$0xff] }
 0x237   : > { %3104 = vst [vmem:[#allocation2 + $0x129] sm:$0xff] %v25373_v38  ;;  %v3041_v43 = vadd.f32 %v22826_v5, %v25303_v22  ;;  %v14904_v5 = vld [vmem:[%s29016_s1 + $0x5e0] sm:$0xff]  ;;  %v3662_v13 = vld [vmem:[#allocation2 + $0xa] sm:$0xff] }
 0x238   : > { %3103 = vst [vmem:[#allocation2 + $0x121] sm:$0xff] %v25377_v40  ;;  %v3040_v48 = vadd.f32 %v22827_v1, %v25303_v22  ;;  %v18384_v50 = vpop.f32.mrb[26].mxu0  ;;  %18459 = vmatprep.mubr.f32.mxu1 %v25377_v40  ;;  %v25494_v1 = vld [vmem:[#allocation2 + $0x78] sm:$0xff] }
 0x239   : > { %v25385_v53 = vmax.f32 %v3041_v43, 0.0  ;;  %v22828_v52 = vadd.f32 %v18384_v50, %v25288_v56  ;;  %v2950_v51 = vpop.f32.mrb[27].mxu0  ;;  %18460 = vmatmul.mubr.f32.gmra.mrb[56].mxu1 %v25373_v38  ;;  %v21682_v43 = vpack.c.bf16 %v14905_v55, %v14904_v5  ;;  %v14906_v50 = vld [vmem:[%s29016_s1 + $0x5f0] sm:$0xff]  ;;  %v14913_v5 = vld [vmem:[%s29016_s1 + $0x628] sm:$0xff]  ;;  %v25584_v55 = vld [vmem:[#allocation2 + $0x1a] sm:$0xff] }
 0x23a   : > { %v25389_v58 = vmax.f32 %v3040_v48, 0.0  ;;  %v22829_v39 = vadd.f32 %v2950_v51, %v25290_v49  ;;  %v25497_v48 = vld [vmem:[#allocation2 + $0x80] sm:$0xff]  ;;  %v25506_v51 = vld [vmem:[#allocation2 + $0x90] sm:$0xff] }
 0x23b   : > { %3106 = vst [vmem:[#allocation2 + $0x141] sm:$0xff] %v25385_v53  ;;  %v3043_v54 = vadd.f32 %v22828_v52, %v25303_v22  ;;  %v14907_v52 = vld [vmem:[%s29016_s1 + $0x5f8] sm:$0xff] }
 0x23c   : > { %3105 = vst [vmem:[#allocation2 + $0x139] sm:$0xff] %v25389_v58  ;;  %v3042_v60 = vadd.f32 %v22829_v39, %v25303_v22  ;;  %v18387_v63 = vpop.f32.mrb[28].mxu0  ;;  %18462 = vmatprep.mubr.f32.mxu1 %v25389_v58  ;;  %v21686_v39 = vpack.c.bf16 %v14907_v52, %v14906_v50  ;;  %v25587_v50 = vld [vmem:[#allocation2 + $0x22] sm:$0xff]  ;;  %v14914_v52 = vld [vmem:[%s29016_s1 + $0x630] sm:$0xff] }
 0x23d   : > { %v25397_v4 = vmax.f32 %v3043_v54, 0.0  ;;  %v22830_v56 = vadd.f32 %v18387_v63, %v25292_v25  ;;  %v2960_v6 = vpop.f32.mrb[29].mxu0  ;;  %18463 = vmatmul.mubr.f32.gmra.mrb[58].mxu1 %v25385_v53  ;;  %v25509_v54 = vld [vmem:[#allocation2 + $0x98] sm:$0xff]  ;;  %v14909_v63 = vld [vmem:[%s29016_s1 + $0x608] sm:$0xff] }
 0x23e   : > { %v25401_v10 = vmax.f32 %v3042_v60, 0.0  ;;  %v22831_v49 = vadd.f32 %v2960_v6, %v25294_v62  ;;  %v14908_v60 = vld [vmem:[%s29016_s1 + $0x600] sm:$0xff] }
 0x23f   : > { %3108 = vst [vmem:[#allocation2 + $0x159] sm:$0xff] %v25397_v4  ;;  %v3045_v59 = vadd.f32 %v22830_v56, %v25303_v22  ;;  %v25518_v56 = vld [vmem:[#allocation2 + $0xa8] sm:$0xff]  ;;  %v21690_v6 = vpack.c.bf16 %v14909_v63, %v14908_v60  ;;  %v25596_v60 = vld [vmem:[#allocation2 + $0x32] sm:$0xff] }
 0x240   : > { %3107 = vst [vmem:[#allocation2 + $0x151] sm:$0xff] %v25401_v10  ;;  %v3044_v18 = vadd.f32 %v22831_v49, %v25303_v22  ;;  %v18390_v61 = vpop.f32.mrb[30].mxu0  ;;  %18465 = vmatprep.mubr.f32.mxu1 %v25401_v10  ;;  %v25521_v49 = vld [vmem:[#allocation2 + $0xb0] sm:$0xff] }
 0x241   : > { %v25409_v20 = vmax.f32 %v3045_v59, 0.0  ;;  %v22832_v25 = vadd.f32 %v18390_v61, %v25296_v28  ;;  %v2970_v14 = vpop.f32.mrb[31].mxu0  ;;  %18466 = vmatmul.mubr.f32.gmra.mrb[60].mxu1 %v25397_v4  ;;  %v14894_v28 = vld [vmem:[%s29016_s1 + $0x590] sm:$0xff]  ;;  %v25524_v59 = vld [vmem:[#allocation2 + $0xc0] sm:$0xff]  ;;  %v25530_v61 = vld [vmem:[#allocation2 + $0xd8] sm:$0xff] }
 0x242   : > { %v25413_v7 = vmax.f32 %v3044_v18, 0.0  ;;  %v22833_v62 = vadd.f32 %v2970_v14, %v25298_v27  ;;  %v14895_v27 = vld [vmem:[%s29016_s1 + $0x598] sm:$0xff]  ;;  %v25527_v18 = vld [vmem:[#allocation2 + $0xc8] sm:$0xff]  ;;  %v25536_v14 = vld [vmem:[#allocation2 + $0xf0] sm:$0xff] }
 0x243   : > { %3110 = vst [vmem:[#allocation2 + $0x171] sm:$0xff] %v25409_v20  ;;  %v25418_v3 = vadd.f32 %v22832_v25, %v25303_v22  ;;  %v25533_v25 = vld [vmem:[#allocation2 + $0xe0] sm:$0xff]  ;;  %v25554_v41 = vld [vmem:[#allocation2 + $0x138] sm:$0xff] }
 0x244   : > { %3109 = vst [vmem:[#allocation2 + $0x169] sm:$0xff] %v25413_v7  ;;  %v25422_v29 = vadd.f32 %v22833_v62, %v25303_v22  ;;  %18468 = vmatprep.mubr.f32.mxu1 %v25413_v7  ;;  %v21662_v22 = vpack.c.bf16 %v14895_v27, %v14894_v28  ;;  %v25539_v62 = vld [vmem:[#allocation2 + $0xf8] sm:$0xff]  ;;  %v25545_v28 = vld [vmem:[#allocation2 + $0x110] sm:$0xff]  ;;  %v25548_v27 = vld [vmem:[#allocation2 + $0x120] sm:$0xff] }
 0x245   : > { %v29037_v31 = vmax.f32 %v25418_v3, 0.0  ;;  %18469 = vmatmul.mubr.f32.gmra.mrb[62].mxu1 %v25409_v20  ;;  %v25557_v19 = vld [vmem:[#allocation2 + $0x140] sm:$0xff] }
 0x246   : > { %v29038_v37 = vmax.f32 %v25422_v29, 0.0  ;;  %18503 = vmatprep.mubr.f32.mxu1 %v3113_v12  ;;  %v25542_v12 = vld [vmem:[#allocation2 + $0x108] sm:$0xff] }
 0x247   : > { %3112 = vst [vmem:[#allocation2 + $0x189] sm:$0xff] %v29037_v31  ;;  %v25632_v31 = vld [vmem:[#allocation2 + $0x7a] sm:$0xff] }
 0x248   : > { %3111 = vst [vmem:[#allocation2 + $0x181] sm:$0xff] %v29038_v37  ;;  %29201 = vst [vmem:[#allocation8_spill] sm:$0xff] %v25632_v31  ;;  %v14923_v37 = vld [vmem:[%s29016_s1 + $0x678] sm:$0xff] }
 0x249   : > { %18504 = vmatmul.mubr.f32.vlgmr.msra.gmra.mrb[32].mxu1 %v24106_v2  ;;  %v25458_v2 = vld [vmem:[#allocation2 + $0x30] sm:$0xff] }
 0x24a   : > { %18506 = vmatprep.mubr.f32.mxu1 %v25445_v44  ;;  %21661 = vmatpush3.bf16.msra.mxu1 %v25271_v21  ;;  %v21670_v21 = vpack.c.bf16 %v14899_v17, %v14898_v47  ;;  %v25563_v47 = vld [vmem:[#allocation2 + $0x158] sm:$0xff] }
 0x24b   : > { %21663 = vmatprep.subr.bf16.mxu1 %v21662_v22  ;;  %v25566_v17 = vld [vmem:[#allocation2 + $0x168] sm:$0xff]  ;;  %v25569_v42 = vld [vmem:[#allocation2 + $0x170] sm:$0xff] }
 0x24c   : > { %29198 = vst [vmem:[#allocation6_spill] sm:$0xff] %v25566_v17  ;;  %29199 = vst [vmem:[#allocation12_spill] sm:$0xff] %v25569_v42 }
 0x24d   : > { %18507 = vmatmul.mubr.f32.gmra.mrb[34].mxu1 %v25449_v15 }
 0x24e   : > { %18509 = vmatprep.mubr.f32.mxu1 %v25458_v2  ;;  %21665 = vmatpush3.bf16.msra.mxu1 %v21662_v22  ;;  %v25551_v22 = vld [vmem:[#allocation2 + $0x128] sm:$0xff] }
 0x24f   : > { %21667 = vmatprep.subr.bf16.mxu1 %v21666_v33 }
 0x251   : > { %18510 = vmatmul.mubr.f32.gmra.mrb[36].mxu1 %v25461_v24 }
 0x252   : > { %18512 = vmatprep.mubr.f32.mxu1 %v25470_v8  ;;  %21669 = vmatpush3.bf16.msra.mxu1 %v21666_v33  ;;  %v25560_v33 = vld [vmem:[#allocation2 + $0x150] sm:$0xff] }
 0x253   : > { %21671 = vmatprep.subr.bf16.mxu1 %v21670_v21 }
 0x255   : > { %18513 = vmatmul.mubr.f32.gmra.mrb[38].mxu1 %v25473_v57 }
 0x256   : > { %18515 = vmatprep.mubr.f32.mxu1 %v25482_v30  ;;  %21673 = vmatpush3.bf16.msra.mxu1 %v21670_v21  ;;  %v3661_v21 = vld [vmem:[#allocation2 + $0x2] sm:$0xff] }
 0x257   : > { %21675 = vmatprep.subr.bf16.mxu1 %v21674_v0 }
 0x259   : > { %18516 = vmatmul.mubr.f32.gmra.mrb[40].mxu1 %v25485_v32 }
 0x25a   : > { %18518 = vmatprep.mubr.f32.mxu1 %v25494_v1  ;;  %21677 = vmatpush3.bf16.msra.mxu1 %v21674_v0  ;;  %v14911_v0 = vld [vmem:[%s29016_s1 + $0x618] sm:$0xff] }
 0x25b   : > { %21679 = vmatprep.subr.bf16.mxu1 %v21678_v35  ;;  %v21694_v46 = vpack.c.bf16 %v14911_v0, %v14910_v34  ;;  %v14917_v34 = vld [vmem:[%s29016_s1 + $0x648] sm:$0xff] }
 0x25c   : > { %v25608_v0 = vld [vmem:[#allocation2 + $0x4a] sm:$0xff] }
 0x25d   : > { %18519 = vmatmul.mubr.f32.gmra.mrb[42].mxu1 %v25497_v48 }
 0x25e   : > { %18521 = vmatprep.mubr.f32.mxu1 %v25506_v51  ;;  %21681 = vmatpush3.bf16.msra.mxu1 %v21678_v35  ;;  %v14912_v35 = vld [vmem:[%s29016_s1 + $0x620] sm:$0xff] }
 0x25f   : > { %21683 = vmatprep.subr.bf16.mxu1 %v21682_v43 }
 0x261   : > { %18522 = vmatmul.mubr.f32.gmra.mrb[44].mxu1 %v25509_v54 }
 0x262   : > { %18524 = vmatprep.mubr.f32.mxu1 %v25518_v56  ;;  %21685 = vmatpush3.bf16.msra.mxu1 %v21682_v43  ;;  %v21698_v43 = vpack.c.bf16 %v14913_v5, %v14912_v35  ;;  %v14918_v35 = vld [vmem:[%s29016_s1 + $0x650] sm:$0xff]  ;;  %v14919_v5 = vld [vmem:[%s29016_s1 + $0x658] sm:$0xff] }
 0x263   : > { %21687 = vmatprep.subr.bf16.mxu1 %v21686_v39 }
 0x265   : > { %18525 = vmatmul.mubr.f32.gmra.mrb[46].mxu1 %v25521_v49 }
 0x266   : > { %18527 = vmatprep.mubr.f32.mxu1 %v25524_v59  ;;  %21689 = vmatpush3.bf16.msra.mxu1 %v21686_v39  ;;  %v14915_v39 = vld [vmem:[%s29016_s1 + $0x638] sm:$0xff] }
 0x267   : > { %21691 = vmatprep.subr.bf16.mxu1 %v21690_v6  ;;  %v21702_v63 = vpack.c.bf16 %v14915_v39, %v14914_v52  ;;  %v25620_v52 = vld [vmem:[#allocation2 + $0x62] sm:$0xff]  ;;  %v25623_v39 = vld [vmem:[#allocation2 + $0x6a] sm:$0xff] }
 0x268   : > { %29200 = vst [vmem:[#allocation7_spill] sm:$0xff] %v25623_v39 }
 0x269   : > { %18528 = vmatmul.mubr.f32.gmra.mrb[48].mxu1 %v25527_v18 }
 0x26a   : > { %18530 = vmatprep.mubr.f32.mxu1 %v25530_v61 }
 0x26d   : > { %18531 = vmatmul.mubr.f32.gmra.mrb[50].mxu1 %v25533_v25 }
 0x26e   : > { %18533 = vmatprep.mubr.f32.mxu1 %v25536_v14 }
 0x271   : > { %18534 = vmatmul.mubr.f32.gmra.mrb[52].mxu1 %v25539_v62 }
 0x272   : > { %18536 = vmatprep.mubr.f32.mxu1 %v25542_v12 }
 0x275   : > { %18537 = vmatmul.mubr.f32.gmra.mrb[54].mxu1 %v25545_v28 }
 0x276   : > { %18539 = vmatprep.mubr.f32.mxu1 %v25548_v27 }
 0x279   : > { %18540 = vmatmul.mubr.f32.gmra.mrb[56].mxu1 %v25551_v22 }
 0x27a   : > { %18542 = vmatprep.mubr.f32.mxu1 %v25554_v41 }
 0x27d   : > { %18543 = vmatmul.mubr.f32.gmra.mrb[58].mxu1 %v25557_v19 }
 0x27e   : > { %18545 = vmatprep.mubr.f32.mxu1 %v25560_v33 }
 0x281   : > { %18546 = vmatmul.mubr.f32.gmra.mrb[60].mxu1 %v25563_v47 }
 0x282   : > { %18548 = vmatprep.mubr.f32.mxu1 %v25566_v17 }
 0x285   : > { %18549 = vmatmul.mubr.f32.gmra.mrb[62].mxu1 %v25569_v42 }
 0x286   : > { %18583 = vmatprep.mubr.f32.mxu1 %v3661_v21  ;;  %v14916_v21 = vld [vmem:[%s29016_s1 + $0x640] sm:$0xff] }
 0x289   : > { %18584 = vmatmul.mubr.f32.vlgmr.msra.gmra.mrb[32].mxu1 %v3662_v13  ;;  %v21706_v13 = vpack.c.bf16 %v14917_v34, %v14916_v21  ;;  %v14920_v21 = vld [vmem:[%s29016_s1 + $0x660] sm:$0xff]  ;;  %v14921_v34 = vld [vmem:[%s29016_s1 + $0x668] sm:$0xff] }
 0x28a   : > { %18586 = vmatprep.mubr.f32.mxu1 %v25584_v55  ;;  %21693 = vmatpush3.bf16.msra.mxu1 %v21690_v6  ;;  %v25599_v6 = vld [vmem:[#allocation2 + $0x3a] sm:$0xff] }
 0x28b   : > { %21695 = vmatprep.subr.bf16.mxu1 %v21694_v46 }
 0x28d   : > { %18587 = vmatmul.mubr.f32.gmra.mrb[34].mxu1 %v25587_v50 }
 0x28e   : > { %18589 = vmatprep.mubr.f32.mxu1 %v25596_v60  ;;  %21697 = vmatpush3.bf16.msra.mxu1 %v21694_v46  ;;  %v25611_v46 = vld [vmem:[#allocation2 + $0x52] sm:$0xff] }
 0x28f   : > { %21699 = vmatprep.subr.bf16.mxu1 %v21698_v43 }
 0x291   : > { %18590 = vmatmul.mubr.f32.gmra.mrb[36].mxu1 %v25599_v6 }
 0x292   : > { %18592 = vmatprep.mubr.f32.mxu1 %v25608_v0  ;;  %21701 = vmatpush3.bf16.msra.mxu1 %v21698_v43  ;;  %v21710_v43 = vpack.c.bf16 %v14919_v5, %v14918_v35  ;;  %v25635_v35 = vld [vmem:[#allocation2 + $0x82] sm:$0xff]  ;;  %v14922_v5 = vld [vmem:[%s29016_s1 + $0x670] sm:$0xff] }
 0x293   : > { %21703 = vmatprep.subr.bf16.mxu1 %v21702_v63  ;;  %29202 = vst [vmem:[#allocation9_spill] sm:$0xff] %v25635_v35 }
 0x295   : > { %18593 = vmatmul.mubr.f32.gmra.mrb[38].mxu1 %v25611_v46 }
 0x296   : > { %18595 = vmatprep.mubr.f32.mxu1 %v25620_v52  ;;  %21705 = vmatpush3.bf16.msra.mxu1 %v21702_v63  ;;  %v21714_v63 = vpack.c.bf16 %v14921_v34, %v14920_v21  ;;  %v25647_v21 = vld [vmem:[#allocation2 + $0x9a] sm:$0xff] }
 0x297   : > { %21707 = vmatprep.subr.bf16.mxu1 %v21706_v13  ;;  %29204 = vst [vmem:[#allocation4_spill] sm:$0xff] %v25647_v21  ;;  %v14924_v34 = vld [vmem:[%s29016_s1 + $0x680] sm:$0xff] }
 0x299   : > { %18596 = vmatmul.mubr.f32.gmra.mrb[40].mxu1 %v25623_v39  ;;  %v25644_v39 = vld [vmem:[#allocation2 + $0x92] sm:$0xff] }
 0x29a   : > { %18598 = vmatprep.mubr.f32.mxu1 %v25632_v31  ;;  %21709 = vmatpush3.bf16.msra.mxu1 %v21706_v13  ;;  %29203 = vst [vmem:[#allocation10_spill] sm:$0xff] %v25644_v39  ;;  %v21718_v13 = vpack.c.bf16 %v14923_v37, %v14922_v5  ;;  %v14925_v31 = vld [vmem:[%s29016_s1 + $0x688] sm:$0xff]  ;;  %v25659_v37 = vld [vmem:[#allocation2 + $0xb2] sm:$0xff] }
 0x29b   : > { %21711 = vmatprep.subr.bf16.mxu1 %v21710_v43  ;;  %v25662_v5 = vld [vmem:[#allocation2 + $0xc2] sm:$0xff] }
 0x29c   : > { %29205 = vst [vmem:[#allocation5_spill] sm:$0xff] %v25662_v5 }
 0x29d   : > { %18599 = vmatmul.mubr.f32.gmra.mrb[42].mxu1 %v25635_v35  ;;  %v25656_v35 = vld [vmem:[#allocation2 + $0xaa] sm:$0xff] }
 0x29e   : > { %18601 = vmatprep.mubr.f32.mxu1 %v25644_v39  ;;  %21713 = vmatpush3.bf16.msra.mxu1 %v21710_v43  ;;  %v21722_v43 = vpack.c.bf16 %v14925_v31, %v14924_v34  ;;  %v25665_v39 = vld [vmem:[#allocation2 + $0xca] sm:$0xff]  ;;  %v25674_v31 = vld [vmem:[#allocation2 + $0xf2] sm:$0xff]  ;;  %v25677_v34 = vld [vmem:[#allocation2 + $0xfa] sm:$0xff] }
 0x29f   : > { %21715 = vmatprep.subr.bf16.mxu1 %v21714_v63  ;;  %29206 = vst [vmem:[#allocation11_spill] sm:$0xff] %v25665_v39  ;;  %29209 = vst [vmem:[#allocation15_spill] sm:$0xff] %v25674_v31 }
 0x2a0   : > { %29210 = vst [vmem:[#allocation16_spill] sm:$0xff] %v25677_v34 }
 0x2a1   : > { %18602 = vmatmul.mubr.f32.gmra.mrb[44].mxu1 %v25647_v21  ;;  %v25668_v21 = vld [vmem:[#allocation2 + $0xda] sm:$0xff] }
 0x2a2   : > { %18604 = vmatprep.mubr.f32.mxu1 %v25656_v35  ;;  %21717 = vmatpush3.bf16.msra.mxu1 %v21714_v63  ;;  %29207 = vst [vmem:[#allocation13_spill] sm:$0xff] %v25668_v21  ;;  %v25671_v63 = vld [vmem:[#allocation2 + $0xe2] sm:$0xff] }
 0x2a3   : > { %21719 = vmatprep.subr.bf16.mxu1 %v21718_v13  ;;  %29208 = vst [vmem:[#allocation14_spill] sm:$0xff] %v25671_v63 }
 0x2a5   : > { %18605 = vmatmul.mubr.f32.gmra.mrb[46].mxu1 %v25659_v37 }
 0x2a6   : > { %18607 = vmatprep.mubr.f32.mxu1 %v25662_v5  ;;  %21721 = vmatpush3.bf16.msra.mxu1 %v21718_v13  ;;  %v25680_v13 = vld [vmem:[#allocation2 + $0x10a] sm:$0xff] }
 0x2a7   : > { %21723 = vmatprep.subr.bf16.mxu1 %v21722_v43  ;;  %29211 = vst [vmem:[#allocation17_spill] sm:$0xff] %v25680_v13 }
 0x2a9   : > { %18608 = vmatmul.mubr.f32.gmra.mrb[48].mxu1 %v25665_v39  ;;  %v25683_v39 = vld [vmem:[#allocation2 + $0x112] sm:$0xff] }
 0x2aa   : > { %18610 = vmatprep.mubr.f32.mxu1 %v25668_v21  ;;  %29212 = vst [vmem:[#allocation18_spill] sm:$0xff] %v25683_v39  ;;  %v25686_v21 = vld [vmem:[#allocation2 + $0x122] sm:$0xff] }
 0x2ab   : > { %29213 = vst [vmem:[#allocation19_spill] sm:$0xff] %v25686_v21 }
 0x2ad   : > { %18611 = vmatmul.mubr.f32.gmra.mrb[50].mxu1 %v25671_v63  ;;  %v25689_v63 = vld [vmem:[#allocation2 + $0x12a] sm:$0xff] }
 0x2ae   : > { %18613 = vmatprep.mubr.f32.mxu1 %v25674_v31  ;;  %29214 = vst [vmem:[#allocation20_spill] sm:$0xff] %v25689_v63  ;;  %v25692_v31 = vld [vmem:[#allocation2 + $0x13a] sm:$0xff] }
 0x2af   : > { %29215 = vst [vmem:[#allocation21_spill] sm:$0xff] %v25692_v31 }
 0x2b1   : > { %18614 = vmatmul.mubr.f32.gmra.mrb[52].mxu1 %v25677_v34  ;;  %v25695_v34 = vld [vmem:[#allocation2 + $0x142] sm:$0xff] }
 0x2b2   : > { %18616 = vmatprep.mubr.f32.mxu1 %v25680_v13  ;;  %29216 = vst [vmem:[#allocation22_spill] sm:$0xff] %v25695_v34  ;;  %v25698_v13 = vld [vmem:[#allocation2 + $0x152] sm:$0xff] }
 0x2b3   : > { %29217 = vst [vmem:[#allocation23_spill] sm:$0xff] %v25698_v13 }
 0x2b5   : > { %18617 = vmatmul.mubr.f32.gmra.mrb[54].mxu1 %v25683_v39  ;;  %v25701_v39 = vld [vmem:[#allocation2 + $0x15a] sm:$0xff] }
 0x2b6   : > { %18619 = vmatprep.mubr.f32.mxu1 %v25686_v21  ;;  %29218 = vst [vmem:[#allocation24_spill] sm:$0xff] %v25701_v39  ;;  %v25704_v21 = vld [vmem:[#allocation2 + $0x16a] sm:$0xff] }
 0x2b7   : > { %29219 = vst [vmem:[#allocation25_spill] sm:$0xff] %v25704_v21 }
 0x2b9   : > { %18620 = vmatmul.mubr.f32.gmra.mrb[56].mxu1 %v25689_v63  ;;  %v25707_v63 = vld [vmem:[#allocation2 + $0x172] sm:$0xff] }
 0x2ba   : > { %18622 = vmatprep.mubr.f32.mxu1 %v25692_v31  ;;  %v14926_v31 = vld [vmem:[%s29016_s1 + $0x690] sm:$0xff] }
 0x2bd   : > { %18623 = vmatmul.mubr.f32.gmra.mrb[58].mxu1 %v25695_v34  ;;  %v14927_v34 = vld [vmem:[%s29016_s1 + $0x698] sm:$0xff] }
 0x2be   : > { %18625 = vmatprep.mubr.f32.mxu1 %v25698_v13  ;;  %v21726_v13 = vpack.c.bf16 %v14927_v34, %v14926_v31  ;;  %v14931_v31 = vld [vmem:[%s29016_s1 + $0x6b8] sm:$0xff]  ;;  %v14934_v34 = vld [vmem:[%s29016_s1 + $0x6d0] sm:$0xff] }
 0x2c1   : > { %18626 = vmatmul.mubr.f32.gmra.mrb[60].mxu1 %v25701_v39  ;;  %v14928_v39 = vld [vmem:[%s29016_s1 + $0x6a0] sm:$0xff] }
 0x2c2   : > { %18628 = vmatprep.mubr.f32.mxu1 %v25704_v21  ;;  %v14929_v21 = vld [vmem:[%s29016_s1 + $0x6a8] sm:$0xff] }
 0x2c3   : > { %v21730_v5 = vpack.c.bf16 %v14929_v21, %v14928_v39  ;;  %v14933_v39 = vld [vmem:[%s29016_s1 + $0x6c8] sm:$0xff] }
 0x2c5   : > { %18629 = vmatmul.mubr.f32.gmra.mrb[62].mxu1 %v25707_v63 }
 0x2c6   : > { %18663 = vmatprep.mubr.f32.mxu1 %v25445_v44  ;;  %v14930_v44 = vld [vmem:[%s29016_s1 + $0x6b0] sm:$0xff] }
 0x2c9   : > { %18664 = vmatmul.mubr.f32.vlgmr.msra.gmra.mrb[32].mxu1 %v25449_v15  ;;  %v21734_v15 = vpack.c.bf16 %v14931_v31, %v14930_v44  ;;  %v14937_v31 = vld [vmem:[%s29016_s1 + $0x6e8] sm:$0xff] }
 0x2ca   : > { %18666 = vmatprep.mubr.f32.mxu1 %v25458_v2  ;;  %21725 = vmatpush3.bf16.msra.mxu1 %v21722_v43  ;;  %v14932_v43 = vld [vmem:[%s29016_s1 + $0x6c0] sm:$0xff] }
 0x2cb   : > { %21727 = vmatprep.subr.bf16.mxu1 %v21726_v13  ;;  %v21738_v21 = vpack.c.bf16 %v14933_v39, %v14932_v43  ;;  %v14939_v39 = vld [vmem:[%s29016_s1 + $0x6f8] sm:$0xff] }
 0x2cd   : > { %18667 = vmatmul.mubr.f32.gmra.mrb[34].mxu1 %v25461_v24 }
 0x2ce   : > { %18669 = vmatprep.mubr.f32.mxu1 %v25470_v8  ;;  %21729 = vmatpush3.bf16.msra.mxu1 %v21726_v13  ;;  %v14935_v13 = vld [vmem:[%s29016_s1 + $0x6d8] sm:$0xff] }
 0x2cf   : > { %21731 = vmatprep.subr.bf16.mxu1 %v21730_v5  ;;  %v21742_v44 = vpack.c.bf16 %v14935_v13, %v14934_v34  ;;  %v14941_v13 = vld [vmem:[%s29016_s1 + $0x708] sm:$0xff] }
 0x2d1   : > { %18670 = vmatmul.mubr.f32.gmra.mrb[36].mxu1 %v25473_v57 }
 0x2d2   : > { %18672 = vmatprep.mubr.f32.mxu1 %v25482_v30  ;;  %21733 = vmatpush3.bf16.msra.mxu1 %v21730_v5  ;;  %v14936_v5 = vld [vmem:[%s29016_s1 + $0x6e0] sm:$0xff] }
 0x2d3   : > { %21735 = vmatprep.subr.bf16.mxu1 %v21734_v15  ;;  %v21746_v43 = vpack.c.bf16 %v14937_v31, %v14936_v5  ;;  %v25791_v31 = vld [vmem:[#allocation2 + $0x188] sm:$0xff] }
 0x2d4   : > { %29221 = vst [vmem:[#allocation27_spill] sm:$0xff] %v25791_v31 }
 0x2d5   : > { %18673 = vmatmul.mubr.f32.gmra.mrb[38].mxu1 %v25485_v32 }
 0x2d6   : > { %18675 = vmatprep.mubr.f32.mxu1 %v25494_v1  ;;  %21737 = vmatpush3.bf16.msra.mxu1 %v21734_v15  ;;  %v14938_v15 = vld [vmem:[%s29016_s1 + $0x6f0] sm:$0xff] }
 0x2d7   : > { %21739 = vmatprep.subr.bf16.mxu1 %v21738_v21  ;;  %v21750_v34 = vpack.c.bf16 %v14939_v39, %v14938_v15  ;;  %v14943_v15 = vld [vmem:[%s29016_s1 + $0x718] sm:$0xff] }
 0x2d8   : > { %v4273_v39 = vld [vmem:[#allocation2 + $0x19] sm:$0xff] }
 0x2d9   : > { %18676 = vmatmul.mubr.f32.gmra.mrb[40].mxu1 %v25497_v48 }
 0x2da   : > { %18678 = vmatprep.mubr.f32.mxu1 %v25506_v51  ;;  %21741 = vmatpush3.bf16.msra.mxu1 %v21738_v21  ;;  %v14940_v21 = vld [vmem:[%s29016_s1 + $0x700] sm:$0xff] }
 0x2db   : > { %21743 = vmatprep.subr.bf16.mxu1 %v21742_v44  ;;  %v21754_v5 = vpack.c.bf16 %v14941_v13, %v14940_v21  ;;  %v4274_v21 = vld [vmem:[#allocation2 + $0x21] sm:$0xff] }
 0x2dc   : > { %v14944_v13 = vld [vmem:[%s29016_s1 + $0x720] sm:$0xff] }
 0x2dd   : > { %18679 = vmatmul.mubr.f32.gmra.mrb[42].mxu1 %v25509_v54 }
 0x2de   : > { %18681 = vmatprep.mubr.f32.mxu1 %v25518_v56  ;;  %21745 = vmatpush3.bf16.msra.mxu1 %v21742_v44  ;;  %v25788_v44 = vld [vmem:[#allocation2 + $0x180] sm:$0xff] }
 0x2df   : > { %21747 = vmatprep.subr.bf16.mxu1 %v21746_v43  ;;  %29220 = vst [vmem:[#allocation26_spill] sm:$0xff] %v25788_v44 }
 0x2e1   : > { %18682 = vmatmul.mubr.f32.gmra.mrb[44].mxu1 %v25521_v49 }
 0x2e2   : > { %18684 = vmatprep.mubr.f32.mxu1 %v25524_v59  ;;  %21749 = vmatpush3.bf16.msra.mxu1 %v21746_v43  ;;  %v14942_v43 = vld [vmem:[%s29016_s1 + $0x710] sm:$0xff] }
 0x2e3   : > { %21751 = vmatprep.subr.bf16.mxu1 %v21750_v34 }
 0x2e5   : > { %18685 = vmatmul.mubr.f32.gmra.mrb[46].mxu1 %v25527_v18 }
 0x2e6   : > { %18687 = vmatprep.mubr.f32.mxu1 %v25530_v61  ;;  %21753 = vmatpush3.bf16.msra.mxu1 %v21750_v34  ;;  %v21758_v34 = vpack.c.bf16 %v14943_v15, %v14942_v43  ;;  %v14946_v43 = vld [vmem:[%s29016_s1 + $0x730] sm:$0xff]  ;;  %v14947_v15 = vld [vmem:[%s29016_s1 + $0x738] sm:$0xff] }
 0x2e7   : > { %21755 = vmatprep.subr.bf16.mxu1 %v21754_v5 }
 0x2e9   : > { %18688 = vmatmul.mubr.f32.gmra.mrb[48].mxu1 %v25533_v25 }
 0x2ea   : > { %18690 = vmatprep.mubr.f32.mxu1 %v25536_v14 }
 0x2ed   : > { %18691 = vmatmul.mubr.f32.gmra.mrb[50].mxu1 %v25539_v62 }
 0x2ee   : > { %18693 = vmatprep.mubr.f32.mxu1 %v25542_v12 }
 0x2f1   : > { %18694 = vmatmul.mubr.f32.gmra.mrb[52].mxu1 %v25545_v28 }
 0x2f2   : > { %18696 = vmatprep.mubr.f32.mxu1 %v25548_v27 }
 0x2f5   : > { %18697 = vmatmul.mubr.f32.gmra.mrb[54].mxu1 %v25551_v22 }
 0x2f6   : > { %18699 = vmatprep.mubr.f32.mxu1 %v25554_v41 }
 0x2f9   : > { %18700 = vmatmul.mubr.f32.gmra.mrb[56].mxu1 %v25557_v19 }
 0x2fa   : > { %18702 = vmatprep.mubr.f32.mxu1 %v25560_v33 }
 0x2fd   : > { %18703 = vmatmul.mubr.f32.gmra.mrb[58].mxu1 %v25563_v47 }
 0x2fe   : > { %18705 = vmatprep.mubr.f32.mxu1 %v25566_v17  ;;  %v25809_v17 = vld [vmem:[#allocation2 + $0x39] sm:$0xff] }
 0x2ff   : > { %29222 = vst [vmem:[#allocation28_spill] sm:$0xff] %v25809_v17 }
 0x301   : > { %18706 = vmatmul.mubr.f32.gmra.mrb[60].mxu1 %v25569_v42  ;;  %v25806_v42 = vld [vmem:[#allocation2 + $0x31] sm:$0xff] }
 0x302   : > { %18708 = vmatprep.mubr.f32.mxu1 %v25788_v44  ;;  %v14945_v44 = vld [vmem:[%s29016_s1 + $0x728] sm:$0xff] }
 0x305   : > { %18709 = vmatmul.mubr.f32.gmra.mrb[62].mxu1 %v25791_v31  ;;  %v21762_v31 = vpack.c.bf16 %v14945_v44, %v14944_v13  ;;  %v25821_v44 = vld [vmem:[#allocation2 + $0x51] sm:$0xff]  ;;  %v14949_v13 = vld [vmem:[%s29016_s1 + $0x748] sm:$0xff] }
 0x306   : > { %18743 = vmatprep.mubr.f32.mxu1 %v4273_v39  ;;  %v25818_v39 = vld [vmem:[#allocation2 + $0x49] sm:$0xff]  ;;  %29224 = vst [vmem:[#allocation30_spill] sm:$0xff] %v25821_v44 }
 0x307   : > { %29223 = vst [vmem:[#allocation29_spill] sm:$0xff] %v25818_v39 }
 0x309   : > { %18744 = vmatmul.mubr.f32.vlgmr.msra.gmra.mrb[32].mxu1 %v4274_v21  ;;  %v14948_v21 = vld [vmem:[%s29016_s1 + $0x740] sm:$0xff] }
 0x30a   : > { %18746 = vmatprep.mubr.f32.mxu1 %v25806_v42  ;;  %21757 = vmatpush3.bf16.msra.mxu1 %v21754_v5  ;;  %v21766_v5 = vpack.c.bf16 %v14947_v15, %v14946_v43  ;;  %v25833_v43 = vld [vmem:[#allocation2 + $0x69] sm:$0xff] }
 0x30b   : > { %21759 = vmatprep.subr.bf16.mxu1 %v21758_v34  ;;  %29226 = vst [vmem:[#allocation32_spill] sm:$0xff] %v25833_v43  ;;  %v14950_v15 = vld [vmem:[%s29016_s1 + $0x750] sm:$0xff] }
 0x30d   : > { %18747 = vmatmul.mubr.f32.gmra.mrb[34].mxu1 %v25809_v17  ;;  %v25830_v17 = vld [vmem:[#allocation2 + $0x61] sm:$0xff] }
 0x30e   : > { %18749 = vmatprep.mubr.f32.mxu1 %v25818_v39  ;;  %21761 = vmatpush3.bf16.msra.mxu1 %v21758_v34  ;;  %29225 = vst [vmem:[#allocation31_spill] sm:$0xff] %v25830_v17  ;;  %v21770_v34 = vpack.c.bf16 %v14949_v13, %v14948_v21  ;;  %v14951_v39 = vld [vmem:[%s29016_s1 + $0x758] sm:$0xff]  ;;  %v25845_v21 = vld [vmem:[#allocation2 + $0x81] sm:$0xff] }
 0x30f   : > { %21763 = vmatprep.subr.bf16.mxu1 %v21762_v31  ;;  %29228 = vst [vmem:[#allocation34_spill] sm:$0xff] %v25845_v21  ;;  %v14952_v13 = vld [vmem:[%s29016_s1 + $0x760] sm:$0xff] }
 0x311   : > { %18750 = vmatmul.mubr.f32.gmra.mrb[36].mxu1 %v25821_v44  ;;  %v25842_v44 = vld [vmem:[#allocation2 + $0x79] sm:$0xff] }
 0x312   : > { %18752 = vmatprep.mubr.f32.mxu1 %v25830_v17  ;;  %21765 = vmatpush3.bf16.msra.mxu1 %v21762_v31  ;;  %29227 = vst [vmem:[#allocation33_spill] sm:$0xff] %v25842_v44  ;;  %v21774_v31 = vpack.c.bf16 %v14951_v39, %v14950_v15  ;;  %v14953_v17 = vld [vmem:[%s29016_s1 + $0x768] sm:$0xff]  ;;  %v25857_v39 = vld [vmem:[#allocation2 + $0x99] sm:$0xff]  ;;  %v14954_v15 = vld [vmem:[%s29016_s1 + $0x770] sm:$0xff] }
 0x313   : > { %21767 = vmatprep.subr.bf16.mxu1 %v21766_v5 }
 0x315   : > { %18753 = vmatmul.mubr.f32.gmra.mrb[38].mxu1 %v25833_v43  ;;  %v25854_v43 = vld [vmem:[#allocation2 + $0x91] sm:$0xff] }
 0x316   : > { %18755 = vmatprep.mubr.f32.mxu1 %v25842_v44  ;;  %21769 = vmatpush3.bf16.msra.mxu1 %v21766_v5  ;;  %29229 = vst [vmem:[#allocation35_spill] sm:$0xff] %v25854_v43  ;;  %v21778_v5 = vpack.c.bf16 %v14953_v17, %v14952_v13  ;;  %v14955_v44 = vld [vmem:[%s29016_s1 + $0x778] sm:$0xff]  ;;  %v14956_v13 = vld [vmem:[%s29016_s1 + $0x780] sm:$0xff] }
 0x317   : > { %21771 = vmatprep.subr.bf16.mxu1 %v21770_v34  ;;  %v25869_v17 = vld [vmem:[#allocation2 + $0xb1] sm:$0xff] }
 0x319   : > { %18756 = vmatmul.mubr.f32.gmra.mrb[40].mxu1 %v25845_v21  ;;  %v25866_v21 = vld [vmem:[#allocation2 + $0xa9] sm:$0xff] }
 0x31a   : > { %18758 = vmatprep.mubr.f32.mxu1 %v25854_v43  ;;  %21773 = vmatpush3.bf16.msra.mxu1 %v21770_v34  ;;  %29230 = vst [vmem:[#allocation36_spill] sm:$0xff] %v25866_v21  ;;  %v21782_v34 = vpack.c.bf16 %v14955_v44, %v14954_v15  ;;  %v14957_v43 = vld [vmem:[%s29016_s1 + $0x788] sm:$0xff]  ;;  %v14970_v44 = vld [vmem:[%s29016_s1 + $0x7f0] sm:$0xff]  ;;  %v14972_v15 = vld [vmem:[%s29016_s1 + $0x800] sm:$0xff] }
 0x31b   : > { %21775 = vmatprep.subr.bf16.mxu1 %v21774_v31 }
 0x31d   : > { %18759 = vmatmul.mubr.f32.gmra.mrb[42].mxu1 %v25857_v39 }
 0x31e   : > { %18761 = vmatprep.mubr.f32.mxu1 %v25866_v21  ;;  %21777 = vmatpush3.bf16.msra.mxu1 %v21774_v31  ;;  %v21786_v21 = vpack.c.bf16 %v14957_v43, %v14956_v13  ;;  %v25879_v31 = vld [vmem:[#allocation2 + $0xc9] sm:$0xff]  ;;  %v14971_v43 = vld [vmem:[%s29016_s1 + $0x7f8] sm:$0xff] }
 0x31f   : > { %21779 = vmatprep.subr.bf16.mxu1 %v21778_v5  ;;  %v29238_v13 = vld [vmem:[#allocation5_spill] sm:$0xff] }
 0x321   : > { %18762 = vmatmul.mubr.f32.gmra.mrb[44].mxu1 %v25869_v17 }
 0x322   : > { %18764 = vmatprep.mubr.f32.mxu1 %v25331_v9  ;;  %21781 = vmatpush3.bf16.msra.mxu1 %v21778_v5  ;;  %v29231_v9 = vmax.f32 %v25422_v29, 0.0  ;;  %v29233_v29 = vld [vmem:[#allocation7_spill] sm:$0xff]  ;;  %v21814_v5 = vpack.c.bf16 %v14971_v43, %v14970_v44  ;;  %v14989_v43 = vld [vmem:[%s29016_s1 + $0x888] sm:$0xff] }
 0x323   : > { %21783 = vmatprep.subr.bf16.mxu1 %v21782_v34  ;;  %v14987_v44 = vld [vmem:[%s29016_s1 + $0x878] sm:$0xff] }
 0x325   : > { %18765 = vmatmul.mubr.f32.gmra.mrb[46].mxu1 %v25879_v31 }
 0x326   : > { %18767 = vmatprep.mubr.f32.mxu1 %v25341_v45  ;;  %21785 = vmatpush3.bf16.msra.mxu1 %v21782_v34  ;;  %v14959_v45 = vld [vmem:[%s29016_s1 + $0x798] sm:$0xff]  ;;  %v14973_v34 = vld [vmem:[%s29016_s1 + $0x808] sm:$0xff] }
 0x327   : > { %21787 = vmatprep.subr.bf16.mxu1 %v21786_v21 }
 0x329   : > { %18768 = vmatmul.mubr.f32.gmra.mrb[48].mxu1 %v25338_v11  ;;  %v14958_v11 = vld [vmem:[%s29016_s1 + $0x790] sm:$0xff] }
 0x32a   : > { %18770 = vmatprep.mubr.f32.mxu1 %v25353_v36  ;;  %v21790_v36 = vpack.c.bf16 %v14959_v45, %v14958_v11  ;;  %v29239_v11 = vld [vmem:[#allocation11_spill] sm:$0xff]  ;;  %v29241_v45 = vld [vmem:[#allocation14_spill] sm:$0xff] }
 0x32d   : > { %18771 = vmatmul.mubr.f32.gmra.mrb[50].mxu1 %v25349_v26  ;;  %v29232_v26 = vmax.f32 %v25418_v3, 0.0  ;;  %v14967_v3 = vld [vmem:[%s29016_s1 + $0x7d8] sm:$0xff] }
 0x32e   : > { %18773 = vmatprep.mubr.f32.mxu1 %v25365_v23  ;;  %v14961_v23 = vld [vmem:[%s29016_s1 + $0x7a8] sm:$0xff] }
 0x331   : > { %18774 = vmatmul.mubr.f32.gmra.mrb[52].mxu1 %v25361_v16  ;;  %v14960_v16 = vld [vmem:[%s29016_s1 + $0x7a0] sm:$0xff] }
 0x332   : > { %18776 = vmatprep.mubr.f32.mxu1 %v25377_v40  ;;  %v14962_v40 = vld [vmem:[%s29016_s1 + $0x7b0] sm:$0xff] }
 0x335   : > { %18777 = vmatmul.mubr.f32.gmra.mrb[54].mxu1 %v25373_v38  ;;  %v21794_v38 = vpack.c.bf16 %v14961_v23, %v14960_v16  ;;  %v29244_v16 = vld [vmem:[#allocation17_spill] sm:$0xff]  ;;  %v29246_v23 = vld [vmem:[#allocation19_spill] sm:$0xff] }
 0x336   : > { %18779 = vmatprep.mubr.f32.mxu1 %v25389_v58 }
 0x339   : > { %18780 = vmatmul.mubr.f32.gmra.mrb[56].mxu1 %v25385_v53  ;;  %v14963_v53 = vld [vmem:[%s29016_s1 + $0x7b8] sm:$0xff] }
 0x33a   : > { %18782 = vmatprep.mubr.f32.mxu1 %v25401_v10  ;;  %v21798_v58 = vpack.c.bf16 %v14963_v53, %v14962_v40  ;;  %v14965_v10 = vld [vmem:[%s29016_s1 + $0x7c8] sm:$0xff]  ;;  %v29249_v53 = vld [vmem:[#allocation22_spill] sm:$0xff] }
 0x33b   : > { %v29248_v40 = vld [vmem:[#allocation21_spill] sm:$0xff] }
 0x33d   : > { %18783 = vmatmul.mubr.f32.gmra.mrb[58].mxu1 %v25397_v4  ;;  %v14964_v4 = vld [vmem:[%s29016_s1 + $0x7c0] sm:$0xff] }
 0x33e   : > { %18785 = vmatprep.mubr.f32.mxu1 %v25413_v7  ;;  %v14966_v7 = vld [vmem:[%s29016_s1 + $0x7d0] sm:$0xff] }
 0x341   : > { %18786 = vmatmul.mubr.f32.gmra.mrb[60].mxu1 %v25409_v20  ;;  %v21802_v20 = vpack.c.bf16 %v14965_v10, %v14964_v4  ;;  %v29251_v4 = vld [vmem:[#allocation24_spill] sm:$0xff]  ;;  %v29252_v10 = vld [vmem:[#allocation25_spill] sm:$0xff] }
 0x342   : > { %18788 = vmatprep.mubr.f32.mxu1 %v29231_v9  ;;  %v21818_v9 = vpack.c.bf16 %v14973_v34, %v14972_v15  ;;  %v14993_v15 = vld [vmem:[%s29016_s1 + $0x8a8] sm:$0xff] }
 0x343   : > { %v15026_v34 = vld [vmem:[%s29016_s1 + $0x9a8] sm:$0xff] }
 0x345   : > { %18789 = vmatmul.mubr.f32.gmra.mrb[62].mxu1 %v29232_v26  ;;  %v29242_v26 = vld [vmem:[#allocation15_spill] sm:$0xff] }
 0x346   : > { %18823 = vmatprep.mubr.f32.mxu1 %v25584_v55  ;;  %v29234_v55 = vld [vmem:[#allocation8_spill] sm:$0xff] }
 0x349   : > { %18824 = vmatmul.mubr.f32.vlgmr.msra.gmra.mrb[32].mxu1 %v25587_v50  ;;  %v21806_v50 = vpack.c.bf16 %v14967_v3, %v14966_v7  ;;  %v25981_v7 = vld [vmem:[#allocation2 + $0x18a] sm:$0xff] }
 0x34a   : > { %18826 = vmatprep.mubr.f32.mxu1 %v25596_v60  ;;  %21789 = vmatpush3.bf16.msra.mxu1 %v21786_v21  ;;  %v14968_v60 = vld [vmem:[%s29016_s1 + $0x7e0] sm:$0xff]  ;;  %v14974_v3 = vld [vmem:[%s29016_s1 + $0x810] sm:$0xff] }
 0x34b   : > { %21791 = vmatprep.subr.bf16.mxu1 %v21790_v36  ;;  %v29237_v21 = vld [vmem:[#allocation4_spill] sm:$0xff] }
 0x34d   : > { %18827 = vmatmul.mubr.f32.gmra.mrb[34].mxu1 %v25599_v6  ;;  %v14969_v6 = vld [vmem:[%s29016_s1 + $0x7e8] sm:$0xff] }
 0x34e   : > { %18829 = vmatprep.mubr.f32.mxu1 %v25608_v0  ;;  %21793 = vmatpush3.bf16.msra.mxu1 %v21790_v36  ;;  %v29235_v0 = vld [vmem:[#allocation9_spill] sm:$0xff]  ;;  %v29243_v36 = vld [vmem:[#allocation16_spill] sm:$0xff] }
 0x34f   : > { %21795 = vmatprep.subr.bf16.mxu1 %v21794_v38 }
 0x351   : > { %18830 = vmatmul.mubr.f32.gmra.mrb[36].mxu1 %v25611_v46  ;;  %v29236_v46 = vld [vmem:[#allocation10_spill] sm:$0xff] }
 0x352   : > { %18832 = vmatprep.mubr.f32.mxu1 %v25620_v52  ;;  %21797 = vmatpush3.bf16.msra.mxu1 %v21794_v38  ;;  %v21810_v52 = vpack.c.bf16 %v14969_v6, %v14968_v60  ;;  %v29247_v38 = vld [vmem:[#allocation20_spill] sm:$0xff]  ;;  %v14979_v6 = vld [vmem:[%s29016_s1 + $0x838] sm:$0xff] }
 0x353   : > { %21799 = vmatprep.subr.bf16.mxu1 %v21798_v58 }
 0x355   : > { %18833 = vmatmul.mubr.f32.gmra.mrb[38].mxu1 %v29233_v29  ;;  %v14975_v29 = vld [vmem:[%s29016_s1 + $0x818] sm:$0xff] }
 0x356   : > { %18835 = vmatprep.mubr.f32.mxu1 %v29234_v55  ;;  %21801 = vmatpush3.bf16.msra.mxu1 %v21798_v58  ;;  %v29250_v58 = vld [vmem:[#allocation23_spill] sm:$0xff]  ;;  %v21822_v55 = vpack.c.bf16 %v14975_v29, %v14974_v3  ;;  %v29261_v3 = vld [vmem:[#allocation32_spill] sm:$0xff]  ;;  %v29262_v29 = vld [vmem:[#allocation33_spill] sm:$0xff] }
 0x357   : > { %21803 = vmatprep.subr.bf16.mxu1 %v21802_v20 }
 0x359   : > { %18836 = vmatmul.mubr.f32.gmra.mrb[40].mxu1 %v29235_v0  ;;  %v14981_v0 = vld [vmem:[%s29016_s1 + $0x848] sm:$0xff] }
 0x35a   : > { %18838 = vmatprep.mubr.f32.mxu1 %v29236_v46  ;;  %21805 = vmatpush3.bf16.msra.mxu1 %v21802_v20  ;;  %v25978_v20 = vld [vmem:[#allocation2 + $0x182] sm:$0xff]  ;;  %v14983_v46 = vld [vmem:[%s29016_s1 + $0x858] sm:$0xff] }
 0x35b   : > { %21807 = vmatprep.subr.bf16.mxu1 %v21806_v50 }
 0x35d   : > { %18839 = vmatmul.mubr.f32.gmra.mrb[42].mxu1 %v29237_v21  ;;  %v14992_v21 = vld [vmem:[%s29016_s1 + $0x8a0] sm:$0xff] }
 0x35e   : > { %18841 = vmatprep.mubr.f32.mxu1 %v25656_v35  ;;  %21809 = vmatpush3.bf16.msra.mxu1 %v21806_v50  ;;  %v29240_v35 = vld [vmem:[#allocation13_spill] sm:$0xff] }
 0x35f   : > { %21811 = vmatprep.subr.bf16.mxu1 %v21810_v52  ;;  %v14977_v50 = vld [vmem:[%s29016_s1 + $0x828] sm:$0xff] }
 0x361   : > { %18842 = vmatmul.mubr.f32.gmra.mrb[44].mxu1 %v25659_v37  ;;  %v29245_v37 = vld [vmem:[#allocation18_spill] sm:$0xff] }
 0x362   : > { %18844 = vmatprep.mubr.f32.mxu1 %v29238_v13  ;;  %21813 = vmatpush3.bf16.msra.mxu1 %v21810_v52  ;;  %v14985_v52 = vld [vmem:[%s29016_s1 + $0x868] sm:$0xff]  ;;  %v29257_v13 = vld [vmem:[#allocation28_spill] sm:$0xff] }
 0x363   : > { %21815 = vmatprep.subr.bf16.mxu1 %v21814_v5 }
 0x365   : > { %18845 = vmatmul.mubr.f32.gmra.mrb[46].mxu1 %v29239_v11  ;;  %v21858_v11 = vpack.c.bf16 %v14993_v15, %v14992_v21  ;;  %v5500_v21 = vld [vmem:[#allocation2 + $0x4a] sm:$0xff]  ;;  %v5502_v15 = vld [vmem:[#allocation2 + $0x62] sm:$0xff] }
 0x366   : > { %18847 = vmatprep.mubr.f32.mxu1 %v29240_v35  ;;  %21817 = vmatpush3.bf16.msra.mxu1 %v21814_v5  ;;  %v14994_v35 = vld [vmem:[%s29016_s1 + $0x8b0] sm:$0xff] }
 0x367   : > { %21819 = vmatprep.subr.bf16.mxu1 %v21818_v9 }
 0x369   : > { %18848 = vmatmul.mubr.f32.gmra.mrb[48].mxu1 %v29241_v45 }
 0x36a   : > { %18850 = vmatprep.mubr.f32.mxu1 %v29242_v26  ;;  %v14995_v26 = vld [vmem:[%s29016_s1 + $0x8b8] sm:$0xff] }
 0x36d   : > { %18851 = vmatmul.mubr.f32.gmra.mrb[50].mxu1 %v29243_v36  ;;  %v15027_v36 = vld [vmem:[%s29016_s1 + $0x9b0] sm:$0xff] }
 0x36e   : > { %18853 = vmatprep.mubr.f32.mxu1 %v29244_v16  ;;  %v15028_v16 = vld [vmem:[%s29016_s1 + $0x9b8] sm:$0xff] }
 0x371   : > { %18854 = vmatmul.mubr.f32.gmra.mrb[52].mxu1 %v29245_v37  ;;  %v29259_v37 = vld [vmem:[#allocation30_spill] sm:$0xff] }
 0x372   : > { %18856 = vmatprep.mubr.f32.mxu1 %v29246_v23  ;;  %v29260_v23 = vld [vmem:[#allocation31_spill] sm:$0xff] }
 0x375   : > { %18857 = vmatmul.mubr.f32.gmra.mrb[54].mxu1 %v29247_v38  ;;  %v21862_v38 = vpack.c.bf16 %v14995_v26, %v14994_v35  ;;  %v5508_v35 = vld [vmem:[#allocation2 + $0xaa] sm:$0xff]  ;;  %v5510_v26 = vld [vmem:[#allocation2 + $0xc2] sm:$0xff] }
 0x376   : > { %18859 = vmatprep.mubr.f32.mxu1 %v29248_v40  ;;  %v14996_v40 = vld [vmem:[%s29016_s1 + $0x8c0] sm:$0xff] }
 0x379   : > { %18860 = vmatmul.mubr.f32.gmra.mrb[56].mxu1 %v29249_v53  ;;  %v21894_v53 = vpack.c.bf16 %v15028_v16, %v15027_v36  ;;  %v5511_v36 = vld [vmem:[#allocation2 + $0xca] sm:$0xff]  ;;  %v5512_v16 = vld [vmem:[#allocation2 + $0xda] sm:$0xff] }
 0x37a   : > { %18862 = vmatprep.mubr.f32.mxu1 %v29250_v58  ;;  %v14997_v58 = vld [vmem:[%s29016_s1 + $0x8c8] sm:$0xff] }
 0x37d   : > { %18863 = vmatmul.mubr.f32.gmra.mrb[58].mxu1 %v29251_v4  ;;  %v15029_v4 = vld [vmem:[%s29016_s1 + $0x9c0] sm:$0xff] }
 0x37e   : > { %18865 = vmatprep.mubr.f32.mxu1 %v29252_v10  ;;  %v15030_v10 = vld [vmem:[%s29016_s1 + $0x9c8] sm:$0xff] }
 0x381   : > { %18866 = vmatmul.mubr.f32.gmra.mrb[60].mxu1 %v25707_v63  ;;  %v14976_v63 = vld [vmem:[%s29016_s1 + $0x820] sm:$0xff] }
 0x382   : > { %18868 = vmatprep.mubr.f32.mxu1 %v25978_v20  ;;  %v21826_v60 = vpack.c.bf16 %v14977_v50, %v14976_v63  ;;  %v14998_v63 = vld [vmem:[%s29016_s1 + $0x8d0] sm:$0xff]  ;;  %v21898_v50 = vpack.c.bf16 %v15030_v10, %v15029_v4  ;;  %v5520_v10 = vld [vmem:[#allocation2 + $0x13a] sm:$0xff] }
 0x383   : > { %v5519_v4 = vld [vmem:[#allocation2 + $0x12a] sm:$0xff] }
 0x385   : > { %18869 = vmatmul.mubr.f32.gmra.mrb[62].mxu1 %v25981_v7 }
 0x386   : > { %18903 = vmatprep.mubr.f32.mxu1 %v25458_v2  ;;  %v14978_v2 = vld [vmem:[%s29016_s1 + $0x830] sm:$0xff] }
 0x389   : > { %18904 = vmatmul.mubr.f32.vlgmr.msra.gmra.mrb[32].mxu1 %v25461_v24  ;;  %v21830_v24 = vpack.c.bf16 %v14979_v6, %v14978_v2  ;;  %v15031_v2 = vld [vmem:[%s29016_s1 + $0x9d0] sm:$0xff]  ;;  %v15032_v6 = vld [vmem:[%s29016_s1 + $0x9d8] sm:$0xff] }
 0x38a   : > { %18906 = vmatprep.mubr.f32.mxu1 %v25470_v8  ;;  %21821 = vmatpush3.bf16.msra.mxu1 %v21818_v9  ;;  %v14980_v8 = vld [vmem:[%s29016_s1 + $0x840] sm:$0xff]  ;;  %v29258_v9 = vld [vmem:[#allocation29_spill] sm:$0xff] }
 0x38b   : > { %21823 = vmatprep.subr.bf16.mxu1 %v21822_v55 }
 0x38d   : > { %18907 = vmatmul.mubr.f32.gmra.mrb[34].mxu1 %v25473_v57  ;;  %v21834_v57 = vpack.c.bf16 %v14981_v0, %v14980_v8  ;;  %v29264_v8 = vld [vmem:[#allocation35_spill] sm:$0xff] }
 0x38e   : > { %18909 = vmatprep.mubr.f32.mxu1 %v25482_v30  ;;  %21825 = vmatpush3.bf16.msra.mxu1 %v21822_v55  ;;  %v14982_v30 = vld [vmem:[%s29016_s1 + $0x850] sm:$0xff]  ;;  %v21866_v55 = vpack.c.bf16 %v14997_v58, %v14996_v40  ;;  %v5518_v58 = vld [vmem:[#allocation2 + $0x122] sm:$0xff] }
 0x38f   : > { %21827 = vmatprep.subr.bf16.mxu1 %v21826_v60  ;;  %v5516_v40 = vld [vmem:[#allocation2 + $0x10a] sm:$0xff] }
 0x391   : > { %18910 = vmatmul.mubr.f32.gmra.mrb[36].mxu1 %v25485_v32  ;;  %v21838_v32 = vpack.c.bf16 %v14983_v46, %v14982_v30  ;;  %v15000_v30 = vld [vmem:[%s29016_s1 + $0x8e0] sm:$0xff]  ;;  %v15001_v46 = vld [vmem:[%s29016_s1 + $0x8e8] sm:$0xff] }
 0x392   : > { %18912 = vmatprep.mubr.f32.mxu1 %v25494_v1  ;;  %21829 = vmatpush3.bf16.msra.mxu1 %v21826_v60  ;;  %v14984_v1 = vld [vmem:[%s29016_s1 + $0x860] sm:$0xff]  ;;  %v14999_v60 = vld [vmem:[%s29016_s1 + $0x8d8] sm:$0xff] }
 0x393   : > { %21831 = vmatprep.subr.bf16.mxu1 %v21830_v24  ;;  %v21870_v0 = vpack.c.bf16 %v14999_v60, %v14998_v63  ;;  %v5524_v63 = vld [vmem:[#allocation2 + $0x16a] sm:$0xff]  ;;  %v5528_v60 = vld [vmem:[#allocation2 + $0x19a] sm:$0xff] }
 0x395   : > { %18913 = vmatmul.mubr.f32.gmra.mrb[38].mxu1 %v25497_v48  ;;  %v21842_v48 = vpack.c.bf16 %v14985_v52, %v14984_v1  ;;  %v21874_v1 = vpack.c.bf16 %v15001_v46, %v15000_v30  ;;  %v15002_v52 = vld [vmem:[%s29016_s1 + $0x8f0] sm:$0xff]  ;;  %v5956_v30 = vld [vmem:[#allocation3 + $0x9] sm:$0xff] }
 0x396   : > { %18915 = vmatprep.mubr.f32.mxu1 %v25506_v51  ;;  %21833 = vmatpush3.bf16.msra.mxu1 %v21830_v24  ;;  %v14986_v51 = vld [vmem:[%s29016_s1 + $0x870] sm:$0xff]  ;;  %v15005_v46 = vld [vmem:[%s29016_s1 + $0x900] sm:$0xff] }
 0x397   : > { %21835 = vmatprep.subr.bf16.mxu1 %v21834_v57  ;;  %v29263_v24 = vld [vmem:[#allocation34_spill] sm:$0xff] }
 0x399   : > { %18916 = vmatmul.mubr.f32.gmra.mrb[40].mxu1 %v25509_v54  ;;  %v21846_v54 = vpack.c.bf16 %v14987_v44, %v14986_v51  ;;  %v5204_v51 = vld [vmem:[#allocation2 + $0xc1] sm:$0xff]  ;;  %v5206_v44 = vld [vmem:[#allocation2 + $0xd9] sm:$0xff] }
 0x39a   : > { %18918 = vmatprep.mubr.f32.mxu1 %v25518_v56  ;;  %21837 = vmatpush3.bf16.msra.mxu1 %v21834_v57  ;;  %v14988_v56 = vld [vmem:[%s29016_s1 + $0x880] sm:$0xff]  ;;  %v21902_v57 = vpack.c.bf16 %v15032_v6, %v15031_v2 }
 0x39b   : > { %21839 = vmatprep.subr.bf16.mxu1 %v21838_v32  ;;  %v5529_v2 = vld [vmem:[#allocation2 + $0x1a2] sm:$0xff] }
 0x39c   : > { %v15033_v6 = vld [vmem:[%s29016_s1 + $0x9e0] sm:$0xff] }
 0x39d   : > { %18919 = vmatmul.mubr.f32.gmra.mrb[42].mxu1 %v25521_v49  ;;  %v21850_v49 = vpack.c.bf16 %v14989_v43, %v14988_v56  ;;  %v5208_v56 = vld [vmem:[#allocation2 + $0xf1] sm:$0xff]  ;;  %v5209_v43 = vld [vmem:[#allocation2 + $0xf9] sm:$0xff] }
 0x39e   : > { %18921 = vmatprep.mubr.f32.mxu1 %v25524_v59  ;;  %21841 = vmatpush3.bf16.msra.mxu1 %v21838_v32  ;;  %v29253_v59 = vld [vmem:[#allocation6_spill] sm:$0xff]  ;;  %v29265_v32 = vld [vmem:[#allocation36_spill] sm:$0xff] }
 0x39f   : > { %21843 = vmatprep.subr.bf16.mxu1 %v21842_v48 }
 0x3a1   : > { %18922 = vmatmul.mubr.f32.gmra.mrb[44].mxu1 %v25527_v18  ;;  %v29254_v18 = vld [vmem:[#allocation12_spill] sm:$0xff] }
 0x3a2   : > { %18924 = vmatprep.mubr.f32.mxu1 %v25530_v61  ;;  %21845 = vmatpush3.bf16.msra.mxu1 %v21842_v48  ;;  %v29255_v61 = vld [vmem:[#allocation26_spill] sm:$0xff]  ;;  %v15003_v48 = vld [vmem:[%s29016_s1 + $0x8f8] sm:$0xff] }
 0x3a3   : > { %21847 = vmatprep.subr.bf16.mxu1 %v21846_v54 }
 0x3a5   : > { %18925 = vmatmul.mubr.f32.gmra.mrb[46].mxu1 %v25533_v25  ;;  %v4916_v25 = vld [vmem:[#allocation2 + $0x198] sm:$0xff] }
 0x3a6   : > { %18927 = vmatprep.mubr.f32.mxu1 %v25536_v14  ;;  %21849 = vmatpush3.bf16.msra.mxu1 %v21846_v54  ;;  %v29256_v14 = vld [vmem:[#allocation27_spill] sm:$0xff]  ;;  %v5207_v54 = vld [vmem:[#allocation2 + $0xe1] sm:$0xff] }
 0x3a7   : > { %21851 = vmatprep.subr.bf16.mxu1 %v21850_v49 }
 0x3a9   : > { %18928 = vmatmul.mubr.f32.gmra.mrb[48].mxu1 %v25539_v62  ;;  %v14990_v62 = vld [vmem:[%s29016_s1 + $0x890] sm:$0xff] }
 0x3aa   : > { %18930 = vmatprep.mubr.f32.mxu1 %v25542_v12  ;;  %v14991_v12 = vld [vmem:[%s29016_s1 + $0x898] sm:$0xff] }
 0x3ad   : > { %18931 = vmatmul.mubr.f32.gmra.mrb[50].mxu1 %v25545_v28  ;;  %v26068_v28 = vld [vmem:[#allocation2 + $0x8] sm:$0xff] }
 0x3ae   : > { %18933 = vmatprep.mubr.f32.mxu1 %v25548_v27  ;;  %v15021_v27 = vld [vmem:[%s29016_s1 + $0x980] sm:$0xff] }
 0x3b1   : > { %18934 = vmatmul.mubr.f32.gmra.mrb[52].mxu1 %v25551_v22  ;;  %v15022_v22 = vld [vmem:[%s29016_s1 + $0x988] sm:$0xff] }
 0x3b2   : > { %18936 = vmatprep.mubr.f32.mxu1 %v25554_v41  ;;  %v15023_v41 = vld [vmem:[%s29016_s1 + $0x990] sm:$0xff] }
 0x3b5   : > { %18937 = vmatmul.mubr.f32.gmra.mrb[54].mxu1 %v25557_v19  ;;  %v21882_v19 = vpack.c.bf16 %v15022_v22, %v15021_v27  ;;  %v5220_v27 = vld [vmem:[#allocation2 + $0x181] sm:$0xff]  ;;  %v5222_v22 = vld [vmem:[#allocation2 + $0x199] sm:$0xff] }
 0x3b6   : > { %18939 = vmatprep.mubr.f32.mxu1 %v25560_v33  ;;  %v15024_v33 = vld [vmem:[%s29016_s1 + $0x998] sm:$0xff] }
 0x3b7   : > { %v21886_v5 = vpack.c.bf16 %v15024_v33, %v15023_v41  ;;  %21883 = vmatprep.subr.bf16.mxu0 %v21882_v19  ;;  %v5221_v41 = vld [vmem:[#allocation2 + $0x189] sm:$0xff]  ;;  %v5498_v33 = vld [vmem:[#allocation2 + $0x32] sm:$0xff] }
 0x3b8   : > { %21885 = vmatpush3.bf16.msra.mxu0 %v21882_v19  ;;  %v5223_v19 = vld [vmem:[#allocation2 + $0x1a1] sm:$0xff] }
 0x3b9   : > { %18940 = vmatmul.mubr.f32.gmra.mrb[56].mxu1 %v25563_v47  ;;  %v21854_v47 = vpack.c.bf16 %v14991_v12, %v14990_v62  ;;  %21887 = vmatprep.subr.bf16.mxu0 %v21886_v5  ;;  %v5218_v62 = vld [vmem:[#allocation2 + $0x169] sm:$0xff]  ;;  %v5219_v12 = vld [vmem:[#allocation2 + $0x171] sm:$0xff] }
 0x3ba   : > { %18942 = vmatprep.mubr.f32.mxu1 %v29253_v59  ;;  %v5212_v59 = vld [vmem:[#allocation2 + $0x121] sm:$0xff] }
 0x3bc   : > { %21889 = vmatpush3.bf16.msra.mxu0 %v21886_v5  ;;  %v5501_v5 = vld [vmem:[#allocation2 + $0x52] sm:$0xff] }
 0x3bd   : > { %18943 = vmatmul.mubr.f32.gmra.mrb[58].mxu1 %v29254_v18  ;;  %v5213_v18 = vld [vmem:[#allocation2 + $0x129] sm:$0xff] }
 0x3be   : > { %18945 = vmatprep.mubr.f32.mxu1 %v29255_v61  ;;  %v5215_v61 = vld [vmem:[#allocation2 + $0x141] sm:$0xff] }
 0x3c1   : > { %18946 = vmatmul.mubr.f32.gmra.mrb[60].mxu1 %v29256_v14  ;;  %v5217_v14 = vld [vmem:[#allocation2 + $0x159] sm:$0xff] }
 0x3c2   : > { %18948 = vmatprep.mubr.f32.mxu1 %v4916_v25  ;;  %v5216_v25 = vld [vmem:[#allocation2 + $0x151] sm:$0xff] }
 0x3c5   : > { %18949 = vmatmul.mubr.f32.gmra.mrb[62].mxu1 %v26068_v28 }
 0x3c6   : > { %18983 = vmatprep.mubr.f32.mxu1 %v25806_v42  ;;  %v15025_v42 = vld [vmem:[%s29016_s1 + $0x9a0] sm:$0xff] }
 0x3c7   : > { %v21890_v45 = vpack.c.bf16 %v15026_v34, %v15025_v42  ;;  %v5503_v42 = vld [vmem:[#allocation2 + $0x6a] sm:$0xff]  ;;  %v5504_v34 = vld [vmem:[#allocation2 + $0x7a] sm:$0xff] }
 0x3c9   : > { %18984 = vmatmul.mubr.f32.vlgmr.msra.gmra.mrb[32].mxu1 %v29257_v13  ;;  %21891 = vmatprep.subr.bf16.mxu0 %v21890_v45  ;;  %v5505_v13 = vld [vmem:[#allocation2 + $0x82] sm:$0xff] }
 0x3ca   : > { %18986 = vmatprep.mubr.f32.mxu1 %v29258_v9  ;;  %21853 = vmatpush3.bf16.msra.mxu1 %v21850_v49  ;;  %v5211_v49 = vld [vmem:[#allocation2 + $0x111] sm:$0xff] }
 0x3cb   : > { %21855 = vmatprep.subr.bf16.mxu1 %v21854_v47  ;;  %21893 = vmatpush3.bf16.msra.mxu0 %v21890_v45  ;;  %v5506_v9 = vld [vmem:[#allocation2 + $0x92] sm:$0xff] }
 0x3cc   : > { %21895 = vmatprep.subr.bf16.mxu0 %v21894_v53  ;;  %v5509_v45 = vld [vmem:[#allocation2 + $0xb2] sm:$0xff] }
 0x3cd   : > { %18987 = vmatmul.mubr.f32.gmra.mrb[34].mxu1 %v29259_v37  ;;  %v5513_v37 = vld [vmem:[#allocation2 + $0xe2] sm:$0xff] }
 0x3ce   : > { %18989 = vmatprep.mubr.f32.mxu1 %v29260_v23  ;;  %21857 = vmatpush3.bf16.msra.mxu1 %v21854_v47  ;;  %v5499_v47 = vld [vmem:[#allocation2 + $0x3a] sm:$0xff]  ;;  %v5514_v23 = vld [vmem:[#allocation2 + $0xf2] sm:$0xff] }
 0x3cf   : > { %21859 = vmatprep.subr.bf16.mxu1 %v21858_v11  ;;  %21897 = vmatpush3.bf16.msra.mxu0 %v21894_v53  ;;  %v5517_v53 = vld [vmem:[#allocation2 + $0x112] sm:$0xff] }
 0x3d0   : > { %21899 = vmatprep.subr.bf16.mxu0 %v21898_v50 }
 0x3d1   : > { %18990 = vmatmul.mubr.f32.gmra.mrb[36].mxu1 %v29261_v3  ;;  %v5521_v3 = vld [vmem:[#allocation2 + $0x142] sm:$0xff] }
 0x3d2   : > { %18992 = vmatprep.mubr.f32.mxu1 %v29262_v29  ;;  %21861 = vmatpush3.bf16.msra.mxu1 %v21858_v11  ;;  %v5507_v11 = vld [vmem:[#allocation2 + $0x9a] sm:$0xff]  ;;  %v5522_v29 = vld [vmem:[#allocation2 + $0x152] sm:$0xff] }
 0x3d3   : > { %21863 = vmatprep.subr.bf16.mxu1 %v21862_v38  ;;  %21901 = vmatpush3.bf16.msra.mxu0 %v21898_v50  ;;  %v5525_v50 = vld [vmem:[#allocation2 + $0x172] sm:$0xff] }
 0x3d4   : > { %21903 = vmatprep.subr.bf16.mxu0 %v21902_v57 }
 0x3d5   : > { %18993 = vmatmul.mubr.f32.gmra.mrb[38].mxu1 %v29263_v24  ;;  %v15034_v24 = vld [vmem:[%s29016_s1 + $0x9e8] sm:$0xff] }
 0x3d6   : > { %18995 = vmatprep.mubr.f32.mxu1 %v29264_v8  ;;  %21865 = vmatpush3.bf16.msra.mxu1 %v21862_v38  ;;  %v5515_v38 = vld [vmem:[#allocation2 + $0xfa] sm:$0xff]  ;;  %v21906_v8 = vpack.c.bf16 %v15034_v24, %v15033_v6 }
 0x3d7   : > { %21867 = vmatprep.subr.bf16.mxu1 %v21866_v55  ;;  %21905 = vmatpush3.bf16.msra.mxu0 %v21902_v57  ;;  %v5955_v57 = vld [vmem:[#allocation3 + $0x1] sm:$0xff] }
 0x3d8   : > { %21907 = vmatprep.subr.bf16.mxu0 %v21906_v8  ;;  %19143 = vmatprep.mubr.f32.mxu0 %v5955_v57 }
 0x3d9   : > { %18996 = vmatmul.mubr.f32.gmra.mrb[40].mxu1 %v25857_v39  ;;  %v21878_v39 = vpack.c.bf16 %v15003_v48, %v15002_v52  ;;  %v15007_v52 = vld [vmem:[%s29016_s1 + $0x910] sm:$0xff]  ;;  %v15008_v48 = vld [vmem:[%s29016_s1 + $0x918] sm:$0xff] }
 0x3da   : > { %18998 = vmatprep.mubr.f32.mxu1 %v29265_v32  ;;  %21869 = vmatpush3.bf16.msra.mxu1 %v21866_v55  ;;  %v5523_v55 = vld [vmem:[#allocation2 + $0x15a] sm:$0xff]  ;;  %v15006_v32 = vld [vmem:[%s29016_s1 + $0x908] sm:$0xff] }
 0x3db   : > { %21871 = vmatprep.subr.bf16.mxu1 %v21870_v0  ;;  %21909 = vmatpush3.bf16.msra.mxu0 %v21906_v8 }
 0x3dd   : > { %18999 = vmatmul.mubr.f32.gmra.mrb[42].mxu1 %v25869_v17  ;;  %v5210_v17 = vld [vmem:[#allocation2 + $0x109] sm:$0xff] }
 0x3de   : > { %19001 = vmatprep.mubr.f32.mxu1 %v5204_v51  ;;  %21873 = vmatpush3.bf16.msra.mxu1 %v21870_v0  ;;  %v21918_v51 = vpack.c.bf16 %v15008_v48, %v15007_v52 }
 0x3df   : > { %21875 = vmatprep.subr.bf16.mxu1 %v21874_v1 }
 0x3e1   : > { %19002 = vmatmul.mubr.f32.gmra.mrb[44].mxu1 %v25879_v31  ;;  %v5214_v31 = vld [vmem:[#allocation2 + $0x139] sm:$0xff] }
 0x3e2   : > { %19004 = vmatprep.mubr.f32.mxu1 %v5206_v44  ;;  %21877 = vmatpush3.bf16.msra.mxu1 %v21874_v1  ;;  %v21914_v1 = vpack.c.bf16 %v15006_v32, %v15005_v46  ;;  %v15010_v44 = vld [vmem:[%s29016_s1 + $0x928] sm:$0xff] }
 0x3e3   : > { %21879 = vmatprep.subr.bf16.mxu1 %v21878_v39 }
 0x3e5   : > { %19005 = vmatmul.mubr.f32.gmra.mrb[46].mxu1 %v5207_v54 }
 0x3e6   : > { %19007 = vmatprep.mubr.f32.mxu1 %v5208_v56  ;;  %21881 = vmatpush3.bf16.msra.mxu1 %v21878_v39  ;;  %v15009_v39 = vld [vmem:[%s29016_s1 + $0x920] sm:$0xff]  ;;  %v15011_v56 = vld [vmem:[%s29016_s1 + $0x930] sm:$0xff] }
 0x3e7   : > { %v21922_v54 = vpack.c.bf16 %v15010_v44, %v15009_v39 }
 0x3e9   : > { %19008 = vmatmul.mubr.f32.gmra.mrb[48].mxu1 %v5209_v43  ;;  %v15012_v43 = vld [vmem:[%s29016_s1 + $0x938] sm:$0xff] }
 0x3ea   : > { %19010 = vmatprep.mubr.f32.mxu1 %v5210_v17  ;;  %v21926_v17 = vpack.c.bf16 %v15012_v43, %v15011_v56 }
 0x3ed   : > { %19011 = vmatmul.mubr.f32.gmra.mrb[50].mxu1 %v5211_v49  ;;  %v15013_v49 = vld [vmem:[%s29016_s1 + $0x940] sm:$0xff] }
 0x3ee   : > { %19013 = vmatprep.mubr.f32.mxu1 %v5212_v59  ;;  %v15014_v59 = vld [vmem:[%s29016_s1 + $0x948] sm:$0xff] }
 0x3f1   : > { %19014 = vmatmul.mubr.f32.gmra.mrb[52].mxu1 %v5213_v18  ;;  %v21930_v18 = vpack.c.bf16 %v15014_v59, %v15013_v49 }
 0x3f2   : > { %19016 = vmatprep.mubr.f32.mxu1 %v5214_v31  ;;  %v15015_v31 = vld [vmem:[%s29016_s1 + $0x950] sm:$0xff] }
 0x3f5   : > { %19017 = vmatmul.mubr.f32.gmra.mrb[54].mxu1 %v5215_v61  ;;  %v15016_v61 = vld [vmem:[%s29016_s1 + $0x958] sm:$0xff] }
 0x3f6   : > { %19019 = vmatprep.mubr.f32.mxu1 %v5216_v25  ;;  %v21934_v25 = vpack.c.bf16 %v15016_v61, %v15015_v31 }
 0x3f9   : > { %19020 = vmatmul.mubr.f32.gmra.mrb[56].mxu1 %v5217_v14  ;;  %v15017_v14 = vld [vmem:[%s29016_s1 + $0x960] sm:$0xff] }
 0x3fa   : > { %19022 = vmatprep.mubr.f32.mxu1 %v5218_v62  ;;  %v15018_v62 = vld [vmem:[%s29016_s1 + $0x968] sm:$0xff] }
 0x3fd   : > { %19023 = vmatmul.mubr.f32.gmra.mrb[58].mxu1 %v5219_v12  ;;  %v21938_v12 = vpack.c.bf16 %v15018_v62, %v15017_v14 }
 0x3fe   : > { %19025 = vmatprep.mubr.f32.mxu1 %v5220_v27  ;;  %v15019_v27 = vld [vmem:[%s29016_s1 + $0x970] sm:$0xff] }
 0x401   : > { %19026 = vmatmul.mubr.f32.gmra.mrb[60].mxu1 %v5221_v41 }
 0x402   : > { %19028 = vmatprep.mubr.f32.mxu1 %v5222_v22  ;;  %v15020_v22 = vld [vmem:[%s29016_s1 + $0x978] sm:$0xff] }
 0x403   : > { %v21942_v41 = vpack.c.bf16 %v15020_v22, %v15019_v27 }
 0x405   : > { %19029 = vmatmul.mubr.f32.gmra.mrb[62].mxu1 %v5223_v19  ;;  %v15037_v19 = vld [vmem:[%s29016_s1 + $0xa00] sm:$0xff] }
 0x406   : > { %19063 = vmatprep.mubr.f32.mxu1 %v5498_v33  ;;  %v15038_v33 = vld [vmem:[%s29016_s1 + $0xa08] sm:$0xff] }
 0x409   : > { %19064 = vmatmul.mubr.f32.vlgmr.msra.gmra.mrb[32].mxu1 %v5499_v47  ;;  %v26224_v47 = vpack.c.bf16 %v15038_v33, %v15037_v19 }
 0x40a   : > { %19066 = vmatprep.mubr.f32.mxu1 %v5500_v21  ;;  %v26230_v21 = vld [vmem:[%s29017_s2 + $0x1] ss:$0 sm:$0xff] }
 0x40d   : > { %19067 = vmatmul.mubr.f32.gmra.mrb[34].mxu1 %v5501_v5 }
 0x40e   : > { %19069 = vmatprep.mubr.f32.mxu1 %v5502_v15 }
 0x411   : > { %19070 = vmatmul.mubr.f32.gmra.mrb[36].mxu1 %v5503_v42 }
 0x412   : > { %19072 = vmatprep.mubr.f32.mxu1 %v5504_v34 }
 0x415   : > { %19073 = vmatmul.mubr.f32.gmra.mrb[38].mxu1 %v5505_v13 }
 0x416   : > { %19075 = vmatprep.mubr.f32.mxu1 %v5506_v9 }
 0x419   : > { %19076 = vmatmul.mubr.f32.gmra.mrb[40].mxu1 %v5507_v11 }
 0x41a   : > { %19078 = vmatprep.mubr.f32.mxu1 %v5508_v35 }
 0x41d   : > { %19079 = vmatmul.mubr.f32.gmra.mrb[42].mxu1 %v5509_v45 }
 0x41e   : > { %19081 = vmatprep.mubr.f32.mxu1 %v5510_v26 }
 0x421   : > { %19082 = vmatmul.mubr.f32.gmra.mrb[44].mxu1 %v5511_v36 }
 0x422   : > { %19084 = vmatprep.mubr.f32.mxu1 %v5512_v16 }
 0x425   : > { %19085 = vmatmul.mubr.f32.gmra.mrb[46].mxu1 %v5513_v37 }
 0x426   : > { %19087 = vmatprep.mubr.f32.mxu1 %v5514_v23 }
 0x429   : > { %19088 = vmatmul.mubr.f32.gmra.mrb[48].mxu1 %v5515_v38 }
 0x42a   : > { %19090 = vmatprep.mubr.f32.mxu1 %v5516_v40 }
 0x42d   : > { %19091 = vmatmul.mubr.f32.gmra.mrb[50].mxu1 %v5517_v53 }
 0x42e   : > { %19093 = vmatprep.mubr.f32.mxu1 %v5518_v58 }
 0x431   : > { %19094 = vmatmul.mubr.f32.gmra.mrb[52].mxu1 %v5519_v4 }
 0x432   : > { %19096 = vmatprep.mubr.f32.mxu1 %v5520_v10 }
 0x435   : > { %19097 = vmatmul.mubr.f32.gmra.mrb[54].mxu1 %v5521_v3 }
 0x436   : > { %19099 = vmatprep.mubr.f32.mxu1 %v5522_v29 }
 0x439   : > { %19100 = vmatmul.mubr.f32.gmra.mrb[56].mxu1 %v5523_v55 }
 0x43a   : > { %19102 = vmatprep.mubr.f32.mxu1 %v5524_v63 }
 0x43d   : > { %19103 = vmatmul.mubr.f32.gmra.mrb[58].mxu1 %v5525_v50 }
 0x43e   : > { %19105 = vmatprep.mubr.f32.mxu1 %v25978_v20  ;;  %v15035_v20 = vld [vmem:[%s29016_s1 + $0x9f0] sm:$0xff] }
 0x441   : > { %19106 = vmatmul.mubr.f32.gmra.mrb[60].mxu1 %v25981_v7  ;;  %v15036_v7 = vld [vmem:[%s29016_s1 + $0x9f8] sm:$0xff] }
 0x442   : > { %19108 = vmatprep.mubr.f32.mxu1 %v5528_v60  ;;  %v21910_v0 = vpack.c.bf16 %v15036_v7, %v15035_v20 }
 0x444   : > { %21911 = vmatprep.subr.bf16.mxu0 %v21910_v0 }
 0x445   : > { %19109 = vmatmul.mubr.f32.gmra.mrb[62].mxu1 %v5529_v2  ;;  %21913 = vmatpush3.bf16.msra.mxu0 %v21910_v0 }
 0x446   : > { %21915 = vmatprep.subr.bf16.mxu0 %v21914_v1 }
 0x448   : > { %19144 = vmatmul.mubr.f32.vlgmr.msra.gmra.mrb[32].mxu0 %v5956_v30 }
 0x449   : > { %21917 = vmatpush3.bf16.msra.mxu0 %v21914_v1 }
 0x44a   : > { %21919 = vmatprep.subr.bf16.mxu0 %v21918_v51 }
 0x44d   : > { %21921 = vmatpush3.bf16.msra.mxu0 %v21918_v51 }
 0x44e   : > { %21923 = vmatprep.subr.bf16.mxu0 %v21922_v54 }
 0x451   : > { %21925 = vmatpush3.bf16.msra.mxu0 %v21922_v54 }
 0x452   : > { %21927 = vmatprep.subr.bf16.mxu0 %v21926_v17 }
 0x455   : > { %21929 = vmatpush3.bf16.msra.mxu0 %v21926_v17 }
 0x456   : > { %21931 = vmatprep.subr.bf16.mxu0 %v21930_v18 }
 0x459   : > { %21933 = vmatpush3.bf16.msra.mxu0 %v21930_v18 }
 0x45a   : > { %21935 = vmatprep.subr.bf16.mxu0 %v21934_v25 }
 0x45d   : > { %21937 = vmatpush3.bf16.msra.mxu0 %v21934_v25 }
 0x45e   : > { %21939 = vmatprep.subr.bf16.mxu0 %v21938_v12 }
 0x461   : > { %21941 = vmatpush3.bf16.msra.mxu0 %v21938_v12 }
 0x462   : > { %21943 = vmatprep.subr.bf16.mxu0 %v21942_v41 }
 0x465   : > { %21945 = vmatpush3.bf16.msra.mxu0 %v21942_v41 }
 0x466   : > { %21947 = vmatprep.subr.bf16.mxu0 %v26224_v47 }
 0x4dc   : > { %v19065_v5 = vpop.f32.mrb[32].mxu1 }
 0x4dd   : > { %v5810_v15 = vadd.f32 %v19065_v5, %v26230_v21  ;;  %v5613_v42 = vpop.f32.mrb[33].mxu1 }
 0x4de   : > { %v5809_v34 = vadd.f32 %v26230_v21, %v5613_v42 }
 0x4df   : > { %v5842_v13 = vmax.f32 %v5810_v15, 0.0 }
 0x4e0   : > { %v5841_v9 = vmax.f32 %v5809_v34, 0.0  ;;  %v19068_v11 = vpop.f32.mrb[34].mxu1 }
 0x4e1   : > { %5875 = vst [vmem:[#allocation3 + $0x21] sm:$0xff] %v5842_v13  ;;  %v5812_v35 = vadd.f32 %v19068_v11, %v26230_v21  ;;  %v5623_v45 = vpop.f32.mrb[35].mxu1 }
 0x4e2   : > { %5874 = vst [vmem:[#allocation3 + $0x19] sm:$0xff] %v5841_v9  ;;  %v5811_v26 = vadd.f32 %v26230_v21, %v5623_v45  ;;  %19146 = vmatprep.mubr.f32.mxu0 %v5841_v9 }
 0x4e3   : > { %v5844_v36 = vmax.f32 %v5812_v35, 0.0  ;;  %19147 = vmatmul.mubr.f32.gmra.mrb[34].mxu0 %v5842_v13 }
 0x4e4   : > { %v5843_v16 = vmax.f32 %v5811_v26, 0.0  ;;  %v19071_v37 = vpop.f32.mrb[36].mxu1 }
 0x4e5   : > { %5877 = vst [vmem:[#allocation3 + $0x39] sm:$0xff] %v5844_v36  ;;  %v5814_v23 = vadd.f32 %v19071_v37, %v26230_v21  ;;  %v5633_v38 = vpop.f32.mrb[37].mxu1 }
 0x4e6   : > { %5876 = vst [vmem:[#allocation3 + $0x31] sm:$0xff] %v5843_v16  ;;  %v5813_v40 = vadd.f32 %v26230_v21, %v5633_v38  ;;  %19149 = vmatprep.mubr.f32.mxu0 %v5843_v16 }
 0x4e7   : > { %v5846_v53 = vmax.f32 %v5814_v23, 0.0  ;;  %19150 = vmatmul.mubr.f32.gmra.mrb[36].mxu0 %v5844_v36 }
 0x4e8   : > { %v5845_v58 = vmax.f32 %v5813_v40, 0.0  ;;  %v19074_v4 = vpop.f32.mrb[38].mxu1 }
 0x4e9   : > { %5879 = vst [vmem:[#allocation3 + $0x51] sm:$0xff] %v5846_v53  ;;  %v5816_v10 = vadd.f32 %v19074_v4, %v26230_v21  ;;  %v5643_v3 = vpop.f32.mrb[39].mxu1 }
 0x4ea   : > { %5878 = vst [vmem:[#allocation3 + $0x49] sm:$0xff] %v5845_v58  ;;  %v5815_v29 = vadd.f32 %v26230_v21, %v5643_v3  ;;  %19152 = vmatprep.mubr.f32.mxu0 %v5845_v58 }
 0x4eb   : > { %v5848_v55 = vmax.f32 %v5816_v10, 0.0  ;;  %19153 = vmatmul.mubr.f32.gmra.mrb[38].mxu0 %v5846_v53 }
 0x4ec   : > { %v5847_v63 = vmax.f32 %v5815_v29, 0.0  ;;  %v19077_v50 = vpop.f32.mrb[40].mxu1 }
 0x4ed   : > { %5881 = vst [vmem:[#allocation3 + $0x69] sm:$0xff] %v5848_v55  ;;  %v5818_v60 = vadd.f32 %v19077_v50, %v26230_v21  ;;  %v5653_v2 = vpop.f32.mrb[41].mxu1 }
 0x4ee   : > { %5880 = vst [vmem:[#allocation3 + $0x61] sm:$0xff] %v5847_v63  ;;  %v5817_v6 = vadd.f32 %v26230_v21, %v5653_v2  ;;  %19155 = vmatprep.mubr.f32.mxu0 %v5847_v63 }
 0x4ef   : > { %v5850_v24 = vmax.f32 %v5818_v60, 0.0  ;;  %19156 = vmatmul.mubr.f32.gmra.mrb[40].mxu0 %v5848_v55 }
 0x4f0   : > { %v5849_v8 = vmax.f32 %v5817_v6, 0.0  ;;  %v19080_v20 = vpop.f32.mrb[42].mxu1 }
 0x4f1   : > { %5883 = vst [vmem:[#allocation3 + $0x81] sm:$0xff] %v5850_v24  ;;  %v5820_v7 = vadd.f32 %v19080_v20, %v26230_v21  ;;  %v5663_v0 = vpop.f32.mrb[43].mxu1 }
 0x4f2   : > { %5882 = vst [vmem:[#allocation3 + $0x79] sm:$0xff] %v5849_v8  ;;  %v5819_v57 = vadd.f32 %v26230_v21, %v5663_v0  ;;  %19158 = vmatprep.mubr.f32.mxu0 %v5849_v8  ;;  %v5906_v0 = vld [vmem:[#allocation3] sm:$0xff] }
 0x4f3   : > { %v26244_v30 = vmax.f32 %v5820_v7, 0.0  ;;  %19159 = vmatmul.mubr.f32.gmra.mrb[42].mxu0 %v5850_v24 }
 0x4f4   : > { %v26246_v46 = vmax.f32 %v5819_v57, 0.0  ;;  %v19083_v32 = vpop.f32.mrb[44].mxu1 }
 0x4f5   : > { %5885 = vst [vmem:[#allocation3 + $0x99] sm:$0xff] %v26244_v30  ;;  %v5822_v1 = vadd.f32 %v19083_v32, %v26230_v21  ;;  %v5673_v52 = vpop.f32.mrb[45].mxu1  ;;  %v15039_v32 = vld [vmem:[%s29016_s1 + $0xa10] sm:$0xff] }
 0x4f6   : > { %5884 = vst [vmem:[#allocation3 + $0x91] sm:$0xff] %v26246_v46  ;;  %v5821_v48 = vadd.f32 %v26230_v21, %v5673_v52  ;;  %19161 = vmatprep.mubr.f32.mxu0 %v26246_v46 }
 0x4f7   : > { %v26253_v51 = vmax.f32 %v5822_v1, 0.0  ;;  %19162 = vmatmul.mubr.f32.gmra.mrb[44].mxu0 %v26244_v30  ;;  %v15040_v1 = vld [vmem:[%s29016_s1 + $0xa18] sm:$0xff] }
 0x4f8   : > { %v26256_v39 = vmax.f32 %v5821_v48, 0.0  ;;  %v19086_v44 = vpop.f32.mrb[46].mxu1 }
 0x4f9   : > { %5887 = vst [vmem:[#allocation3 + $0xb1] sm:$0xff] %v26253_v51  ;;  %v5824_v54 = vadd.f32 %v19086_v44, %v26230_v21  ;;  %v5683_v56 = vpop.f32.mrb[47].mxu1  ;;  %v15041_v44 = vld [vmem:[%s29016_s1 + $0xa20] sm:$0xff] }
 0x4fa   : > { %5886 = vst [vmem:[#allocation3 + $0xa9] sm:$0xff] %v26256_v39  ;;  %v5823_v43 = vadd.f32 %v26230_v21, %v5683_v56  ;;  %19164 = vmatprep.mubr.f32.mxu0 %v26256_v39  ;;  %v26367_v56 = vld [vmem:[#allocation3 + $0x18] sm:$0xff] }
 0x4fb   : > { %v26263_v17 = vmax.f32 %v5824_v54, 0.0  ;;  %19165 = vmatmul.mubr.f32.gmra.mrb[46].mxu0 %v26253_v51  ;;  %v15042_v54 = vld [vmem:[%s29016_s1 + $0xa28] sm:$0xff] }
 0x4fc   : > { %v26266_v49 = vmax.f32 %v5823_v43, 0.0  ;;  %v19089_v59 = vpop.f32.mrb[48].mxu1  ;;  %v21954_v43 = vpack.c.bf16 %v15042_v54, %v15041_v44 }
 0x4fd   : > { %5889 = vst [vmem:[#allocation3 + $0xc9] sm:$0xff] %v26263_v17  ;;  %v5826_v18 = vadd.f32 %v19089_v59, %v26230_v21  ;;  %v5693_v31 = vpop.f32.mrb[49].mxu1  ;;  %v26371_v59 = vld [vmem:[#allocation3 + $0x20] sm:$0xff] }
 0x4fe   : > { %5888 = vst [vmem:[#allocation3 + $0xc1] sm:$0xff] %v26266_v49  ;;  %v5825_v61 = vadd.f32 %v26230_v21, %v5693_v31  ;;  %19167 = vmatprep.mubr.f32.mxu0 %v26266_v49  ;;  %v15044_v31 = vld [vmem:[%s29016_s1 + $0xa38] sm:$0xff] }
 0x4ff   : > { %v26273_v25 = vmax.f32 %v5826_v18, 0.0  ;;  %19168 = vmatmul.mubr.f32.gmra.mrb[48].mxu0 %v26263_v17  ;;  %v15043_v18 = vld [vmem:[%s29016_s1 + $0xa30] sm:$0xff] }
 0x500   : > { %v26276_v14 = vmax.f32 %v5825_v61, 0.0  ;;  %v19092_v62 = vpop.f32.mrb[50].mxu1  ;;  %v26383_v61 = vld [vmem:[#allocation3 + $0x38] sm:$0xff] }
 0x501   : > { %5891 = vst [vmem:[#allocation3 + $0xe1] sm:$0xff] %v26273_v25  ;;  %v5828_v12 = vadd.f32 %v19092_v62, %v26230_v21  ;;  %v5703_v27 = vpop.f32.mrb[51].mxu1  ;;  %v15045_v62 = vld [vmem:[%s29016_s1 + $0xa40] sm:$0xff] }
 0x502   : > { %5890 = vst [vmem:[#allocation3 + $0xd9] sm:$0xff] %v26276_v14  ;;  %v5827_v22 = vadd.f32 %v26230_v21, %v5703_v27  ;;  %19170 = vmatprep.mubr.f32.mxu0 %v26276_v14  ;;  %v26392_v27 = vld [vmem:[#allocation3 + $0x48] sm:$0xff] }
 0x503   : > { %v26283_v41 = vmax.f32 %v5828_v12, 0.0  ;;  %19171 = vmatmul.mubr.f32.gmra.mrb[50].mxu0 %v26273_v25  ;;  %v15046_v12 = vld [vmem:[%s29016_s1 + $0xa48] sm:$0xff] }
 0x504   : > { %v26286_v19 = vmax.f32 %v5827_v22, 0.0  ;;  %v19095_v33 = vpop.f32.mrb[52].mxu1  ;;  %v21962_v22 = vpack.c.bf16 %v15046_v12, %v15045_v62 }
 0x505   : > { %5893 = vst [vmem:[#allocation3 + $0xf9] sm:$0xff] %v26283_v41  ;;  %v5830_v5 = vadd.f32 %v19095_v33, %v26230_v21  ;;  %v5713_v15 = vpop.f32.mrb[53].mxu1  ;;  %v26395_v33 = vld [vmem:[#allocation3 + $0x50] sm:$0xff] }
 0x506   : > { %5892 = vst [vmem:[#allocation3 + $0xf1] sm:$0xff] %v26286_v19  ;;  %v5829_v42 = vadd.f32 %v26230_v21, %v5713_v15  ;;  %19173 = vmatprep.mubr.f32.mxu0 %v26286_v19  ;;  %v15048_v15 = vld [vmem:[%s29016_s1 + $0xa58] sm:$0xff] }
 0x507   : > { %v26293_v34 = vmax.f32 %v5830_v5, 0.0  ;;  %19174 = vmatmul.mubr.f32.gmra.mrb[52].mxu0 %v26283_v41  ;;  %v15047_v5 = vld [vmem:[%s29016_s1 + $0xa50] sm:$0xff] }
 0x508   : > { %v26296_v13 = vmax.f32 %v5829_v42, 0.0  ;;  %v19098_v9 = vpop.f32.mrb[54].mxu1  ;;  %v26404_v42 = vld [vmem:[#allocation3 + $0x60] sm:$0xff] }
 0x509   : > { %5895 = vst [vmem:[#allocation3 + $0x111] sm:$0xff] %v26293_v34  ;;  %v5832_v11 = vadd.f32 %v19098_v9, %v26230_v21  ;;  %v5723_v35 = vpop.f32.mrb[55].mxu1  ;;  %v21966_v9 = vpack.c.bf16 %v15048_v15, %v15047_v5  ;;  %v6454_v15 = vld [vmem:[#allocation3 + $0x2] sm:$0xff] }
 0x50a   : > { %5894 = vst [vmem:[#allocation3 + $0x109] sm:$0xff] %v26296_v13  ;;  %v5831_v45 = vadd.f32 %v26230_v21, %v5723_v35  ;;  %19176 = vmatprep.mubr.f32.mxu0 %v26296_v13  ;;  %v15049_v35 = vld [vmem:[%s29016_s1 + $0xa60] sm:$0xff] }
 0x50b   : > { %v26303_v26 = vmax.f32 %v5832_v11, 0.0  ;;  %19177 = vmatmul.mubr.f32.gmra.mrb[54].mxu0 %v26293_v34  ;;  %v26407_v11 = vld [vmem:[#allocation3 + $0x68] sm:$0xff] }
 0x50c   : > { %v26306_v36 = vmax.f32 %v5831_v45, 0.0  ;;  %v19101_v16 = vpop.f32.mrb[56].mxu1  ;;  %v15050_v45 = vld [vmem:[%s29016_s1 + $0xa68] sm:$0xff] }
 0x50d   : > { %5897 = vst [vmem:[#allocation3 + $0x129] sm:$0xff] %v26303_v26  ;;  %v5834_v37 = vadd.f32 %v19101_v16, %v26230_v21  ;;  %v5733_v23 = vpop.f32.mrb[57].mxu1  ;;  %v26416_v16 = vld [vmem:[#allocation3 + $0x78] sm:$0xff] }
 0x50e   : > { %5896 = vst [vmem:[#allocation3 + $0x121] sm:$0xff] %v26306_v36  ;;  %v5833_v38 = vadd.f32 %v26230_v21, %v5733_v23  ;;  %19179 = vmatprep.mubr.f32.mxu0 %v26306_v36  ;;  %v26419_v23 = vld [vmem:[#allocation3 + $0x80] sm:$0xff]  ;;  %v26461_v44 = vld [vmem:[#allocation3 + $0xf8] sm:$0xff] }
 0x50f   : > { %v26313_v40 = vmax.f32 %v5834_v37, 0.0  ;;  %19180 = vmatmul.mubr.f32.gmra.mrb[56].mxu0 %v26303_v26  ;;  %v21970_v37 = vpack.c.bf16 %v15050_v45, %v15049_v35  ;;  %v15055_v35 = vld [vmem:[%s29016_s1 + $0xa90] sm:$0xff]  ;;  %v15056_v45 = vld [vmem:[%s29016_s1 + $0xa98] sm:$0xff] }
 0x510   : > { %v26316_v53 = vmax.f32 %v5833_v38, 0.0  ;;  %v19104_v58 = vpop.f32.mrb[58].mxu1  ;;  %v15051_v38 = vld [vmem:[%s29016_s1 + $0xa70] sm:$0xff] }
 0x511   : > { %5899 = vst [vmem:[#allocation3 + $0x141] sm:$0xff] %v26313_v40  ;;  %v5836_v4 = vadd.f32 %v19104_v58, %v26230_v21  ;;  %v5743_v10 = vpop.f32.mrb[59].mxu1  ;;  %v15052_v58 = vld [vmem:[%s29016_s1 + $0xa78] sm:$0xff] }
 0x512   : > { %5898 = vst [vmem:[#allocation3 + $0x139] sm:$0xff] %v26316_v53  ;;  %v5835_v3 = vadd.f32 %v26230_v21, %v5743_v10  ;;  %19182 = vmatprep.mubr.f32.mxu0 %v26316_v53  ;;  %v21974_v10 = vpack.c.bf16 %v15052_v58, %v15051_v38  ;;  %v26464_v54 = vld [vmem:[#allocation3 + $0x108] sm:$0xff]  ;;  %v21982_v38 = vpack.c.bf16 %v15056_v45, %v15055_v35  ;;  %v15057_v58 = vld [vmem:[%s29016_s1 + $0xaa0] sm:$0xff] }
 0x513   : > { %v26323_v29 = vmax.f32 %v5836_v4, 0.0  ;;  %19183 = vmatmul.mubr.f32.gmra.mrb[58].mxu0 %v26313_v40  ;;  %v26428_v4 = vld [vmem:[#allocation3 + $0x90] sm:$0xff]  ;;  %v15060_v35 = vld [vmem:[%s29016_s1 + $0xab8] sm:$0xff] }
 0x514   : > { %v26326_v55 = vmax.f32 %v5835_v3, 0.0  ;;  %v19107_v63 = vpop.f32.mrb[60].mxu1  ;;  %v26431_v3 = vld [vmem:[#allocation3 + $0x98] sm:$0xff] }
 0x515   : > { %5901 = vst [vmem:[#allocation3 + $0x159] sm:$0xff] %v26323_v29  ;;  %v5838_v50 = vadd.f32 %v19107_v63, %v26230_v21  ;;  %v5753_v60 = vpop.f32.mrb[61].mxu1  ;;  %v15053_v63 = vld [vmem:[%s29016_s1 + $0xa80] sm:$0xff] }
 0x516   : > { %5900 = vst [vmem:[#allocation3 + $0x151] sm:$0xff] %v26326_v55  ;;  %v5837_v2 = vadd.f32 %v26230_v21, %v5753_v60  ;;  %19185 = vmatprep.mubr.f32.mxu0 %v26326_v55  ;;  %v26440_v60 = vld [vmem:[#allocation3 + $0xa8] sm:$0xff]  ;;  %v26518_v45 = vld [vmem:[#allocation3 + $0x32] sm:$0xff] }
 0x517   : > { %v26333_v6 = vmax.f32 %v5838_v50, 0.0  ;;  %19186 = vmatmul.mubr.f32.gmra.mrb[60].mxu0 %v26323_v29  ;;  %v15054_v50 = vld [vmem:[%s29016_s1 + $0xa88] sm:$0xff]  ;;  %29268 = vst [vmem:[#allocation9_spill] sm:$0xff] %v26518_v45 }
 0x518   : > { %v26336_v24 = vmax.f32 %v5837_v2, 0.0  ;;  %v19110_v8 = vpop.f32.mrb[62].mxu1  ;;  %v21978_v2 = vpack.c.bf16 %v15054_v50, %v15053_v63  ;;  %v26506_v63 = vld [vmem:[#allocation3 + $0x1a] sm:$0xff] }
 0x519   : > { %5903 = vst [vmem:[#allocation3 + $0x171] sm:$0xff] %v26333_v6  ;;  %v26340_v20 = vadd.f32 %v19110_v8, %v26230_v21  ;;  %v5763_v7 = vpop.f32.mrb[63].mxu1  ;;  %v26443_v8 = vld [vmem:[#allocation3 + $0xb0] sm:$0xff]  ;;  %v26479_v62 = vld [vmem:[#allocation3 + $0x140] sm:$0xff] }
 0x51a   : > { %5902 = vst [vmem:[#allocation3 + $0x169] sm:$0xff] %v26336_v24  ;;  %v26344_v57 = vadd.f32 %v26230_v21, %v5763_v7  ;;  %19188 = vmatprep.mubr.f32.mxu0 %v26336_v24  ;;  %v21950_v21 = vpack.c.bf16 %v15040_v1, %v15039_v32  ;;  %v26446_v7 = vld [vmem:[#allocation3 + $0xc0] sm:$0xff]  ;;  %v26452_v32 = vld [vmem:[#allocation3 + $0xd8] sm:$0xff] }
 0x51b   : > { %v29072_v52 = vmax.f32 %v26340_v20, 0.0  ;;  %19189 = vmatmul.mubr.f32.gmra.mrb[62].mxu0 %v26333_v6  ;;  %v26455_v1 = vld [vmem:[#allocation3 + $0xe0] sm:$0xff] }
 0x51c   : > { %v29073_v48 = vmax.f32 %v26344_v57, 0.0  ;;  %19223 = vmatprep.mubr.f32.mxu0 %v5906_v0  ;;  %v26449_v0 = vld [vmem:[#allocation3 + $0xc8] sm:$0xff] }
 0x51d   : > { %5905 = vst [vmem:[#allocation3 + $0x189] sm:$0xff] %v29072_v52  ;;  %v26482_v12 = vld [vmem:[#allocation3 + $0x150] sm:$0xff]  ;;  %v26509_v52 = vld [vmem:[#allocation3 + $0x22] sm:$0xff] }
 0x51e   : > { %5904 = vst [vmem:[#allocation3 + $0x181] sm:$0xff] %v29073_v48  ;;  %v26530_v48 = vld [vmem:[#allocation3 + $0x4a] sm:$0xff] }
 0x51f   : > { %19224 = vmatmul.mubr.f32.vlgmr.msra.gmra.mrb[32].mxu0 %v26068_v28  ;;  %v26380_v28 = vld [vmem:[#allocation3 + $0x30] sm:$0xff]  ;;  %29270 = vst [vmem:[#allocation4_spill] sm:$0xff] %v26530_v48 }
 0x520   : > { %19226 = vmatprep.mubr.f32.mxu0 %v26367_v56  ;;  %21949 = vmatpush3.bf16.msra.mxu0 %v26224_v47  ;;  %v21958_v47 = vpack.c.bf16 %v15044_v31, %v15043_v18  ;;  %v26470_v18 = vld [vmem:[#allocation3 + $0x120] sm:$0xff]  ;;  %v26473_v31 = vld [vmem:[#allocation3 + $0x128] sm:$0xff] }
 0x521   : > { %21951 = vmatprep.subr.bf16.mxu0 %v21950_v21  ;;  %v26488_v5 = vld [vmem:[#allocation3 + $0x168] sm:$0xff] }
 0x522   : > { %29266 = vst [vmem:[#allocation7_spill] sm:$0xff] %v26488_v5 }
 0x523   : > { %19227 = vmatmul.mubr.f32.gmra.mrb[34].mxu0 %v26371_v59 }
 0x524   : > { %19229 = vmatprep.mubr.f32.mxu0 %v26380_v28  ;;  %21953 = vmatpush3.bf16.msra.mxu0 %v21950_v21  ;;  %v26458_v21 = vld [vmem:[#allocation3 + $0xf0] sm:$0xff] }
 0x525   : > { %21955 = vmatprep.subr.bf16.mxu0 %v21954_v43 }
 0x527   : > { %19230 = vmatmul.mubr.f32.gmra.mrb[36].mxu0 %v26383_v61 }
 0x528   : > { %19232 = vmatprep.mubr.f32.mxu0 %v26392_v27  ;;  %21957 = vmatpush3.bf16.msra.mxu0 %v21954_v43  ;;  %v26467_v43 = vld [vmem:[#allocation3 + $0x110] sm:$0xff] }
 0x529   : > { %21959 = vmatprep.subr.bf16.mxu0 %v21958_v47 }
 0x52b   : > { %19233 = vmatmul.mubr.f32.gmra.mrb[38].mxu0 %v26395_v33 }
 0x52c   : > { %19235 = vmatprep.mubr.f32.mxu0 %v26404_v42  ;;  %21961 = vmatpush3.bf16.msra.mxu0 %v21958_v47  ;;  %v26476_v47 = vld [vmem:[#allocation3 + $0x138] sm:$0xff] }
 0x52d   : > { %21963 = vmatprep.subr.bf16.mxu0 %v21962_v22 }
 0x52f   : > { %19236 = vmatmul.mubr.f32.gmra.mrb[40].mxu0 %v26407_v11 }
 0x530   : > { %19238 = vmatprep.mubr.f32.mxu0 %v26416_v16  ;;  %21965 = vmatpush3.bf16.msra.mxu0 %v21962_v22  ;;  %v26485_v22 = vld [vmem:[#allocation3 + $0x158] sm:$0xff] }
 0x531   : > { %21967 = vmatprep.subr.bf16.mxu0 %v21966_v9 }
 0x533   : > { %19239 = vmatmul.mubr.f32.gmra.mrb[42].mxu0 %v26419_v23 }
 0x534   : > { %19241 = vmatprep.mubr.f32.mxu0 %v26428_v4  ;;  %21969 = vmatpush3.bf16.msra.mxu0 %v21966_v9  ;;  %v26491_v9 = vld [vmem:[#allocation3 + $0x170] sm:$0xff] }
 0x535   : > { %21971 = vmatprep.subr.bf16.mxu0 %v21970_v37  ;;  %29267 = vst [vmem:[#allocation8_spill] sm:$0xff] %v26491_v9 }
 0x537   : > { %19242 = vmatmul.mubr.f32.gmra.mrb[44].mxu0 %v26431_v3 }
 0x538   : > { %19244 = vmatprep.mubr.f32.mxu0 %v26440_v60  ;;  %21973 = vmatpush3.bf16.msra.mxu0 %v21970_v37  ;;  %v6455_v37 = vld [vmem:[#allocation3 + $0xa] sm:$0xff] }
 0x539   : > { %21975 = vmatprep.subr.bf16.mxu0 %v21974_v10 }
 0x53b   : > { %19245 = vmatmul.mubr.f32.gmra.mrb[46].mxu0 %v26443_v8 }
 0x53c   : > { %19247 = vmatprep.mubr.f32.mxu0 %v26446_v7  ;;  %21977 = vmatpush3.bf16.msra.mxu0 %v21974_v10  ;;  %v15058_v10 = vld [vmem:[%s29016_s1 + $0xaa8] sm:$0xff] }
 0x53d   : > { %21979 = vmatprep.subr.bf16.mxu0 %v21978_v2  ;;  %v21986_v50 = vpack.c.bf16 %v15058_v10, %v15057_v58  ;;  %v15061_v58 = vld [vmem:[%s29016_s1 + $0xac0] sm:$0xff]  ;;  %v15062_v10 = vld [vmem:[%s29016_s1 + $0xac8] sm:$0xff] }
 0x53f   : > { %19248 = vmatmul.mubr.f32.gmra.mrb[48].mxu0 %v26449_v0 }
 0x540   : > { %19250 = vmatprep.mubr.f32.mxu0 %v26452_v32 }
 0x543   : > { %19251 = vmatmul.mubr.f32.gmra.mrb[50].mxu0 %v26455_v1 }
 0x544   : > { %19253 = vmatprep.mubr.f32.mxu0 %v26458_v21 }
 0x547   : > { %19254 = vmatmul.mubr.f32.gmra.mrb[52].mxu0 %v26461_v44 }
 0x548   : > { %19256 = vmatprep.mubr.f32.mxu0 %v26464_v54 }
 0x54b   : > { %19257 = vmatmul.mubr.f32.gmra.mrb[54].mxu0 %v26467_v43 }
 0x54c   : > { %19259 = vmatprep.mubr.f32.mxu0 %v26470_v18 }
 0x54f   : > { %19260 = vmatmul.mubr.f32.gmra.mrb[56].mxu0 %v26473_v31 }
 0x550   : > { %19262 = vmatprep.mubr.f32.mxu0 %v26476_v47 }
 0x553   : > { %19263 = vmatmul.mubr.f32.gmra.mrb[58].mxu0 %v26479_v62 }
 0x554   : > { %19265 = vmatprep.mubr.f32.mxu0 %v26482_v12 }
 0x557   : > { %19266 = vmatmul.mubr.f32.gmra.mrb[60].mxu0 %v26485_v22 }
 0x558   : > { %19268 = vmatprep.mubr.f32.mxu0 %v26488_v5 }
 0x55b   : > { %19269 = vmatmul.mubr.f32.gmra.mrb[62].mxu0 %v26491_v9 }
 0x55c   : > { %19303 = vmatprep.mubr.f32.mxu0 %v6454_v15  ;;  %v15059_v15 = vld [vmem:[%s29016_s1 + $0xab0] sm:$0xff] }
 0x55f   : > { %19304 = vmatmul.mubr.f32.vlgmr.msra.gmra.mrb[32].mxu0 %v6455_v37  ;;  %v26521_v37 = vld [vmem:[#allocation3 + $0x3a] sm:$0xff] }
 0x560   : > { %19306 = vmatprep.mubr.f32.mxu0 %v26506_v63  ;;  %21981 = vmatpush3.bf16.msra.mxu0 %v21978_v2  ;;  %v21990_v2 = vpack.c.bf16 %v15060_v35, %v15059_v15  ;;  %29269 = vst [vmem:[#allocation10_spill] sm:$0xff] %v26521_v37  ;;  %v26533_v15 = vld [vmem:[#allocation3 + $0x52] sm:$0xff]  ;;  %v15063_v35 = vld [vmem:[%s29016_s1 + $0xad0] sm:$0xff] }
 0x561   : > { %21983 = vmatprep.subr.bf16.mxu0 %v21982_v38  ;;  %29271 = vst [vmem:[#allocation5_spill] sm:$0xff] %v26533_v15 }
 0x563   : > { %19307 = vmatmul.mubr.f32.gmra.mrb[34].mxu0 %v26509_v52 }
 0x564   : > { %19309 = vmatprep.mubr.f32.mxu0 %v26518_v45  ;;  %21985 = vmatpush3.bf16.msra.mxu0 %v21982_v38  ;;  %v21994_v38 = vpack.c.bf16 %v15062_v10, %v15061_v58  ;;  %v15064_v45 = vld [vmem:[%s29016_s1 + $0xad8] sm:$0xff]  ;;  %v15065_v10 = vld [vmem:[%s29016_s1 + $0xae0] sm:$0xff] }
 0x565   : > { %21987 = vmatprep.subr.bf16.mxu0 %v21986_v50  ;;  %v26545_v58 = vld [vmem:[#allocation3 + $0x6a] sm:$0xff] }
 0x566   : > { %29273 = vst [vmem:[#allocation13_spill] sm:$0xff] %v26545_v58 }
 0x567   : > { %19310 = vmatmul.mubr.f32.gmra.mrb[36].mxu0 %v26521_v37  ;;  %v26542_v37 = vld [vmem:[#allocation3 + $0x62] sm:$0xff] }
 0x568   : > { %19312 = vmatprep.mubr.f32.mxu0 %v26530_v48  ;;  %21989 = vmatpush3.bf16.msra.mxu0 %v21986_v50  ;;  %29272 = vst [vmem:[#allocation11_spill] sm:$0xff] %v26542_v37  ;;  %v21998_v50 = vpack.c.bf16 %v15064_v45, %v15063_v35  ;;  %v15066_v48 = vld [vmem:[%s29016_s1 + $0xae8] sm:$0xff]  ;;  %v26557_v45 = vld [vmem:[#allocation3 + $0x82] sm:$0xff] }
 0x569   : > { %21991 = vmatprep.subr.bf16.mxu0 %v21990_v2  ;;  %29275 = vst [vmem:[#allocation15_spill] sm:$0xff] %v26557_v45  ;;  %v15067_v35 = vld [vmem:[%s29016_s1 + $0xaf0] sm:$0xff] }
 0x56b   : > { %19313 = vmatmul.mubr.f32.gmra.mrb[38].mxu0 %v26533_v15  ;;  %v26554_v15 = vld [vmem:[#allocation3 + $0x7a] sm:$0xff] }
 0x56c   : > { %19315 = vmatprep.mubr.f32.mxu0 %v26542_v37  ;;  %21993 = vmatpush3.bf16.msra.mxu0 %v21990_v2  ;;  %29274 = vst [vmem:[#allocation14_spill] sm:$0xff] %v26554_v15  ;;  %v22002_v2 = vpack.c.bf16 %v15066_v48, %v15065_v10  ;;  %v15068_v37 = vld [vmem:[%s29016_s1 + $0xaf8] sm:$0xff]  ;;  %v26569_v48 = vld [vmem:[#allocation3 + $0x9a] sm:$0xff]  ;;  %v15069_v10 = vld [vmem:[%s29016_s1 + $0xb00] sm:$0xff] }
 0x56d   : > { %21995 = vmatprep.subr.bf16.mxu0 %v21994_v38  ;;  %29277 = vst [vmem:[#allocation17_spill] sm:$0xff] %v26569_v48 }
 0x56f   : > { %19316 = vmatmul.mubr.f32.gmra.mrb[40].mxu0 %v26545_v58  ;;  %v26566_v58 = vld [vmem:[#allocation3 + $0x92] sm:$0xff] }
 0x570   : > { %19318 = vmatprep.mubr.f32.mxu0 %v26554_v15  ;;  %21997 = vmatpush3.bf16.msra.mxu0 %v21994_v38  ;;  %29276 = vst [vmem:[#allocation16_spill] sm:$0xff] %v26566_v58  ;;  %v22006_v38 = vpack.c.bf16 %v15068_v37, %v15067_v35  ;;  %v15070_v15 = vld [vmem:[%s29016_s1 + $0xb08] sm:$0xff]  ;;  %v26584_v35 = vld [vmem:[#allocation3 + $0xc2] sm:$0xff] }
 0x571   : > { %21999 = vmatprep.subr.bf16.mxu0 %v21998_v50  ;;  %v26581_v37 = vld [vmem:[#allocation3 + $0xb2] sm:$0xff]  ;;  %29278 = vst [vmem:[#allocation18_spill] sm:$0xff] %v26584_v35 }
 0x573   : > { %19319 = vmatmul.mubr.f32.gmra.mrb[42].mxu0 %v26557_v45  ;;  %v26578_v45 = vld [vmem:[#allocation3 + $0xaa] sm:$0xff] }
 0x574   : > { %19321 = vmatprep.mubr.f32.mxu0 %v26566_v58  ;;  %22001 = vmatpush3.bf16.msra.mxu0 %v21998_v50  ;;  %v22010_v50 = vpack.c.bf16 %v15070_v15, %v15069_v10  ;;  %v26587_v58 = vld [vmem:[#allocation3 + $0xca] sm:$0xff]  ;;  %v26596_v15 = vld [vmem:[#allocation3 + $0xf2] sm:$0xff]  ;;  %v26599_v10 = vld [vmem:[#allocation3 + $0xfa] sm:$0xff] }
 0x575   : > { %22003 = vmatprep.subr.bf16.mxu0 %v22002_v2  ;;  %29279 = vst [vmem:[#allocation19_spill] sm:$0xff] %v26587_v58  ;;  %29282 = vst [vmem:[#allocation22_spill] sm:$0xff] %v26596_v15 }
 0x576   : > { %29283 = vst [vmem:[#allocation23_spill] sm:$0xff] %v26599_v10 }
 0x577   : > { %19322 = vmatmul.mubr.f32.gmra.mrb[44].mxu0 %v26569_v48  ;;  %v26590_v48 = vld [vmem:[#allocation3 + $0xda] sm:$0xff] }
 0x578   : > { %19324 = vmatprep.mubr.f32.mxu0 %v26578_v45  ;;  %22005 = vmatpush3.bf16.msra.mxu0 %v22002_v2  ;;  %29280 = vst [vmem:[#allocation20_spill] sm:$0xff] %v26590_v48  ;;  %v26593_v2 = vld [vmem:[#allocation3 + $0xe2] sm:$0xff] }
 0x579   : > { %22007 = vmatprep.subr.bf16.mxu0 %v22006_v38  ;;  %29281 = vst [vmem:[#allocation21_spill] sm:$0xff] %v26593_v2 }
 0x57b   : > { %19325 = vmatmul.mubr.f32.gmra.mrb[46].mxu0 %v26581_v37 }
 0x57c   : > { %19327 = vmatprep.mubr.f32.mxu0 %v26584_v35  ;;  %22009 = vmatpush3.bf16.msra.mxu0 %v22006_v38  ;;  %v26602_v38 = vld [vmem:[#allocation3 + $0x10a] sm:$0xff] }
 0x57d   : > { %22011 = vmatprep.subr.bf16.mxu0 %v22010_v50  ;;  %29284 = vst [vmem:[#allocation24_spill] sm:$0xff] %v26602_v38 }
 0x57f   : > { %19328 = vmatmul.mubr.f32.gmra.mrb[48].mxu0 %v26587_v58  ;;  %v26605_v58 = vld [vmem:[#allocation3 + $0x112] sm:$0xff] }
 0x580   : > { %19330 = vmatprep.mubr.f32.mxu0 %v26590_v48  ;;  %29285 = vst [vmem:[#allocation25_spill] sm:$0xff] %v26605_v58  ;;  %v26608_v48 = vld [vmem:[#allocation3 + $0x122] sm:$0xff] }
 0x581   : > { %29286 = vst [vmem:[#allocation6_spill] sm:$0xff] %v26608_v48 }
 0x583   : > { %19331 = vmatmul.mubr.f32.gmra.mrb[50].mxu0 %v26593_v2  ;;  %v26611_v2 = vld [vmem:[#allocation3 + $0x12a] sm:$0xff] }
 0x584   : > { %19333 = vmatprep.mubr.f32.mxu0 %v26596_v15  ;;  %29287 = vst [vmem:[#allocation12_spill] sm:$0xff] %v26611_v2  ;;  %v26614_v15 = vld [vmem:[#allocation3 + $0x13a] sm:$0xff] }
 0x585   : > { %29288 = vst [vmem:[#allocation26_spill] sm:$0xff] %v26614_v15 }
 0x587   : > { %19334 = vmatmul.mubr.f32.gmra.mrb[52].mxu0 %v26599_v10  ;;  %v26617_v10 = vld [vmem:[#allocation3 + $0x142] sm:$0xff] }
 0x588   : > { %19336 = vmatprep.mubr.f32.mxu0 %v26602_v38  ;;  %29289 = vst [vmem:[#allocation27_spill] sm:$0xff] %v26617_v10  ;;  %v26620_v38 = vld [vmem:[#allocation3 + $0x152] sm:$0xff] }
 0x589   : > { %29290 = vst [vmem:[#allocation28_spill] sm:$0xff] %v26620_v38 }
 0x58b   : > { %19337 = vmatmul.mubr.f32.gmra.mrb[54].mxu0 %v26605_v58  ;;  %v26623_v58 = vld [vmem:[#allocation3 + $0x15a] sm:$0xff] }
 0x58c   : > { %19339 = vmatprep.mubr.f32.mxu0 %v26608_v48  ;;  %29291 = vst [vmem:[#allocation29_spill] sm:$0xff] %v26623_v58  ;;  %v26626_v48 = vld [vmem:[#allocation3 + $0x16a] sm:$0xff] }
 0x58d   : > { %29292 = vst [vmem:[#allocation30_spill] sm:$0xff] %v26626_v48 }
 0x58f   : > { %19340 = vmatmul.mubr.f32.gmra.mrb[56].mxu0 %v26611_v2  ;;  %v26629_v2 = vld [vmem:[#allocation3 + $0x172] sm:$0xff] }
 0x590   : > { %19342 = vmatprep.mubr.f32.mxu0 %v26614_v15  ;;  %v15071_v15 = vld [vmem:[%s29016_s1 + $0xb10] sm:$0xff] }
 0x593   : > { %19343 = vmatmul.mubr.f32.gmra.mrb[58].mxu0 %v26617_v10  ;;  %v15072_v10 = vld [vmem:[%s29016_s1 + $0xb18] sm:$0xff] }
 0x594   : > { %19345 = vmatprep.mubr.f32.mxu0 %v26620_v38  ;;  %v22014_v38 = vpack.c.bf16 %v15072_v10, %v15071_v15  ;;  %v15076_v15 = vld [vmem:[%s29016_s1 + $0xb38] sm:$0xff]  ;;  %v15079_v10 = vld [vmem:[%s29016_s1 + $0xb50] sm:$0xff] }
 0x597   : > { %19346 = vmatmul.mubr.f32.gmra.mrb[60].mxu0 %v26623_v58  ;;  %v15073_v58 = vld [vmem:[%s29016_s1 + $0xb20] sm:$0xff] }
 0x598   : > { %19348 = vmatprep.mubr.f32.mxu0 %v26626_v48  ;;  %v15074_v48 = vld [vmem:[%s29016_s1 + $0xb28] sm:$0xff] }
 0x599   : > { %v22018_v35 = vpack.c.bf16 %v15074_v48, %v15073_v58  ;;  %v15078_v58 = vld [vmem:[%s29016_s1 + $0xb48] sm:$0xff] }
 0x59b   : > { %19349 = vmatmul.mubr.f32.gmra.mrb[62].mxu0 %v26629_v2 }
 0x59c   : > { %19383 = vmatprep.mubr.f32.mxu0 %v26367_v56  ;;  %v15075_v56 = vld [vmem:[%s29016_s1 + $0xb30] sm:$0xff] }
 0x59f   : > { %19384 = vmatmul.mubr.f32.vlgmr.msra.gmra.mrb[32].mxu0 %v26371_v59  ;;  %v22022_v59 = vpack.c.bf16 %v15076_v15, %v15075_v56  ;;  %v15082_v15 = vld [vmem:[%s29016_s1 + $0xb68] sm:$0xff] }
 0x5a0   : > { %19386 = vmatprep.mubr.f32.mxu0 %v26380_v28  ;;  %22013 = vmatpush3.bf16.msra.mxu0 %v22010_v50  ;;  %v15077_v50 = vld [vmem:[%s29016_s1 + $0xb40] sm:$0xff] }
 0x5a1   : > { %22015 = vmatprep.subr.bf16.mxu0 %v22014_v38  ;;  %v22026_v48 = vpack.c.bf16 %v15078_v58, %v15077_v50  ;;  %v15084_v58 = vld [vmem:[%s29016_s1 + $0xb78] sm:$0xff] }
 0x5a3   : > { %19387 = vmatmul.mubr.f32.gmra.mrb[34].mxu0 %v26383_v61 }
 0x5a4   : > { %19389 = vmatprep.mubr.f32.mxu0 %v26392_v27  ;;  %22017 = vmatpush3.bf16.msra.mxu0 %v22014_v38  ;;  %v15080_v38 = vld [vmem:[%s29016_s1 + $0xb58] sm:$0xff] }
 0x5a5   : > { %22019 = vmatprep.subr.bf16.mxu0 %v22018_v35  ;;  %v22030_v56 = vpack.c.bf16 %v15080_v38, %v15079_v10  ;;  %v15086_v38 = vld [vmem:[%s29016_s1 + $0xb88] sm:$0xff] }
 0x5a7   : > { %19390 = vmatmul.mubr.f32.gmra.mrb[36].mxu0 %v26395_v33 }
 0x5a8   : > { %19392 = vmatprep.mubr.f32.mxu0 %v26404_v42  ;;  %22021 = vmatpush3.bf16.msra.mxu0 %v22018_v35  ;;  %v15081_v35 = vld [vmem:[%s29016_s1 + $0xb60] sm:$0xff] }
 0x5a9   : > { %22023 = vmatprep.subr.bf16.mxu0 %v22022_v59  ;;  %v22034_v50 = vpack.c.bf16 %v15082_v15, %v15081_v35  ;;  %v26713_v15 = vld [vmem:[#allocation3 + $0x188] sm:$0xff] }
 0x5aa   : > { %29294 = vst [vmem:[#allocation32_spill] sm:$0xff] %v26713_v15 }
 0x5ab   : > { %19393 = vmatmul.mubr.f32.gmra.mrb[38].mxu0 %v26407_v11 }
 0x5ac   : > { %19395 = vmatprep.mubr.f32.mxu0 %v26416_v16  ;;  %22025 = vmatpush3.bf16.msra.mxu0 %v22022_v59  ;;  %v15083_v59 = vld [vmem:[%s29016_s1 + $0xb70] sm:$0xff] }
 0x5ad   : > { %22027 = vmatprep.subr.bf16.mxu0 %v22026_v48  ;;  %v22038_v10 = vpack.c.bf16 %v15084_v58, %v15083_v59  ;;  %v15088_v59 = vld [vmem:[%s29016_s1 + $0xb98] sm:$0xff]  ;;  %v7066_v58 = vld [vmem:[#allocation3 + $0x19] sm:$0xff] }
 0x5af   : > { %19396 = vmatmul.mubr.f32.gmra.mrb[40].mxu0 %v26419_v23 }
 0x5b0   : > { %19398 = vmatprep.mubr.f32.mxu0 %v26428_v4  ;;  %22029 = vmatpush3.bf16.msra.mxu0 %v22026_v48  ;;  %v15085_v48 = vld [vmem:[%s29016_s1 + $0xb80] sm:$0xff] }
 0x5b1   : > { %22031 = vmatprep.subr.bf16.mxu0 %v22030_v56  ;;  %v22042_v35 = vpack.c.bf16 %v15086_v38, %v15085_v48  ;;  %v7067_v48 = vld [vmem:[#allocation3 + $0x21] sm:$0xff]  ;;  %v15089_v38 = vld [vmem:[%s29016_s1 + $0xba0] sm:$0xff] }
 0x5b3   : > { %19399 = vmatmul.mubr.f32.gmra.mrb[42].mxu0 %v26431_v3 }
 0x5b4   : > { %19401 = vmatprep.mubr.f32.mxu0 %v26440_v60  ;;  %22033 = vmatpush3.bf16.msra.mxu0 %v22030_v56  ;;  %v26710_v56 = vld [vmem:[#allocation3 + $0x180] sm:$0xff] }
 0x5b5   : > { %22035 = vmatprep.subr.bf16.mxu0 %v22034_v50  ;;  %29293 = vst [vmem:[#allocation31_spill] sm:$0xff] %v26710_v56 }
 0x5b7   : > { %19402 = vmatmul.mubr.f32.gmra.mrb[44].mxu0 %v26443_v8 }
 0x5b8   : > { %19404 = vmatprep.mubr.f32.mxu0 %v26446_v7  ;;  %22037 = vmatpush3.bf16.msra.mxu0 %v22034_v50  ;;  %v15087_v50 = vld [vmem:[%s29016_s1 + $0xb90] sm:$0xff] }
 0x5b9   : > { %22039 = vmatprep.subr.bf16.mxu0 %v22038_v10 }
 0x5bb   : > { %19405 = vmatmul.mubr.f32.gmra.mrb[46].mxu0 %v26449_v0 }
 0x5bc   : > { %19407 = vmatprep.mubr.f32.mxu0 %v26452_v32  ;;  %22041 = vmatpush3.bf16.msra.mxu0 %v22038_v10  ;;  %v22046_v10 = vpack.c.bf16 %v15088_v59, %v15087_v50  ;;  %v15091_v50 = vld [vmem:[%s29016_s1 + $0xbb0] sm:$0xff]  ;;  %v15092_v59 = vld [vmem:[%s29016_s1 + $0xbb8] sm:$0xff] }
 0x5bd   : > { %22043 = vmatprep.subr.bf16.mxu0 %v22042_v35 }
 0x5bf   : > { %19408 = vmatmul.mubr.f32.gmra.mrb[48].mxu0 %v26455_v1 }
 0x5c0   : > { %19410 = vmatprep.mubr.f32.mxu0 %v26458_v21 }
 0x5c3   : > { %19411 = vmatmul.mubr.f32.gmra.mrb[50].mxu0 %v26461_v44 }
 0x5c4   : > { %19413 = vmatprep.mubr.f32.mxu0 %v26464_v54 }
 0x5c7   : > { %19414 = vmatmul.mubr.f32.gmra.mrb[52].mxu0 %v26467_v43 }
 0x5c8   : > { %19416 = vmatprep.mubr.f32.mxu0 %v26470_v18 }
 0x5cb   : > { %19417 = vmatmul.mubr.f32.gmra.mrb[54].mxu0 %v26473_v31 }
 0x5cc   : > { %19419 = vmatprep.mubr.f32.mxu0 %v26476_v47 }
 0x5cf   : > { %19420 = vmatmul.mubr.f32.gmra.mrb[56].mxu0 %v26479_v62 }
 0x5d0   : > { %19422 = vmatprep.mubr.f32.mxu0 %v26482_v12 }
 0x5d3   : > { %19423 = vmatmul.mubr.f32.gmra.mrb[58].mxu0 %v26485_v22 }
 0x5d4   : > { %19425 = vmatprep.mubr.f32.mxu0 %v26488_v5  ;;  %v26731_v5 = vld [vmem:[#allocation3 + $0x39] sm:$0xff] }
 0x5d5   : > { %29295 = vst [vmem:[#allocation33_spill] sm:$0xff] %v26731_v5 }
 0x5d7   : > { %19426 = vmatmul.mubr.f32.gmra.mrb[60].mxu0 %v26491_v9  ;;  %v26728_v9 = vld [vmem:[#allocation3 + $0x31] sm:$0xff] }
 0x5d8   : > { %19428 = vmatprep.mubr.f32.mxu0 %v26710_v56  ;;  %v15090_v56 = vld [vmem:[%s29016_s1 + $0xba8] sm:$0xff] }
 0x5db   : > { %19429 = vmatmul.mubr.f32.gmra.mrb[62].mxu0 %v26713_v15  ;;  %v22050_v15 = vpack.c.bf16 %v15090_v56, %v15089_v38  ;;  %v26743_v56 = vld [vmem:[#allocation3 + $0x51] sm:$0xff] }
 0x5dc   : > { %19463 = vmatprep.mubr.f32.mxu0 %v7066_v58  ;;  %v26740_v58 = vld [vmem:[#allocation3 + $0x49] sm:$0xff]  ;;  %29297 = vst [vmem:[#allocation35_spill] sm:$0xff] %v26743_v56  ;;  %v15094_v38 = vld [vmem:[%s29016_s1 + $0xbc8] sm:$0xff] }
 0x5dd   : > { %29296 = vst [vmem:[#allocation34_spill] sm:$0xff] %v26740_v58 }
 0x5df   : > { %19464 = vmatmul.mubr.f32.vlgmr.msra.gmra.mrb[32].mxu0 %v7067_v48  ;;  %v15093_v48 = vld [vmem:[%s29016_s1 + $0xbc0] sm:$0xff] }
 0x5e0   : > { %19466 = vmatprep.mubr.f32.mxu0 %v26728_v9  ;;  %22045 = vmatpush3.bf16.msra.mxu0 %v22042_v35  ;;  %v22054_v35 = vpack.c.bf16 %v15092_v59, %v15091_v50  ;;  %v26755_v50 = vld [vmem:[#allocation3 + $0x69] sm:$0xff]  ;;  %v15095_v59 = vld [vmem:[%s29016_s1 + $0xbd0] sm:$0xff] }
 0x5e1   : > { %22047 = vmatprep.subr.bf16.mxu0 %v22046_v10 }
 0x5e3   : > { %19467 = vmatmul.mubr.f32.gmra.mrb[34].mxu0 %v26731_v5  ;;  %v26752_v5 = vld [vmem:[#allocation3 + $0x61] sm:$0xff] }
 0x5e4   : > { %19469 = vmatprep.mubr.f32.mxu0 %v26740_v58  ;;  %22049 = vmatpush3.bf16.msra.mxu0 %v22046_v10  ;;  %29298 = vst [vmem:[#allocation36_spill] sm:$0xff] %v26752_v5  ;;  %v22058_v10 = vpack.c.bf16 %v15094_v38, %v15093_v48  ;;  %v15096_v58 = vld [vmem:[%s29016_s1 + $0xbd8] sm:$0xff]  ;;  %v15097_v38 = vld [vmem:[%s29016_s1 + $0xbe0] sm:$0xff] }
 0x5e5   : > { %22051 = vmatprep.subr.bf16.mxu0 %v22050_v15  ;;  %v26767_v48 = vld [vmem:[#allocation3 + $0x81] sm:$0xff] }
 0x5e7   : > { %19470 = vmatmul.mubr.f32.gmra.mrb[36].mxu0 %v26743_v56  ;;  %v26764_v56 = vld [vmem:[#allocation3 + $0x79] sm:$0xff] }
 0x5e8   : > { %19472 = vmatprep.mubr.f32.mxu0 %v26752_v5  ;;  %22053 = vmatpush3.bf16.msra.mxu0 %v22050_v15  ;;  %29299 = vst [vmem:[#allocation37_spill] sm:$0xff] %v26764_v56  ;;  %v22062_v15 = vpack.c.bf16 %v15096_v58, %v15095_v59  ;;  %v15098_v5 = vld [vmem:[%s29016_s1 + $0xbe8] sm:$0xff]  ;;  %v15099_v58 = vld [vmem:[%s29016_s1 + $0xbf0] sm:$0xff] }
 0x5e9   : > { %22055 = vmatprep.subr.bf16.mxu0 %v22054_v35 }
 0x5eb   : > { %19473 = vmatmul.mubr.f32.gmra.mrb[38].mxu0 %v26755_v50 }
 0x5ec   : > { %19475 = vmatprep.mubr.f32.mxu0 %v26764_v56  ;;  %22057 = vmatpush3.bf16.msra.mxu0 %v22054_v35  ;;  %v22066_v56 = vpack.c.bf16 %v15098_v5, %v15097_v38  ;;  %v15100_v35 = vld [vmem:[%s29016_s1 + $0xbf8] sm:$0xff]  ;;  %v15102_v5 = vld [vmem:[%s29016_s1 + $0xc08] sm:$0xff] }
 0x5ed   : > { %22059 = vmatprep.subr.bf16.mxu0 %v22058_v10  ;;  %v22070_v59 = vpack.c.bf16 %v15100_v35, %v15099_v58  ;;  %v15114_v38 = vld [vmem:[%s29016_s1 + $0xc68] sm:$0xff]  ;;  %v29309_v58 = vld [vmem:[#allocation15_spill] sm:$0xff]  ;;  %v29310_v35 = vld [vmem:[#allocation16_spill] sm:$0xff] }
 0x5ef   : > { %19476 = vmatmul.mubr.f32.gmra.mrb[40].mxu0 %v26767_v48 }
 0x5f0   : > { %19478 = vmatprep.mubr.f32.mxu0 %v26246_v46  ;;  %22061 = vmatpush3.bf16.msra.mxu0 %v22058_v10  ;;  %v15101_v46 = vld [vmem:[%s29016_s1 + $0xc00] sm:$0xff] }
 0x5f1   : > { %22063 = vmatprep.subr.bf16.mxu0 %v22062_v15 }
 0x5f3   : > { %19479 = vmatmul.mubr.f32.gmra.mrb[42].mxu0 %v26244_v30  ;;  %v22074_v30 = vpack.c.bf16 %v15102_v5, %v15101_v46  ;;  %v15115_v46 = vld [vmem:[%s29016_s1 + $0xc70] sm:$0xff]  ;;  %v15116_v5 = vld [vmem:[%s29016_s1 + $0xc78] sm:$0xff] }
 0x5f4   : > { %19481 = vmatprep.mubr.f32.mxu0 %v26256_v39  ;;  %22065 = vmatpush3.bf16.msra.mxu0 %v22062_v15  ;;  %v15103_v39 = vld [vmem:[%s29016_s1 + $0xc10] sm:$0xff]  ;;  %v15113_v15 = vld [vmem:[%s29016_s1 + $0xc60] sm:$0xff] }
 0x5f5   : > { %22067 = vmatprep.subr.bf16.mxu0 %v22066_v56 }
 0x5f7   : > { %19482 = vmatmul.mubr.f32.gmra.mrb[44].mxu0 %v26253_v51  ;;  %v29300_v51 = vmax.f32 %v26344_v57, 0.0  ;;  %v15111_v57 = vld [vmem:[%s29016_s1 + $0xc50] sm:$0xff] }
 0x5f8   : > { %19484 = vmatprep.mubr.f32.mxu0 %v26266_v49  ;;  %22069 = vmatpush3.bf16.msra.mxu0 %v22066_v56  ;;  %v29301_v49 = vmax.f32 %v26340_v20, 0.0  ;;  %v29308_v56 = vld [vmem:[#allocation14_spill] sm:$0xff] }
 0x5f9   : > { %22071 = vmatprep.subr.bf16.mxu0 %v22070_v59 }
 0x5fb   : > { %19485 = vmatmul.mubr.f32.gmra.mrb[46].mxu0 %v26263_v17  ;;  %v15104_v17 = vld [vmem:[%s29016_s1 + $0xc18] sm:$0xff] }
 0x5fc   : > { %19487 = vmatprep.mubr.f32.mxu0 %v26276_v14  ;;  %22073 = vmatpush3.bf16.msra.mxu0 %v22070_v59  ;;  %v15105_v14 = vld [vmem:[%s29016_s1 + $0xc20] sm:$0xff]  ;;  %v22098_v59 = vpack.c.bf16 %v15114_v38, %v15113_v15  ;;  %v15124_v15 = vld [vmem:[%s29016_s1 + $0xcb8] sm:$0xff]  ;;  %v15126_v38 = vld [vmem:[%s29016_s1 + $0xcc8] sm:$0xff] }
 0x5fd   : > { %22075 = vmatprep.subr.bf16.mxu0 %v22074_v30 }
 0x5ff   : > { %19488 = vmatmul.mubr.f32.gmra.mrb[48].mxu0 %v26273_v25  ;;  %v22078_v25 = vpack.c.bf16 %v15104_v17, %v15103_v39  ;;  %v15117_v39 = vld [vmem:[%s29016_s1 + $0xc80] sm:$0xff]  ;;  %v15118_v17 = vld [vmem:[%s29016_s1 + $0xc88] sm:$0xff] }
 0x600   : > { %19490 = vmatprep.mubr.f32.mxu0 %v26286_v19  ;;  %v29302_v19 = vld [vmem:[#allocation9_spill] sm:$0xff] }
 0x603   : > { %19491 = vmatmul.mubr.f32.gmra.mrb[50].mxu0 %v26283_v41  ;;  %v15106_v41 = vld [vmem:[%s29016_s1 + $0xc28] sm:$0xff] }
 0x604   : > { %19493 = vmatprep.mubr.f32.mxu0 %v26296_v13  ;;  %v15107_v13 = vld [vmem:[%s29016_s1 + $0xc30] sm:$0xff] }
 0x607   : > { %19494 = vmatmul.mubr.f32.gmra.mrb[52].mxu0 %v26293_v34  ;;  %v22082_v34 = vpack.c.bf16 %v15106_v41, %v15105_v14  ;;  %v29313_v14 = vld [vmem:[#allocation19_spill] sm:$0xff]  ;;  %v29315_v41 = vld [vmem:[#allocation21_spill] sm:$0xff] }
 0x608   : > { %19496 = vmatprep.mubr.f32.mxu0 %v26306_v36  ;;  %v29303_v36 = vld [vmem:[#allocation10_spill] sm:$0xff] }
 0x60b   : > { %19497 = vmatmul.mubr.f32.gmra.mrb[54].mxu0 %v26303_v26  ;;  %v15108_v26 = vld [vmem:[%s29016_s1 + $0xc38] sm:$0xff] }
 0x60c   : > { %19499 = vmatprep.mubr.f32.mxu0 %v26316_v53  ;;  %v22086_v53 = vpack.c.bf16 %v15108_v26, %v15107_v13  ;;  %v29318_v13 = vld [vmem:[#allocation24_spill] sm:$0xff]  ;;  %v29320_v26 = vld [vmem:[#allocation6_spill] sm:$0xff] }
 0x60f   : > { %19500 = vmatmul.mubr.f32.gmra.mrb[56].mxu0 %v26313_v40  ;;  %v29304_v40 = vld [vmem:[#allocation4_spill] sm:$0xff] }
 0x610   : > { %19502 = vmatprep.mubr.f32.mxu0 %v26326_v55  ;;  %v15110_v55 = vld [vmem:[%s29016_s1 + $0xc48] sm:$0xff] }
 0x613   : > { %19503 = vmatmul.mubr.f32.gmra.mrb[58].mxu0 %v26323_v29  ;;  %v15109_v29 = vld [vmem:[%s29016_s1 + $0xc40] sm:$0xff] }
 0x614   : > { %19505 = vmatprep.mubr.f32.mxu0 %v26336_v24  ;;  %v29306_v24 = vld [vmem:[#allocation11_spill] sm:$0xff]  ;;  %v22090_v20 = vpack.c.bf16 %v15110_v55, %v15109_v29  ;;  %v29324_v29 = vld [vmem:[#allocation28_spill] sm:$0xff]  ;;  %v29325_v55 = vld [vmem:[#allocation29_spill] sm:$0xff] }
 0x617   : > { %19506 = vmatmul.mubr.f32.gmra.mrb[60].mxu0 %v26333_v6  ;;  %v29305_v6 = vld [vmem:[#allocation5_spill] sm:$0xff] }
 0x618   : > { %19508 = vmatprep.mubr.f32.mxu0 %v29300_v51  ;;  %v22102_v51 = vpack.c.bf16 %v15116_v5, %v15115_v46  ;;  %v15134_v46 = vld [vmem:[%s29016_s1 + $0xd08] sm:$0xff]  ;;  %v15137_v5 = vld [vmem:[%s29016_s1 + $0xd20] sm:$0xff] }
 0x61b   : > { %19509 = vmatmul.mubr.f32.gmra.mrb[62].mxu0 %v29301_v49  ;;  %v29312_v49 = vld [vmem:[#allocation18_spill] sm:$0xff] }
 0x61c   : > { %19543 = vmatprep.mubr.f32.mxu0 %v26506_v63  ;;  %v29307_v63 = vld [vmem:[#allocation13_spill] sm:$0xff] }
 0x61f   : > { %19544 = vmatmul.mubr.f32.vlgmr.msra.gmra.mrb[32].mxu0 %v26509_v52  ;;  %v15112_v52 = vld [vmem:[%s29016_s1 + $0xc58] sm:$0xff] }
 0x620   : > { %19546 = vmatprep.mubr.f32.mxu0 %v29302_v19  ;;  %22077 = vmatpush3.bf16.msra.mxu0 %v22074_v30  ;;  %v22094_v10 = vpack.c.bf16 %v15112_v52, %v15111_v57  ;;  %v29311_v30 = vld [vmem:[#allocation17_spill] sm:$0xff]  ;;  %v29316_v19 = vld [vmem:[#allocation22_spill] sm:$0xff]  ;;  %v15120_v52 = vld [vmem:[%s29016_s1 + $0xc98] sm:$0xff] }
 0x621   : > { %22079 = vmatprep.subr.bf16.mxu0 %v22078_v25  ;;  %v15119_v57 = vld [vmem:[%s29016_s1 + $0xc90] sm:$0xff] }
 0x623   : > { %19547 = vmatmul.mubr.f32.gmra.mrb[34].mxu0 %v29303_v36  ;;  %v29321_v36 = vld [vmem:[#allocation12_spill] sm:$0xff] }
 0x624   : > { %19549 = vmatprep.mubr.f32.mxu0 %v29304_v40  ;;  %22081 = vmatpush3.bf16.msra.mxu0 %v22078_v25  ;;  %v22106_v25 = vpack.c.bf16 %v15118_v17, %v15117_v39  ;;  %v29322_v40 = vld [vmem:[#allocation26_spill] sm:$0xff]  ;;  %v15171_v39 = vld [vmem:[%s29016_s1 + $0xe28] sm:$0xff] }
 0x625   : > { %22083 = vmatprep.subr.bf16.mxu0 %v22082_v34  ;;  %v29331_v17 = vld [vmem:[#allocation33_spill] sm:$0xff] }
 0x627   : > { %19550 = vmatmul.mubr.f32.gmra.mrb[36].mxu0 %v29305_v6  ;;  %v29326_v6 = vld [vmem:[#allocation30_spill] sm:$0xff] }
 0x628   : > { %19552 = vmatprep.mubr.f32.mxu0 %v29306_v24  ;;  %22085 = vmatpush3.bf16.msra.mxu0 %v22082_v34  ;;  %v29317_v34 = vld [vmem:[#allocation23_spill] sm:$0xff] }
 0x629   : > { %22087 = vmatprep.subr.bf16.mxu0 %v22086_v53  ;;  %v26890_v24 = vld [vmem:[#allocation3 + $0x182] sm:$0xff] }
 0x62b   : > { %19553 = vmatmul.mubr.f32.gmra.mrb[38].mxu0 %v29307_v63  ;;  %v22110_v63 = vpack.c.bf16 %v15120_v52, %v15119_v57  ;;  %v15143_v52 = vld [vmem:[%s29016_s1 + $0xd50] sm:$0xff] }
 0x62c   : > { %19555 = vmatprep.mubr.f32.mxu0 %v29308_v56  ;;  %22089 = vmatpush3.bf16.msra.mxu0 %v22086_v53  ;;  %v29323_v53 = vld [vmem:[#allocation27_spill] sm:$0xff]  ;;  %v15122_v56 = vld [vmem:[%s29016_s1 + $0xca8] sm:$0xff] }
 0x62d   : > { %22091 = vmatprep.subr.bf16.mxu0 %v22090_v20 }
 0x62f   : > { %19556 = vmatmul.mubr.f32.gmra.mrb[40].mxu0 %v29309_v58  ;;  %v15128_v58 = vld [vmem:[%s29016_s1 + $0xcd8] sm:$0xff] }
 0x630   : > { %19558 = vmatprep.mubr.f32.mxu0 %v29310_v35  ;;  %22093 = vmatpush3.bf16.msra.mxu0 %v22090_v20  ;;  %v26893_v20 = vld [vmem:[#allocation3 + $0x18a] sm:$0xff]  ;;  %v15130_v35 = vld [vmem:[%s29016_s1 + $0xce8] sm:$0xff] }
 0x631   : > { %22095 = vmatprep.subr.bf16.mxu0 %v22094_v10 }
 0x633   : > { %19559 = vmatmul.mubr.f32.gmra.mrb[42].mxu0 %v29311_v30 }
 0x634   : > { %19561 = vmatprep.mubr.f32.mxu0 %v26578_v45  ;;  %22097 = vmatpush3.bf16.msra.mxu0 %v22094_v10  ;;  %v29314_v45 = vld [vmem:[#allocation20_spill] sm:$0xff] }
 0x635   : > { %22099 = vmatprep.subr.bf16.mxu0 %v22098_v59 }
 0x637   : > { %19562 = vmatmul.mubr.f32.gmra.mrb[44].mxu0 %v26581_v37  ;;  %v29319_v37 = vld [vmem:[#allocation25_spill] sm:$0xff] }
 0x638   : > { %19564 = vmatprep.mubr.f32.mxu0 %v29312_v49  ;;  %22101 = vmatpush3.bf16.msra.mxu0 %v22098_v59  ;;  %v15132_v59 = vld [vmem:[%s29016_s1 + $0xcf8] sm:$0xff]  ;;  %v29332_v49 = vld [vmem:[#allocation34_spill] sm:$0xff] }
 0x639   : > { %22103 = vmatprep.subr.bf16.mxu0 %v22102_v51 }
 0x63b   : > { %19565 = vmatmul.mubr.f32.gmra.mrb[46].mxu0 %v29313_v14  ;;  %v15139_v14 = vld [vmem:[%s29016_s1 + $0xd30] sm:$0xff] }
 0x63c   : > { %19567 = vmatprep.mubr.f32.mxu0 %v29314_v45  ;;  %22105 = vmatpush3.bf16.msra.mxu0 %v22102_v51  ;;  %v15138_v51 = vld [vmem:[%s29016_s1 + $0xd28] sm:$0xff] }
 0x63d   : > { %22107 = vmatprep.subr.bf16.mxu0 %v22106_v25 }
 0x63f   : > { %19568 = vmatmul.mubr.f32.gmra.mrb[48].mxu0 %v29315_v41  ;;  %v15140_v41 = vld [vmem:[%s29016_s1 + $0xd38] sm:$0xff] }
 0x640   : > { %19570 = vmatprep.mubr.f32.mxu0 %v29316_v19  ;;  %v15172_v19 = vld [vmem:[%s29016_s1 + $0xe30] sm:$0xff] }
 0x643   : > { %19571 = vmatmul.mubr.f32.gmra.mrb[50].mxu0 %v29317_v34  ;;  %v15173_v34 = vld [vmem:[%s29016_s1 + $0xe38] sm:$0xff] }
 0x644   : > { %19573 = vmatprep.mubr.f32.mxu0 %v29318_v13  ;;  %v29333_v13 = vld [vmem:[#allocation35_spill] sm:$0xff] }
 0x647   : > { %19574 = vmatmul.mubr.f32.gmra.mrb[52].mxu0 %v29319_v37  ;;  %v29334_v37 = vld [vmem:[#allocation36_spill] sm:$0xff] }
 0x648   : > { %19576 = vmatprep.mubr.f32.mxu0 %v29320_v26  ;;  %v22150_v26 = vpack.c.bf16 %v15140_v41, %v15139_v14  ;;  %v8300_v14 = vld [vmem:[#allocation3 + $0x9a] sm:$0xff]  ;;  %v8302_v41 = vld [vmem:[#allocation3 + $0xb2] sm:$0xff] }
 0x64b   : > { %19577 = vmatmul.mubr.f32.gmra.mrb[54].mxu0 %v29321_v36  ;;  %v15141_v36 = vld [vmem:[%s29016_s1 + $0xd40] sm:$0xff] }
 0x64c   : > { %19579 = vmatprep.mubr.f32.mxu0 %v29322_v40  ;;  %v22182_v40 = vpack.c.bf16 %v15173_v34, %v15172_v19  ;;  %v8303_v19 = vld [vmem:[#allocation3 + $0xc2] sm:$0xff]  ;;  %v8304_v34 = vld [vmem:[#allocation3 + $0xca] sm:$0xff] }
 0x64f   : > { %19580 = vmatmul.mubr.f32.gmra.mrb[56].mxu0 %v29323_v53  ;;  %v15142_v53 = vld [vmem:[%s29016_s1 + $0xd48] sm:$0xff] }
 0x650   : > { %19582 = vmatprep.mubr.f32.mxu0 %v29324_v29  ;;  %v15174_v29 = vld [vmem:[%s29016_s1 + $0xe40] sm:$0xff]  ;;  %v22154_v57 = vpack.c.bf16 %v15142_v53, %v15141_v36  ;;  %v8308_v36 = vld [vmem:[#allocation3 + $0xfa] sm:$0xff] }
 0x651   : > { %v8310_v53 = vld [vmem:[#allocation3 + $0x112] sm:$0xff] }
 0x653   : > { %19583 = vmatmul.mubr.f32.gmra.mrb[58].mxu0 %v29325_v55  ;;  %v15175_v55 = vld [vmem:[%s29016_s1 + $0xe48] sm:$0xff] }
 0x654   : > { %19585 = vmatprep.mubr.f32.mxu0 %v29326_v6  ;;  %v29335_v6 = vld [vmem:[#allocation37_spill] sm:$0xff] }
 0x657   : > { %19586 = vmatmul.mubr.f32.gmra.mrb[60].mxu0 %v26629_v2  ;;  %v15121_v2 = vld [vmem:[%s29016_s1 + $0xca0] sm:$0xff] }
 0x658   : > { %19588 = vmatprep.mubr.f32.mxu0 %v26890_v24  ;;  %v22114_v10 = vpack.c.bf16 %v15122_v56, %v15121_v2  ;;  %v15144_v2 = vld [vmem:[%s29016_s1 + $0xd58] sm:$0xff] }
 0x659   : > { %v15177_v56 = vld [vmem:[%s29016_s1 + $0xe58] sm:$0xff] }
 0x65b   : > { %19589 = vmatmul.mubr.f32.gmra.mrb[62].mxu0 %v26893_v20 }
 0x65c   : > { %19623 = vmatprep.mubr.f32.mxu0 %v26380_v28  ;;  %v15123_v28 = vld [vmem:[%s29016_s1 + $0xcb0] sm:$0xff] }
 0x65f   : > { %19624 = vmatmul.mubr.f32.vlgmr.msra.gmra.mrb[32].mxu0 %v26383_v61  ;;  %v22118_v61 = vpack.c.bf16 %v15124_v15, %v15123_v28  ;;  %v22158_v28 = vpack.c.bf16 %v15144_v2, %v15143_v52  ;;  %v8315_v52 = vld [vmem:[#allocation3 + $0x152] sm:$0xff]  ;;  %v8317_v2 = vld [vmem:[#allocation3 + $0x16a] sm:$0xff] }
 0x660   : > { %19626 = vmatprep.mubr.f32.mxu0 %v26392_v27  ;;  %22109 = vmatpush3.bf16.msra.mxu0 %v22106_v25  ;;  %v15125_v27 = vld [vmem:[%s29016_s1 + $0xcc0] sm:$0xff]  ;;  %v22146_v25 = vpack.c.bf16 %v15138_v51, %v15137_v5  ;;  %v8292_v5 = vld [vmem:[#allocation3 + $0x3a] sm:$0xff] }
 0x661   : > { %22111 = vmatprep.subr.bf16.mxu0 %v22110_v63  ;;  %v8294_v51 = vld [vmem:[#allocation3 + $0x52] sm:$0xff] }
 0x663   : > { %19627 = vmatmul.mubr.f32.gmra.mrb[34].mxu0 %v26395_v33  ;;  %v22122_v33 = vpack.c.bf16 %v15126_v38, %v15125_v27  ;;  %v15145_v27 = vld [vmem:[%s29016_s1 + $0xd60] sm:$0xff]  ;;  %v15146_v38 = vld [vmem:[%s29016_s1 + $0xd68] sm:$0xff] }
 0x664   : > { %19629 = vmatprep.mubr.f32.mxu0 %v26404_v42  ;;  %22113 = vmatpush3.bf16.msra.mxu0 %v22110_v63  ;;  %v15127_v42 = vld [vmem:[%s29016_s1 + $0xcd0] sm:$0xff]  ;;  %v22186_v63 = vpack.c.bf16 %v15175_v55, %v15174_v29  ;;  %v8312_v55 = vld [vmem:[#allocation3 + $0x12a] sm:$0xff] }
 0x665   : > { %22115 = vmatprep.subr.bf16.mxu0 %v22114_v10  ;;  %v8311_v29 = vld [vmem:[#allocation3 + $0x122] sm:$0xff] }
 0x667   : > { %19630 = vmatmul.mubr.f32.gmra.mrb[36].mxu0 %v26407_v11  ;;  %v22126_v11 = vpack.c.bf16 %v15128_v58, %v15127_v42  ;;  %v7996_v42 = vld [vmem:[#allocation3 + $0xb1] sm:$0xff]  ;;  %v15147_v58 = vld [vmem:[%s29016_s1 + $0xd70] sm:$0xff] }
 0x668   : > { %19632 = vmatprep.mubr.f32.mxu0 %v26416_v16  ;;  %22117 = vmatpush3.bf16.msra.mxu0 %v22114_v10  ;;  %v15129_v16 = vld [vmem:[%s29016_s1 + $0xce0] sm:$0xff] }
 0x669   : > { %22119 = vmatprep.subr.bf16.mxu0 %v22118_v61  ;;  %v7993_v10 = vld [vmem:[#allocation3 + $0x91] sm:$0xff] }
 0x66b   : > { %19633 = vmatmul.mubr.f32.gmra.mrb[38].mxu0 %v26419_v23  ;;  %v22130_v23 = vpack.c.bf16 %v15130_v35, %v15129_v16  ;;  %v7997_v16 = vld [vmem:[#allocation3 + $0xc1] sm:$0xff] }
 0x66c   : > { %19635 = vmatprep.mubr.f32.mxu0 %v26428_v4  ;;  %22121 = vmatpush3.bf16.msra.mxu0 %v22118_v61  ;;  %v15131_v4 = vld [vmem:[%s29016_s1 + $0xcf0] sm:$0xff] }
 0x66d   : > { %22123 = vmatprep.subr.bf16.mxu0 %v22122_v33  ;;  %v7994_v61 = vld [vmem:[#allocation3 + $0x99] sm:$0xff] }
 0x66f   : > { %19636 = vmatmul.mubr.f32.gmra.mrb[40].mxu0 %v26431_v3  ;;  %v22134_v3 = vpack.c.bf16 %v15132_v59, %v15131_v4  ;;  %v7999_v4 = vld [vmem:[#allocation3 + $0xd9] sm:$0xff]  ;;  %v8000_v59 = vld [vmem:[#allocation3 + $0xe1] sm:$0xff] }
 0x670   : > { %19638 = vmatprep.mubr.f32.mxu0 %v26440_v60  ;;  %22125 = vmatpush3.bf16.msra.mxu0 %v22122_v33  ;;  %v15133_v60 = vld [vmem:[%s29016_s1 + $0xd00] sm:$0xff] }
 0x671   : > { %22127 = vmatprep.subr.bf16.mxu0 %v22126_v11  ;;  %v7995_v33 = vld [vmem:[#allocation3 + $0xa9] sm:$0xff] }
 0x673   : > { %19639 = vmatmul.mubr.f32.gmra.mrb[42].mxu0 %v26443_v8  ;;  %v22138_v8 = vpack.c.bf16 %v15134_v46, %v15133_v60  ;;  %v8002_v60 = vld [vmem:[#allocation3 + $0xf9] sm:$0xff]  ;;  %v8003_v46 = vld [vmem:[#allocation3 + $0x109] sm:$0xff] }
 0x674   : > { %19641 = vmatprep.mubr.f32.mxu0 %v26446_v7  ;;  %22129 = vmatpush3.bf16.msra.mxu0 %v22126_v11  ;;  %v29327_v7 = vld [vmem:[#allocation7_spill] sm:$0xff] }
 0x675   : > { %22131 = vmatprep.subr.bf16.mxu0 %v22130_v23  ;;  %v15148_v11 = vld [vmem:[%s29016_s1 + $0xd78] sm:$0xff] }
 0x676   : > { %v22166_v35 = vpack.c.bf16 %v15148_v11, %v15147_v58  ;;  %v15152_v11 = vld [vmem:[%s29016_s1 + $0xd90] sm:$0xff] }
 0x677   : > { %19642 = vmatmul.mubr.f32.gmra.mrb[44].mxu0 %v26449_v0  ;;  %v29328_v0 = vld [vmem:[#allocation8_spill] sm:$0xff] }
 0x678   : > { %19644 = vmatprep.mubr.f32.mxu0 %v26452_v32  ;;  %22133 = vmatpush3.bf16.msra.mxu0 %v22130_v23  ;;  %v29329_v32 = vld [vmem:[#allocation31_spill] sm:$0xff] }
 0x679   : > { %22135 = vmatprep.subr.bf16.mxu0 %v22134_v3  ;;  %v7998_v23 = vld [vmem:[#allocation3 + $0xc9] sm:$0xff] }
 0x67b   : > { %19645 = vmatmul.mubr.f32.gmra.mrb[46].mxu0 %v26455_v1  ;;  %v7709_v1 = vld [vmem:[#allocation3 + $0x198] sm:$0xff] }
 0x67c   : > { %19647 = vmatprep.mubr.f32.mxu0 %v26458_v21  ;;  %22137 = vmatpush3.bf16.msra.mxu0 %v22134_v3  ;;  %v29330_v21 = vld [vmem:[#allocation32_spill] sm:$0xff] }
 0x67d   : > { %22139 = vmatprep.subr.bf16.mxu0 %v22138_v8  ;;  %v8001_v3 = vld [vmem:[#allocation3 + $0xf1] sm:$0xff] }
 0x67f   : > { %19648 = vmatmul.mubr.f32.gmra.mrb[48].mxu0 %v26461_v44  ;;  %v15135_v44 = vld [vmem:[%s29016_s1 + $0xd10] sm:$0xff] }
 0x680   : > { %19650 = vmatprep.mubr.f32.mxu0 %v26464_v54  ;;  %v15136_v54 = vld [vmem:[%s29016_s1 + $0xd18] sm:$0xff] }
 0x683   : > { %19651 = vmatmul.mubr.f32.gmra.mrb[50].mxu0 %v26467_v43  ;;  %v26980_v43 = vld [vmem:[#allocation2 + $0x8] sm:$0xff] }
 0x684   : > { %19653 = vmatprep.mubr.f32.mxu0 %v26470_v18  ;;  %v15166_v18 = vld [vmem:[%s29016_s1 + $0xe00] sm:$0xff] }
 0x687   : > { %19654 = vmatmul.mubr.f32.gmra.mrb[52].mxu0 %v26473_v31  ;;  %v15167_v31 = vld [vmem:[%s29016_s1 + $0xe08] sm:$0xff] }
 0x688   : > { %19656 = vmatprep.mubr.f32.mxu0 %v26476_v47  ;;  %v15168_v47 = vld [vmem:[%s29016_s1 + $0xe10] sm:$0xff] }
 0x68b   : > { %19657 = vmatmul.mubr.f32.gmra.mrb[54].mxu0 %v26479_v62  ;;  %v22170_v62 = vpack.c.bf16 %v15167_v31, %v15166_v18  ;;  %v8012_v18 = vld [vmem:[#allocation3 + $0x171] sm:$0xff]  ;;  %v8013_v31 = vld [vmem:[#allocation3 + $0x181] sm:$0xff] }
 0x68c   : > { %19659 = vmatprep.mubr.f32.mxu0 %v26482_v12  ;;  %v15169_v12 = vld [vmem:[%s29016_s1 + $0xe18] sm:$0xff] }
 0x68d   : > { %v22174_v30 = vpack.c.bf16 %v15169_v12, %v15168_v47  ;;  %22171 = vmatprep.subr.bf16.mxu1 %v22170_v62  ;;  %v8015_v47 = vld [vmem:[#allocation3 + $0x199] sm:$0xff]  ;;  %v8016_v12 = vld [vmem:[#allocation3 + $0x1a1] sm:$0xff] }
 0x68e   : > { %22173 = vmatpush3.bf16.msra.mxu1 %v22170_v62  ;;  %v8014_v62 = vld [vmem:[#allocation3 + $0x189] sm:$0xff] }
 0x68f   : > { %19660 = vmatmul.mubr.f32.gmra.mrb[56].mxu0 %v26485_v22  ;;  %v22142_v22 = vpack.c.bf16 %v15136_v54, %v15135_v44  ;;  %22175 = vmatprep.subr.bf16.mxu1 %v22174_v30  ;;  %v8010_v44 = vld [vmem:[#allocation3 + $0x159] sm:$0xff]  ;;  %v8011_v54 = vld [vmem:[#allocation3 + $0x169] sm:$0xff] }
 0x690   : > { %19662 = vmatprep.mubr.f32.mxu0 %v29327_v7  ;;  %v8005_v7 = vld [vmem:[#allocation3 + $0x121] sm:$0xff] }
 0x692   : > { %22177 = vmatpush3.bf16.msra.mxu1 %v22174_v30  ;;  %v8293_v30 = vld [vmem:[#allocation3 + $0x4a] sm:$0xff] }
 0x693   : > { %19663 = vmatmul.mubr.f32.gmra.mrb[58].mxu0 %v29328_v0  ;;  %v8006_v0 = vld [vmem:[#allocation3 + $0x129] sm:$0xff] }
 0x694   : > { %19665 = vmatprep.mubr.f32.mxu0 %v29329_v32  ;;  %v8007_v32 = vld [vmem:[#allocation3 + $0x139] sm:$0xff] }
 0x697   : > { %19666 = vmatmul.mubr.f32.gmra.mrb[60].mxu0 %v29330_v21  ;;  %v8009_v21 = vld [vmem:[#allocation3 + $0x151] sm:$0xff] }
 0x698   : > { %19668 = vmatprep.mubr.f32.mxu0 %v7709_v1  ;;  %v8008_v1 = vld [vmem:[#allocation3 + $0x141] sm:$0xff] }
 0x69b   : > { %19669 = vmatmul.mubr.f32.gmra.mrb[62].mxu0 %v26980_v43 }
 0x69c   : > { %19703 = vmatprep.mubr.f32.mxu0 %v26728_v9  ;;  %v15170_v9 = vld [vmem:[%s29016_s1 + $0xe20] sm:$0xff] }
 0x69d   : > { %v22178_v45 = vpack.c.bf16 %v15171_v39, %v15170_v9  ;;  %v8295_v9 = vld [vmem:[#allocation3 + $0x62] sm:$0xff]  ;;  %v8296_v39 = vld [vmem:[#allocation3 + $0x6a] sm:$0xff] }
 0x69f   : > { %19704 = vmatmul.mubr.f32.vlgmr.msra.gmra.mrb[32].mxu0 %v29331_v17  ;;  %22179 = vmatprep.subr.bf16.mxu1 %v22178_v45  ;;  %v8297_v17 = vld [vmem:[#allocation3 + $0x7a] sm:$0xff] }
 0x6a0   : > { %19706 = vmatprep.mubr.f32.mxu0 %v29332_v49  ;;  %22141 = vmatpush3.bf16.msra.mxu0 %v22138_v8  ;;  %v8004_v8 = vld [vmem:[#allocation3 + $0x111] sm:$0xff]  ;;  %v8298_v49 = vld [vmem:[#allocation3 + $0x82] sm:$0xff] }
 0x6a1   : > { %22143 = vmatprep.subr.bf16.mxu0 %v22142_v22  ;;  %22181 = vmatpush3.bf16.msra.mxu1 %v22178_v45  ;;  %v8301_v45 = vld [vmem:[#allocation3 + $0xaa] sm:$0xff] }
 0x6a2   : > { %22183 = vmatprep.subr.bf16.mxu1 %v22182_v40 }
 0x6a3   : > { %19707 = vmatmul.mubr.f32.gmra.mrb[34].mxu0 %v29333_v13  ;;  %v8305_v13 = vld [vmem:[#allocation3 + $0xda] sm:$0xff] }
 0x6a4   : > { %19709 = vmatprep.mubr.f32.mxu0 %v29334_v37  ;;  %22145 = vmatpush3.bf16.msra.mxu0 %v22142_v22  ;;  %v8291_v22 = vld [vmem:[#allocation3 + $0x32] sm:$0xff]  ;;  %v8306_v37 = vld [vmem:[#allocation3 + $0xe2] sm:$0xff] }
 0x6a5   : > { %22147 = vmatprep.subr.bf16.mxu0 %v22146_v25  ;;  %22185 = vmatpush3.bf16.msra.mxu1 %v22182_v40  ;;  %v8309_v40 = vld [vmem:[#allocation3 + $0x10a] sm:$0xff] }
 0x6a6   : > { %22187 = vmatprep.subr.bf16.mxu1 %v22186_v63 }
 0x6a7   : > { %19710 = vmatmul.mubr.f32.gmra.mrb[36].mxu0 %v26755_v50  ;;  %v15176_v50 = vld [vmem:[%s29016_s1 + $0xe50] sm:$0xff] }
 0x6a8   : > { %19712 = vmatprep.mubr.f32.mxu0 %v29335_v6  ;;  %22149 = vmatpush3.bf16.msra.mxu0 %v22146_v25  ;;  %v22190_v15 = vpack.c.bf16 %v15177_v56, %v15176_v50  ;;  %v8299_v25 = vld [vmem:[#allocation3 + $0x92] sm:$0xff]  ;;  %v8313_v6 = vld [vmem:[#allocation3 + $0x13a] sm:$0xff] }
 0x6a9   : > { %22151 = vmatprep.subr.bf16.mxu0 %v22150_v26  ;;  %22189 = vmatpush3.bf16.msra.mxu1 %v22186_v63  ;;  %v8316_v63 = vld [vmem:[#allocation3 + $0x15a] sm:$0xff]  ;;  %v8318_v50 = vld [vmem:[#allocation3 + $0x172] sm:$0xff] }
 0x6aa   : > { %22191 = vmatprep.subr.bf16.mxu1 %v22190_v15  ;;  %v8321_v56 = vld [vmem:[#allocation3 + $0x19a] sm:$0xff] }
 0x6ab   : > { %19713 = vmatmul.mubr.f32.gmra.mrb[38].mxu0 %v26767_v48  ;;  %v22162_v48 = vpack.c.bf16 %v15146_v38, %v15145_v27  ;;  %v8747_v38 = vld [vmem:[#allocation2 + $0x1] sm:$0xff] }
 0x6ac   : > { %19715 = vmatprep.mubr.f32.mxu0 %v7993_v10  ;;  %22153 = vmatpush3.bf16.msra.mxu0 %v22150_v26  ;;  %v8307_v26 = vld [vmem:[#allocation3 + $0xf2] sm:$0xff]  ;;  %v8322_v10 = vld [vmem:[#allocation3 + $0x1a2] sm:$0xff] }
 0x6ad   : > { %22155 = vmatprep.subr.bf16.mxu0 %v22154_v57  ;;  %22193 = vmatpush3.bf16.msra.mxu1 %v22190_v15  ;;  %v15179_v15 = vld [vmem:[%s29016_s1 + $0xe68] sm:$0xff] }
 0x6ae   : > { %19863 = vmatprep.mubr.f32.mxu1 %v8747_v38 }
 0x6af   : > { %19716 = vmatmul.mubr.f32.gmra.mrb[40].mxu0 %v7994_v61 }
 0x6b0   : > { %19718 = vmatprep.mubr.f32.mxu0 %v7995_v33  ;;  %22157 = vmatpush3.bf16.msra.mxu0 %v22154_v57  ;;  %v8314_v57 = vld [vmem:[#allocation3 + $0x142] sm:$0xff]  ;;  %v8748_v33 = vld [vmem:[#allocation2 + $0x9] sm:$0xff] }
 0x6b1   : > { %22159 = vmatprep.subr.bf16.mxu0 %v22158_v28 }
 0x6b3   : > { %19719 = vmatmul.mubr.f32.gmra.mrb[42].mxu0 %v7996_v42  ;;  %v15151_v42 = vld [vmem:[%s29016_s1 + $0xd88] sm:$0xff] }
 0x6b4   : > { %19721 = vmatprep.mubr.f32.mxu0 %v7997_v16  ;;  %22161 = vmatpush3.bf16.msra.mxu0 %v22158_v28  ;;  %v15178_v28 = vld [vmem:[%s29016_s1 + $0xe60] sm:$0xff]  ;;  %v15153_v16 = vld [vmem:[%s29016_s1 + $0xd98] sm:$0xff] }
 0x6b5   : > { %22163 = vmatprep.subr.bf16.mxu0 %v22162_v48  ;;  %v22194_v61 = vpack.c.bf16 %v15179_v15, %v15178_v28 }
 0x6b7   : > { %19722 = vmatmul.mubr.f32.gmra.mrb[44].mxu0 %v7998_v23  ;;  %22195 = vmatprep.subr.bf16.mxu1 %v22194_v61  ;;  %v15154_v23 = vld [vmem:[%s29016_s1 + $0xda0] sm:$0xff] }
 0x6b8   : > { %19724 = vmatprep.mubr.f32.mxu0 %v7999_v4  ;;  %22165 = vmatpush3.bf16.msra.mxu0 %v22162_v48  ;;  %v15150_v48 = vld [vmem:[%s29016_s1 + $0xd80] sm:$0xff]  ;;  %v15155_v4 = vld [vmem:[%s29016_s1 + $0xda8] sm:$0xff] }
 0x6b9   : > { %22167 = vmatprep.subr.bf16.mxu0 %v22166_v35  ;;  %22197 = vmatpush3.bf16.msra.mxu1 %v22194_v61  ;;  %v22202_v58 = vpack.c.bf16 %v15151_v42, %v15150_v48 }
 0x6bb   : > { %19725 = vmatmul.mubr.f32.gmra.mrb[46].mxu0 %v8000_v59  ;;  %v22210_v59 = vpack.c.bf16 %v15155_v4, %v15154_v23 }
 0x6bc   : > { %19727 = vmatprep.mubr.f32.mxu0 %v8001_v3  ;;  %22169 = vmatpush3.bf16.msra.mxu0 %v22166_v35  ;;  %v22206_v35 = vpack.c.bf16 %v15153_v16, %v15152_v11  ;;  %v15156_v3 = vld [vmem:[%s29016_s1 + $0xdb0] sm:$0xff] }
 0x6bf   : > { %19728 = vmatmul.mubr.f32.gmra.mrb[48].mxu0 %v8002_v60  ;;  %v15157_v60 = vld [vmem:[%s29016_s1 + $0xdb8] sm:$0xff] }
 0x6c0   : > { %19730 = vmatprep.mubr.f32.mxu0 %v8003_v46  ;;  %v22214_v46 = vpack.c.bf16 %v15157_v60, %v15156_v3 }
 0x6c3   : > { %19731 = vmatmul.mubr.f32.gmra.mrb[50].mxu0 %v8004_v8  ;;  %v15158_v8 = vld [vmem:[%s29016_s1 + $0xdc0] sm:$0xff] }
 0x6c4   : > { %19733 = vmatprep.mubr.f32.mxu0 %v8005_v7  ;;  %v15159_v7 = vld [vmem:[%s29016_s1 + $0xdc8] sm:$0xff] }
 0x6c7   : > { %19734 = vmatmul.mubr.f32.gmra.mrb[52].mxu0 %v8006_v0  ;;  %v22218_v0 = vpack.c.bf16 %v15159_v7, %v15158_v8 }
 0x6c8   : > { %19736 = vmatprep.mubr.f32.mxu0 %v8007_v32  ;;  %v15160_v32 = vld [vmem:[%s29016_s1 + $0xdd0] sm:$0xff] }
 0x6cb   : > { %19737 = vmatmul.mubr.f32.gmra.mrb[54].mxu0 %v8008_v1  ;;  %v15161_v1 = vld [vmem:[%s29016_s1 + $0xdd8] sm:$0xff] }
 0x6cc   : > { %19739 = vmatprep.mubr.f32.mxu0 %v8009_v21  ;;  %v22222_v21 = vpack.c.bf16 %v15161_v1, %v15160_v32 }
 0x6cf   : > { %19740 = vmatmul.mubr.f32.gmra.mrb[56].mxu0 %v8010_v44  ;;  %v15162_v44 = vld [vmem:[%s29016_s1 + $0xde0] sm:$0xff] }
 0x6d0   : > { %19742 = vmatprep.mubr.f32.mxu0 %v8011_v54  ;;  %v15163_v54 = vld [vmem:[%s29016_s1 + $0xde8] sm:$0xff] }
 0x6d3   : > { %19743 = vmatmul.mubr.f32.gmra.mrb[58].mxu0 %v8012_v18  ;;  %v22226_v18 = vpack.c.bf16 %v15163_v54, %v15162_v44 }
 0x6d4   : > { %19745 = vmatprep.mubr.f32.mxu0 %v8013_v31  ;;  %v15164_v31 = vld [vmem:[%s29016_s1 + $0xdf0] sm:$0xff] }
 0x6d7   : > { %19746 = vmatmul.mubr.f32.gmra.mrb[60].mxu0 %v8014_v62 }
 0x6d8   : > { %19748 = vmatprep.mubr.f32.mxu0 %v8015_v47  ;;  %v15165_v47 = vld [vmem:[%s29016_s1 + $0xdf8] sm:$0xff] }
 0x6d9   : > { %v22230_v62 = vpack.c.bf16 %v15165_v47, %v15164_v31 }
 0x6db   : > { %19749 = vmatmul.mubr.f32.gmra.mrb[62].mxu0 %v8016_v12  ;;  %v15182_v12 = vld [vmem:[%s29016_s1 + $0xe80] sm:$0xff] }
 0x6dc   : > { %19783 = vmatprep.mubr.f32.mxu0 %v8291_v22  ;;  %v15183_v22 = vld [vmem:[%s29016_s1 + $0xe88] sm:$0xff] }
 0x6df   : > { %19784 = vmatmul.mubr.f32.vlgmr.msra.gmra.mrb[32].mxu0 %v8292_v5  ;;  %v27131_v5 = vpack.c.bf16 %v15183_v22, %v15182_v12 }
 0x6e0   : > { %19786 = vmatprep.mubr.f32.mxu0 %v8293_v30  ;;  %v27137_v30 = vld [vmem:[%s29017_s2 + $0x2] ss:$0 sm:$0xff] }
 0x6e3   : > { %19787 = vmatmul.mubr.f32.gmra.mrb[34].mxu0 %v8294_v51 }
 0x6e4   : > { %19789 = vmatprep.mubr.f32.mxu0 %v8295_v9 }
 0x6e7   : > { %19790 = vmatmul.mubr.f32.gmra.mrb[36].mxu0 %v8296_v39 }
 0x6e8   : > { %19792 = vmatprep.mubr.f32.mxu0 %v8297_v17 }
 0x6eb   : > { %19793 = vmatmul.mubr.f32.gmra.mrb[38].mxu0 %v8298_v49 }
 0x6ec   : > { %19795 = vmatprep.mubr.f32.mxu0 %v8299_v25 }
 0x6ef   : > { %19796 = vmatmul.mubr.f32.gmra.mrb[40].mxu0 %v8300_v14 }
 0x6f0   : > { %19798 = vmatprep.mubr.f32.mxu0 %v8301_v45 }
 0x6f3   : > { %19799 = vmatmul.mubr.f32.gmra.mrb[42].mxu0 %v8302_v41 }
 0x6f4   : > { %19801 = vmatprep.mubr.f32.mxu0 %v8303_v19 }
 0x6f7   : > { %19802 = vmatmul.mubr.f32.gmra.mrb[44].mxu0 %v8304_v34 }
 0x6f8   : > { %19804 = vmatprep.mubr.f32.mxu0 %v8305_v13 }
 0x6fb   : > { %19805 = vmatmul.mubr.f32.gmra.mrb[46].mxu0 %v8306_v37 }
 0x6fc   : > { %19807 = vmatprep.mubr.f32.mxu0 %v8307_v26 }
 0x6ff   : > { %19808 = vmatmul.mubr.f32.gmra.mrb[48].mxu0 %v8308_v36 }
 0x700   : > { %19810 = vmatprep.mubr.f32.mxu0 %v8309_v40 }
 0x703   : > { %19811 = vmatmul.mubr.f32.gmra.mrb[50].mxu0 %v8310_v53 }
 0x704   : > { %19813 = vmatprep.mubr.f32.mxu0 %v8311_v29 }
 0x707   : > { %19814 = vmatmul.mubr.f32.gmra.mrb[52].mxu0 %v8312_v55 }
 0x708   : > { %19816 = vmatprep.mubr.f32.mxu0 %v8313_v6 }
 0x70b   : > { %19817 = vmatmul.mubr.f32.gmra.mrb[54].mxu0 %v8314_v57 }
 0x70c   : > { %19819 = vmatprep.mubr.f32.mxu0 %v8315_v52 }
 0x70f   : > { %19820 = vmatmul.mubr.f32.gmra.mrb[56].mxu0 %v8316_v63 }
 0x710   : > { %19822 = vmatprep.mubr.f32.mxu0 %v8317_v2 }
 0x713   : > { %19823 = vmatmul.mubr.f32.gmra.mrb[58].mxu0 %v8318_v50 }
 0x714   : > { %19825 = vmatprep.mubr.f32.mxu0 %v26890_v24  ;;  %v15180_v24 = vld [vmem:[%s29016_s1 + $0xe70] sm:$0xff] }
 0x717   : > { %19826 = vmatmul.mubr.f32.gmra.mrb[60].mxu0 %v26893_v20  ;;  %v15181_v20 = vld [vmem:[%s29016_s1 + $0xe78] sm:$0xff] }
 0x718   : > { %19828 = vmatprep.mubr.f32.mxu0 %v8321_v56  ;;  %v22198_v27 = vpack.c.bf16 %v15181_v20, %v15180_v24 }
 0x71a   : > { %22199 = vmatprep.subr.bf16.mxu1 %v22198_v27 }
 0x71b   : > { %19829 = vmatmul.mubr.f32.gmra.mrb[62].mxu0 %v8322_v10  ;;  %22201 = vmatpush3.bf16.msra.mxu1 %v22198_v27 }
 0x71c   : > { %22203 = vmatprep.subr.bf16.mxu1 %v22202_v58 }
 0x71e   : > { %19864 = vmatmul.mubr.f32.vlgmr.msra.gmra.mrb[64].mxu1 %v8748_v33 }
 0x71f   : > { %22205 = vmatpush3.bf16.msra.mxu1 %v22202_v58 }
 0x720   : > { %22207 = vmatprep.subr.bf16.mxu1 %v22206_v35 }
 0x723   : > { %22209 = vmatpush3.bf16.msra.mxu1 %v22206_v35 }
 0x724   : > { %22211 = vmatprep.subr.bf16.mxu1 %v22210_v59 }
 0x727   : > { %22213 = vmatpush3.bf16.msra.mxu1 %v22210_v59 }
 0x728   : > { %22215 = vmatprep.subr.bf16.mxu1 %v22214_v46 }
 0x72b   : > { %22217 = vmatpush3.bf16.msra.mxu1 %v22214_v46 }
 0x72c   : > { %22219 = vmatprep.subr.bf16.mxu1 %v22218_v0 }
 0x72f   : > { %22221 = vmatpush3.bf16.msra.mxu1 %v22218_v0 }
 0x730   : > { %22223 = vmatprep.subr.bf16.mxu1 %v22222_v21 }
 0x733   : > { %22225 = vmatpush3.bf16.msra.mxu1 %v22222_v21 }
 0x734   : > { %22227 = vmatprep.subr.bf16.mxu1 %v22226_v18 }
 0x737   : > { %22229 = vmatpush3.bf16.msra.mxu1 %v22226_v18 }
 0x738   : > { %22231 = vmatprep.subr.bf16.mxu1 %v22230_v62 }
 0x73b   : > { %22233 = vmatpush3.bf16.msra.mxu1 %v22230_v62 }
 0x73c   : > { %22235 = vmatprep.subr.bf16.mxu1 %v27131_v5 }
 0x7b2   : > { %v19785_v51 = vpop.f32.mrb[32].mxu0 }
 0x7b3   : > { %v8603_v9 = vadd.f32 %v19785_v51, %v27137_v30  ;;  %v8406_v39 = vpop.f32.mrb[33].mxu0 }
 0x7b4   : > { %v8602_v17 = vadd.f32 %v27137_v30, %v8406_v39 }
 0x7b5   : > { %v8635_v49 = vmax.f32 %v8603_v9, 0.0 }
 0x7b6   : > { %v8634_v25 = vmax.f32 %v8602_v17, 0.0  ;;  %v19788_v14 = vpop.f32.mrb[34].mxu0 }
 0x7b7   : > { %8667 = vst [vmem:[#allocation2 + $0x21] sm:$0xff] %v8635_v49  ;;  %v8605_v45 = vadd.f32 %v19788_v14, %v27137_v30  ;;  %v8416_v41 = vpop.f32.mrb[35].mxu0 }
 0x7b8   : > { %8666 = vst [vmem:[#allocation2 + $0x19] sm:$0xff] %v8634_v25  ;;  %v8604_v19 = vadd.f32 %v27137_v30, %v8416_v41  ;;  %19866 = vmatprep.mubr.f32.mxu1 %v8634_v25 }
 0x7b9   : > { %v8637_v34 = vmax.f32 %v8605_v45, 0.0  ;;  %19867 = vmatmul.mubr.f32.gmra.mrb[66].mxu1 %v8635_v49 }
 0x7ba   : > { %v8636_v13 = vmax.f32 %v8604_v19, 0.0  ;;  %v19791_v37 = vpop.f32.mrb[36].mxu0 }
 0x7bb   : > { %8669 = vst [vmem:[#allocation2 + $0x39] sm:$0xff] %v8637_v34  ;;  %v8607_v26 = vadd.f32 %v19791_v37, %v27137_v30  ;;  %v8426_v36 = vpop.f32.mrb[37].mxu0 }
 0x7bc   : > { %8668 = vst [vmem:[#allocation2 + $0x31] sm:$0xff] %v8636_v13  ;;  %v8606_v40 = vadd.f32 %v27137_v30, %v8426_v36  ;;  %19869 = vmatprep.mubr.f32.mxu1 %v8636_v13 }
 0x7bd   : > { %v8639_v53 = vmax.f32 %v8607_v26, 0.0  ;;  %19870 = vmatmul.mubr.f32.gmra.mrb[68].mxu1 %v8637_v34 }
 0x7be   : > { %v8638_v29 = vmax.f32 %v8606_v40, 0.0  ;;  %v19794_v55 = vpop.f32.mrb[38].mxu0 }
 0x7bf   : > { %8671 = vst [vmem:[#allocation2 + $0x51] sm:$0xff] %v8639_v53  ;;  %v8609_v6 = vadd.f32 %v19794_v55, %v27137_v30  ;;  %v8436_v57 = vpop.f32.mrb[39].mxu0 }
 0x7c0   : > { %8670 = vst [vmem:[#allocation2 + $0x49] sm:$0xff] %v8638_v29  ;;  %v8608_v52 = vadd.f32 %v27137_v30, %v8436_v57  ;;  %19872 = vmatprep.mubr.f32.mxu1 %v8638_v29 }
 0x7c1   : > { %v8641_v63 = vmax.f32 %v8609_v6, 0.0  ;;  %19873 = vmatmul.mubr.f32.gmra.mrb[70].mxu1 %v8639_v53 }
 0x7c2   : > { %v8640_v2 = vmax.f32 %v8608_v52, 0.0  ;;  %v19797_v50 = vpop.f32.mrb[40].mxu0 }
 0x7c3   : > { %8673 = vst [vmem:[#allocation2 + $0x69] sm:$0xff] %v8641_v63  ;;  %v8611_v56 = vadd.f32 %v19797_v50, %v27137_v30  ;;  %v8446_v10 = vpop.f32.mrb[41].mxu0 }
 0x7c4   : > { %8672 = vst [vmem:[#allocation2 + $0x61] sm:$0xff] %v8640_v2  ;;  %v8610_v28 = vadd.f32 %v27137_v30, %v8446_v10  ;;  %19875 = vmatprep.mubr.f32.mxu1 %v8640_v2 }
 0x7c5   : > { %v8643_v15 = vmax.f32 %v8611_v56, 0.0  ;;  %19876 = vmatmul.mubr.f32.gmra.mrb[72].mxu1 %v8641_v63 }
 0x7c6   : > { %v8642_v61 = vmax.f32 %v8610_v28, 0.0  ;;  %v19800_v24 = vpop.f32.mrb[42].mxu0 }
 0x7c7   : > { %8675 = vst [vmem:[#allocation2 + $0x81] sm:$0xff] %v8643_v15  ;;  %v8613_v20 = vadd.f32 %v19800_v24, %v27137_v30  ;;  %v8456_v27 = vpop.f32.mrb[43].mxu0 }
 0x7c8   : > { %8674 = vst [vmem:[#allocation2 + $0x79] sm:$0xff] %v8642_v61  ;;  %v8612_v38 = vadd.f32 %v27137_v30, %v8456_v27  ;;  %19878 = vmatprep.mubr.f32.mxu1 %v8642_v61  ;;  %v8698_v27 = vld [vmem:[#allocation2] sm:$0xff] }
 0x7c9   : > { %v27151_v33 = vmax.f32 %v8613_v20, 0.0  ;;  %19879 = vmatmul.mubr.f32.gmra.mrb[74].mxu1 %v8643_v15 }
 0x7ca   : > { %v27153_v48 = vmax.f32 %v8612_v38, 0.0  ;;  %v19803_v42 = vpop.f32.mrb[44].mxu0 }
 0x7cb   : > { %8677 = vst [vmem:[#allocation2 + $0x99] sm:$0xff] %v27151_v33  ;;  %v8615_v58 = vadd.f32 %v19803_v42, %v27137_v30  ;;  %v8466_v11 = vpop.f32.mrb[45].mxu0  ;;  %v15184_v42 = vld [vmem:[%s29016_s1 + $0xe90] sm:$0xff] }
 0x7cc   : > { %8676 = vst [vmem:[#allocation2 + $0x91] sm:$0xff] %v27153_v48  ;;  %v8614_v16 = vadd.f32 %v27137_v30, %v8466_v11  ;;  %19881 = vmatprep.mubr.f32.mxu1 %v27153_v48 }
 0x7cd   : > { %v27160_v35 = vmax.f32 %v8615_v58, 0.0  ;;  %19882 = vmatmul.mubr.f32.gmra.mrb[76].mxu1 %v27151_v33  ;;  %v15185_v58 = vld [vmem:[%s29016_s1 + $0xe98] sm:$0xff] }
 0x7ce   : > { %v27163_v23 = vmax.f32 %v8614_v16, 0.0  ;;  %v19806_v4 = vpop.f32.mrb[46].mxu0 }
 0x7cf   : > { %8679 = vst [vmem:[#allocation2 + $0xb1] sm:$0xff] %v27160_v35  ;;  %v8617_v59 = vadd.f32 %v19806_v4, %v27137_v30  ;;  %v8476_v3 = vpop.f32.mrb[47].mxu0  ;;  %v15186_v4 = vld [vmem:[%s29016_s1 + $0xea0] sm:$0xff] }
 0x7d0   : > { %8678 = vst [vmem:[#allocation2 + $0xa9] sm:$0xff] %v27163_v23  ;;  %v8616_v60 = vadd.f32 %v27137_v30, %v8476_v3  ;;  %19884 = vmatprep.mubr.f32.mxu1 %v27163_v23  ;;  %v27274_v3 = vld [vmem:[#allocation2 + $0x18] sm:$0xff] }
 0x7d1   : > { %v27170_v46 = vmax.f32 %v8617_v59, 0.0  ;;  %19885 = vmatmul.mubr.f32.gmra.mrb[78].mxu1 %v27160_v35  ;;  %v15187_v59 = vld [vmem:[%s29016_s1 + $0xea8] sm:$0xff] }
 0x7d2   : > { %v27173_v8 = vmax.f32 %v8616_v60, 0.0  ;;  %v19809_v7 = vpop.f32.mrb[48].mxu0  ;;  %v22242_v60 = vpack.c.bf16 %v15187_v59, %v15186_v4 }
 0x7d3   : > { %8681 = vst [vmem:[#allocation2 + $0xc9] sm:$0xff] %v27170_v46  ;;  %v8619_v0 = vadd.f32 %v19809_v7, %v27137_v30  ;;  %v8486_v32 = vpop.f32.mrb[49].mxu0  ;;  %v27278_v7 = vld [vmem:[#allocation2 + $0x20] sm:$0xff] }
 0x7d4   : > { %8680 = vst [vmem:[#allocation2 + $0xc1] sm:$0xff] %v27173_v8  ;;  %v8618_v1 = vadd.f32 %v27137_v30, %v8486_v32  ;;  %19887 = vmatprep.mubr.f32.mxu1 %v27173_v8  ;;  %v15189_v32 = vld [vmem:[%s29016_s1 + $0xeb8] sm:$0xff] }
 0x7d5   : > { %v27180_v21 = vmax.f32 %v8619_v0, 0.0  ;;  %19888 = vmatmul.mubr.f32.gmra.mrb[80].mxu1 %v27170_v46  ;;  %v15188_v0 = vld [vmem:[%s29016_s1 + $0xeb0] sm:$0xff] }
 0x7d6   : > { %v27183_v44 = vmax.f32 %v8618_v1, 0.0  ;;  %v19812_v54 = vpop.f32.mrb[50].mxu0  ;;  %v27290_v1 = vld [vmem:[#allocation2 + $0x38] sm:$0xff] }
 0x7d7   : > { %8683 = vst [vmem:[#allocation2 + $0xe1] sm:$0xff] %v27180_v21  ;;  %v8621_v18 = vadd.f32 %v19812_v54, %v27137_v30  ;;  %v8496_v31 = vpop.f32.mrb[51].mxu0  ;;  %v15190_v54 = vld [vmem:[%s29016_s1 + $0xec0] sm:$0xff] }
 0x7d8   : > { %8682 = vst [vmem:[#allocation2 + $0xd9] sm:$0xff] %v27183_v44  ;;  %v8620_v47 = vadd.f32 %v27137_v30, %v8496_v31  ;;  %19890 = vmatprep.mubr.f32.mxu1 %v27183_v44  ;;  %v27299_v31 = vld [vmem:[#allocation2 + $0x48] sm:$0xff] }
 0x7d9   : > { %v27190_v62 = vmax.f32 %v8621_v18, 0.0  ;;  %19891 = vmatmul.mubr.f32.gmra.mrb[82].mxu1 %v27180_v21  ;;  %v15191_v18 = vld [vmem:[%s29016_s1 + $0xec8] sm:$0xff] }
 0x7da   : > { %v27193_v12 = vmax.f32 %v8620_v47, 0.0  ;;  %v19815_v22 = vpop.f32.mrb[52].mxu0  ;;  %v22250_v47 = vpack.c.bf16 %v15191_v18, %v15190_v54 }
 0x7db   : > { %8685 = vst [vmem:[#allocation2 + $0xf9] sm:$0xff] %v27190_v62  ;;  %v8623_v51 = vadd.f32 %v19815_v22, %v27137_v30  ;;  %v8506_v9 = vpop.f32.mrb[53].mxu0  ;;  %v27302_v22 = vld [vmem:[#allocation2 + $0x50] sm:$0xff] }
 0x7dc   : > { %8684 = vst [vmem:[#allocation2 + $0xf1] sm:$0xff] %v27193_v12  ;;  %v8622_v39 = vadd.f32 %v27137_v30, %v8506_v9  ;;  %19893 = vmatprep.mubr.f32.mxu1 %v27193_v12  ;;  %v15193_v9 = vld [vmem:[%s29016_s1 + $0xed8] sm:$0xff] }
 0x7dd   : > { %v27200_v17 = vmax.f32 %v8623_v51, 0.0  ;;  %19894 = vmatmul.mubr.f32.gmra.mrb[84].mxu1 %v27190_v62  ;;  %v15192_v51 = vld [vmem:[%s29016_s1 + $0xed0] sm:$0xff] }
 0x7de   : > { %v27203_v49 = vmax.f32 %v8622_v39, 0.0  ;;  %v19818_v25 = vpop.f32.mrb[54].mxu0  ;;  %v27311_v39 = vld [vmem:[#allocation2 + $0x60] sm:$0xff] }
 0x7df   : > { %8687 = vst [vmem:[#allocation2 + $0x111] sm:$0xff] %v27200_v17  ;;  %v8625_v14 = vadd.f32 %v19818_v25, %v27137_v30  ;;  %v8516_v45 = vpop.f32.mrb[55].mxu0  ;;  %v22254_v25 = vpack.c.bf16 %v15193_v9, %v15192_v51  ;;  %v9246_v9 = vld [vmem:[#allocation2 + $0x2] sm:$0xff] }
 0x7e0   : > { %8686 = vst [vmem:[#allocation2 + $0x109] sm:$0xff] %v27203_v49  ;;  %v8624_v41 = vadd.f32 %v27137_v30, %v8516_v45  ;;  %19896 = vmatprep.mubr.f32.mxu1 %v27203_v49  ;;  %v15194_v45 = vld [vmem:[%s29016_s1 + $0xee0] sm:$0xff] }
 0x7e1   : > { %v27210_v19 = vmax.f32 %v8625_v14, 0.0  ;;  %19897 = vmatmul.mubr.f32.gmra.mrb[86].mxu1 %v27200_v17  ;;  %v27314_v14 = vld [vmem:[#allocation2 + $0x68] sm:$0xff] }
 0x7e2   : > { %v27213_v34 = vmax.f32 %v8624_v41, 0.0  ;;  %v19821_v13 = vpop.f32.mrb[56].mxu0  ;;  %v15195_v41 = vld [vmem:[%s29016_s1 + $0xee8] sm:$0xff] }
 0x7e3   : > { %8689 = vst [vmem:[#allocation2 + $0x129] sm:$0xff] %v27210_v19  ;;  %v8627_v37 = vadd.f32 %v19821_v13, %v27137_v30  ;;  %v8526_v26 = vpop.f32.mrb[57].mxu0  ;;  %v27323_v13 = vld [vmem:[#allocation2 + $0x78] sm:$0xff] }
 0x7e4   : > { %8688 = vst [vmem:[#allocation2 + $0x121] sm:$0xff] %v27213_v34  ;;  %v8626_v36 = vadd.f32 %v27137_v30, %v8526_v26  ;;  %19899 = vmatprep.mubr.f32.mxu1 %v27213_v34  ;;  %v27326_v26 = vld [vmem:[#allocation2 + $0x80] sm:$0xff]  ;;  %v27368_v4 = vld [vmem:[#allocation2 + $0xf8] sm:$0xff] }
 0x7e5   : > { %v27220_v40 = vmax.f32 %v8627_v37, 0.0  ;;  %19900 = vmatmul.mubr.f32.gmra.mrb[88].mxu1 %v27210_v19  ;;  %v22258_v37 = vpack.c.bf16 %v15195_v41, %v15194_v45  ;;  %v15200_v45 = vld [vmem:[%s29016_s1 + $0xf10] sm:$0xff]  ;;  %v15201_v41 = vld [vmem:[%s29016_s1 + $0xf18] sm:$0xff] }
 0x7e6   : > { %v27223_v53 = vmax.f32 %v8626_v36, 0.0  ;;  %v19824_v29 = vpop.f32.mrb[58].mxu0  ;;  %v15196_v36 = vld [vmem:[%s29016_s1 + $0xef0] sm:$0xff] }
 0x7e7   : > { %8691 = vst [vmem:[#allocation2 + $0x141] sm:$0xff] %v27220_v40  ;;  %v8629_v55 = vadd.f32 %v19824_v29, %v27137_v30  ;;  %v8536_v6 = vpop.f32.mrb[59].mxu0  ;;  %v15197_v29 = vld [vmem:[%s29016_s1 + $0xef8] sm:$0xff]  ;;  %v27371_v59 = vld [vmem:[#allocation2 + $0x108] sm:$0xff] }
 0x7e8   : > { %8690 = vst [vmem:[#allocation2 + $0x139] sm:$0xff] %v27223_v53  ;;  %v8628_v57 = vadd.f32 %v27137_v30, %v8536_v6  ;;  %19902 = vmatprep.mubr.f32.mxu1 %v27223_v53  ;;  %v22262_v6 = vpack.c.bf16 %v15197_v29, %v15196_v36  ;;  %v22270_v36 = vpack.c.bf16 %v15201_v41, %v15200_v45  ;;  %v15202_v29 = vld [vmem:[%s29016_s1 + $0xf20] sm:$0xff]  ;;  %v15205_v45 = vld [vmem:[%s29016_s1 + $0xf38] sm:$0xff] }
 0x7e9   : > { %v27230_v52 = vmax.f32 %v8629_v55, 0.0  ;;  %19903 = vmatmul.mubr.f32.gmra.mrb[90].mxu1 %v27220_v40  ;;  %v27335_v55 = vld [vmem:[#allocation2 + $0x90] sm:$0xff] }
 0x7ea   : > { %v27233_v63 = vmax.f32 %v8628_v57, 0.0  ;;  %v19827_v2 = vpop.f32.mrb[60].mxu0  ;;  %v27338_v57 = vld [vmem:[#allocation2 + $0x98] sm:$0xff] }
 0x7eb   : > { %8693 = vst [vmem:[#allocation2 + $0x159] sm:$0xff] %v27230_v52  ;;  %v8631_v50 = vadd.f32 %v19827_v2, %v27137_v30  ;;  %v8546_v56 = vpop.f32.mrb[61].mxu0  ;;  %v15198_v2 = vld [vmem:[%s29016_s1 + $0xf00] sm:$0xff]  ;;  %v27425_v41 = vld [vmem:[#allocation2 + $0x32] sm:$0xff] }
 0x7ec   : > { %8692 = vst [vmem:[#allocation2 + $0x151] sm:$0xff] %v27233_v63  ;;  %v8630_v10 = vadd.f32 %v27137_v30, %v8546_v56  ;;  %19905 = vmatprep.mubr.f32.mxu1 %v27233_v63  ;;  %v27347_v56 = vld [vmem:[#allocation2 + $0xa8] sm:$0xff]  ;;  %29338 = vst [vmem:[#allocation4_spill] sm:$0xff] %v27425_v41 }
 0x7ed   : > { %v27240_v28 = vmax.f32 %v8631_v50, 0.0  ;;  %19906 = vmatmul.mubr.f32.gmra.mrb[92].mxu1 %v27230_v52  ;;  %v15199_v50 = vld [vmem:[%s29016_s1 + $0xf08] sm:$0xff] }
 0x7ee   : > { %v27243_v15 = vmax.f32 %v8630_v10, 0.0  ;;  %v19830_v61 = vpop.f32.mrb[62].mxu0  ;;  %v22266_v10 = vpack.c.bf16 %v15199_v50, %v15198_v2  ;;  %v27413_v2 = vld [vmem:[#allocation2 + $0x1a] sm:$0xff] }
 0x7ef   : > { %8695 = vst [vmem:[#allocation2 + $0x171] sm:$0xff] %v27240_v28  ;;  %v27247_v24 = vadd.f32 %v19830_v61, %v27137_v30  ;;  %v8556_v20 = vpop.f32.mrb[63].mxu0  ;;  %v27350_v61 = vld [vmem:[#allocation2 + $0xb0] sm:$0xff]  ;;  %v27386_v54 = vld [vmem:[#allocation2 + $0x140] sm:$0xff] }
 0x7f0   : > { %8694 = vst [vmem:[#allocation2 + $0x169] sm:$0xff] %v27243_v15  ;;  %v27251_v38 = vadd.f32 %v27137_v30, %v8556_v20  ;;  %19908 = vmatprep.mubr.f32.mxu1 %v27243_v15  ;;  %v22238_v30 = vpack.c.bf16 %v15185_v58, %v15184_v42  ;;  %v27353_v20 = vld [vmem:[#allocation2 + $0xc0] sm:$0xff]  ;;  %v27359_v42 = vld [vmem:[#allocation2 + $0xd8] sm:$0xff] }
 0x7f1   : > { %v29108_v11 = vmax.f32 %v27247_v24, 0.0  ;;  %19909 = vmatmul.mubr.f32.gmra.mrb[94].mxu1 %v27240_v28  ;;  %v27362_v58 = vld [vmem:[#allocation2 + $0xe0] sm:$0xff] }
 0x7f2   : > { %v29109_v16 = vmax.f32 %v27251_v38, 0.0  ;;  %19943 = vmatprep.mubr.f32.mxu1 %v8698_v27  ;;  %v27356_v27 = vld [vmem:[#allocation2 + $0xc8] sm:$0xff] }
 0x7f3   : > { %8697 = vst [vmem:[#allocation2 + $0x189] sm:$0xff] %v29108_v11  ;;  %v27389_v18 = vld [vmem:[#allocation2 + $0x150] sm:$0xff]  ;;  %v27416_v11 = vld [vmem:[#allocation2 + $0x22] sm:$0xff] }
 0x7f4   : > { %8696 = vst [vmem:[#allocation2 + $0x181] sm:$0xff] %v29109_v16  ;;  %v27437_v16 = vld [vmem:[#allocation2 + $0x4a] sm:$0xff] }
 0x7f5   : > { %19944 = vmatmul.mubr.f32.vlgmr.msra.gmra.mrb[64].mxu1 %v26980_v43  ;;  %v27287_v43 = vld [vmem:[#allocation2 + $0x30] sm:$0xff]  ;;  %29340 = vst [vmem:[#allocation11_spill] sm:$0xff] %v27437_v16 }
 0x7f6   : > { %19946 = vmatprep.mubr.f32.mxu1 %v27274_v3  ;;  %22237 = vmatpush3.bf16.msra.mxu1 %v27131_v5  ;;  %v22246_v5 = vpack.c.bf16 %v15189_v32, %v15188_v0  ;;  %v27377_v0 = vld [vmem:[#allocation2 + $0x120] sm:$0xff]  ;;  %v27380_v32 = vld [vmem:[#allocation2 + $0x128] sm:$0xff] }
 0x7f7   : > { %22239 = vmatprep.subr.bf16.mxu1 %v22238_v30  ;;  %v27395_v51 = vld [vmem:[#allocation2 + $0x168] sm:$0xff] }
 0x7f8   : > { %29336 = vst [vmem:[#allocation9_spill] sm:$0xff] %v27395_v51 }
 0x7f9   : > { %19947 = vmatmul.mubr.f32.gmra.mrb[66].mxu1 %v27278_v7 }
 0x7fa   : > { %19949 = vmatprep.mubr.f32.mxu1 %v27287_v43  ;;  %22241 = vmatpush3.bf16.msra.mxu1 %v22238_v30  ;;  %v27365_v30 = vld [vmem:[#allocation2 + $0xf0] sm:$0xff] }
 0x7fb   : > { %22243 = vmatprep.subr.bf16.mxu1 %v22242_v60 }
 0x7fd   : > { %19950 = vmatmul.mubr.f32.gmra.mrb[68].mxu1 %v27290_v1 }
 0x7fe   : > { %19952 = vmatprep.mubr.f32.mxu1 %v27299_v31  ;;  %22245 = vmatpush3.bf16.msra.mxu1 %v22242_v60  ;;  %v27374_v60 = vld [vmem:[#allocation2 + $0x110] sm:$0xff] }
 0x7ff   : > { %22247 = vmatprep.subr.bf16.mxu1 %v22246_v5 }
 0x801   : > { %19953 = vmatmul.mubr.f32.gmra.mrb[70].mxu1 %v27302_v22 }
 0x802   : > { %19955 = vmatprep.mubr.f32.mxu1 %v27311_v39  ;;  %22249 = vmatpush3.bf16.msra.mxu1 %v22246_v5  ;;  %v27383_v5 = vld [vmem:[#allocation2 + $0x138] sm:$0xff] }
 0x803   : > { %22251 = vmatprep.subr.bf16.mxu1 %v22250_v47 }
 0x805   : > { %19956 = vmatmul.mubr.f32.gmra.mrb[72].mxu1 %v27314_v14 }
 0x806   : > { %19958 = vmatprep.mubr.f32.mxu1 %v27323_v13  ;;  %22253 = vmatpush3.bf16.msra.mxu1 %v22250_v47  ;;  %v27392_v47 = vld [vmem:[#allocation2 + $0x158] sm:$0xff] }
 0x807   : > { %22255 = vmatprep.subr.bf16.mxu1 %v22254_v25 }
 0x809   : > { %19959 = vmatmul.mubr.f32.gmra.mrb[74].mxu1 %v27326_v26 }
 0x80a   : > { %19961 = vmatprep.mubr.f32.mxu1 %v27335_v55  ;;  %22257 = vmatpush3.bf16.msra.mxu1 %v22254_v25  ;;  %v27398_v25 = vld [vmem:[#allocation2 + $0x170] sm:$0xff] }
 0x80b   : > { %22259 = vmatprep.subr.bf16.mxu1 %v22258_v37  ;;  %29337 = vst [vmem:[#allocation10_spill] sm:$0xff] %v27398_v25 }
 0x80d   : > { %19962 = vmatmul.mubr.f32.gmra.mrb[76].mxu1 %v27338_v57 }
 0x80e   : > { %19964 = vmatprep.mubr.f32.mxu1 %v27347_v56  ;;  %22261 = vmatpush3.bf16.msra.mxu1 %v22258_v37  ;;  %v9247_v37 = vld [vmem:[#allocation2 + $0xa] sm:$0xff] }
 0x80f   : > { %22263 = vmatprep.subr.bf16.mxu1 %v22262_v6 }
 0x811   : > { %19965 = vmatmul.mubr.f32.gmra.mrb[78].mxu1 %v27350_v61 }
 0x812   : > { %19967 = vmatprep.mubr.f32.mxu1 %v27353_v20  ;;  %22265 = vmatpush3.bf16.msra.mxu1 %v22262_v6  ;;  %v15203_v6 = vld [vmem:[%s29016_s1 + $0xf28] sm:$0xff] }
 0x813   : > { %22267 = vmatprep.subr.bf16.mxu1 %v22266_v10  ;;  %v22274_v50 = vpack.c.bf16 %v15203_v6, %v15202_v29  ;;  %v15206_v29 = vld [vmem:[%s29016_s1 + $0xf40] sm:$0xff]  ;;  %v15207_v6 = vld [vmem:[%s29016_s1 + $0xf48] sm:$0xff] }
 0x815   : > { %19968 = vmatmul.mubr.f32.gmra.mrb[80].mxu1 %v27356_v27 }
 0x816   : > { %19970 = vmatprep.mubr.f32.mxu1 %v27359_v42 }
 0x819   : > { %19971 = vmatmul.mubr.f32.gmra.mrb[82].mxu1 %v27362_v58 }
 0x81a   : > { %19973 = vmatprep.mubr.f32.mxu1 %v27365_v30 }
 0x81d   : > { %19974 = vmatmul.mubr.f32.gmra.mrb[84].mxu1 %v27368_v4 }
 0x81e   : > { %19976 = vmatprep.mubr.f32.mxu1 %v27371_v59 }
 0x821   : > { %19977 = vmatmul.mubr.f32.gmra.mrb[86].mxu1 %v27374_v60 }
 0x822   : > { %19979 = vmatprep.mubr.f32.mxu1 %v27377_v0 }
 0x825   : > { %19980 = vmatmul.mubr.f32.gmra.mrb[88].mxu1 %v27380_v32 }
 0x826   : > { %19982 = vmatprep.mubr.f32.mxu1 %v27383_v5 }
 0x829   : > { %19983 = vmatmul.mubr.f32.gmra.mrb[90].mxu1 %v27386_v54 }
 0x82a   : > { %19985 = vmatprep.mubr.f32.mxu1 %v27389_v18 }
 0x82d   : > { %19986 = vmatmul.mubr.f32.gmra.mrb[92].mxu1 %v27392_v47 }
 0x82e   : > { %19988 = vmatprep.mubr.f32.mxu1 %v27395_v51 }
 0x831   : > { %19989 = vmatmul.mubr.f32.gmra.mrb[94].mxu1 %v27398_v25 }
 0x832   : > { %20023 = vmatprep.mubr.f32.mxu1 %v9246_v9  ;;  %v15204_v9 = vld [vmem:[%s29016_s1 + $0xf30] sm:$0xff] }
 0x835   : > { %20024 = vmatmul.mubr.f32.vlgmr.msra.gmra.mrb[64].mxu1 %v9247_v37  ;;  %v27428_v37 = vld [vmem:[#allocation2 + $0x3a] sm:$0xff] }
 0x836   : > { %20026 = vmatprep.mubr.f32.mxu1 %v27413_v2  ;;  %22269 = vmatpush3.bf16.msra.mxu1 %v22266_v10  ;;  %v22278_v10 = vpack.c.bf16 %v15205_v45, %v15204_v9  ;;  %29339 = vst [vmem:[#allocation5_spill] sm:$0xff] %v27428_v37  ;;  %v27440_v9 = vld [vmem:[#allocation2 + $0x52] sm:$0xff] }
 0x837   : > { %22271 = vmatprep.subr.bf16.mxu1 %v22270_v36  ;;  %29341 = vst [vmem:[#allocation13_spill] sm:$0xff] %v27440_v9  ;;  %v15208_v45 = vld [vmem:[%s29016_s1 + $0xf50] sm:$0xff] }
 0x839   : > { %20027 = vmatmul.mubr.f32.gmra.mrb[66].mxu1 %v27416_v11 }
 0x83a   : > { %20029 = vmatprep.mubr.f32.mxu1 %v27425_v41  ;;  %22273 = vmatpush3.bf16.msra.mxu1 %v22270_v36  ;;  %v22282_v36 = vpack.c.bf16 %v15207_v6, %v15206_v29  ;;  %v15209_v41 = vld [vmem:[%s29016_s1 + $0xf58] sm:$0xff]  ;;  %v27452_v29 = vld [vmem:[#allocation2 + $0x6a] sm:$0xff]  ;;  %v15210_v6 = vld [vmem:[%s29016_s1 + $0xf60] sm:$0xff] }
 0x83b   : > { %22275 = vmatprep.subr.bf16.mxu1 %v22274_v50  ;;  %29343 = vst [vmem:[#allocation15_spill] sm:$0xff] %v27452_v29 }
 0x83d   : > { %20030 = vmatmul.mubr.f32.gmra.mrb[68].mxu1 %v27428_v37  ;;  %v27449_v37 = vld [vmem:[#allocation2 + $0x62] sm:$0xff] }
 0x83e   : > { %20032 = vmatprep.mubr.f32.mxu1 %v27437_v16  ;;  %22277 = vmatpush3.bf16.msra.mxu1 %v22274_v50  ;;  %29342 = vst [vmem:[#allocation14_spill] sm:$0xff] %v27449_v37  ;;  %v22286_v50 = vpack.c.bf16 %v15209_v41, %v15208_v45  ;;  %v15211_v16 = vld [vmem:[%s29016_s1 + $0xf68] sm:$0xff]  ;;  %v15212_v45 = vld [vmem:[%s29016_s1 + $0xf70] sm:$0xff] }
 0x83f   : > { %22279 = vmatprep.subr.bf16.mxu1 %v22278_v10  ;;  %v27464_v41 = vld [vmem:[#allocation2 + $0x82] sm:$0xff] }
 0x840   : > { %29345 = vst [vmem:[#allocation17_spill] sm:$0xff] %v27464_v41 }
 0x841   : > { %20033 = vmatmul.mubr.f32.gmra.mrb[70].mxu1 %v27440_v9  ;;  %v27461_v9 = vld [vmem:[#allocation2 + $0x7a] sm:$0xff] }
 0x842   : > { %20035 = vmatprep.mubr.f32.mxu1 %v27449_v37  ;;  %22281 = vmatpush3.bf16.msra.mxu1 %v22278_v10  ;;  %29344 = vst [vmem:[#allocation16_spill] sm:$0xff] %v27461_v9  ;;  %v22290_v10 = vpack.c.bf16 %v15211_v16, %v15210_v6  ;;  %v15213_v37 = vld [vmem:[%s29016_s1 + $0xf78] sm:$0xff]  ;;  %v15214_v6 = vld [vmem:[%s29016_s1 + $0xf80] sm:$0xff] }
 0x843   : > { %22283 = vmatprep.subr.bf16.mxu1 %v22282_v36  ;;  %v27476_v16 = vld [vmem:[#allocation2 + $0x9a] sm:$0xff] }
 0x844   : > { %29347 = vst [vmem:[#allocation19_spill] sm:$0xff] %v27476_v16 }
 0x845   : > { %20036 = vmatmul.mubr.f32.gmra.mrb[72].mxu1 %v27452_v29  ;;  %v27473_v29 = vld [vmem:[#allocation2 + $0x92] sm:$0xff] }
 0x846   : > { %20038 = vmatprep.mubr.f32.mxu1 %v27461_v9  ;;  %22285 = vmatpush3.bf16.msra.mxu1 %v22282_v36  ;;  %29346 = vst [vmem:[#allocation18_spill] sm:$0xff] %v27473_v29  ;;  %v22294_v36 = vpack.c.bf16 %v15213_v37, %v15212_v45  ;;  %v15215_v9 = vld [vmem:[%s29016_s1 + $0xf88] sm:$0xff]  ;;  %v27488_v37 = vld [vmem:[#allocation2 + $0xb2] sm:$0xff] }
 0x847   : > { %22287 = vmatprep.subr.bf16.mxu1 %v22286_v50  ;;  %v27491_v45 = vld [vmem:[#allocation2 + $0xc2] sm:$0xff] }
 0x848   : > { %29348 = vst [vmem:[#allocation20_spill] sm:$0xff] %v27491_v45 }
 0x849   : > { %20039 = vmatmul.mubr.f32.gmra.mrb[74].mxu1 %v27464_v41  ;;  %v27485_v41 = vld [vmem:[#allocation2 + $0xaa] sm:$0xff] }
 0x84a   : > { %20041 = vmatprep.mubr.f32.mxu1 %v27473_v29  ;;  %22289 = vmatpush3.bf16.msra.mxu1 %v22286_v50  ;;  %v22298_v50 = vpack.c.bf16 %v15215_v9, %v15214_v6  ;;  %v27494_v29 = vld [vmem:[#allocation2 + $0xca] sm:$0xff]  ;;  %v27503_v9 = vld [vmem:[#allocation2 + $0xf2] sm:$0xff]  ;;  %v27506_v6 = vld [vmem:[#allocation2 + $0xfa] sm:$0xff] }
 0x84b   : > { %22291 = vmatprep.subr.bf16.mxu1 %v22290_v10  ;;  %29349 = vst [vmem:[#allocation21_spill] sm:$0xff] %v27494_v29  ;;  %29352 = vst [vmem:[#allocation24_spill] sm:$0xff] %v27503_v9 }
 0x84c   : > { %29353 = vst [vmem:[#allocation25_spill] sm:$0xff] %v27506_v6 }
 0x84d   : > { %20042 = vmatmul.mubr.f32.gmra.mrb[76].mxu1 %v27476_v16  ;;  %v27497_v16 = vld [vmem:[#allocation2 + $0xda] sm:$0xff] }
 0x84e   : > { %20044 = vmatprep.mubr.f32.mxu1 %v27485_v41  ;;  %22293 = vmatpush3.bf16.msra.mxu1 %v22290_v10  ;;  %29350 = vst [vmem:[#allocation22_spill] sm:$0xff] %v27497_v16  ;;  %v27500_v10 = vld [vmem:[#allocation2 + $0xe2] sm:$0xff] }
 0x84f   : > { %22295 = vmatprep.subr.bf16.mxu1 %v22294_v36  ;;  %29351 = vst [vmem:[#allocation23_spill] sm:$0xff] %v27500_v10 }
 0x851   : > { %20045 = vmatmul.mubr.f32.gmra.mrb[78].mxu1 %v27488_v37 }
 0x852   : > { %20047 = vmatprep.mubr.f32.mxu1 %v27491_v45  ;;  %22297 = vmatpush3.bf16.msra.mxu1 %v22294_v36  ;;  %v27509_v36 = vld [vmem:[#allocation2 + $0x10a] sm:$0xff] }
 0x853   : > { %22299 = vmatprep.subr.bf16.mxu1 %v22298_v50  ;;  %29354 = vst [vmem:[#allocation6_spill] sm:$0xff] %v27509_v36 }
 0x855   : > { %20048 = vmatmul.mubr.f32.gmra.mrb[80].mxu1 %v27494_v29  ;;  %v27512_v29 = vld [vmem:[#allocation2 + $0x112] sm:$0xff] }
 0x856   : > { %20050 = vmatprep.mubr.f32.mxu1 %v27497_v16  ;;  %29355 = vst [vmem:[#allocation12_spill] sm:$0xff] %v27512_v29  ;;  %v27515_v16 = vld [vmem:[#allocation2 + $0x122] sm:$0xff] }
 0x857   : > { %29356 = vst [vmem:[#allocation26_spill] sm:$0xff] %v27515_v16 }
 0x859   : > { %20051 = vmatmul.mubr.f32.gmra.mrb[82].mxu1 %v27500_v10  ;;  %v27518_v10 = vld [vmem:[#allocation2 + $0x12a] sm:$0xff] }
 0x85a   : > { %20053 = vmatprep.mubr.f32.mxu1 %v27503_v9  ;;  %29357 = vst [vmem:[#allocation27_spill] sm:$0xff] %v27518_v10  ;;  %v27521_v9 = vld [vmem:[#allocation2 + $0x13a] sm:$0xff] }
 0x85b   : > { %29358 = vst [vmem:[#allocation28_spill] sm:$0xff] %v27521_v9 }
 0x85d   : > { %20054 = vmatmul.mubr.f32.gmra.mrb[84].mxu1 %v27506_v6  ;;  %v27524_v6 = vld [vmem:[#allocation2 + $0x142] sm:$0xff] }
 0x85e   : > { %20056 = vmatprep.mubr.f32.mxu1 %v27509_v36  ;;  %29359 = vst [vmem:[#allocation29_spill] sm:$0xff] %v27524_v6  ;;  %v27527_v36 = vld [vmem:[#allocation2 + $0x152] sm:$0xff] }
 0x85f   : > { %29360 = vst [vmem:[#allocation30_spill] sm:$0xff] %v27527_v36 }
 0x861   : > { %20057 = vmatmul.mubr.f32.gmra.mrb[86].mxu1 %v27512_v29  ;;  %v27530_v29 = vld [vmem:[#allocation2 + $0x15a] sm:$0xff] }
 0x862   : > { %20059 = vmatprep.mubr.f32.mxu1 %v27515_v16  ;;  %29361 = vst [vmem:[#allocation7_spill] sm:$0xff] %v27530_v29  ;;  %v27533_v16 = vld [vmem:[#allocation2 + $0x16a] sm:$0xff] }
 0x863   : > { %29362 = vst [vmem:[#allocation8_spill] sm:$0xff] %v27533_v16 }
 0x865   : > { %20060 = vmatmul.mubr.f32.gmra.mrb[88].mxu1 %v27518_v10  ;;  %v27536_v10 = vld [vmem:[#allocation2 + $0x172] sm:$0xff] }
 0x866   : > { %20062 = vmatprep.mubr.f32.mxu1 %v27521_v9  ;;  %v15216_v9 = vld [vmem:[%s29016_s1 + $0xf90] sm:$0xff] }
 0x869   : > { %20063 = vmatmul.mubr.f32.gmra.mrb[90].mxu1 %v27524_v6  ;;  %v15217_v6 = vld [vmem:[%s29016_s1 + $0xf98] sm:$0xff] }
 0x86a   : > { %20065 = vmatprep.mubr.f32.mxu1 %v27527_v36  ;;  %v22302_v36 = vpack.c.bf16 %v15217_v6, %v15216_v9  ;;  %v15221_v9 = vld [vmem:[%s29016_s1 + $0xfb8] sm:$0xff]  ;;  %v15224_v6 = vld [vmem:[%s29016_s1 + $0xfd0] sm:$0xff] }
 0x86d   : > { %20066 = vmatmul.mubr.f32.gmra.mrb[92].mxu1 %v27530_v29  ;;  %v15218_v29 = vld [vmem:[%s29016_s1 + $0xfa0] sm:$0xff] }
 0x86e   : > { %20068 = vmatprep.mubr.f32.mxu1 %v27533_v16  ;;  %v15219_v16 = vld [vmem:[%s29016_s1 + $0xfa8] sm:$0xff] }
 0x86f   : > { %v22306_v45 = vpack.c.bf16 %v15219_v16, %v15218_v29  ;;  %v15223_v29 = vld [vmem:[%s29016_s1 + $0xfc8] sm:$0xff] }
 0x871   : > { %20069 = vmatmul.mubr.f32.gmra.mrb[94].mxu1 %v27536_v10 }
 0x872   : > { %20103 = vmatprep.mubr.f32.mxu1 %v27274_v3  ;;  %v15220_v3 = vld [vmem:[%s29016_s1 + $0xfb0] sm:$0xff] }
 0x875   : > { %20104 = vmatmul.mubr.f32.vlgmr.msra.gmra.mrb[64].mxu1 %v27278_v7  ;;  %v22310_v7 = vpack.c.bf16 %v15221_v9, %v15220_v3  ;;  %v15227_v9 = vld [vmem:[%s29016_s1 + $0xfe8] sm:$0xff] }
 0x876   : > { %20106 = vmatprep.mubr.f32.mxu1 %v27287_v43  ;;  %22301 = vmatpush3.bf16.msra.mxu1 %v22298_v50  ;;  %v15222_v50 = vld [vmem:[%s29016_s1 + $0xfc0] sm:$0xff] }
 0x877   : > { %22303 = vmatprep.subr.bf16.mxu1 %v22302_v36  ;;  %v22314_v16 = vpack.c.bf16 %v15223_v29, %v15222_v50  ;;  %v15229_v29 = vld [vmem:[%s29016_s1 + $0xff8] sm:$0xff] }
 0x879   : > { %20107 = vmatmul.mubr.f32.gmra.mrb[66].mxu1 %v27290_v1 }
 0x87a   : > { %20109 = vmatprep.mubr.f32.mxu1 %v27299_v31  ;;  %22305 = vmatpush3.bf16.msra.mxu1 %v22302_v36  ;;  %v15225_v36 = vld [vmem:[%s29016_s1 + $0xfd8] sm:$0xff] }
 0x87b   : > { %22307 = vmatprep.subr.bf16.mxu1 %v22306_v45  ;;  %v22318_v3 = vpack.c.bf16 %v15225_v36, %v15224_v6  ;;  %v15231_v36 = vld [vmem:[%s29016_s1 + $0x1008] sm:$0xff] }
 0x87d   : > { %20110 = vmatmul.mubr.f32.gmra.mrb[68].mxu1 %v27302_v22 }
 0x87e   : > { %20112 = vmatprep.mubr.f32.mxu1 %v27311_v39  ;;  %22309 = vmatpush3.bf16.msra.mxu1 %v22306_v45  ;;  %v15226_v45 = vld [vmem:[%s29016_s1 + $0xfe0] sm:$0xff] }
 0x87f   : > { %22311 = vmatprep.subr.bf16.mxu1 %v22310_v7  ;;  %v22322_v50 = vpack.c.bf16 %v15227_v9, %v15226_v45  ;;  %v27620_v9 = vld [vmem:[#allocation2 + $0x188] sm:$0xff] }
 0x880   : > { %29364 = vst [vmem:[#allocation32_spill] sm:$0xff] %v27620_v9 }
 0x881   : > { %20113 = vmatmul.mubr.f32.gmra.mrb[70].mxu1 %v27314_v14 }
 0x882   : > { %20115 = vmatprep.mubr.f32.mxu1 %v27323_v13  ;;  %22313 = vmatpush3.bf16.msra.mxu1 %v22310_v7  ;;  %v15228_v7 = vld [vmem:[%s29016_s1 + $0xff0] sm:$0xff] }
 0x883   : > { %22315 = vmatprep.subr.bf16.mxu1 %v22314_v16  ;;  %v22326_v6 = vpack.c.bf16 %v15229_v29, %v15228_v7  ;;  %v15233_v7 = vld [vmem:[%s29016_s1 + $0x1018] sm:$0xff] }
 0x884   : > { %v9858_v29 = vld [vmem:[#allocation2 + $0x19] sm:$0xff] }
 0x885   : > { %20116 = vmatmul.mubr.f32.gmra.mrb[72].mxu1 %v27326_v26 }
 0x886   : > { %20118 = vmatprep.mubr.f32.mxu1 %v27335_v55  ;;  %22317 = vmatpush3.bf16.msra.mxu1 %v22314_v16  ;;  %v15230_v16 = vld [vmem:[%s29016_s1 + $0x1000] sm:$0xff] }
 0x887   : > { %22319 = vmatprep.subr.bf16.mxu1 %v22318_v3  ;;  %v22330_v45 = vpack.c.bf16 %v15231_v36, %v15230_v16  ;;  %v9859_v16 = vld [vmem:[#allocation2 + $0x21] sm:$0xff] }
 0x888   : > { %v15234_v36 = vld [vmem:[%s29016_s1 + $0x1020] sm:$0xff] }
 0x889   : > { %20119 = vmatmul.mubr.f32.gmra.mrb[74].mxu1 %v27338_v57 }
 0x88a   : > { %20121 = vmatprep.mubr.f32.mxu1 %v27347_v56  ;;  %22321 = vmatpush3.bf16.msra.mxu1 %v22318_v3  ;;  %v27617_v3 = vld [vmem:[#allocation2 + $0x180] sm:$0xff] }
 0x88b   : > { %22323 = vmatprep.subr.bf16.mxu1 %v22322_v50  ;;  %29363 = vst [vmem:[#allocation31_spill] sm:$0xff] %v27617_v3 }
 0x88d   : > { %20122 = vmatmul.mubr.f32.gmra.mrb[76].mxu1 %v27350_v61 }
 0x88e   : > { %20124 = vmatprep.mubr.f32.mxu1 %v27353_v20  ;;  %22325 = vmatpush3.bf16.msra.mxu1 %v22322_v50  ;;  %v15232_v50 = vld [vmem:[%s29016_s1 + $0x1010] sm:$0xff] }
 0x88f   : > { %22327 = vmatprep.subr.bf16.mxu1 %v22326_v6 }
 0x891   : > { %20125 = vmatmul.mubr.f32.gmra.mrb[78].mxu1 %v27356_v27 }
 0x892   : > { %20127 = vmatprep.mubr.f32.mxu1 %v27359_v42  ;;  %22329 = vmatpush3.bf16.msra.mxu1 %v22326_v6  ;;  %v22334_v6 = vpack.c.bf16 %v15233_v7, %v15232_v50  ;;  %v15236_v50 = vld [vmem:[%s29016_s1 + $0x1030] sm:$0xff]  ;;  %v15237_v7 = vld [vmem:[%s29016_s1 + $0x1038] sm:$0xff] }
 0x893   : > { %22331 = vmatprep.subr.bf16.mxu1 %v22330_v45 }
 0x895   : > { %20128 = vmatmul.mubr.f32.gmra.mrb[80].mxu1 %v27362_v58 }
 0x896   : > { %20130 = vmatprep.mubr.f32.mxu1 %v27365_v30 }
 0x899   : > { %20131 = vmatmul.mubr.f32.gmra.mrb[82].mxu1 %v27368_v4 }
 0x89a   : > { %20133 = vmatprep.mubr.f32.mxu1 %v27371_v59 }
 0x89d   : > { %20134 = vmatmul.mubr.f32.gmra.mrb[84].mxu1 %v27374_v60 }
 0x89e   : > { %20136 = vmatprep.mubr.f32.mxu1 %v27377_v0 }
 0x8a1   : > { %20137 = vmatmul.mubr.f32.gmra.mrb[86].mxu1 %v27380_v32 }
 0x8a2   : > { %20139 = vmatprep.mubr.f32.mxu1 %v27383_v5 }
 0x8a5   : > { %20140 = vmatmul.mubr.f32.gmra.mrb[88].mxu1 %v27386_v54 }
 0x8a6   : > { %20142 = vmatprep.mubr.f32.mxu1 %v27389_v18 }
 0x8a9   : > { %20143 = vmatmul.mubr.f32.gmra.mrb[90].mxu1 %v27392_v47 }
 0x8aa   : > { %20145 = vmatprep.mubr.f32.mxu1 %v27395_v51  ;;  %v27638_v51 = vld [vmem:[#allocation2 + $0x39] sm:$0xff] }
 0x8ab   : > { %29365 = vst [vmem:[#allocation33_spill] sm:$0xff] %v27638_v51 }
 0x8ad   : > { %20146 = vmatmul.mubr.f32.gmra.mrb[92].mxu1 %v27398_v25  ;;  %v27635_v25 = vld [vmem:[#allocation2 + $0x31] sm:$0xff] }
 0x8ae   : > { %20148 = vmatprep.mubr.f32.mxu1 %v27617_v3  ;;  %v15235_v3 = vld [vmem:[%s29016_s1 + $0x1028] sm:$0xff] }
 0x8b1   : > { %20149 = vmatmul.mubr.f32.gmra.mrb[94].mxu1 %v27620_v9  ;;  %v22338_v9 = vpack.c.bf16 %v15235_v3, %v15234_v36  ;;  %v27650_v3 = vld [vmem:[#allocation2 + $0x51] sm:$0xff]  ;;  %v15239_v36 = vld [vmem:[%s29016_s1 + $0x1048] sm:$0xff] }
 0x8b2   : > { %20183 = vmatprep.mubr.f32.mxu1 %v9858_v29  ;;  %v27647_v29 = vld [vmem:[#allocation2 + $0x49] sm:$0xff]  ;;  %29367 = vst [vmem:[#allocation35_spill] sm:$0xff] %v27650_v3 }
 0x8b3   : > { %29366 = vst [vmem:[#allocation34_spill] sm:$0xff] %v27647_v29 }
 0x8b5   : > { %20184 = vmatmul.mubr.f32.vlgmr.msra.gmra.mrb[64].mxu1 %v9859_v16  ;;  %v15238_v16 = vld [vmem:[%s29016_s1 + $0x1040] sm:$0xff] }
 0x8b6   : > { %20186 = vmatprep.mubr.f32.mxu1 %v27635_v25  ;;  %22333 = vmatpush3.bf16.msra.mxu1 %v22330_v45  ;;  %v22342_v45 = vpack.c.bf16 %v15237_v7, %v15236_v50  ;;  %v27662_v50 = vld [vmem:[#allocation2 + $0x69] sm:$0xff] }
 0x8b7   : > { %22335 = vmatprep.subr.bf16.mxu1 %v22334_v6  ;;  %v15240_v7 = vld [vmem:[%s29016_s1 + $0x1050] sm:$0xff] }
 0x8b9   : > { %20187 = vmatmul.mubr.f32.gmra.mrb[66].mxu1 %v27638_v51  ;;  %v27659_v51 = vld [vmem:[#allocation2 + $0x61] sm:$0xff] }
 0x8ba   : > { %20189 = vmatprep.mubr.f32.mxu1 %v27647_v29  ;;  %22337 = vmatpush3.bf16.msra.mxu1 %v22334_v6  ;;  %29368 = vst [vmem:[#allocation36_spill] sm:$0xff] %v27659_v51  ;;  %v22346_v6 = vpack.c.bf16 %v15239_v36, %v15238_v16  ;;  %v15241_v29 = vld [vmem:[%s29016_s1 + $0x1058] sm:$0xff]  ;;  %v27674_v16 = vld [vmem:[#allocation2 + $0x81] sm:$0xff] }
 0x8bb   : > { %22339 = vmatprep.subr.bf16.mxu1 %v22338_v9  ;;  %v15242_v36 = vld [vmem:[%s29016_s1 + $0x1060] sm:$0xff] }
 0x8bd   : > { %20190 = vmatmul.mubr.f32.gmra.mrb[68].mxu1 %v27650_v3  ;;  %v27671_v3 = vld [vmem:[#allocation2 + $0x79] sm:$0xff] }
 0x8be   : > { %20192 = vmatprep.mubr.f32.mxu1 %v27659_v51  ;;  %22341 = vmatpush3.bf16.msra.mxu1 %v22338_v9  ;;  %29369 = vst [vmem:[#allocation37_spill] sm:$0xff] %v27671_v3  ;;  %v22350_v9 = vpack.c.bf16 %v15241_v29, %v15240_v7  ;;  %v15243_v51 = vld [vmem:[%s29016_s1 + $0x1068] sm:$0xff]  ;;  %v15244_v29 = vld [vmem:[%s29016_s1 + $0x1070] sm:$0xff] }
 0x8bf   : > { %22343 = vmatprep.subr.bf16.mxu1 %v22342_v45 }
 0x8c1   : > { %20193 = vmatmul.mubr.f32.gmra.mrb[70].mxu1 %v27662_v50 }
 0x8c2   : > { %20195 = vmatprep.mubr.f32.mxu1 %v27671_v3  ;;  %22345 = vmatpush3.bf16.msra.mxu1 %v22342_v45  ;;  %v22354_v3 = vpack.c.bf16 %v15243_v51, %v15242_v36  ;;  %v15245_v45 = vld [vmem:[%s29016_s1 + $0x1078] sm:$0xff]  ;;  %v15247_v51 = vld [vmem:[%s29016_s1 + $0x1088] sm:$0xff] }
 0x8c3   : > { %22347 = vmatprep.subr.bf16.mxu1 %v22346_v6  ;;  %v22358_v7 = vpack.c.bf16 %v15245_v45, %v15244_v29  ;;  %v15259_v36 = vld [vmem:[%s29016_s1 + $0x10e8] sm:$0xff]  ;;  %v29380_v45 = vld [vmem:[#allocation18_spill] sm:$0xff] }
 0x8c4   : > { %v29379_v29 = vld [vmem:[#allocation17_spill] sm:$0xff] }
 0x8c5   : > { %20196 = vmatmul.mubr.f32.gmra.mrb[72].mxu1 %v27674_v16 }
 0x8c6   : > { %20198 = vmatprep.mubr.f32.mxu1 %v27153_v48  ;;  %22349 = vmatpush3.bf16.msra.mxu1 %v22346_v6  ;;  %v15246_v48 = vld [vmem:[%s29016_s1 + $0x1080] sm:$0xff] }
 0x8c7   : > { %22351 = vmatprep.subr.bf16.mxu1 %v22350_v9 }
 0x8c9   : > { %20199 = vmatmul.mubr.f32.gmra.mrb[74].mxu1 %v27151_v33  ;;  %v22362_v33 = vpack.c.bf16 %v15247_v51, %v15246_v48  ;;  %v15260_v48 = vld [vmem:[%s29016_s1 + $0x10f0] sm:$0xff]  ;;  %v15261_v51 = vld [vmem:[%s29016_s1 + $0x10f8] sm:$0xff] }
 0x8ca   : > { %20201 = vmatprep.mubr.f32.mxu1 %v27163_v23  ;;  %22353 = vmatpush3.bf16.msra.mxu1 %v22350_v9  ;;  %v15248_v23 = vld [vmem:[%s29016_s1 + $0x1090] sm:$0xff]  ;;  %v15258_v9 = vld [vmem:[%s29016_s1 + $0x10e0] sm:$0xff] }
 0x8cb   : > { %22355 = vmatprep.subr.bf16.mxu1 %v22354_v3 }
 0x8cd   : > { %20202 = vmatmul.mubr.f32.gmra.mrb[76].mxu1 %v27160_v35  ;;  %v29370_v35 = vmax.f32 %v27251_v38, 0.0  ;;  %v15256_v38 = vld [vmem:[%s29016_s1 + $0x10d0] sm:$0xff] }
 0x8ce   : > { %20204 = vmatprep.mubr.f32.mxu1 %v27173_v8  ;;  %22357 = vmatpush3.bf16.msra.mxu1 %v22354_v3  ;;  %v29371_v8 = vmax.f32 %v27247_v24, 0.0  ;;  %v29378_v3 = vld [vmem:[#allocation16_spill] sm:$0xff] }
 0x8cf   : > { %22359 = vmatprep.subr.bf16.mxu1 %v22358_v7 }
 0x8d1   : > { %20205 = vmatmul.mubr.f32.gmra.mrb[78].mxu1 %v27170_v46  ;;  %v15249_v46 = vld [vmem:[%s29016_s1 + $0x1098] sm:$0xff] }
 0x8d2   : > { %20207 = vmatprep.mubr.f32.mxu1 %v27183_v44  ;;  %22361 = vmatpush3.bf16.msra.mxu1 %v22358_v7  ;;  %v15250_v44 = vld [vmem:[%s29016_s1 + $0x10a0] sm:$0xff]  ;;  %v22386_v7 = vpack.c.bf16 %v15259_v36, %v15258_v9  ;;  %v15269_v9 = vld [vmem:[%s29016_s1 + $0x1138] sm:$0xff]  ;;  %v15271_v36 = vld [vmem:[%s29016_s1 + $0x1148] sm:$0xff] }
 0x8d3   : > { %22363 = vmatprep.subr.bf16.mxu1 %v22362_v33 }
 0x8d5   : > { %20208 = vmatmul.mubr.f32.gmra.mrb[80].mxu1 %v27180_v21  ;;  %v22366_v21 = vpack.c.bf16 %v15249_v46, %v15248_v23  ;;  %v15262_v23 = vld [vmem:[%s29016_s1 + $0x1100] sm:$0xff]  ;;  %v15263_v46 = vld [vmem:[%s29016_s1 + $0x1108] sm:$0xff] }
 0x8d6   : > { %20210 = vmatprep.mubr.f32.mxu1 %v27193_v12  ;;  %v29372_v12 = vld [vmem:[#allocation4_spill] sm:$0xff] }
 0x8d9   : > { %20211 = vmatmul.mubr.f32.gmra.mrb[82].mxu1 %v27190_v62  ;;  %v15251_v62 = vld [vmem:[%s29016_s1 + $0x10a8] sm:$0xff] }
 0x8da   : > { %20213 = vmatprep.mubr.f32.mxu1 %v27203_v49  ;;  %v15252_v49 = vld [vmem:[%s29016_s1 + $0x10b0] sm:$0xff] }
 0x8dd   : > { %20214 = vmatmul.mubr.f32.gmra.mrb[84].mxu1 %v27200_v17  ;;  %v22370_v17 = vpack.c.bf16 %v15251_v62, %v15250_v44  ;;  %v29383_v44 = vld [vmem:[#allocation21_spill] sm:$0xff]  ;;  %v29385_v62 = vld [vmem:[#allocation23_spill] sm:$0xff] }
 0x8de   : > { %20216 = vmatprep.mubr.f32.mxu1 %v27213_v34  ;;  %v29373_v34 = vld [vmem:[#allocation5_spill] sm:$0xff] }
 0x8e1   : > { %20217 = vmatmul.mubr.f32.gmra.mrb[86].mxu1 %v27210_v19  ;;  %v15253_v19 = vld [vmem:[%s29016_s1 + $0x10b8] sm:$0xff] }
 0x8e2   : > { %20219 = vmatprep.mubr.f32.mxu1 %v27223_v53  ;;  %v22374_v53 = vpack.c.bf16 %v15253_v19, %v15252_v49  ;;  %v29388_v49 = vld [vmem:[#allocation6_spill] sm:$0xff] }
 0x8e3   : > { %v29390_v19 = vld [vmem:[#allocation26_spill] sm:$0xff] }
 0x8e5   : > { %20220 = vmatmul.mubr.f32.gmra.mrb[88].mxu1 %v27220_v40  ;;  %v29374_v40 = vld [vmem:[#allocation11_spill] sm:$0xff] }
 0x8e6   : > { %20222 = vmatprep.mubr.f32.mxu1 %v27233_v63  ;;  %v15255_v63 = vld [vmem:[%s29016_s1 + $0x10c8] sm:$0xff] }
 0x8e9   : > { %20223 = vmatmul.mubr.f32.gmra.mrb[90].mxu1 %v27230_v52  ;;  %v15254_v52 = vld [vmem:[%s29016_s1 + $0x10c0] sm:$0xff] }
 0x8ea   : > { %20225 = vmatprep.mubr.f32.mxu1 %v27243_v15  ;;  %v29376_v15 = vld [vmem:[#allocation14_spill] sm:$0xff]  ;;  %v22378_v24 = vpack.c.bf16 %v15255_v63, %v15254_v52  ;;  %v29395_v63 = vld [vmem:[#allocation7_spill] sm:$0xff] }
 0x8eb   : > { %v29394_v52 = vld [vmem:[#allocation30_spill] sm:$0xff] }
 0x8ed   : > { %20226 = vmatmul.mubr.f32.gmra.mrb[92].mxu1 %v27240_v28  ;;  %v29375_v28 = vld [vmem:[#allocation13_spill] sm:$0xff] }
 0x8ee   : > { %20228 = vmatprep.mubr.f32.mxu1 %v29370_v35  ;;  %v22390_v35 = vpack.c.bf16 %v15261_v51, %v15260_v48  ;;  %v15279_v48 = vld [vmem:[%s29016_s1 + $0x1188] sm:$0xff]  ;;  %v15282_v51 = vld [vmem:[%s29016_s1 + $0x11a0] sm:$0xff] }
 0x8f1   : > { %20229 = vmatmul.mubr.f32.gmra.mrb[94].mxu1 %v29371_v8  ;;  %v29382_v8 = vld [vmem:[#allocation20_spill] sm:$0xff] }
 0x8f2   : > { %20263 = vmatprep.mubr.f32.mxu1 %v27413_v2  ;;  %v29377_v2 = vld [vmem:[#allocation15_spill] sm:$0xff] }
 0x8f5   : > { %20264 = vmatmul.mubr.f32.vlgmr.msra.gmra.mrb[64].mxu1 %v27416_v11  ;;  %v15257_v11 = vld [vmem:[%s29016_s1 + $0x10d8] sm:$0xff] }
 0x8f6   : > { %20266 = vmatprep.mubr.f32.mxu1 %v29372_v12  ;;  %22365 = vmatpush3.bf16.msra.mxu1 %v22362_v33  ;;  %v22382_v6 = vpack.c.bf16 %v15257_v11, %v15256_v38  ;;  %v29381_v33 = vld [vmem:[#allocation19_spill] sm:$0xff]  ;;  %v29386_v12 = vld [vmem:[#allocation24_spill] sm:$0xff]  ;;  %v15264_v38 = vld [vmem:[%s29016_s1 + $0x1110] sm:$0xff] }
 0x8f7   : > { %22367 = vmatprep.subr.bf16.mxu1 %v22366_v21  ;;  %v15265_v11 = vld [vmem:[%s29016_s1 + $0x1118] sm:$0xff] }
 0x8f9   : > { %20267 = vmatmul.mubr.f32.gmra.mrb[66].mxu1 %v29373_v34  ;;  %v29391_v34 = vld [vmem:[#allocation27_spill] sm:$0xff] }
 0x8fa   : > { %20269 = vmatprep.mubr.f32.mxu1 %v29374_v40  ;;  %22369 = vmatpush3.bf16.msra.mxu1 %v22366_v21  ;;  %v22394_v21 = vpack.c.bf16 %v15263_v46, %v15262_v23  ;;  %v29392_v40 = vld [vmem:[#allocation28_spill] sm:$0xff]  ;;  %v15316_v23 = vld [vmem:[%s29016_s1 + $0x12a8] sm:$0xff] }
 0x8fb   : > { %22371 = vmatprep.subr.bf16.mxu1 %v22370_v17  ;;  %v29401_v46 = vld [vmem:[#allocation33_spill] sm:$0xff] }
 0x8fd   : > { %20270 = vmatmul.mubr.f32.gmra.mrb[68].mxu1 %v29375_v28  ;;  %v29396_v28 = vld [vmem:[#allocation8_spill] sm:$0xff] }
 0x8fe   : > { %20272 = vmatprep.mubr.f32.mxu1 %v29376_v15  ;;  %22373 = vmatpush3.bf16.msra.mxu1 %v22370_v17  ;;  %v29387_v17 = vld [vmem:[#allocation25_spill] sm:$0xff] }
 0x8ff   : > { %22375 = vmatprep.subr.bf16.mxu1 %v22374_v53  ;;  %v27797_v15 = vld [vmem:[#allocation2 + $0x182] sm:$0xff] }
 0x901   : > { %20273 = vmatmul.mubr.f32.gmra.mrb[70].mxu1 %v29377_v2  ;;  %v22398_v2 = vpack.c.bf16 %v15265_v11, %v15264_v38  ;;  %v15288_v11 = vld [vmem:[%s29016_s1 + $0x11d0] sm:$0xff] }
 0x902   : > { %20275 = vmatprep.mubr.f32.mxu1 %v29378_v3  ;;  %22377 = vmatpush3.bf16.msra.mxu1 %v22374_v53  ;;  %v29393_v53 = vld [vmem:[#allocation29_spill] sm:$0xff] }
 0x903   : > { %22379 = vmatprep.subr.bf16.mxu1 %v22378_v24  ;;  %v15267_v3 = vld [vmem:[%s29016_s1 + $0x1128] sm:$0xff] }
 0x905   : > { %20276 = vmatmul.mubr.f32.gmra.mrb[72].mxu1 %v29379_v29  ;;  %v15273_v29 = vld [vmem:[%s29016_s1 + $0x1158] sm:$0xff] }
 0x906   : > { %20278 = vmatprep.mubr.f32.mxu1 %v29380_v45  ;;  %22381 = vmatpush3.bf16.msra.mxu1 %v22378_v24  ;;  %v27800_v24 = vld [vmem:[#allocation2 + $0x18a] sm:$0xff] }
 0x907   : > { %22383 = vmatprep.subr.bf16.mxu1 %v22382_v6  ;;  %v15275_v45 = vld [vmem:[%s29016_s1 + $0x1168] sm:$0xff] }
 0x909   : > { %20279 = vmatmul.mubr.f32.gmra.mrb[74].mxu1 %v29381_v33 }
 0x90a   : > { %20281 = vmatprep.mubr.f32.mxu1 %v27485_v41  ;;  %22385 = vmatpush3.bf16.msra.mxu1 %v22382_v6  ;;  %v29384_v41 = vld [vmem:[#allocation22_spill] sm:$0xff] }
 0x90b   : > { %22387 = vmatprep.subr.bf16.mxu1 %v22386_v7 }
 0x90d   : > { %20282 = vmatmul.mubr.f32.gmra.mrb[76].mxu1 %v27488_v37  ;;  %v29389_v37 = vld [vmem:[#allocation12_spill] sm:$0xff] }
 0x90e   : > { %20284 = vmatprep.mubr.f32.mxu1 %v29382_v8  ;;  %22389 = vmatpush3.bf16.msra.mxu1 %v22386_v7  ;;  %v15277_v7 = vld [vmem:[%s29016_s1 + $0x1178] sm:$0xff]  ;;  %v29402_v8 = vld [vmem:[#allocation34_spill] sm:$0xff] }
 0x90f   : > { %22391 = vmatprep.subr.bf16.mxu1 %v22390_v35 }
 0x911   : > { %20285 = vmatmul.mubr.f32.gmra.mrb[78].mxu1 %v29383_v44  ;;  %v15284_v44 = vld [vmem:[%s29016_s1 + $0x11b0] sm:$0xff] }
 0x912   : > { %20287 = vmatprep.mubr.f32.mxu1 %v29384_v41  ;;  %22393 = vmatpush3.bf16.msra.mxu1 %v22390_v35  ;;  %v15283_v35 = vld [vmem:[%s29016_s1 + $0x11a8] sm:$0xff] }
 0x913   : > { %22395 = vmatprep.subr.bf16.mxu1 %v22394_v21 }
 0x915   : > { %20288 = vmatmul.mubr.f32.gmra.mrb[80].mxu1 %v29385_v62  ;;  %v15285_v62 = vld [vmem:[%s29016_s1 + $0x11b8] sm:$0xff] }
 0x916   : > { %20290 = vmatprep.mubr.f32.mxu1 %v29386_v12  ;;  %v15317_v12 = vld [vmem:[%s29016_s1 + $0x12b0] sm:$0xff] }
 0x919   : > { %20291 = vmatmul.mubr.f32.gmra.mrb[82].mxu1 %v29387_v17  ;;  %v15318_v17 = vld [vmem:[%s29016_s1 + $0x12b8] sm:$0xff] }
 0x91a   : > { %20293 = vmatprep.mubr.f32.mxu1 %v29388_v49  ;;  %v29403_v49 = vld [vmem:[#allocation35_spill] sm:$0xff] }
 0x91d   : > { %20294 = vmatmul.mubr.f32.gmra.mrb[84].mxu1 %v29389_v37  ;;  %v29404_v37 = vld [vmem:[#allocation36_spill] sm:$0xff] }
 0x91e   : > { %20296 = vmatprep.mubr.f32.mxu1 %v29390_v19  ;;  %v22438_v19 = vpack.c.bf16 %v15285_v62, %v15284_v44  ;;  %v11091_v44 = vld [vmem:[#allocation2 + $0x9a] sm:$0xff]  ;;  %v11093_v62 = vld [vmem:[#allocation2 + $0xb2] sm:$0xff] }
 0x921   : > { %20297 = vmatmul.mubr.f32.gmra.mrb[86].mxu1 %v29391_v34  ;;  %v15286_v34 = vld [vmem:[%s29016_s1 + $0x11c0] sm:$0xff] }
 0x922   : > { %20299 = vmatprep.mubr.f32.mxu1 %v29392_v40  ;;  %v22470_v40 = vpack.c.bf16 %v15318_v17, %v15317_v12  ;;  %v11094_v12 = vld [vmem:[#allocation2 + $0xc2] sm:$0xff]  ;;  %v11095_v17 = vld [vmem:[#allocation2 + $0xca] sm:$0xff] }
 0x925   : > { %20300 = vmatmul.mubr.f32.gmra.mrb[88].mxu1 %v29393_v53  ;;  %v15287_v53 = vld [vmem:[%s29016_s1 + $0x11c8] sm:$0xff] }
 0x926   : > { %20302 = vmatprep.mubr.f32.mxu1 %v29394_v52  ;;  %v15319_v52 = vld [vmem:[%s29016_s1 + $0x12c0] sm:$0xff]  ;;  %v22442_v38 = vpack.c.bf16 %v15287_v53, %v15286_v34  ;;  %v11101_v53 = vld [vmem:[#allocation2 + $0x112] sm:$0xff] }
 0x927   : > { %v11099_v34 = vld [vmem:[#allocation2 + $0xfa] sm:$0xff] }
 0x929   : > { %20303 = vmatmul.mubr.f32.gmra.mrb[90].mxu1 %v29395_v63  ;;  %v15320_v63 = vld [vmem:[%s29016_s1 + $0x12c8] sm:$0xff] }
 0x92a   : > { %20305 = vmatprep.mubr.f32.mxu1 %v29396_v28  ;;  %v29405_v28 = vld [vmem:[#allocation37_spill] sm:$0xff] }
 0x92d   : > { %20306 = vmatmul.mubr.f32.gmra.mrb[92].mxu1 %v27536_v10  ;;  %v15266_v10 = vld [vmem:[%s29016_s1 + $0x1120] sm:$0xff] }
 0x92e   : > { %20308 = vmatprep.mubr.f32.mxu1 %v27797_v15  ;;  %v22402_v6 = vpack.c.bf16 %v15267_v3, %v15266_v10  ;;  %v15289_v10 = vld [vmem:[%s29016_s1 + $0x11d8] sm:$0xff] }
 0x92f   : > { %v15322_v3 = vld [vmem:[%s29016_s1 + $0x12d8] sm:$0xff] }
 0x931   : > { %20309 = vmatmul.mubr.f32.gmra.mrb[94].mxu1 %v27800_v24 }
 0x932   : > { %20343 = vmatprep.mubr.f32.mxu1 %v27287_v43  ;;  %v15268_v43 = vld [vmem:[%s29016_s1 + $0x1130] sm:$0xff] }
 0x935   : > { %20344 = vmatmul.mubr.f32.vlgmr.msra.gmra.mrb[64].mxu1 %v27290_v1  ;;  %v22406_v1 = vpack.c.bf16 %v15269_v9, %v15268_v43  ;;  %v22446_v43 = vpack.c.bf16 %v15289_v10, %v15288_v11  ;;  %v11106_v11 = vld [vmem:[#allocation2 + $0x152] sm:$0xff]  ;;  %v11108_v10 = vld [vmem:[#allocation2 + $0x16a] sm:$0xff] }
 0x936   : > { %20346 = vmatprep.mubr.f32.mxu1 %v27299_v31  ;;  %22397 = vmatpush3.bf16.msra.mxu1 %v22394_v21  ;;  %v15270_v31 = vld [vmem:[%s29016_s1 + $0x1140] sm:$0xff]  ;;  %v22434_v21 = vpack.c.bf16 %v15283_v35, %v15282_v51  ;;  %v11085_v35 = vld [vmem:[#allocation2 + $0x52] sm:$0xff] }
 0x937   : > { %22399 = vmatprep.subr.bf16.mxu1 %v22398_v2  ;;  %v11083_v51 = vld [vmem:[#allocation2 + $0x3a] sm:$0xff] }
 0x939   : > { %20347 = vmatmul.mubr.f32.gmra.mrb[66].mxu1 %v27302_v22  ;;  %v22410_v22 = vpack.c.bf16 %v15271_v36, %v15270_v31  ;;  %v15290_v31 = vld [vmem:[%s29016_s1 + $0x11e0] sm:$0xff]  ;;  %v15291_v36 = vld [vmem:[%s29016_s1 + $0x11e8] sm:$0xff] }
 0x93a   : > { %20349 = vmatprep.mubr.f32.mxu1 %v27311_v39  ;;  %22401 = vmatpush3.bf16.msra.mxu1 %v22398_v2  ;;  %v15272_v39 = vld [vmem:[%s29016_s1 + $0x1150] sm:$0xff]  ;;  %v22474_v2 = vpack.c.bf16 %v15320_v63, %v15319_v52  ;;  %v11102_v52 = vld [vmem:[#allocation2 + $0x122] sm:$0xff] }
 0x93b   : > { %22403 = vmatprep.subr.bf16.mxu1 %v22402_v6  ;;  %v11103_v63 = vld [vmem:[#allocation2 + $0x12a] sm:$0xff] }
 0x93d   : > { %20350 = vmatmul.mubr.f32.gmra.mrb[68].mxu1 %v27314_v14  ;;  %v22414_v14 = vpack.c.bf16 %v15273_v29, %v15272_v39  ;;  %v10787_v39 = vld [vmem:[#allocation2 + $0xb1] sm:$0xff] }
 0x93e   : > { %20352 = vmatprep.mubr.f32.mxu1 %v27323_v13  ;;  %22405 = vmatpush3.bf16.msra.mxu1 %v22402_v6  ;;  %v15274_v13 = vld [vmem:[%s29016_s1 + $0x1160] sm:$0xff]  ;;  %v10784_v6 = vld [vmem:[#allocation2 + $0x91] sm:$0xff] }
 0x93f   : > { %22407 = vmatprep.subr.bf16.mxu1 %v22406_v1  ;;  %v15292_v29 = vld [vmem:[%s29016_s1 + $0x11f0] sm:$0xff] }
 0x941   : > { %20353 = vmatmul.mubr.f32.gmra.mrb[70].mxu1 %v27326_v26  ;;  %v22418_v26 = vpack.c.bf16 %v15275_v45, %v15274_v13  ;;  %v10788_v13 = vld [vmem:[#allocation2 + $0xc1] sm:$0xff] }
 0x942   : > { %20355 = vmatprep.mubr.f32.mxu1 %v27335_v55  ;;  %22409 = vmatpush3.bf16.msra.mxu1 %v22406_v1  ;;  %v15276_v55 = vld [vmem:[%s29016_s1 + $0x1170] sm:$0xff]  ;;  %v10785_v1 = vld [vmem:[#allocation2 + $0x99] sm:$0xff] }
 0x943   : > { %22411 = vmatprep.subr.bf16.mxu1 %v22410_v22 }
 0x945   : > { %20356 = vmatmul.mubr.f32.gmra.mrb[72].mxu1 %v27338_v57  ;;  %v22422_v57 = vpack.c.bf16 %v15277_v7, %v15276_v55  ;;  %v10790_v55 = vld [vmem:[#allocation2 + $0xd9] sm:$0xff]  ;;  %v10791_v7 = vld [vmem:[#allocation2 + $0xe1] sm:$0xff] }
 0x946   : > { %20358 = vmatprep.mubr.f32.mxu1 %v27347_v56  ;;  %22413 = vmatpush3.bf16.msra.mxu1 %v22410_v22  ;;  %v15278_v56 = vld [vmem:[%s29016_s1 + $0x1180] sm:$0xff]  ;;  %v10786_v22 = vld [vmem:[#allocation2 + $0xa9] sm:$0xff] }
 0x947   : > { %22415 = vmatprep.subr.bf16.mxu1 %v22414_v14 }
 0x949   : > { %20359 = vmatmul.mubr.f32.gmra.mrb[74].mxu1 %v27350_v61  ;;  %v22426_v61 = vpack.c.bf16 %v15279_v48, %v15278_v56  ;;  %v10793_v56 = vld [vmem:[#allocation2 + $0xf9] sm:$0xff]  ;;  %v10794_v48 = vld [vmem:[#allocation2 + $0x109] sm:$0xff] }
 0x94a   : > { %20361 = vmatprep.mubr.f32.mxu1 %v27353_v20  ;;  %22417 = vmatpush3.bf16.msra.mxu1 %v22414_v14  ;;  %v29397_v20 = vld [vmem:[#allocation9_spill] sm:$0xff]  ;;  %v15293_v14 = vld [vmem:[%s29016_s1 + $0x11f8] sm:$0xff] }
 0x94b   : > { %22419 = vmatprep.subr.bf16.mxu1 %v22418_v26  ;;  %v22454_v45 = vpack.c.bf16 %v15293_v14, %v15292_v29  ;;  %v15297_v14 = vld [vmem:[%s29016_s1 + $0x1210] sm:$0xff] }
 0x94d   : > { %20362 = vmatmul.mubr.f32.gmra.mrb[76].mxu1 %v27356_v27  ;;  %v29398_v27 = vld [vmem:[#allocation10_spill] sm:$0xff] }
 0x94e   : > { %20364 = vmatprep.mubr.f32.mxu1 %v27359_v42  ;;  %22421 = vmatpush3.bf16.msra.mxu1 %v22418_v26  ;;  %v29399_v42 = vld [vmem:[#allocation31_spill] sm:$0xff]  ;;  %v10789_v26 = vld [vmem:[#allocation2 + $0xc9] sm:$0xff] }
 0x94f   : > { %22423 = vmatprep.subr.bf16.mxu1 %v22422_v57 }
 0x951   : > { %20365 = vmatmul.mubr.f32.gmra.mrb[78].mxu1 %v27362_v58  ;;  %v10500_v58 = vld [vmem:[#allocation2 + $0x198] sm:$0xff] }
 0x952   : > { %20367 = vmatprep.mubr.f32.mxu1 %v27365_v30  ;;  %22425 = vmatpush3.bf16.msra.mxu1 %v22422_v57  ;;  %v29400_v30 = vld [vmem:[#allocation32_spill] sm:$0xff]  ;;  %v10792_v57 = vld [vmem:[#allocation2 + $0xf1] sm:$0xff] }
 0x953   : > { %22427 = vmatprep.subr.bf16.mxu1 %v22426_v61 }
 0x955   : > { %20368 = vmatmul.mubr.f32.gmra.mrb[80].mxu1 %v27368_v4  ;;  %v15280_v4 = vld [vmem:[%s29016_s1 + $0x1190] sm:$0xff] }
 0x956   : > { %20370 = vmatprep.mubr.f32.mxu1 %v27371_v59  ;;  %v15281_v59 = vld [vmem:[%s29016_s1 + $0x1198] sm:$0xff] }
 0x959   : > { %20371 = vmatmul.mubr.f32.gmra.mrb[82].mxu1 %v27374_v60  ;;  %v27887_v60 = vld [vmem:[#allocation2 + $0x8] sm:$0xff] }
 0x95a   : > { %20373 = vmatprep.mubr.f32.mxu1 %v27377_v0  ;;  %v15311_v0 = vld [vmem:[%s29016_s1 + $0x1280] sm:$0xff] }
 0x95d   : > { %20374 = vmatmul.mubr.f32.gmra.mrb[84].mxu1 %v27380_v32  ;;  %v15312_v32 = vld [vmem:[%s29016_s1 + $0x1288] sm:$0xff] }
 0x95e   : > { %20376 = vmatprep.mubr.f32.mxu1 %v27383_v5  ;;  %v15313_v5 = vld [vmem:[%s29016_s1 + $0x1290] sm:$0xff] }
 0x961   : > { %20377 = vmatmul.mubr.f32.gmra.mrb[86].mxu1 %v27386_v54  ;;  %v22458_v54 = vpack.c.bf16 %v15312_v32, %v15311_v0  ;;  %v10803_v0 = vld [vmem:[#allocation2 + $0x171] sm:$0xff]  ;;  %v10804_v32 = vld [vmem:[#allocation2 + $0x181] sm:$0xff] }
 0x962   : > { %20379 = vmatprep.mubr.f32.mxu1 %v27389_v18  ;;  %v15314_v18 = vld [vmem:[%s29016_s1 + $0x1298] sm:$0xff] }
 0x963   : > { %v22462_v33 = vpack.c.bf16 %v15314_v18, %v15313_v5  ;;  %22459 = vmatprep.subr.bf16.mxu0 %v22458_v54  ;;  %v10806_v5 = vld [vmem:[#allocation2 + $0x199] sm:$0xff]  ;;  %v10807_v18 = vld [vmem:[#allocation2 + $0x1a1] sm:$0xff] }
 0x964   : > { %22461 = vmatpush3.bf16.msra.mxu0 %v22458_v54  ;;  %v10805_v54 = vld [vmem:[#allocation2 + $0x189] sm:$0xff] }
 0x965   : > { %20380 = vmatmul.mubr.f32.gmra.mrb[88].mxu1 %v27392_v47  ;;  %v22430_v47 = vpack.c.bf16 %v15281_v59, %v15280_v4  ;;  %22463 = vmatprep.subr.bf16.mxu0 %v22462_v33  ;;  %v10801_v4 = vld [vmem:[#allocation2 + $0x159] sm:$0xff]  ;;  %v10802_v59 = vld [vmem:[#allocation2 + $0x169] sm:$0xff] }
 0x966   : > { %20382 = vmatprep.mubr.f32.mxu1 %v29397_v20  ;;  %v10796_v20 = vld [vmem:[#allocation2 + $0x121] sm:$0xff] }
 0x968   : > { %22465 = vmatpush3.bf16.msra.mxu0 %v22462_v33  ;;  %v11084_v33 = vld [vmem:[#allocation2 + $0x4a] sm:$0xff] }
 0x969   : > { %20383 = vmatmul.mubr.f32.gmra.mrb[90].mxu1 %v29398_v27  ;;  %v10797_v27 = vld [vmem:[#allocation2 + $0x129] sm:$0xff] }
 0x96a   : > { %20385 = vmatprep.mubr.f32.mxu1 %v29399_v42  ;;  %v10798_v42 = vld [vmem:[#allocation2 + $0x139] sm:$0xff] }
 0x96d   : > { %20386 = vmatmul.mubr.f32.gmra.mrb[92].mxu1 %v29400_v30  ;;  %v10800_v30 = vld [vmem:[#allocation2 + $0x151] sm:$0xff] }
 0x96e   : > { %20388 = vmatprep.mubr.f32.mxu1 %v10500_v58  ;;  %v10799_v58 = vld [vmem:[#allocation2 + $0x141] sm:$0xff] }
 0x971   : > { %20389 = vmatmul.mubr.f32.gmra.mrb[94].mxu1 %v27887_v60 }
 0x972   : > { %20423 = vmatprep.mubr.f32.mxu1 %v27635_v25  ;;  %v15315_v25 = vld [vmem:[%s29016_s1 + $0x12a0] sm:$0xff] }
 0x973   : > { %v22466_v41 = vpack.c.bf16 %v15316_v23, %v15315_v25  ;;  %v11086_v25 = vld [vmem:[#allocation2 + $0x62] sm:$0xff]  ;;  %v11087_v23 = vld [vmem:[#allocation2 + $0x6a] sm:$0xff] }
 0x975   : > { %20424 = vmatmul.mubr.f32.vlgmr.msra.gmra.mrb[64].mxu1 %v29401_v46  ;;  %22467 = vmatprep.subr.bf16.mxu0 %v22466_v41  ;;  %v11088_v46 = vld [vmem:[#allocation2 + $0x7a] sm:$0xff] }
 0x976   : > { %20426 = vmatprep.mubr.f32.mxu1 %v29402_v8  ;;  %22429 = vmatpush3.bf16.msra.mxu1 %v22426_v61  ;;  %v10795_v61 = vld [vmem:[#allocation2 + $0x111] sm:$0xff]  ;;  %v11089_v8 = vld [vmem:[#allocation2 + $0x82] sm:$0xff] }
 0x977   : > { %22431 = vmatprep.subr.bf16.mxu1 %v22430_v47  ;;  %22469 = vmatpush3.bf16.msra.mxu0 %v22466_v41  ;;  %v11092_v41 = vld [vmem:[#allocation2 + $0xaa] sm:$0xff] }
 0x978   : > { %22471 = vmatprep.subr.bf16.mxu0 %v22470_v40 }
 0x979   : > { %20427 = vmatmul.mubr.f32.gmra.mrb[66].mxu1 %v29403_v49  ;;  %v11096_v49 = vld [vmem:[#allocation2 + $0xda] sm:$0xff] }
 0x97a   : > { %20429 = vmatprep.mubr.f32.mxu1 %v29404_v37  ;;  %22433 = vmatpush3.bf16.msra.mxu1 %v22430_v47  ;;  %v11082_v47 = vld [vmem:[#allocation2 + $0x32] sm:$0xff]  ;;  %v11097_v37 = vld [vmem:[#allocation2 + $0xe2] sm:$0xff] }
 0x97b   : > { %22435 = vmatprep.subr.bf16.mxu1 %v22434_v21  ;;  %22473 = vmatpush3.bf16.msra.mxu0 %v22470_v40  ;;  %v11100_v40 = vld [vmem:[#allocation2 + $0x10a] sm:$0xff] }
 0x97c   : > { %22475 = vmatprep.subr.bf16.mxu0 %v22474_v2 }
 0x97d   : > { %20430 = vmatmul.mubr.f32.gmra.mrb[68].mxu1 %v27662_v50  ;;  %v15321_v50 = vld [vmem:[%s29016_s1 + $0x12d0] sm:$0xff] }
 0x97e   : > { %20432 = vmatprep.mubr.f32.mxu1 %v29405_v28  ;;  %22437 = vmatpush3.bf16.msra.mxu1 %v22434_v21  ;;  %v22478_v9 = vpack.c.bf16 %v15322_v3, %v15321_v50  ;;  %v11090_v21 = vld [vmem:[#allocation2 + $0x92] sm:$0xff]  ;;  %v11104_v28 = vld [vmem:[#allocation2 + $0x13a] sm:$0xff] }
 0x97f   : > { %22439 = vmatprep.subr.bf16.mxu1 %v22438_v19  ;;  %22477 = vmatpush3.bf16.msra.mxu0 %v22474_v2  ;;  %v11107_v2 = vld [vmem:[#allocation2 + $0x15a] sm:$0xff]  ;;  %v11109_v50 = vld [vmem:[#allocation2 + $0x172] sm:$0xff] }
 0x980   : > { %22479 = vmatprep.subr.bf16.mxu0 %v22478_v9  ;;  %v11112_v3 = vld [vmem:[#allocation2 + $0x19a] sm:$0xff] }
 0x981   : > { %20433 = vmatmul.mubr.f32.gmra.mrb[70].mxu1 %v27674_v16  ;;  %v22450_v16 = vpack.c.bf16 %v15291_v36, %v15290_v31  ;;  %v11570_v36 = vld [vmem:[#allocation3 + $0x1] sm:$0xff] }
 0x982   : > { %20435 = vmatprep.mubr.f32.mxu1 %v10784_v6  ;;  %22441 = vmatpush3.bf16.msra.mxu1 %v22438_v19  ;;  %v11098_v19 = vld [vmem:[#allocation2 + $0xf2] sm:$0xff]  ;;  %v11113_v6 = vld [vmem:[#allocation2 + $0x1a2] sm:$0xff] }
 0x983   : > { %22443 = vmatprep.subr.bf16.mxu1 %v22442_v38  ;;  %22481 = vmatpush3.bf16.msra.mxu0 %v22478_v9  ;;  %v15324_v9 = vld [vmem:[%s29016_s1 + $0x12e8] sm:$0xff] }
 0x984   : > { %20583 = vmatprep.mubr.f32.mxu0 %v11570_v36 }
 0x985   : > { %20436 = vmatmul.mubr.f32.gmra.mrb[72].mxu1 %v10785_v1 }
 0x986   : > { %20438 = vmatprep.mubr.f32.mxu1 %v10786_v22  ;;  %22445 = vmatpush3.bf16.msra.mxu1 %v22442_v38  ;;  %v11105_v38 = vld [vmem:[#allocation2 + $0x142] sm:$0xff]  ;;  %v11571_v22 = vld [vmem:[#allocation3 + $0x9] sm:$0xff] }
 0x987   : > { %22447 = vmatprep.subr.bf16.mxu1 %v22446_v43 }
 0x989   : > { %20439 = vmatmul.mubr.f32.gmra.mrb[74].mxu1 %v10787_v39  ;;  %v15296_v39 = vld [vmem:[%s29016_s1 + $0x1208] sm:$0xff] }
 0x98a   : > { %20441 = vmatprep.mubr.f32.mxu1 %v10788_v13  ;;  %22449 = vmatpush3.bf16.msra.mxu1 %v22446_v43  ;;  %v15323_v43 = vld [vmem:[%s29016_s1 + $0x12e0] sm:$0xff]  ;;  %v15298_v13 = vld [vmem:[%s29016_s1 + $0x1218] sm:$0xff] }
 0x98b   : > { %22451 = vmatprep.subr.bf16.mxu1 %v22450_v16  ;;  %v22482_v1 = vpack.c.bf16 %v15324_v9, %v15323_v43 }
 0x98d   : > { %20442 = vmatmul.mubr.f32.gmra.mrb[76].mxu1 %v10789_v26  ;;  %22483 = vmatprep.subr.bf16.mxu0 %v22482_v1  ;;  %v15299_v26 = vld [vmem:[%s29016_s1 + $0x1220] sm:$0xff] }
 0x98e   : > { %20444 = vmatprep.mubr.f32.mxu1 %v10790_v55  ;;  %22453 = vmatpush3.bf16.msra.mxu1 %v22450_v16  ;;  %v15295_v16 = vld [vmem:[%s29016_s1 + $0x1200] sm:$0xff]  ;;  %v15300_v55 = vld [vmem:[%s29016_s1 + $0x1228] sm:$0xff] }
 0x98f   : > { %22455 = vmatprep.subr.bf16.mxu1 %v22454_v45  ;;  %22485 = vmatpush3.bf16.msra.mxu0 %v22482_v1  ;;  %v22490_v29 = vpack.c.bf16 %v15296_v39, %v15295_v16 }
 0x991   : > { %20445 = vmatmul.mubr.f32.gmra.mrb[78].mxu1 %v10791_v7  ;;  %v22498_v7 = vpack.c.bf16 %v15300_v55, %v15299_v26 }
 0x992   : > { %20447 = vmatprep.mubr.f32.mxu1 %v10792_v57  ;;  %22457 = vmatpush3.bf16.msra.mxu1 %v22454_v45  ;;  %v22494_v45 = vpack.c.bf16 %v15298_v13, %v15297_v14  ;;  %v15301_v57 = vld [vmem:[%s29016_s1 + $0x1230] sm:$0xff] }
 0x995   : > { %20448 = vmatmul.mubr.f32.gmra.mrb[80].mxu1 %v10793_v56  ;;  %v15302_v56 = vld [vmem:[%s29016_s1 + $0x1238] sm:$0xff] }
 0x996   : > { %20450 = vmatprep.mubr.f32.mxu1 %v10794_v48  ;;  %v22502_v48 = vpack.c.bf16 %v15302_v56, %v15301_v57 }
 0x999   : > { %20451 = vmatmul.mubr.f32.gmra.mrb[82].mxu1 %v10795_v61  ;;  %v15303_v61 = vld [vmem:[%s29016_s1 + $0x1240] sm:$0xff] }
 0x99a   : > { %20453 = vmatprep.mubr.f32.mxu1 %v10796_v20  ;;  %v15304_v20 = vld [vmem:[%s29016_s1 + $0x1248] sm:$0xff] }
 0x99d   : > { %20454 = vmatmul.mubr.f32.gmra.mrb[84].mxu1 %v10797_v27  ;;  %v22506_v27 = vpack.c.bf16 %v15304_v20, %v15303_v61 }
 0x99e   : > { %20456 = vmatprep.mubr.f32.mxu1 %v10798_v42  ;;  %v15305_v42 = vld [vmem:[%s29016_s1 + $0x1250] sm:$0xff] }
 0x9a1   : > { %20457 = vmatmul.mubr.f32.gmra.mrb[86].mxu1 %v10799_v58  ;;  %v15306_v58 = vld [vmem:[%s29016_s1 + $0x1258] sm:$0xff] }
 0x9a2   : > { %20459 = vmatprep.mubr.f32.mxu1 %v10800_v30  ;;  %v22510_v30 = vpack.c.bf16 %v15306_v58, %v15305_v42 }
 0x9a5   : > { %20460 = vmatmul.mubr.f32.gmra.mrb[88].mxu1 %v10801_v4  ;;  %v15307_v4 = vld [vmem:[%s29016_s1 + $0x1260] sm:$0xff] }
 0x9a6   : > { %20462 = vmatprep.mubr.f32.mxu1 %v10802_v59  ;;  %v15308_v59 = vld [vmem:[%s29016_s1 + $0x1268] sm:$0xff] }
 0x9a9   : > { %20463 = vmatmul.mubr.f32.gmra.mrb[90].mxu1 %v10803_v0  ;;  %v22514_v0 = vpack.c.bf16 %v15308_v59, %v15307_v4 }
 0x9aa   : > { %20465 = vmatprep.mubr.f32.mxu1 %v10804_v32  ;;  %v15309_v32 = vld [vmem:[%s29016_s1 + $0x1270] sm:$0xff] }
 0x9ad   : > { %20466 = vmatmul.mubr.f32.gmra.mrb[92].mxu1 %v10805_v54 }
 0x9ae   : > { %20468 = vmatprep.mubr.f32.mxu1 %v10806_v5  ;;  %v15310_v5 = vld [vmem:[%s29016_s1 + $0x1278] sm:$0xff] }
 0x9af   : > { %v22518_v54 = vpack.c.bf16 %v15310_v5, %v15309_v32 }
 0x9b1   : > { %20469 = vmatmul.mubr.f32.gmra.mrb[94].mxu1 %v10807_v18  ;;  %v15327_v18 = vld [vmem:[%s29016_s1 + $0x1300] sm:$0xff] }
 0x9b2   : > { %20503 = vmatprep.mubr.f32.mxu1 %v11082_v47  ;;  %v15328_v47 = vld [vmem:[%s29016_s1 + $0x1308] sm:$0xff] }
 0x9b5   : > { %20504 = vmatmul.mubr.f32.vlgmr.msra.gmra.mrb[64].mxu1 %v11083_v51  ;;  %v28038_v51 = vpack.c.bf16 %v15328_v47, %v15327_v18 }
 0x9b6   : > { %20506 = vmatprep.mubr.f32.mxu1 %v11084_v33  ;;  %v28044_v33 = vld [vmem:[%s29017_s2 + $0x3] ss:$0 sm:$0xff] }
 0x9b9   : > { %20507 = vmatmul.mubr.f32.gmra.mrb[66].mxu1 %v11085_v35 }
 0x9ba   : > { %20509 = vmatprep.mubr.f32.mxu1 %v11086_v25 }
 0x9bd   : > { %20510 = vmatmul.mubr.f32.gmra.mrb[68].mxu1 %v11087_v23 }
 0x9be   : > { %20512 = vmatprep.mubr.f32.mxu1 %v11088_v46 }
 0x9c1   : > { %20513 = vmatmul.mubr.f32.gmra.mrb[70].mxu1 %v11089_v8 }
 0x9c2   : > { %20515 = vmatprep.mubr.f32.mxu1 %v11090_v21 }
 0x9c5   : > { %20516 = vmatmul.mubr.f32.gmra.mrb[72].mxu1 %v11091_v44 }
 0x9c6   : > { %20518 = vmatprep.mubr.f32.mxu1 %v11092_v41 }
 0x9c9   : > { %20519 = vmatmul.mubr.f32.gmra.mrb[74].mxu1 %v11093_v62 }
 0x9ca   : > { %20521 = vmatprep.mubr.f32.mxu1 %v11094_v12 }
 0x9cd   : > { %20522 = vmatmul.mubr.f32.gmra.mrb[76].mxu1 %v11095_v17 }
 0x9ce   : > { %20524 = vmatprep.mubr.f32.mxu1 %v11096_v49 }
 0x9d1   : > { %20525 = vmatmul.mubr.f32.gmra.mrb[78].mxu1 %v11097_v37 }
 0x9d2   : > { %20527 = vmatprep.mubr.f32.mxu1 %v11098_v19 }
 0x9d5   : > { %20528 = vmatmul.mubr.f32.gmra.mrb[80].mxu1 %v11099_v34 }
 0x9d6   : > { %20530 = vmatprep.mubr.f32.mxu1 %v11100_v40 }
 0x9d9   : > { %20531 = vmatmul.mubr.f32.gmra.mrb[82].mxu1 %v11101_v53 }
 0x9da   : > { %20533 = vmatprep.mubr.f32.mxu1 %v11102_v52 }
 0x9dd   : > { %20534 = vmatmul.mubr.f32.gmra.mrb[84].mxu1 %v11103_v63 }
 0x9de   : > { %20536 = vmatprep.mubr.f32.mxu1 %v11104_v28 }
 0x9e1   : > { %20537 = vmatmul.mubr.f32.gmra.mrb[86].mxu1 %v11105_v38 }
 0x9e2   : > { %20539 = vmatprep.mubr.f32.mxu1 %v11106_v11 }
 0x9e5   : > { %20540 = vmatmul.mubr.f32.gmra.mrb[88].mxu1 %v11107_v2 }
 0x9e6   : > { %20542 = vmatprep.mubr.f32.mxu1 %v11108_v10 }
 0x9e9   : > { %20543 = vmatmul.mubr.f32.gmra.mrb[90].mxu1 %v11109_v50 }
 0x9ea   : > { %20545 = vmatprep.mubr.f32.mxu1 %v27797_v15  ;;  %v15325_v15 = vld [vmem:[%s29016_s1 + $0x12f0] sm:$0xff] }
 0x9ed   : > { %20546 = vmatmul.mubr.f32.gmra.mrb[92].mxu1 %v27800_v24  ;;  %v15326_v24 = vld [vmem:[%s29016_s1 + $0x12f8] sm:$0xff] }
 0x9ee   : > { %20548 = vmatprep.mubr.f32.mxu1 %v11112_v3  ;;  %v22486_v31 = vpack.c.bf16 %v15326_v24, %v15325_v15 }
 0x9f0   : > { %22487 = vmatprep.subr.bf16.mxu0 %v22486_v31 }
 0x9f1   : > { %20549 = vmatmul.mubr.f32.gmra.mrb[94].mxu1 %v11113_v6  ;;  %22489 = vmatpush3.bf16.msra.mxu0 %v22486_v31 }
 0x9f2   : > { %22491 = vmatprep.subr.bf16.mxu0 %v22490_v29 }
 0x9f4   : > { %20584 = vmatmul.mubr.f32.vlgmr.msra.gmra.mrb[64].mxu0 %v11571_v22 }
 0x9f5   : > { %22493 = vmatpush3.bf16.msra.mxu0 %v22490_v29 }
 0x9f6   : > { %22495 = vmatprep.subr.bf16.mxu0 %v22494_v45 }
 0x9f9   : > { %22497 = vmatpush3.bf16.msra.mxu0 %v22494_v45 }
 0x9fa   : > { %22499 = vmatprep.subr.bf16.mxu0 %v22498_v7 }
 0x9fd   : > { %22501 = vmatpush3.bf16.msra.mxu0 %v22498_v7 }
 0x9fe   : > { %22503 = vmatprep.subr.bf16.mxu0 %v22502_v48 }
 0xa01   : > { %22505 = vmatpush3.bf16.msra.mxu0 %v22502_v48 }
 0xa02   : > { %22507 = vmatprep.subr.bf16.mxu0 %v22506_v27 }
 0xa05   : > { %22509 = vmatpush3.bf16.msra.mxu0 %v22506_v27 }
 0xa06   : > { %22511 = vmatprep.subr.bf16.mxu0 %v22510_v30 }
 0xa09   : > { %22513 = vmatpush3.bf16.msra.mxu0 %v22510_v30 }
 0xa0a   : > { %22515 = vmatprep.subr.bf16.mxu0 %v22514_v0 }
 0xa0d   : > { %22517 = vmatpush3.bf16.msra.mxu0 %v22514_v0 }
 0xa0e   : > { %22519 = vmatprep.subr.bf16.mxu0 %v22518_v54 }
 0xa11   : > { %22521 = vmatpush3.bf16.msra.mxu0 %v22518_v54 }
 0xa12   : > { %22523 = vmatprep.subr.bf16.mxu0 %v28038_v51 }
 0xa88   : > { %v20505_v35 = vpop.f32.mrb[64].mxu1 }
 0xa89   : > { %v11394_v25 = vadd.f32 %v20505_v35, %v28044_v33  ;;  %v11197_v23 = vpop.f32.mrb[65].mxu1 }
 0xa8a   : > { %v11393_v46 = vadd.f32 %v28044_v33, %v11197_v23 }
 0xa8b   : > { %v11426_v8 = vmax.f32 %v11394_v25, 0.0 }
 0xa8c   : > { %v11425_v21 = vmax.f32 %v11393_v46, 0.0  ;;  %v20508_v44 = vpop.f32.mrb[66].mxu1 }
 0xa8d   : > { %11458 = vst [vmem:[%s28051_s24 + $0x8] sm:$0xff] %v11426_v8  ;;  %11490 = vst [vmem:[#allocation3 + $0x21] sm:$0xff] %v11426_v8  ;;  %v11396_v41 = vadd.f32 %v20508_v44, %v28044_v33  ;;  %v11207_v62 = vpop.f32.mrb[67].mxu1 }
 0xa8e   : > { %11457 = vst [vmem:[%s28051_s24] sm:$0xff] %v11425_v21  ;;  %11489 = vst [vmem:[#allocation3 + $0x19] sm:$0xff] %v11425_v21  ;;  %v11395_v12 = vadd.f32 %v28044_v33, %v11207_v62  ;;  %20586 = vmatprep.mubr.f32.mxu0 %v11425_v21 }
 0xa8f   : > { %v11428_v17 = vmax.f32 %v11396_v41, 0.0  ;;  %20587 = vmatmul.mubr.f32.gmra.mrb[66].mxu0 %v11426_v8 }
 0xa90   : > { %v11427_v49 = vmax.f32 %v11395_v12, 0.0  ;;  %v20511_v37 = vpop.f32.mrb[68].mxu1 }
 0xa91   : > { %11460 = vst [vmem:[%s28051_s24 + $0x18] sm:$0xff] %v11428_v17  ;;  %11492 = vst [vmem:[#allocation3 + $0x39] sm:$0xff] %v11428_v17  ;;  %v11398_v19 = vadd.f32 %v20511_v37, %v28044_v33  ;;  %v11217_v34 = vpop.f32.mrb[69].mxu1 }
 0xa92   : > { %11459 = vst [vmem:[%s28051_s24 + $0x10] sm:$0xff] %v11427_v49  ;;  %11491 = vst [vmem:[#allocation3 + $0x31] sm:$0xff] %v11427_v49  ;;  %v11397_v40 = vadd.f32 %v28044_v33, %v11217_v34  ;;  %20589 = vmatprep.mubr.f32.mxu0 %v11427_v49 }
 0xa93   : > { %v11430_v53 = vmax.f32 %v11398_v19, 0.0  ;;  %20590 = vmatmul.mubr.f32.gmra.mrb[68].mxu0 %v11428_v17 }
 0xa94   : > { %v11429_v52 = vmax.f32 %v11397_v40, 0.0  ;;  %v20514_v63 = vpop.f32.mrb[70].mxu1 }
 0xa95   : > { %11462 = vst [vmem:[%s28051_s24 + $0x28] sm:$0xff] %v11430_v53  ;;  %11494 = vst [vmem:[#allocation3 + $0x51] sm:$0xff] %v11430_v53  ;;  %v11400_v28 = vadd.f32 %v20514_v63, %v28044_v33  ;;  %v11227_v38 = vpop.f32.mrb[71].mxu1 }
 0xa96   : > { %11461 = vst [vmem:[%s28051_s24 + $0x20] sm:$0xff] %v11429_v52  ;;  %11493 = vst [vmem:[#allocation3 + $0x49] sm:$0xff] %v11429_v52  ;;  %v11399_v11 = vadd.f32 %v28044_v33, %v11227_v38  ;;  %20592 = vmatprep.mubr.f32.mxu0 %v11429_v52 }
 0xa97   : > { %v11432_v2 = vmax.f32 %v11400_v28, 0.0  ;;  %20593 = vmatmul.mubr.f32.gmra.mrb[70].mxu0 %v11430_v53 }
 0xa98   : > { %v11431_v10 = vmax.f32 %v11399_v11, 0.0  ;;  %v20517_v50 = vpop.f32.mrb[72].mxu1 }
 0xa99   : > { %11464 = vst [vmem:[%s28051_s24 + $0x38] sm:$0xff] %v11432_v2  ;;  %11496 = vst [vmem:[#allocation3 + $0x69] sm:$0xff] %v11432_v2  ;;  %v11402_v3 = vadd.f32 %v20517_v50, %v28044_v33  ;;  %v11237_v6 = vpop.f32.mrb[73].mxu1 }
 0xa9a   : > { %11463 = vst [vmem:[%s28051_s24 + $0x30] sm:$0xff] %v11431_v10  ;;  %11495 = vst [vmem:[#allocation3 + $0x61] sm:$0xff] %v11431_v10  ;;  %v11401_v43 = vadd.f32 %v28044_v33, %v11237_v6  ;;  %20595 = vmatprep.mubr.f32.mxu0 %v11431_v10 }
 0xa9b   : > { %v11434_v9 = vmax.f32 %v11402_v3, 0.0  ;;  %20596 = vmatmul.mubr.f32.gmra.mrb[72].mxu0 %v11432_v2 }
 0xa9c   : > { %v11433_v1 = vmax.f32 %v11401_v43, 0.0  ;;  %v20520_v15 = vpop.f32.mrb[74].mxu1 }
 0xa9d   : > { %11466 = vst [vmem:[%s28051_s24 + $0x48] sm:$0xff] %v11434_v9  ;;  %11498 = vst [vmem:[#allocation3 + $0x81] sm:$0xff] %v11434_v9  ;;  %v11404_v24 = vadd.f32 %v20520_v15, %v28044_v33  ;;  %v11247_v31 = vpop.f32.mrb[75].mxu1 }
 0xa9e   : > { %11465 = vst [vmem:[%s28051_s24 + $0x40] sm:$0xff] %v11433_v1  ;;  %11497 = vst [vmem:[#allocation3 + $0x79] sm:$0xff] %v11433_v1  ;;  %v11403_v36 = vadd.f32 %v28044_v33, %v11247_v31  ;;  %20598 = vmatprep.mubr.f32.mxu0 %v11433_v1  ;;  %v11521_v31 = vld [vmem:[#allocation3] sm:$0xff] }
 0xa9f   : > { %v11436_v22 = vmax.f32 %v11404_v24, 0.0  ;;  %20599 = vmatmul.mubr.f32.gmra.mrb[74].mxu0 %v11434_v9 }
 0xaa0   : > { %v11435_v16 = vmax.f32 %v11403_v36, 0.0  ;;  %v20523_v39 = vpop.f32.mrb[76].mxu1 }
 0xaa1   : > { %11468 = vst [vmem:[%s28051_s24 + $0x58] sm:$0xff] %v11436_v22  ;;  %11500 = vst [vmem:[#allocation3 + $0x99] sm:$0xff] %v11436_v22  ;;  %v11406_v29 = vadd.f32 %v20523_v39, %v28044_v33  ;;  %v11257_v14 = vpop.f32.mrb[77].mxu1 }
 0xaa2   : > { %11467 = vst [vmem:[%s28051_s24 + $0x50] sm:$0xff] %v11435_v16  ;;  %11499 = vst [vmem:[#allocation3 + $0x91] sm:$0xff] %v11435_v16  ;;  %v11405_v13 = vadd.f32 %v28044_v33, %v11257_v14  ;;  %20601 = vmatprep.mubr.f32.mxu0 %v11435_v16  ;;  %v15330_v16 = vld [vmem:[%s29016_s1 + $0x1318] sm:$0xff]  ;;  %v15331_v14 = vld [vmem:[%s29016_s1 + $0x1320] sm:$0xff] }
 0xaa3   : > { %v11438_v45 = vmax.f32 %v11406_v29, 0.0  ;;  %20602 = vmatmul.mubr.f32.gmra.mrb[76].mxu0 %v11436_v22  ;;  %v15329_v22 = vld [vmem:[%s29016_s1 + $0x1310] sm:$0xff] }
 0xaa4   : > { %v11437_v26 = vmax.f32 %v11405_v13, 0.0  ;;  %v20526_v55 = vpop.f32.mrb[78].mxu1  ;;  %v15332_v13 = vld [vmem:[%s29016_s1 + $0x1328] sm:$0xff] }
 0xaa5   : > { %11470 = vst [vmem:[%s28051_s24 + $0x68] sm:$0xff] %v11438_v45  ;;  %11502 = vst [vmem:[#allocation3 + $0xb1] sm:$0xff] %v11438_v45  ;;  %v11408_v7 = vadd.f32 %v20526_v55, %v28044_v33  ;;  %v11267_v57 = vpop.f32.mrb[79].mxu1  ;;  %v28221_v55 = vld [vmem:[#allocation3 + $0x20] sm:$0xff] }
 0xaa6   : > { %11469 = vst [vmem:[%s28051_s24 + $0x60] sm:$0xff] %v11437_v26  ;;  %11501 = vst [vmem:[#allocation3 + $0xa9] sm:$0xff] %v11437_v26  ;;  %v11407_v56 = vadd.f32 %v28044_v33, %v11267_v57  ;;  %20604 = vmatprep.mubr.f32.mxu0 %v11437_v26  ;;  %v22530_v26 = vpack.c.bf16 %v15332_v13, %v15331_v14  ;;  %v15334_v57 = vld [vmem:[%s29016_s1 + $0x1338] sm:$0xff] }
 0xaa7   : > { %v28082_v48 = vmax.f32 %v11408_v7, 0.0  ;;  %20605 = vmatmul.mubr.f32.gmra.mrb[78].mxu0 %v11438_v45  ;;  %v28217_v45 = vld [vmem:[#allocation3 + $0x18] sm:$0xff]  ;;  %v15333_v7 = vld [vmem:[%s29016_s1 + $0x1330] sm:$0xff] }
 0xaa8   : > { %v28084_v61 = vmax.f32 %v11407_v56, 0.0  ;;  %v20529_v20 = vpop.f32.mrb[80].mxu1  ;;  %v28233_v56 = vld [vmem:[#allocation3 + $0x38] sm:$0xff] }
 0xaa9   : > { %11472 = vst [vmem:[%s28051_s24 + $0x78] sm:$0xff] %v28082_v48  ;;  %11504 = vst [vmem:[#allocation3 + $0xc9] sm:$0xff] %v28082_v48  ;;  %v11410_v27 = vadd.f32 %v20529_v20, %v28044_v33  ;;  %v11277_v42 = vpop.f32.mrb[81].mxu1  ;;  %v15335_v20 = vld [vmem:[%s29016_s1 + $0x1340] sm:$0xff] }
 0xaaa   : > { %11471 = vst [vmem:[%s28051_s24 + $0x70] sm:$0xff] %v28084_v61  ;;  %11503 = vst [vmem:[#allocation3 + $0xc1] sm:$0xff] %v28084_v61  ;;  %v11409_v58 = vadd.f32 %v28044_v33, %v11277_v42  ;;  %20607 = vmatprep.mubr.f32.mxu0 %v28084_v61  ;;  %v28242_v42 = vld [vmem:[#allocation3 + $0x48] sm:$0xff] }
 0xaab   : > { %v28095_v30 = vmax.f32 %v11410_v27, 0.0  ;;  %20608 = vmatmul.mubr.f32.gmra.mrb[80].mxu0 %v28082_v48  ;;  %v15336_v27 = vld [vmem:[%s29016_s1 + $0x1348] sm:$0xff] }
 0xaac   : > { %v28098_v4 = vmax.f32 %v11409_v58, 0.0  ;;  %v20532_v59 = vpop.f32.mrb[82].mxu1  ;;  %v22538_v58 = vpack.c.bf16 %v15336_v27, %v15335_v20  ;;  %v15345_v20 = vld [vmem:[%s29016_s1 + $0x1390] sm:$0xff]  ;;  %v15346_v27 = vld [vmem:[%s29016_s1 + $0x1398] sm:$0xff] }
 0xaad   : > { %11474 = vst [vmem:[%s28051_s24 + $0x88] sm:$0xff] %v28095_v30  ;;  %11506 = vst [vmem:[#allocation3 + $0xe1] sm:$0xff] %v28095_v30  ;;  %v11412_v0 = vadd.f32 %v20532_v59, %v28044_v33  ;;  %v11287_v32 = vpop.f32.mrb[83].mxu1  ;;  %v28245_v59 = vld [vmem:[#allocation3 + $0x50] sm:$0xff] }
 0xaae   : > { %11473 = vst [vmem:[%s28051_s24 + $0x80] sm:$0xff] %v28098_v4  ;;  %11505 = vst [vmem:[#allocation3 + $0xd9] sm:$0xff] %v28098_v4  ;;  %v11411_v5 = vadd.f32 %v28044_v33, %v11287_v32  ;;  %20610 = vmatprep.mubr.f32.mxu0 %v28098_v4  ;;  %v15338_v32 = vld [vmem:[%s29016_s1 + $0x1358] sm:$0xff] }
 0xaaf   : > { %v28109_v54 = vmax.f32 %v11412_v0, 0.0  ;;  %20611 = vmatmul.mubr.f32.gmra.mrb[82].mxu0 %v28095_v30  ;;  %v15337_v0 = vld [vmem:[%s29016_s1 + $0x1350] sm:$0xff] }
 0xab0   : > { %v28112_v18 = vmax.f32 %v11411_v5, 0.0  ;;  %v20535_v47 = vpop.f32.mrb[84].mxu1  ;;  %v28254_v5 = vld [vmem:[#allocation3 + $0x60] sm:$0xff] }
 0xab1   : > { %11476 = vst [vmem:[%s28051_s24 + $0x98] sm:$0xff] %v28109_v54  ;;  %11508 = vst [vmem:[#allocation3 + $0xf9] sm:$0xff] %v28109_v54  ;;  %v11414_v35 = vadd.f32 %v20535_v47, %v28044_v33  ;;  %v11297_v25 = vpop.f32.mrb[85].mxu1  ;;  %v22542_v47 = vpack.c.bf16 %v15338_v32, %v15337_v0  ;;  %v22558_v0 = vpack.c.bf16 %v15346_v27, %v15345_v20  ;;  %v15347_v32 = vld [vmem:[%s29016_s1 + $0x13a0] sm:$0xff] }
 0xab2   : > { %11475 = vst [vmem:[%s28051_s24 + $0x90] sm:$0xff] %v28112_v18  ;;  %11507 = vst [vmem:[#allocation3 + $0xf1] sm:$0xff] %v28112_v18  ;;  %v11413_v23 = vadd.f32 %v28044_v33, %v11297_v25  ;;  %20613 = vmatprep.mubr.f32.mxu0 %v28112_v18  ;;  %v15339_v25 = vld [vmem:[%s29016_s1 + $0x1360] sm:$0xff] }
 0xab3   : > { %v28123_v46 = vmax.f32 %v11414_v35, 0.0  ;;  %20614 = vmatmul.mubr.f32.gmra.mrb[84].mxu0 %v28109_v54  ;;  %v28257_v35 = vld [vmem:[#allocation3 + $0x68] sm:$0xff] }
 0xab4   : > { %v28126_v8 = vmax.f32 %v11413_v23, 0.0  ;;  %v20538_v21 = vpop.f32.mrb[86].mxu1  ;;  %v15340_v23 = vld [vmem:[%s29016_s1 + $0x1368] sm:$0xff]  ;;  %v28380_v20 = vld [vmem:[#allocation3 + $0x4a] sm:$0xff] }
 0xab5   : > { %11478 = vst [vmem:[%s28051_s24 + $0xa8] sm:$0xff] %v28123_v46  ;;  %11510 = vst [vmem:[#allocation3 + $0x111] sm:$0xff] %v28123_v46  ;;  %v11416_v44 = vadd.f32 %v20538_v21, %v28044_v33  ;;  %v11307_v41 = vpop.f32.mrb[87].mxu1  ;;  %v28266_v21 = vld [vmem:[#allocation3 + $0x78] sm:$0xff] }
 0xab6   : > { %11477 = vst [vmem:[%s28051_s24 + $0xa0] sm:$0xff] %v28126_v8  ;;  %11509 = vst [vmem:[#allocation3 + $0x109] sm:$0xff] %v28126_v8  ;;  %v11415_v62 = vadd.f32 %v28044_v33, %v11307_v41  ;;  %20616 = vmatprep.mubr.f32.mxu0 %v28126_v8  ;;  %v28269_v41 = vld [vmem:[#allocation3 + $0x80] sm:$0xff] }
 0xab7   : > { %v28137_v12 = vmax.f32 %v11416_v44, 0.0  ;;  %20617 = vmatmul.mubr.f32.gmra.mrb[86].mxu0 %v28123_v46  ;;  %v22546_v44 = vpack.c.bf16 %v15340_v23, %v15339_v25  ;;  %v28356_v25 = vld [vmem:[#allocation3 + $0x1a] sm:$0xff] }
 0xab8   : > { %v28140_v17 = vmax.f32 %v11415_v62, 0.0  ;;  %v20541_v49 = vpop.f32.mrb[88].mxu1  ;;  %v15341_v62 = vld [vmem:[%s29016_s1 + $0x1370] sm:$0xff] }
 0xab9   : > { %11480 = vst [vmem:[%s28051_s24 + $0xb8] sm:$0xff] %v28137_v12  ;;  %11512 = vst [vmem:[#allocation3 + $0x129] sm:$0xff] %v28137_v12  ;;  %v11418_v37 = vadd.f32 %v20541_v49, %v28044_v33  ;;  %v11317_v19 = vpop.f32.mrb[89].mxu1  ;;  %v15342_v49 = vld [vmem:[%s29016_s1 + $0x1378] sm:$0xff] }
 0xaba   : > { %11479 = vst [vmem:[%s28051_s24 + $0xb0] sm:$0xff] %v28140_v17  ;;  %11511 = vst [vmem:[#allocation3 + $0x121] sm:$0xff] %v28140_v17  ;;  %v11417_v34 = vadd.f32 %v28044_v33, %v11317_v19  ;;  %20619 = vmatprep.mubr.f32.mxu0 %v28140_v17  ;;  %v22550_v19 = vpack.c.bf16 %v15342_v49, %v15341_v62  ;;  %v15349_v62 = vld [vmem:[%s29016_s1 + $0x13b0] sm:$0xff]  ;;  %v15350_v49 = vld [vmem:[%s29016_s1 + $0x13b8] sm:$0xff] }
 0xabb   : > { %v28151_v40 = vmax.f32 %v11418_v37, 0.0  ;;  %20620 = vmatmul.mubr.f32.gmra.mrb[88].mxu0 %v28137_v12  ;;  %v28278_v37 = vld [vmem:[#allocation3 + $0x90] sm:$0xff] }
 0xabc   : > { %v28154_v53 = vmax.f32 %v11417_v34, 0.0  ;;  %v20544_v52 = vpop.f32.mrb[90].mxu1  ;;  %v28281_v34 = vld [vmem:[#allocation3 + $0x98] sm:$0xff] }
 0xabd   : > { %11482 = vst [vmem:[%s28051_s24 + $0xc8] sm:$0xff] %v28151_v40  ;;  %11514 = vst [vmem:[#allocation3 + $0x141] sm:$0xff] %v28151_v40  ;;  %v11420_v63 = vadd.f32 %v20544_v52, %v28044_v33  ;;  %v11327_v28 = vpop.f32.mrb[91].mxu1  ;;  %v15343_v52 = vld [vmem:[%s29016_s1 + $0x1380] sm:$0xff] }
 0xabe   : > { %11481 = vst [vmem:[%s28051_s24 + $0xc0] sm:$0xff] %v28154_v53  ;;  %11513 = vst [vmem:[#allocation3 + $0x139] sm:$0xff] %v28154_v53  ;;  %v11419_v38 = vadd.f32 %v28044_v33, %v11327_v28  ;;  %20622 = vmatprep.mubr.f32.mxu0 %v28154_v53  ;;  %v28290_v28 = vld [vmem:[#allocation3 + $0xa8] sm:$0xff] }
 0xabf   : > { %v28165_v11 = vmax.f32 %v11420_v63, 0.0  ;;  %20623 = vmatmul.mubr.f32.gmra.mrb[90].mxu0 %v28151_v40  ;;  %v15344_v63 = vld [vmem:[%s29016_s1 + $0x1388] sm:$0xff] }
 0xac0   : > { %v28168_v2 = vmax.f32 %v11419_v38, 0.0  ;;  %v20547_v10 = vpop.f32.mrb[92].mxu1  ;;  %v22554_v38 = vpack.c.bf16 %v15344_v63, %v15343_v52  ;;  %v22566_v52 = vpack.c.bf16 %v15350_v49, %v15349_v62  ;;  %v28371_v63 = vld [vmem:[#allocation3 + $0x3a] sm:$0xff]  ;;  %v28395_v62 = vld [vmem:[#allocation3 + $0x6a] sm:$0xff] }
 0xac1   : > { %11484 = vst [vmem:[%s28051_s24 + $0xd8] sm:$0xff] %v28165_v11  ;;  %11516 = vst [vmem:[#allocation3 + $0x159] sm:$0xff] %v28165_v11  ;;  %v11422_v50 = vadd.f32 %v20547_v10, %v28044_v33  ;;  %v11337_v3 = vpop.f32.mrb[93].mxu1  ;;  %v28293_v10 = vld [vmem:[#allocation3 + $0xb0] sm:$0xff] }
 0xac2   : > { %11483 = vst [vmem:[%s28051_s24 + $0xd0] sm:$0xff] %v28168_v2  ;;  %11515 = vst [vmem:[#allocation3 + $0x151] sm:$0xff] %v28168_v2  ;;  %v11421_v6 = vadd.f32 %v28044_v33, %v11337_v3  ;;  %20625 = vmatprep.mubr.f32.mxu0 %v28168_v2  ;;  %v28299_v3 = vld [vmem:[#allocation3 + $0xc8] sm:$0xff]  ;;  %v15355_v49 = vld [vmem:[%s29016_s1 + $0x13e0] sm:$0xff] }
 0xac3   : > { %v28179_v43 = vmax.f32 %v11422_v50, 0.0  ;;  %20626 = vmatmul.mubr.f32.gmra.mrb[92].mxu0 %v28165_v11  ;;  %v28296_v50 = vld [vmem:[#allocation3 + $0xc0] sm:$0xff]  ;;  %29409 = vst [vmem:[#allocation13_spill] sm:$0xff] %v28395_v62 }
 0xac4   : > { %v28182_v9 = vmax.f32 %v11421_v6, 0.0  ;;  %v20550_v1 = vpop.f32.mrb[94].mxu1  ;;  %v28302_v6 = vld [vmem:[#allocation3 + $0xd8] sm:$0xff] }
 0xac5   : > { %11486 = vst [vmem:[%s28051_s24 + $0xe8] sm:$0xff] %v28179_v43  ;;  %11518 = vst [vmem:[#allocation3 + $0x171] sm:$0xff] %v28179_v43  ;;  %v11424_v15 = vadd.f32 %v20550_v1, %v28044_v33  ;;  %v11347_v24 = vpop.f32.mrb[95].mxu1  ;;  %v28305_v1 = vld [vmem:[#allocation3 + $0xe0] sm:$0xff] }
 0xac6   : > { %11485 = vst [vmem:[%s28051_s24 + $0xe0] sm:$0xff] %v28182_v9  ;;  %11517 = vst [vmem:[#allocation3 + $0x169] sm:$0xff] %v28182_v9  ;;  %v11423_v36 = vadd.f32 %v28044_v33, %v11347_v24  ;;  %20628 = vmatprep.mubr.f32.mxu0 %v28182_v9  ;;  %v22526_v33 = vpack.c.bf16 %v15330_v16, %v15329_v22  ;;  %v28311_v24 = vld [vmem:[#allocation3 + $0xf8] sm:$0xff]  ;;  %v28320_v22 = vld [vmem:[#allocation3 + $0x120] sm:$0xff] }
 0xac7   : > { %v28199_v39 = vmax.f32 %v11424_v15, 0.0  ;;  %20629 = vmatmul.mubr.f32.gmra.mrb[94].mxu0 %v28179_v43  ;;  %v28308_v15 = vld [vmem:[#allocation3 + $0xf0] sm:$0xff]  ;;  %v28323_v16 = vld [vmem:[#allocation3 + $0x128] sm:$0xff]  ;;  %v28329_v14 = vld [vmem:[#allocation3 + $0x140] sm:$0xff] }
 0xac8   : > { %v28202_v29 = vmax.f32 %v11423_v36, 0.0  ;;  %20663 = vmatprep.mubr.f32.mxu0 %v11521_v31  ;;  %v28314_v31 = vld [vmem:[#allocation3 + $0x108] sm:$0xff]  ;;  %v28317_v36 = vld [vmem:[#allocation3 + $0x110] sm:$0xff] }
 0xac9   : > { %11488 = vst [vmem:[%s28051_s24 + $0xf8] sm:$0xff] %v28199_v39  ;;  %11520 = vst [vmem:[#allocation3 + $0x189] sm:$0xff] %v28199_v39  ;;  %v28332_v13 = vld [vmem:[#allocation3 + $0x150] sm:$0xff] }
 0xaca   : > { %11487 = vst [vmem:[%s28051_s24 + $0xf0] sm:$0xff] %v28202_v29  ;;  %11519 = vst [vmem:[#allocation3 + $0x181] sm:$0xff] %v28202_v29 }
 0xacb   : > { %20664 = vmatmul.mubr.f32.vlgmr.msra.gmra.mrb[64].mxu0 %v27887_v60  ;;  %v28230_v60 = vld [vmem:[#allocation3 + $0x30] sm:$0xff] }
 0xacc   : > { %20666 = vmatprep.mubr.f32.mxu0 %v28217_v45  ;;  %22525 = vmatpush3.bf16.msra.mxu0 %v28038_v51  ;;  %v22534_v51 = vpack.c.bf16 %v15334_v57, %v15333_v7  ;;  %v12069_v57 = vld [vmem:[#allocation3 + $0x2] sm:$0xff] }
 0xacd   : > { %22527 = vmatprep.subr.bf16.mxu0 %v22526_v33  ;;  %v28338_v7 = vld [vmem:[#allocation3 + $0x168] sm:$0xff] }
 0xace   : > { %29406 = vst [vmem:[#allocation4_spill] sm:$0xff] %v28338_v7 }
 0xacf   : > { %20667 = vmatmul.mubr.f32.gmra.mrb[66].mxu0 %v28221_v55 }
 0xad0   : > { %20669 = vmatprep.mubr.f32.mxu0 %v28230_v60  ;;  %22529 = vmatpush3.bf16.msra.mxu0 %v22526_v33  ;;  %v28326_v33 = vld [vmem:[#allocation3 + $0x138] sm:$0xff] }
 0xad1   : > { %22531 = vmatprep.subr.bf16.mxu0 %v22530_v26 }
 0xad3   : > { %20670 = vmatmul.mubr.f32.gmra.mrb[68].mxu0 %v28233_v56 }
 0xad4   : > { %20672 = vmatprep.mubr.f32.mxu0 %v28242_v42  ;;  %22533 = vmatpush3.bf16.msra.mxu0 %v22530_v26  ;;  %v28335_v26 = vld [vmem:[#allocation3 + $0x158] sm:$0xff] }
 0xad5   : > { %22535 = vmatprep.subr.bf16.mxu0 %v22534_v51 }
 0xad7   : > { %20673 = vmatmul.mubr.f32.gmra.mrb[70].mxu0 %v28245_v59 }
 0xad8   : > { %20675 = vmatprep.mubr.f32.mxu0 %v28254_v5  ;;  %22537 = vmatpush3.bf16.msra.mxu0 %v22534_v51  ;;  %v28341_v51 = vld [vmem:[#allocation3 + $0x170] sm:$0xff] }
 0xad9   : > { %22539 = vmatprep.subr.bf16.mxu0 %v22538_v58  ;;  %29407 = vst [vmem:[#allocation5_spill] sm:$0xff] %v28341_v51 }
 0xadb   : > { %20676 = vmatmul.mubr.f32.gmra.mrb[72].mxu0 %v28257_v35 }
 0xadc   : > { %20678 = vmatprep.mubr.f32.mxu0 %v28266_v21  ;;  %22541 = vmatpush3.bf16.msra.mxu0 %v22538_v58  ;;  %v12070_v58 = vld [vmem:[#allocation3 + $0xa] sm:$0xff] }
 0xadd   : > { %22543 = vmatprep.subr.bf16.mxu0 %v22542_v47 }
 0xadf   : > { %20679 = vmatmul.mubr.f32.gmra.mrb[74].mxu0 %v28269_v41 }
 0xae0   : > { %20681 = vmatprep.mubr.f32.mxu0 %v28278_v37  ;;  %22545 = vmatpush3.bf16.msra.mxu0 %v22542_v47  ;;  %v15348_v47 = vld [vmem:[%s29016_s1 + $0x13a8] sm:$0xff] }
 0xae1   : > { %22547 = vmatprep.subr.bf16.mxu0 %v22546_v44  ;;  %v22562_v23 = vpack.c.bf16 %v15348_v47, %v15347_v32  ;;  %v15354_v32 = vld [vmem:[%s29016_s1 + $0x13d8] sm:$0xff] }
 0xae2   : > { %v28392_v47 = vld [vmem:[#allocation3 + $0x62] sm:$0xff] }
 0xae3   : > { %20682 = vmatmul.mubr.f32.gmra.mrb[76].mxu0 %v28281_v34  ;;  %29408 = vst [vmem:[#allocation11_spill] sm:$0xff] %v28392_v47 }
 0xae4   : > { %20684 = vmatprep.mubr.f32.mxu0 %v28290_v28  ;;  %22549 = vmatpush3.bf16.msra.mxu0 %v22546_v44  ;;  %v28359_v44 = vld [vmem:[#allocation3 + $0x22] sm:$0xff] }
 0xae5   : > { %22551 = vmatprep.subr.bf16.mxu0 %v22550_v19 }
 0xae7   : > { %20685 = vmatmul.mubr.f32.gmra.mrb[78].mxu0 %v28293_v10 }
 0xae8   : > { %20687 = vmatprep.mubr.f32.mxu0 %v28296_v50  ;;  %22553 = vmatpush3.bf16.msra.mxu0 %v22550_v19  ;;  %v28368_v19 = vld [vmem:[#allocation3 + $0x32] sm:$0xff] }
 0xae9   : > { %22555 = vmatprep.subr.bf16.mxu0 %v22554_v38 }
 0xaeb   : > { %20688 = vmatmul.mubr.f32.gmra.mrb[80].mxu0 %v28299_v3 }
 0xaec   : > { %20690 = vmatprep.mubr.f32.mxu0 %v28302_v6 }
 0xaef   : > { %20691 = vmatmul.mubr.f32.gmra.mrb[82].mxu0 %v28305_v1 }
 0xaf0   : > { %20693 = vmatprep.mubr.f32.mxu0 %v28308_v15 }
 0xaf3   : > { %20694 = vmatmul.mubr.f32.gmra.mrb[84].mxu0 %v28311_v24 }
 0xaf4   : > { %20696 = vmatprep.mubr.f32.mxu0 %v28314_v31 }
 0xaf7   : > { %20697 = vmatmul.mubr.f32.gmra.mrb[86].mxu0 %v28317_v36 }
 0xaf8   : > { %20699 = vmatprep.mubr.f32.mxu0 %v28320_v22 }
 0xafb   : > { %20700 = vmatmul.mubr.f32.gmra.mrb[88].mxu0 %v28323_v16 }
 0xafc   : > { %20702 = vmatprep.mubr.f32.mxu0 %v28326_v33 }
 0xaff   : > { %20703 = vmatmul.mubr.f32.gmra.mrb[90].mxu0 %v28329_v14 }
 0xb00   : > { %20705 = vmatprep.mubr.f32.mxu0 %v28332_v13 }
 0xb03   : > { %20706 = vmatmul.mubr.f32.gmra.mrb[92].mxu0 %v28335_v26 }
 0xb04   : > { %20708 = vmatprep.mubr.f32.mxu0 %v28338_v7 }
 0xb07   : > { %20709 = vmatmul.mubr.f32.gmra.mrb[94].mxu0 %v28341_v51 }
 0xb08   : > { %20743 = vmatprep.mubr.f32.mxu0 %v12069_v57  ;;  %v15352_v57 = vld [vmem:[%s29016_s1 + $0x13c8] sm:$0xff] }
 0xb0b   : > { %20744 = vmatmul.mubr.f32.vlgmr.msra.gmra.mrb[64].mxu0 %v12070_v58  ;;  %v28383_v58 = vld [vmem:[#allocation3 + $0x52] sm:$0xff] }
 0xb0c   : > { %20746 = vmatprep.mubr.f32.mxu0 %v28356_v25  ;;  %22557 = vmatpush3.bf16.msra.mxu0 %v22554_v38  ;;  %v15351_v38 = vld [vmem:[%s29016_s1 + $0x13c0] sm:$0xff] }
 0xb0d   : > { %22559 = vmatprep.subr.bf16.mxu0 %v22558_v0  ;;  %v22570_v27 = vpack.c.bf16 %v15352_v57, %v15351_v38  ;;  %v15356_v38 = vld [vmem:[%s29016_s1 + $0x13e8] sm:$0xff] }
 0xb0e   : > { %v28404_v57 = vld [vmem:[#allocation3 + $0x7a] sm:$0xff] }
 0xb0f   : > { %20747 = vmatmul.mubr.f32.gmra.mrb[66].mxu0 %v28359_v44  ;;  %29410 = vst [vmem:[#allocation14_spill] sm:$0xff] %v28404_v57 }
 0xb10   : > { %20749 = vmatprep.mubr.f32.mxu0 %v28368_v19  ;;  %22561 = vmatpush3.bf16.msra.mxu0 %v22558_v0  ;;  %v15353_v0 = vld [vmem:[%s29016_s1 + $0x13d0] sm:$0xff] }
 0xb11   : > { %22563 = vmatprep.subr.bf16.mxu0 %v22562_v23 }
 0xb13   : > { %20750 = vmatmul.mubr.f32.gmra.mrb[68].mxu0 %v28371_v63 }
 0xb14   : > { %20752 = vmatprep.mubr.f32.mxu0 %v28380_v20  ;;  %22565 = vmatpush3.bf16.msra.mxu0 %v22562_v23  ;;  %v22574_v23 = vpack.c.bf16 %v15354_v32, %v15353_v0  ;;  %v28407_v0 = vld [vmem:[#allocation3 + $0x82] sm:$0xff] }
 0xb15   : > { %22567 = vmatprep.subr.bf16.mxu0 %v22566_v52  ;;  %29411 = vst [vmem:[#allocation15_spill] sm:$0xff] %v28407_v0  ;;  %v15357_v32 = vld [vmem:[%s29016_s1 + $0x13f0] sm:$0xff] }
 0xb17   : > { %20753 = vmatmul.mubr.f32.gmra.mrb[70].mxu0 %v28383_v58 }
 0xb18   : > { %20755 = vmatprep.mubr.f32.mxu0 %v28392_v47  ;;  %22569 = vmatpush3.bf16.msra.mxu0 %v22566_v52  ;;  %v22578_v52 = vpack.c.bf16 %v15356_v38, %v15355_v49  ;;  %v15358_v47 = vld [vmem:[%s29016_s1 + $0x13f8] sm:$0xff]  ;;  %v28419_v49 = vld [vmem:[#allocation3 + $0x9a] sm:$0xff]  ;;  %v15359_v38 = vld [vmem:[%s29016_s1 + $0x1400] sm:$0xff] }
 0xb19   : > { %22571 = vmatprep.subr.bf16.mxu0 %v22570_v27  ;;  %29413 = vst [vmem:[#allocation17_spill] sm:$0xff] %v28419_v49 }
 0xb1b   : > { %20756 = vmatmul.mubr.f32.gmra.mrb[72].mxu0 %v28395_v62  ;;  %v28416_v62 = vld [vmem:[#allocation3 + $0x92] sm:$0xff] }
 0xb1c   : > { %20758 = vmatprep.mubr.f32.mxu0 %v28404_v57  ;;  %22573 = vmatpush3.bf16.msra.mxu0 %v22570_v27  ;;  %29412 = vst [vmem:[#allocation16_spill] sm:$0xff] %v28416_v62  ;;  %v22582_v27 = vpack.c.bf16 %v15358_v47, %v15357_v32  ;;  %v15360_v57 = vld [vmem:[%s29016_s1 + $0x1408] sm:$0xff]  ;;  %v28434_v32 = vld [vmem:[#allocation3 + $0xc2] sm:$0xff] }
 0xb1d   : > { %22575 = vmatprep.subr.bf16.mxu0 %v22574_v23  ;;  %v28431_v47 = vld [vmem:[#allocation3 + $0xb2] sm:$0xff]  ;;  %29414 = vst [vmem:[#allocation18_spill] sm:$0xff] %v28434_v32 }
 0xb1f   : > { %20759 = vmatmul.mubr.f32.gmra.mrb[74].mxu0 %v28407_v0  ;;  %v28428_v0 = vld [vmem:[#allocation3 + $0xaa] sm:$0xff] }
 0xb20   : > { %20761 = vmatprep.mubr.f32.mxu0 %v28416_v62  ;;  %22577 = vmatpush3.bf16.msra.mxu0 %v22574_v23  ;;  %v22586_v23 = vpack.c.bf16 %v15360_v57, %v15359_v38  ;;  %v28437_v62 = vld [vmem:[#allocation3 + $0xca] sm:$0xff]  ;;  %v28446_v57 = vld [vmem:[#allocation3 + $0xf2] sm:$0xff]  ;;  %v28449_v38 = vld [vmem:[#allocation3 + $0xfa] sm:$0xff] }
 0xb21   : > { %22579 = vmatprep.subr.bf16.mxu0 %v22578_v52  ;;  %29415 = vst [vmem:[#allocation19_spill] sm:$0xff] %v28437_v62  ;;  %29418 = vst [vmem:[#allocation22_spill] sm:$0xff] %v28446_v57 }
 0xb22   : > { %29419 = vst [vmem:[#allocation23_spill] sm:$0xff] %v28449_v38 }
 0xb23   : > { %20762 = vmatmul.mubr.f32.gmra.mrb[76].mxu0 %v28419_v49  ;;  %v28440_v49 = vld [vmem:[#allocation3 + $0xda] sm:$0xff] }
 0xb24   : > { %20764 = vmatprep.mubr.f32.mxu0 %v28428_v0  ;;  %22581 = vmatpush3.bf16.msra.mxu0 %v22578_v52  ;;  %29416 = vst [vmem:[#allocation20_spill] sm:$0xff] %v28440_v49  ;;  %v28443_v52 = vld [vmem:[#allocation3 + $0xe2] sm:$0xff] }
 0xb25   : > { %22583 = vmatprep.subr.bf16.mxu0 %v22582_v27  ;;  %29417 = vst [vmem:[#allocation21_spill] sm:$0xff] %v28443_v52 }
 0xb27   : > { %20765 = vmatmul.mubr.f32.gmra.mrb[78].mxu0 %v28431_v47 }
 0xb28   : > { %20767 = vmatprep.mubr.f32.mxu0 %v28434_v32  ;;  %22585 = vmatpush3.bf16.msra.mxu0 %v22582_v27  ;;  %v28452_v27 = vld [vmem:[#allocation3 + $0x10a] sm:$0xff] }
 0xb29   : > { %22587 = vmatprep.subr.bf16.mxu0 %v22586_v23  ;;  %29420 = vst [vmem:[#allocation24_spill] sm:$0xff] %v28452_v27 }
 0xb2b   : > { %20768 = vmatmul.mubr.f32.gmra.mrb[80].mxu0 %v28437_v62  ;;  %v28455_v62 = vld [vmem:[#allocation3 + $0x112] sm:$0xff] }
 0xb2c   : > { %20770 = vmatprep.mubr.f32.mxu0 %v28440_v49  ;;  %29421 = vst [vmem:[#allocation25_spill] sm:$0xff] %v28455_v62  ;;  %v28458_v49 = vld [vmem:[#allocation3 + $0x122] sm:$0xff] }
 0xb2d   : > { %29422 = vst [vmem:[#allocation6_spill] sm:$0xff] %v28458_v49 }
 0xb2f   : > { %20771 = vmatmul.mubr.f32.gmra.mrb[82].mxu0 %v28443_v52  ;;  %v28461_v52 = vld [vmem:[#allocation3 + $0x12a] sm:$0xff] }
 0xb30   : > { %20773 = vmatprep.mubr.f32.mxu0 %v28446_v57  ;;  %29423 = vst [vmem:[#allocation12_spill] sm:$0xff] %v28461_v52  ;;  %v28464_v57 = vld [vmem:[#allocation3 + $0x13a] sm:$0xff] }
 0xb31   : > { %29424 = vst [vmem:[#allocation26_spill] sm:$0xff] %v28464_v57 }
 0xb33   : > { %20774 = vmatmul.mubr.f32.gmra.mrb[84].mxu0 %v28449_v38  ;;  %v28467_v38 = vld [vmem:[#allocation3 + $0x142] sm:$0xff] }
 0xb34   : > { %20776 = vmatprep.mubr.f32.mxu0 %v28452_v27  ;;  %29425 = vst [vmem:[#allocation27_spill] sm:$0xff] %v28467_v38  ;;  %v28470_v27 = vld [vmem:[#allocation3 + $0x152] sm:$0xff] }
 0xb35   : > { %29426 = vst [vmem:[#allocation28_spill] sm:$0xff] %v28470_v27 }
 0xb37   : > { %20777 = vmatmul.mubr.f32.gmra.mrb[86].mxu0 %v28455_v62  ;;  %v28473_v62 = vld [vmem:[#allocation3 + $0x15a] sm:$0xff] }
 0xb38   : > { %20779 = vmatprep.mubr.f32.mxu0 %v28458_v49  ;;  %29427 = vst [vmem:[#allocation29_spill] sm:$0xff] %v28473_v62  ;;  %v28476_v49 = vld [vmem:[#allocation3 + $0x16a] sm:$0xff] }
 0xb39   : > { %29428 = vst [vmem:[#allocation30_spill] sm:$0xff] %v28476_v49 }
 0xb3b   : > { %20780 = vmatmul.mubr.f32.gmra.mrb[88].mxu0 %v28461_v52  ;;  %v28479_v52 = vld [vmem:[#allocation3 + $0x172] sm:$0xff] }
 0xb3c   : > { %20782 = vmatprep.mubr.f32.mxu0 %v28464_v57  ;;  %v15361_v57 = vld [vmem:[%s29016_s1 + $0x1410] sm:$0xff] }
 0xb3f   : > { %20783 = vmatmul.mubr.f32.gmra.mrb[90].mxu0 %v28467_v38  ;;  %v15362_v38 = vld [vmem:[%s29016_s1 + $0x1418] sm:$0xff] }
 0xb40   : > { %20785 = vmatprep.mubr.f32.mxu0 %v28470_v27  ;;  %v22590_v27 = vpack.c.bf16 %v15362_v38, %v15361_v57  ;;  %v15366_v57 = vld [vmem:[%s29016_s1 + $0x1438] sm:$0xff]  ;;  %v15369_v38 = vld [vmem:[%s29016_s1 + $0x1450] sm:$0xff] }
 0xb43   : > { %20786 = vmatmul.mubr.f32.gmra.mrb[92].mxu0 %v28473_v62  ;;  %v15363_v62 = vld [vmem:[%s29016_s1 + $0x1420] sm:$0xff] }
 0xb44   : > { %20788 = vmatprep.mubr.f32.mxu0 %v28476_v49  ;;  %v15364_v49 = vld [vmem:[%s29016_s1 + $0x1428] sm:$0xff] }
 0xb45   : > { %v22594_v32 = vpack.c.bf16 %v15364_v49, %v15363_v62  ;;  %v15368_v62 = vld [vmem:[%s29016_s1 + $0x1448] sm:$0xff] }
 0xb47   : > { %20789 = vmatmul.mubr.f32.gmra.mrb[94].mxu0 %v28479_v52 }
 0xb48   : > { %20823 = vmatprep.mubr.f32.mxu0 %v28217_v45  ;;  %v15365_v45 = vld [vmem:[%s29016_s1 + $0x1430] sm:$0xff] }
 0xb4b   : > { %20824 = vmatmul.mubr.f32.vlgmr.msra.gmra.mrb[64].mxu0 %v28221_v55  ;;  %v22598_v55 = vpack.c.bf16 %v15366_v57, %v15365_v45  ;;  %v15372_v57 = vld [vmem:[%s29016_s1 + $0x1468] sm:$0xff] }
 0xb4c   : > { %20826 = vmatprep.mubr.f32.mxu0 %v28230_v60  ;;  %22589 = vmatpush3.bf16.msra.mxu0 %v22586_v23  ;;  %v15367_v23 = vld [vmem:[%s29016_s1 + $0x1440] sm:$0xff] }
 0xb4d   : > { %22591 = vmatprep.subr.bf16.mxu0 %v22590_v27  ;;  %v22602_v49 = vpack.c.bf16 %v15368_v62, %v15367_v23  ;;  %v15374_v62 = vld [vmem:[%s29016_s1 + $0x1478] sm:$0xff] }
 0xb4f   : > { %20827 = vmatmul.mubr.f32.gmra.mrb[66].mxu0 %v28233_v56 }
 0xb50   : > { %20829 = vmatprep.mubr.f32.mxu0 %v28242_v42  ;;  %22593 = vmatpush3.bf16.msra.mxu0 %v22590_v27  ;;  %v15370_v27 = vld [vmem:[%s29016_s1 + $0x1458] sm:$0xff] }
 0xb51   : > { %22595 = vmatprep.subr.bf16.mxu0 %v22594_v32  ;;  %v22606_v45 = vpack.c.bf16 %v15370_v27, %v15369_v38  ;;  %v15376_v27 = vld [vmem:[%s29016_s1 + $0x1488] sm:$0xff] }
 0xb53   : > { %20830 = vmatmul.mubr.f32.gmra.mrb[68].mxu0 %v28245_v59 }
 0xb54   : > { %20832 = vmatprep.mubr.f32.mxu0 %v28254_v5  ;;  %22597 = vmatpush3.bf16.msra.mxu0 %v22594_v32  ;;  %v15371_v32 = vld [vmem:[%s29016_s1 + $0x1460] sm:$0xff] }
 0xb55   : > { %22599 = vmatprep.subr.bf16.mxu0 %v22598_v55  ;;  %v22610_v23 = vpack.c.bf16 %v15372_v57, %v15371_v32  ;;  %v28563_v57 = vld [vmem:[#allocation3 + $0x188] sm:$0xff] }
 0xb56   : > { %29430 = vst [vmem:[#allocation8_spill] sm:$0xff] %v28563_v57 }
 0xb57   : > { %20833 = vmatmul.mubr.f32.gmra.mrb[70].mxu0 %v28257_v35 }
 0xb58   : > { %20835 = vmatprep.mubr.f32.mxu0 %v28266_v21  ;;  %22601 = vmatpush3.bf16.msra.mxu0 %v22598_v55  ;;  %v15373_v55 = vld [vmem:[%s29016_s1 + $0x1470] sm:$0xff] }
 0xb59   : > { %22603 = vmatprep.subr.bf16.mxu0 %v22602_v49  ;;  %v22614_v38 = vpack.c.bf16 %v15374_v62, %v15373_v55  ;;  %v15378_v55 = vld [vmem:[%s29016_s1 + $0x1498] sm:$0xff]  ;;  %v12681_v62 = vld [vmem:[#allocation3 + $0x19] sm:$0xff] }
 0xb5b   : > { %20836 = vmatmul.mubr.f32.gmra.mrb[72].mxu0 %v28269_v41 }
 0xb5c   : > { %20838 = vmatprep.mubr.f32.mxu0 %v28278_v37  ;;  %22605 = vmatpush3.bf16.msra.mxu0 %v22602_v49  ;;  %v15375_v49 = vld [vmem:[%s29016_s1 + $0x1480] sm:$0xff] }
 0xb5d   : > { %22607 = vmatprep.subr.bf16.mxu0 %v22606_v45  ;;  %v22618_v32 = vpack.c.bf16 %v15376_v27, %v15375_v49  ;;  %v12682_v49 = vld [vmem:[#allocation3 + $0x21] sm:$0xff]  ;;  %v15379_v27 = vld [vmem:[%s29016_s1 + $0x14a0] sm:$0xff] }
 0xb5f   : > { %20839 = vmatmul.mubr.f32.gmra.mrb[74].mxu0 %v28281_v34 }
 0xb60   : > { %20841 = vmatprep.mubr.f32.mxu0 %v28290_v28  ;;  %22609 = vmatpush3.bf16.msra.mxu0 %v22606_v45  ;;  %v28560_v45 = vld [vmem:[#allocation3 + $0x180] sm:$0xff] }
 0xb61   : > { %22611 = vmatprep.subr.bf16.mxu0 %v22610_v23  ;;  %29429 = vst [vmem:[#allocation7_spill] sm:$0xff] %v28560_v45 }
 0xb63   : > { %20842 = vmatmul.mubr.f32.gmra.mrb[76].mxu0 %v28293_v10 }
 0xb64   : > { %20844 = vmatprep.mubr.f32.mxu0 %v28296_v50  ;;  %22613 = vmatpush3.bf16.msra.mxu0 %v22610_v23  ;;  %v15377_v23 = vld [vmem:[%s29016_s1 + $0x1490] sm:$0xff] }
 0xb65   : > { %22615 = vmatprep.subr.bf16.mxu0 %v22614_v38 }
 0xb67   : > { %20845 = vmatmul.mubr.f32.gmra.mrb[78].mxu0 %v28299_v3 }
 0xb68   : > { %20847 = vmatprep.mubr.f32.mxu0 %v28302_v6  ;;  %22617 = vmatpush3.bf16.msra.mxu0 %v22614_v38  ;;  %v22622_v38 = vpack.c.bf16 %v15378_v55, %v15377_v23  ;;  %v15381_v23 = vld [vmem:[%s29016_s1 + $0x14b0] sm:$0xff]  ;;  %v15382_v55 = vld [vmem:[%s29016_s1 + $0x14b8] sm:$0xff] }
 0xb69   : > { %22619 = vmatprep.subr.bf16.mxu0 %v22618_v32 }
 0xb6b   : > { %20848 = vmatmul.mubr.f32.gmra.mrb[80].mxu0 %v28305_v1 }
 0xb6c   : > { %20850 = vmatprep.mubr.f32.mxu0 %v28308_v15 }
 0xb6f   : > { %20851 = vmatmul.mubr.f32.gmra.mrb[82].mxu0 %v28311_v24 }
 0xb70   : > { %20853 = vmatprep.mubr.f32.mxu0 %v28314_v31 }
 0xb73   : > { %20854 = vmatmul.mubr.f32.gmra.mrb[84].mxu0 %v28317_v36 }
 0xb74   : > { %20856 = vmatprep.mubr.f32.mxu0 %v28320_v22 }
 0xb77   : > { %20857 = vmatmul.mubr.f32.gmra.mrb[86].mxu0 %v28323_v16 }
 0xb78   : > { %20859 = vmatprep.mubr.f32.mxu0 %v28326_v33 }
 0xb7b   : > { %20860 = vmatmul.mubr.f32.gmra.mrb[88].mxu0 %v28329_v14 }
 0xb7c   : > { %20862 = vmatprep.mubr.f32.mxu0 %v28332_v13 }
 0xb7f   : > { %20863 = vmatmul.mubr.f32.gmra.mrb[90].mxu0 %v28335_v26 }
 0xb80   : > { %20865 = vmatprep.mubr.f32.mxu0 %v28338_v7  ;;  %v28581_v7 = vld [vmem:[#allocation3 + $0x39] sm:$0xff] }
 0xb81   : > { %29431 = vst [vmem:[#allocation9_spill] sm:$0xff] %v28581_v7 }
 0xb83   : > { %20866 = vmatmul.mubr.f32.gmra.mrb[92].mxu0 %v28341_v51  ;;  %v28578_v51 = vld [vmem:[#allocation3 + $0x31] sm:$0xff] }
 0xb84   : > { %20868 = vmatprep.mubr.f32.mxu0 %v28560_v45  ;;  %v15380_v45 = vld [vmem:[%s29016_s1 + $0x14a8] sm:$0xff] }
 0xb87   : > { %20869 = vmatmul.mubr.f32.gmra.mrb[94].mxu0 %v28563_v57  ;;  %v22626_v57 = vpack.c.bf16 %v15380_v45, %v15379_v27  ;;  %v28593_v45 = vld [vmem:[#allocation3 + $0x51] sm:$0xff] }
 0xb88   : > { %20903 = vmatprep.mubr.f32.mxu0 %v12681_v62  ;;  %v28590_v62 = vld [vmem:[#allocation3 + $0x49] sm:$0xff]  ;;  %29433 = vst [vmem:[#allocation31_spill] sm:$0xff] %v28593_v45  ;;  %v15384_v27 = vld [vmem:[%s29016_s1 + $0x14c8] sm:$0xff] }
 0xb89   : > { %29432 = vst [vmem:[#allocation10_spill] sm:$0xff] %v28590_v62 }
 0xb8b   : > { %20904 = vmatmul.mubr.f32.vlgmr.msra.gmra.mrb[64].mxu0 %v12682_v49  ;;  %v15383_v49 = vld [vmem:[%s29016_s1 + $0x14c0] sm:$0xff] }
 0xb8c   : > { %20906 = vmatprep.mubr.f32.mxu0 %v28578_v51  ;;  %22621 = vmatpush3.bf16.msra.mxu0 %v22618_v32  ;;  %v22630_v32 = vpack.c.bf16 %v15382_v55, %v15381_v23  ;;  %v28605_v23 = vld [vmem:[#allocation3 + $0x69] sm:$0xff]  ;;  %v15385_v55 = vld [vmem:[%s29016_s1 + $0x14d0] sm:$0xff] }
 0xb8d   : > { %22623 = vmatprep.subr.bf16.mxu0 %v22622_v38  ;;  %29435 = vst [vmem:[#allocation33_spill] sm:$0xff] %v28605_v23 }
 0xb8f   : > { %20907 = vmatmul.mubr.f32.gmra.mrb[66].mxu0 %v28581_v7  ;;  %v28602_v7 = vld [vmem:[#allocation3 + $0x61] sm:$0xff] }
 0xb90   : > { %20909 = vmatprep.mubr.f32.mxu0 %v28590_v62  ;;  %22625 = vmatpush3.bf16.msra.mxu0 %v22622_v38  ;;  %29434 = vst [vmem:[#allocation32_spill] sm:$0xff] %v28602_v7  ;;  %v22634_v38 = vpack.c.bf16 %v15384_v27, %v15383_v49  ;;  %v15386_v62 = vld [vmem:[%s29016_s1 + $0x14d8] sm:$0xff]  ;;  %v15387_v27 = vld [vmem:[%s29016_s1 + $0x14e0] sm:$0xff] }
 0xb91   : > { %22627 = vmatprep.subr.bf16.mxu0 %v22626_v57  ;;  %v28617_v49 = vld [vmem:[#allocation3 + $0x81] sm:$0xff] }
 0xb92   : > { %29437 = vst [vmem:[#allocation35_spill] sm:$0xff] %v28617_v49 }
 0xb93   : > { %20910 = vmatmul.mubr.f32.gmra.mrb[68].mxu0 %v28593_v45  ;;  %v28614_v45 = vld [vmem:[#allocation3 + $0x79] sm:$0xff] }
 0xb94   : > { %20912 = vmatprep.mubr.f32.mxu0 %v28602_v7  ;;  %22629 = vmatpush3.bf16.msra.mxu0 %v22626_v57  ;;  %29436 = vst [vmem:[#allocation34_spill] sm:$0xff] %v28614_v45  ;;  %v22638_v57 = vpack.c.bf16 %v15386_v62, %v15385_v55  ;;  %v15388_v7 = vld [vmem:[%s29016_s1 + $0x14e8] sm:$0xff]  ;;  %v15389_v55 = vld [vmem:[%s29016_s1 + $0x14f0] sm:$0xff] }
 0xb95   : > { %22631 = vmatprep.subr.bf16.mxu0 %v22630_v32  ;;  %v28629_v62 = vld [vmem:[#allocation3 + $0x99] sm:$0xff] }
 0xb97   : > { %20913 = vmatmul.mubr.f32.gmra.mrb[70].mxu0 %v28605_v23  ;;  %v28626_v23 = vld [vmem:[#allocation3 + $0x91] sm:$0xff] }
 0xb98   : > { %20915 = vmatprep.mubr.f32.mxu0 %v28614_v45  ;;  %22633 = vmatpush3.bf16.msra.mxu0 %v22630_v32  ;;  %29438 = vst [vmem:[#allocation36_spill] sm:$0xff] %v28626_v23  ;;  %v22642_v32 = vpack.c.bf16 %v15388_v7, %v15387_v27  ;;  %v15390_v45 = vld [vmem:[%s29016_s1 + $0x14f8] sm:$0xff]  ;;  %v28641_v7 = vld [vmem:[#allocation3 + $0xb1] sm:$0xff] }
 0xb99   : > { %22635 = vmatprep.subr.bf16.mxu0 %v22634_v38  ;;  %v15391_v27 = vld [vmem:[%s29016_s1 + $0x1500] sm:$0xff] }
 0xb9b   : > { %20916 = vmatmul.mubr.f32.gmra.mrb[72].mxu0 %v28617_v49  ;;  %v28638_v49 = vld [vmem:[#allocation3 + $0xa9] sm:$0xff] }
 0xb9c   : > { %20918 = vmatprep.mubr.f32.mxu0 %v28626_v23  ;;  %22637 = vmatpush3.bf16.msra.mxu0 %v22634_v38  ;;  %29439 = vst [vmem:[#allocation37_spill] sm:$0xff] %v28638_v49  ;;  %v22646_v38 = vpack.c.bf16 %v15390_v45, %v15389_v55  ;;  %v15392_v23 = vld [vmem:[%s29016_s1 + $0x1508] sm:$0xff]  ;;  %v15406_v45 = vld [vmem:[%s29016_s1 + $0x1578] sm:$0xff]  ;;  %v29446_v55 = vld [vmem:[#allocation18_spill] sm:$0xff] }
 0xb9d   : > { %22639 = vmatprep.subr.bf16.mxu0 %v22638_v57 }
 0xb9f   : > { %20919 = vmatmul.mubr.f32.gmra.mrb[74].mxu0 %v28629_v62 }
 0xba0   : > { %20921 = vmatprep.mubr.f32.mxu0 %v28638_v49  ;;  %22641 = vmatpush3.bf16.msra.mxu0 %v22638_v57  ;;  %v22650_v49 = vpack.c.bf16 %v15392_v23, %v15391_v27  ;;  %v29445_v23 = vld [vmem:[#allocation17_spill] sm:$0xff]  ;;  %v29447_v27 = vld [vmem:[#allocation19_spill] sm:$0xff] }
 0xba1   : > { %22643 = vmatprep.subr.bf16.mxu0 %v22642_v32 }
 0xba3   : > { %20922 = vmatmul.mubr.f32.gmra.mrb[76].mxu0 %v28641_v7 }
 0xba4   : > { %20924 = vmatprep.mubr.f32.mxu0 %v28084_v61  ;;  %22645 = vmatpush3.bf16.msra.mxu0 %v22642_v32  ;;  %v15394_v61 = vld [vmem:[%s29016_s1 + $0x1518] sm:$0xff]  ;;  %v15408_v32 = vld [vmem:[%s29016_s1 + $0x1588] sm:$0xff] }
 0xba5   : > { %22647 = vmatprep.subr.bf16.mxu0 %v22646_v38 }
 0xba7   : > { %20925 = vmatmul.mubr.f32.gmra.mrb[78].mxu0 %v28082_v48  ;;  %v15393_v48 = vld [vmem:[%s29016_s1 + $0x1510] sm:$0xff] }
 0xba8   : > { %20927 = vmatprep.mubr.f32.mxu0 %v28098_v4  ;;  %22649 = vmatpush3.bf16.msra.mxu0 %v22646_v38  ;;  %v15395_v4 = vld [vmem:[%s29016_s1 + $0x1520] sm:$0xff] }
 0xba9   : > { %22651 = vmatprep.subr.bf16.mxu0 %v22650_v49 }
 0xbab   : > { %20928 = vmatmul.mubr.f32.gmra.mrb[80].mxu0 %v28095_v30  ;;  %v22654_v30 = vpack.c.bf16 %v15394_v61, %v15393_v48  ;;  %v29449_v48 = vld [vmem:[#allocation21_spill] sm:$0xff]  ;;  %v29450_v61 = vld [vmem:[#allocation22_spill] sm:$0xff] }
 0xbac   : > { %20930 = vmatprep.mubr.f32.mxu0 %v28112_v18 }
 0xbaf   : > { %20931 = vmatmul.mubr.f32.gmra.mrb[82].mxu0 %v28109_v54  ;;  %v15396_v54 = vld [vmem:[%s29016_s1 + $0x1528] sm:$0xff] }
 0xbb0   : > { %20933 = vmatprep.mubr.f32.mxu0 %v28126_v8  ;;  %v22658_v18 = vpack.c.bf16 %v15396_v54, %v15395_v4  ;;  %v15398_v8 = vld [vmem:[%s29016_s1 + $0x1538] sm:$0xff]  ;;  %v29452_v4 = vld [vmem:[#allocation24_spill] sm:$0xff]  ;;  %v29454_v54 = vld [vmem:[#allocation6_spill] sm:$0xff] }
 0xbb3   : > { %20934 = vmatmul.mubr.f32.gmra.mrb[84].mxu0 %v28123_v46  ;;  %v15397_v46 = vld [vmem:[%s29016_s1 + $0x1530] sm:$0xff] }
 0xbb4   : > { %20936 = vmatprep.mubr.f32.mxu0 %v28140_v17  ;;  %v15399_v17 = vld [vmem:[%s29016_s1 + $0x1540] sm:$0xff] }
 0xbb7   : > { %20937 = vmatmul.mubr.f32.gmra.mrb[86].mxu0 %v28137_v12  ;;  %v22662_v12 = vpack.c.bf16 %v15398_v8, %v15397_v46  ;;  %v29456_v46 = vld [vmem:[#allocation26_spill] sm:$0xff]  ;;  %v29457_v8 = vld [vmem:[#allocation27_spill] sm:$0xff] }
 0xbb8   : > { %20939 = vmatprep.mubr.f32.mxu0 %v28154_v53  ;;  %v29440_v53 = vld [vmem:[#allocation11_spill] sm:$0xff] }
 0xbbb   : > { %20940 = vmatmul.mubr.f32.gmra.mrb[88].mxu0 %v28151_v40  ;;  %v15400_v40 = vld [vmem:[%s29016_s1 + $0x1548] sm:$0xff] }
 0xbbc   : > { %20942 = vmatprep.mubr.f32.mxu0 %v28168_v2  ;;  %v15401_v2 = vld [vmem:[%s29016_s1 + $0x1550] sm:$0xff] }
 0xbbf   : > { %20943 = vmatmul.mubr.f32.gmra.mrb[90].mxu0 %v28165_v11  ;;  %v22666_v11 = vpack.c.bf16 %v15400_v40, %v15399_v17  ;;  %v29459_v17 = vld [vmem:[#allocation29_spill] sm:$0xff]  ;;  %v29460_v40 = vld [vmem:[#allocation30_spill] sm:$0xff] }
 0xbc0   : > { %20945 = vmatprep.mubr.f32.mxu0 %v28182_v9  ;;  %v29441_v9 = vld [vmem:[#allocation13_spill] sm:$0xff] }
 0xbc3   : > { %20946 = vmatmul.mubr.f32.gmra.mrb[92].mxu0 %v28179_v43  ;;  %v15402_v43 = vld [vmem:[%s29016_s1 + $0x1558] sm:$0xff] }
 0xbc4   : > { %20948 = vmatprep.mubr.f32.mxu0 %v28202_v29  ;;  %v22670_v29 = vpack.c.bf16 %v15402_v43, %v15401_v2  ;;  %v15409_v2 = vld [vmem:[%s29016_s1 + $0x1590] sm:$0xff]  ;;  %v15410_v43 = vld [vmem:[%s29016_s1 + $0x1598] sm:$0xff] }
 0xbc7   : > { %20949 = vmatmul.mubr.f32.gmra.mrb[94].mxu0 %v28199_v39  ;;  %v29442_v39 = vld [vmem:[#allocation14_spill] sm:$0xff] }
 0xbc8   : > { %20983 = vmatprep.mubr.f32.mxu0 %v28356_v25  ;;  %v15403_v25 = vld [vmem:[%s29016_s1 + $0x1560] sm:$0xff] }
 0xbcb   : > { %20984 = vmatmul.mubr.f32.vlgmr.msra.gmra.mrb[64].mxu0 %v28359_v44  ;;  %v15404_v44 = vld [vmem:[%s29016_s1 + $0x1568] sm:$0xff] }
 0xbcc   : > { %20986 = vmatprep.mubr.f32.mxu0 %v28368_v19  ;;  %22653 = vmatpush3.bf16.msra.mxu0 %v22650_v49  ;;  %v29443_v19 = vld [vmem:[#allocation15_spill] sm:$0xff]  ;;  %v15407_v49 = vld [vmem:[%s29016_s1 + $0x1580] sm:$0xff] }
 0xbcd   : > { %22655 = vmatprep.subr.bf16.mxu0 %v22654_v30  ;;  %v22682_v38 = vpack.c.bf16 %v15408_v32, %v15407_v49  ;;  %v15431_v32 = vld [vmem:[%s29016_s1 + $0x1640] sm:$0xff] }
 0xbcf   : > { %20987 = vmatmul.mubr.f32.gmra.mrb[66].mxu0 %v28371_v63  ;;  %v29444_v63 = vld [vmem:[#allocation16_spill] sm:$0xff] }
 0xbd0   : > { %20989 = vmatprep.mubr.f32.mxu0 %v28380_v20  ;;  %22657 = vmatpush3.bf16.msra.mxu0 %v22654_v30  ;;  %v22674_v20 = vpack.c.bf16 %v15404_v44, %v15403_v25  ;;  %v29451_v30 = vld [vmem:[#allocation23_spill] sm:$0xff]  ;;  %v15416_v44 = vld [vmem:[%s29016_s1 + $0x15c8] sm:$0xff] }
 0xbd1   : > { %22659 = vmatprep.subr.bf16.mxu0 %v22658_v18  ;;  %v15414_v25 = vld [vmem:[%s29016_s1 + $0x15b8] sm:$0xff] }
 0xbd3   : > { %20990 = vmatmul.mubr.f32.gmra.mrb[68].mxu0 %v28383_v58  ;;  %v15405_v58 = vld [vmem:[%s29016_s1 + $0x1570] sm:$0xff] }
 0xbd4   : > { %20992 = vmatprep.mubr.f32.mxu0 %v29440_v53  ;;  %22661 = vmatpush3.bf16.msra.mxu0 %v22658_v18  ;;  %v22678_v57 = vpack.c.bf16 %v15406_v45, %v15405_v58  ;;  %v29455_v18 = vld [vmem:[#allocation12_spill] sm:$0xff]  ;;  %v28746_v53 = vld [vmem:[#allocation3 + $0x182] sm:$0xff]  ;;  %v15424_v58 = vld [vmem:[%s29016_s1 + $0x1608] sm:$0xff] }
 0xbd5   : > { %22663 = vmatprep.subr.bf16.mxu0 %v22662_v12  ;;  %v15430_v45 = vld [vmem:[%s29016_s1 + $0x1638] sm:$0xff] }
 0xbd7   : > { %20993 = vmatmul.mubr.f32.gmra.mrb[70].mxu0 %v29441_v9  ;;  %v22686_v9 = vpack.c.bf16 %v15410_v43, %v15409_v2  ;;  %v13612_v2 = vld [vmem:[#allocation3 + $0xc9] sm:$0xff]  ;;  %v13613_v43 = vld [vmem:[#allocation3 + $0xd9] sm:$0xff] }
 0xbd8   : > { %20995 = vmatprep.mubr.f32.mxu0 %v29442_v39  ;;  %22665 = vmatpush3.bf16.msra.mxu0 %v22662_v12  ;;  %v29458_v12 = vld [vmem:[#allocation28_spill] sm:$0xff]  ;;  %v15412_v39 = vld [vmem:[%s29016_s1 + $0x15a8] sm:$0xff] }
 0xbd9   : > { %22667 = vmatprep.subr.bf16.mxu0 %v22666_v11 }
 0xbdb   : > { %20996 = vmatmul.mubr.f32.gmra.mrb[72].mxu0 %v29443_v19  ;;  %v15418_v19 = vld [vmem:[%s29016_s1 + $0x15d8] sm:$0xff] }
 0xbdc   : > { %20998 = vmatprep.mubr.f32.mxu0 %v29444_v63  ;;  %22669 = vmatpush3.bf16.msra.mxu0 %v22666_v11  ;;  %v28749_v11 = vld [vmem:[#allocation3 + $0x18a] sm:$0xff]  ;;  %v15420_v63 = vld [vmem:[%s29016_s1 + $0x15e8] sm:$0xff] }
 0xbdd   : > { %22671 = vmatprep.subr.bf16.mxu0 %v22670_v29 }
 0xbdf   : > { %20999 = vmatmul.mubr.f32.gmra.mrb[74].mxu0 %v29445_v23  ;;  %v29467_v23 = vld [vmem:[#allocation31_spill] sm:$0xff] }
 0xbe0   : > { %21001 = vmatprep.mubr.f32.mxu0 %v28428_v0  ;;  %22673 = vmatpush3.bf16.msra.mxu0 %v22670_v29  ;;  %v29448_v0 = vld [vmem:[#allocation20_spill] sm:$0xff] }
 0xbe1   : > { %22675 = vmatprep.subr.bf16.mxu0 %v22674_v20 }
 0xbe3   : > { %21002 = vmatmul.mubr.f32.gmra.mrb[76].mxu0 %v28431_v47  ;;  %v29453_v47 = vld [vmem:[#allocation25_spill] sm:$0xff] }
 0xbe4   : > { %21004 = vmatprep.mubr.f32.mxu0 %v29446_v55  ;;  %22677 = vmatpush3.bf16.msra.mxu0 %v22674_v20  ;;  %v15422_v20 = vld [vmem:[%s29016_s1 + $0x15f8] sm:$0xff]  ;;  %v15432_v55 = vld [vmem:[%s29016_s1 + $0x1648] sm:$0xff] }
 0xbe5   : > { %22679 = vmatprep.subr.bf16.mxu0 %v22678_v57 }
 0xbe7   : > { %21005 = vmatmul.mubr.f32.gmra.mrb[78].mxu0 %v29447_v27  ;;  %v29470_v27 = vld [vmem:[#allocation34_spill] sm:$0xff] }
 0xbe8   : > { %21007 = vmatprep.mubr.f32.mxu0 %v29448_v0  ;;  %22681 = vmatpush3.bf16.msra.mxu0 %v22678_v57  ;;  %v29468_v57 = vld [vmem:[#allocation32_spill] sm:$0xff]  ;;  %v22730_v0 = vpack.c.bf16 %v15432_v55, %v15431_v32  ;;  %v13930_v55 = vld [vmem:[#allocation3 + $0x15a] sm:$0xff] }
 0xbe9   : > { %22683 = vmatprep.subr.bf16.mxu0 %v22682_v38  ;;  %v13929_v32 = vld [vmem:[#allocation3 + $0x152] sm:$0xff] }
 0xbeb   : > { %21008 = vmatmul.mubr.f32.gmra.mrb[80].mxu0 %v29449_v48  ;;  %v15433_v48 = vld [vmem:[%s29016_s1 + $0x1650] sm:$0xff] }
 0xbec   : > { %21010 = vmatprep.mubr.f32.mxu0 %v29450_v61  ;;  %v15434_v61 = vld [vmem:[%s29016_s1 + $0x1658] sm:$0xff] }
 0xbef   : > { %21011 = vmatmul.mubr.f32.gmra.mrb[82].mxu0 %v29451_v30  ;;  %v29471_v30 = vld [vmem:[#allocation35_spill] sm:$0xff] }
 0xbf0   : > { %21013 = vmatprep.mubr.f32.mxu0 %v29452_v4  ;;  %v29472_v4 = vld [vmem:[#allocation36_spill] sm:$0xff] }
 0xbf3   : > { %21014 = vmatmul.mubr.f32.gmra.mrb[84].mxu0 %v29453_v47  ;;  %v22734_v47 = vpack.c.bf16 %v15434_v61, %v15433_v48  ;;  %v13936_v48 = vld [vmem:[#allocation3 + $0x1a2] sm:$0xff]  ;;  %v14282_v61 = vlaneseq }
 0xbf4   : > { %21016 = vmatprep.mubr.f32.mxu0 %v29454_v54  ;;  %v15435_v54 = vld [vmem:[%s29016_s1 + $0x1660] sm:$0xff] }
 0xbf7   : > { %21017 = vmatmul.mubr.f32.gmra.mrb[86].mxu0 %v29455_v18  ;;  %v15436_v18 = vld [vmem:[%s29016_s1 + $0x1668] sm:$0xff] }
 0xbf8   : > { %21019 = vmatprep.mubr.f32.mxu0 %v29456_v46  ;;  %v29473_v46 = vld [vmem:[#allocation37_spill] sm:$0xff] }
 0xbfb   : > { %21020 = vmatmul.mubr.f32.gmra.mrb[88].mxu0 %v29457_v8  ;;  %v22738_v8 = vpack.c.bf16 %v15436_v18, %v15435_v54 }
 0xbfc   : > { %21022 = vmatprep.mubr.f32.mxu0 %v29458_v12  ;;  %v15437_v12 = vld [vmem:[%s29016_s1 + $0x1670] sm:$0xff] }
 0xbff   : > { %21023 = vmatmul.mubr.f32.gmra.mrb[90].mxu0 %v29459_v17  ;;  %v15438_v17 = vld [vmem:[%s29016_s1 + $0x1678] sm:$0xff] }
 0xc00   : > { %21025 = vmatprep.mubr.f32.mxu0 %v29460_v40  ;;  %v13611_v40 = vld [vmem:[#allocation3 + $0xc1] sm:$0xff] }
 0xc03   : > { %21026 = vmatmul.mubr.f32.gmra.mrb[92].mxu0 %v28479_v52  ;;  %v15411_v52 = vld [vmem:[%s29016_s1 + $0x15a0] sm:$0xff] }
 0xc04   : > { %21028 = vmatprep.mubr.f32.mxu0 %v28746_v53  ;;  %v22690_v29 = vpack.c.bf16 %v15412_v39, %v15411_v52  ;;  %v13615_v52 = vld [vmem:[#allocation3 + $0xf1] sm:$0xff]  ;;  %v13616_v39 = vld [vmem:[#allocation3 + $0xf9] sm:$0xff] }
 0xc07   : > { %21029 = vmatmul.mubr.f32.gmra.mrb[94].mxu0 %v28749_v11 }
 0xc08   : > { %21063 = vmatprep.mubr.f32.mxu0 %v28230_v60  ;;  %v15413_v60 = vld [vmem:[%s29016_s1 + $0x15b0] sm:$0xff] }
 0xc0b   : > { %21064 = vmatmul.mubr.f32.vlgmr.msra.gmra.mrb[64].mxu0 %v28233_v56  ;;  %v22694_v56 = vpack.c.bf16 %v15414_v25, %v15413_v60  ;;  %v13619_v60 = vld [vmem:[#allocation3 + $0x121] sm:$0xff]  ;;  %v13620_v25 = vld [vmem:[#allocation3 + $0x129] sm:$0xff] }
 0xc0c   : > { %21066 = vmatprep.mubr.f32.mxu0 %v28242_v42  ;;  %22685 = vmatpush3.bf16.msra.mxu0 %v22682_v38  ;;  %v15415_v42 = vld [vmem:[%s29016_s1 + $0x15c0] sm:$0xff]  ;;  %v29469_v38 = vld [vmem:[#allocation33_spill] sm:$0xff] }
 0xc0d   : > { %22687 = vmatprep.subr.bf16.mxu0 %v22686_v9 }
 0xc0f   : > { %21067 = vmatmul.mubr.f32.gmra.mrb[66].mxu0 %v28245_v59  ;;  %v22698_v59 = vpack.c.bf16 %v15416_v44, %v15415_v42  ;;  %v13622_v42 = vld [vmem:[#allocation3 + $0x141] sm:$0xff]  ;;  %v13623_v44 = vld [vmem:[#allocation3 + $0x151] sm:$0xff] }
 0xc10   : > { %21069 = vmatprep.mubr.f32.mxu0 %v28254_v5  ;;  %22689 = vmatpush3.bf16.msra.mxu0 %v22686_v9  ;;  %v15417_v5 = vld [vmem:[%s29016_s1 + $0x15d0] sm:$0xff] }
 0xc11   : > { %22691 = vmatprep.subr.bf16.mxu0 %v22690_v29  ;;  %v13614_v9 = vld [vmem:[#allocation3 + $0xe1] sm:$0xff] }
 0xc13   : > { %21070 = vmatmul.mubr.f32.gmra.mrb[68].mxu0 %v28257_v35  ;;  %v22702_v35 = vpack.c.bf16 %v15418_v19, %v15417_v5  ;;  %v13625_v5 = vld [vmem:[#allocation3 + $0x169] sm:$0xff]  ;;  %v13626_v19 = vld [vmem:[#allocation3 + $0x171] sm:$0xff] }
 0xc14   : > { %21072 = vmatprep.mubr.f32.mxu0 %v28266_v21  ;;  %22693 = vmatpush3.bf16.msra.mxu0 %v22690_v29  ;;  %v15419_v21 = vld [vmem:[%s29016_s1 + $0x15e0] sm:$0xff] }
 0xc15   : > { %22695 = vmatprep.subr.bf16.mxu0 %v22694_v56  ;;  %v13617_v29 = vld [vmem:[#allocation3 + $0x109] sm:$0xff] }
 0xc17   : > { %21073 = vmatmul.mubr.f32.gmra.mrb[70].mxu0 %v28269_v41  ;;  %v22706_v41 = vpack.c.bf16 %v15420_v63, %v15419_v21  ;;  %v13629_v21 = vld [vmem:[#allocation3 + $0x199] sm:$0xff]  ;;  %v13628_v63 = vld [vmem:[#allocation3 + $0x189] sm:$0xff] }
 0xc18   : > { %21075 = vmatprep.mubr.f32.mxu0 %v28278_v37  ;;  %22697 = vmatpush3.bf16.msra.mxu0 %v22694_v56  ;;  %v15421_v37 = vld [vmem:[%s29016_s1 + $0x15f0] sm:$0xff] }
 0xc19   : > { %22699 = vmatprep.subr.bf16.mxu0 %v22698_v59  ;;  %v13621_v56 = vld [vmem:[#allocation3 + $0x139] sm:$0xff] }
 0xc1b   : > { %21076 = vmatmul.mubr.f32.gmra.mrb[72].mxu0 %v28281_v34  ;;  %v22710_v34 = vpack.c.bf16 %v15422_v20, %v15421_v37  ;;  %v13905_v37 = vld [vmem:[#allocation3 + $0x32] sm:$0xff]  ;;  %v13906_v20 = vld [vmem:[#allocation3 + $0x3a] sm:$0xff] }
 0xc1c   : > { %21078 = vmatprep.mubr.f32.mxu0 %v28290_v28  ;;  %22701 = vmatpush3.bf16.msra.mxu0 %v22698_v59  ;;  %v15423_v28 = vld [vmem:[%s29016_s1 + $0x1600] sm:$0xff]  ;;  %v13624_v59 = vld [vmem:[#allocation3 + $0x159] sm:$0xff] }
 0xc1d   : > { %22703 = vmatprep.subr.bf16.mxu0 %v22702_v35 }
 0xc1f   : > { %21079 = vmatmul.mubr.f32.gmra.mrb[74].mxu0 %v28293_v10  ;;  %v22714_v10 = vpack.c.bf16 %v15424_v58, %v15423_v28  ;;  %v13908_v28 = vld [vmem:[#allocation3 + $0x52] sm:$0xff]  ;;  %v13909_v58 = vld [vmem:[#allocation3 + $0x62] sm:$0xff] }
 0xc20   : > { %21081 = vmatprep.mubr.f32.mxu0 %v28296_v50  ;;  %22705 = vmatpush3.bf16.msra.mxu0 %v22702_v35  ;;  %v29461_v50 = vld [vmem:[#allocation4_spill] sm:$0xff]  ;;  %v13627_v35 = vld [vmem:[#allocation3 + $0x181] sm:$0xff] }
 0xc21   : > { %22707 = vmatprep.subr.bf16.mxu0 %v22706_v41 }
 0xc23   : > { %21082 = vmatmul.mubr.f32.gmra.mrb[76].mxu0 %v28299_v3  ;;  %v29462_v3 = vld [vmem:[#allocation5_spill] sm:$0xff] }
 0xc24   : > { %21084 = vmatprep.mubr.f32.mxu0 %v28302_v6  ;;  %22709 = vmatpush3.bf16.msra.mxu0 %v22706_v41  ;;  %v29463_v6 = vld [vmem:[#allocation7_spill] sm:$0xff] }
 0xc25   : > { %22711 = vmatprep.subr.bf16.mxu0 %v22710_v34  ;;  %v13630_v41 = vld [vmem:[#allocation3 + $0x1a1] sm:$0xff] }
 0xc27   : > { %21085 = vmatmul.mubr.f32.gmra.mrb[78].mxu0 %v28305_v1  ;;  %v13323_v1 = vld [vmem:[#allocation3 + $0x198] sm:$0xff] }
 0xc28   : > { %21087 = vmatprep.mubr.f32.mxu0 %v28308_v15  ;;  %22713 = vmatpush3.bf16.msra.mxu0 %v22710_v34  ;;  %v29464_v15 = vld [vmem:[#allocation8_spill] sm:$0xff] }
 0xc29   : > { %22715 = vmatprep.subr.bf16.mxu0 %v22714_v10  ;;  %v13907_v34 = vld [vmem:[#allocation3 + $0x4a] sm:$0xff] }
 0xc2b   : > { %21088 = vmatmul.mubr.f32.gmra.mrb[80].mxu0 %v28311_v24  ;;  %v15425_v24 = vld [vmem:[%s29016_s1 + $0x1610] sm:$0xff] }
 0xc2c   : > { %21090 = vmatprep.mubr.f32.mxu0 %v28314_v31  ;;  %v15426_v31 = vld [vmem:[%s29016_s1 + $0x1618] sm:$0xff] }
 0xc2f   : > { %21091 = vmatmul.mubr.f32.gmra.mrb[82].mxu0 %v28317_v36  ;;  %v28836_v36 = vld [vmem:[#allocation2 + $0x8] sm:$0xff] }
 0xc30   : > { %21093 = vmatprep.mubr.f32.mxu0 %v28320_v22  ;;  %v22718_v22 = vpack.c.bf16 %v15426_v31, %v15425_v24  ;;  %v13916_v24 = vld [vmem:[#allocation3 + $0xb2] sm:$0xff]  ;;  %v13917_v31 = vld [vmem:[#allocation3 + $0xc2] sm:$0xff] }
 0xc33   : > { %21094 = vmatmul.mubr.f32.gmra.mrb[84].mxu0 %v28323_v16  ;;  %v15427_v16 = vld [vmem:[%s29016_s1 + $0x1620] sm:$0xff] }
 0xc34   : > { %21096 = vmatprep.mubr.f32.mxu0 %v28326_v33  ;;  %v15428_v33 = vld [vmem:[%s29016_s1 + $0x1628] sm:$0xff] }
 0xc37   : > { %21097 = vmatmul.mubr.f32.gmra.mrb[86].mxu0 %v28329_v14  ;;  %v29465_v14 = vld [vmem:[#allocation9_spill] sm:$0xff] }
 0xc38   : > { %21099 = vmatprep.mubr.f32.mxu0 %v28332_v13  ;;  %v29466_v13 = vld [vmem:[#allocation10_spill] sm:$0xff] }
 0xc3b   : > { %21100 = vmatmul.mubr.f32.gmra.mrb[88].mxu0 %v28335_v26  ;;  %v22722_v26 = vpack.c.bf16 %v15428_v33, %v15427_v16  ;;  %v13919_v16 = vld [vmem:[#allocation3 + $0xda] sm:$0xff]  ;;  %v13920_v33 = vld [vmem:[#allocation3 + $0xe2] sm:$0xff] }
 0xc3c   : > { %21102 = vmatprep.mubr.f32.mxu0 %v29461_v50  ;;  %v13911_v50 = vld [vmem:[#allocation3 + $0x7a] sm:$0xff] }
 0xc3f   : > { %21103 = vmatmul.mubr.f32.gmra.mrb[90].mxu0 %v29462_v3  ;;  %v13912_v3 = vld [vmem:[#allocation3 + $0x82] sm:$0xff] }
 0xc40   : > { %21105 = vmatprep.mubr.f32.mxu0 %v29463_v6  ;;  %v13913_v6 = vld [vmem:[#allocation3 + $0x92] sm:$0xff] }
 0xc43   : > { %21106 = vmatmul.mubr.f32.gmra.mrb[92].mxu0 %v29464_v15  ;;  %v13915_v15 = vld [vmem:[#allocation3 + $0xaa] sm:$0xff] }
 0xc44   : > { %21108 = vmatprep.mubr.f32.mxu0 %v13323_v1  ;;  %v13914_v1 = vld [vmem:[#allocation3 + $0x9a] sm:$0xff] }
 0xc47   : > { %21109 = vmatmul.mubr.f32.gmra.mrb[94].mxu0 %v28836_v36 }
 0xc48   : > { %21143 = vmatprep.mubr.f32.mxu0 %v28578_v51  ;;  %v15429_v51 = vld [vmem:[%s29016_s1 + $0x1630] sm:$0xff] }
 0xc49   : > { %v22726_v49 = vpack.c.bf16 %v15430_v45, %v15429_v51  ;;  %v13924_v51 = vld [vmem:[#allocation3 + $0x112] sm:$0xff]  ;;  %v13925_v45 = vld [vmem:[#allocation3 + $0x122] sm:$0xff] }
 0xc4b   : > { %21144 = vmatmul.mubr.f32.vlgmr.msra.gmra.mrb[64].mxu0 %v29465_v14  ;;  %v13921_v14 = vld [vmem:[#allocation3 + $0xf2] sm:$0xff] }
 0xc4c   : > { %21146 = vmatprep.mubr.f32.mxu0 %v29466_v13  ;;  %22717 = vmatpush3.bf16.msra.mxu0 %v22714_v10  ;;  %v13910_v10 = vld [vmem:[#allocation3 + $0x6a] sm:$0xff]  ;;  %v13922_v13 = vld [vmem:[#allocation3 + $0xfa] sm:$0xff] }
 0xc4d   : > { %22719 = vmatprep.subr.bf16.mxu0 %v22718_v22 }
 0xc4f   : > { %21147 = vmatmul.mubr.f32.gmra.mrb[66].mxu0 %v29467_v23  ;;  %v13926_v23 = vld [vmem:[#allocation3 + $0x12a] sm:$0xff] }
 0xc50   : > { %21149 = vmatprep.mubr.f32.mxu0 %v29468_v57  ;;  %22721 = vmatpush3.bf16.msra.mxu0 %v22718_v22  ;;  %v13918_v22 = vld [vmem:[#allocation3 + $0xca] sm:$0xff]  ;;  %v13927_v57 = vld [vmem:[#allocation3 + $0x13a] sm:$0xff] }
 0xc51   : > { %22723 = vmatprep.subr.bf16.mxu0 %v22722_v26 }
 0xc53   : > { %21150 = vmatmul.mubr.f32.gmra.mrb[68].mxu0 %v29469_v38  ;;  %v13931_v38 = vld [vmem:[#allocation3 + $0x16a] sm:$0xff] }
 0xc54   : > { %21152 = vmatprep.mubr.f32.mxu0 %v29470_v27  ;;  %22725 = vmatpush3.bf16.msra.mxu0 %v22722_v26  ;;  %v13923_v26 = vld [vmem:[#allocation3 + $0x10a] sm:$0xff]  ;;  %v13932_v27 = vld [vmem:[#allocation3 + $0x172] sm:$0xff] }
 0xc55   : > { %22727 = vmatprep.subr.bf16.mxu0 %v22726_v49 }
 0xc57   : > { %21153 = vmatmul.mubr.f32.gmra.mrb[70].mxu0 %v29471_v30  ;;  %v14283_v30 = vshrl.u32 %v14282_v61, 7 }
 0xc58   : > { %21155 = vmatprep.mubr.f32.mxu0 %v29472_v4  ;;  %22729 = vmatpush3.bf16.msra.mxu0 %v22726_v49  ;;  %v13928_v49 = vld [vmem:[#allocation3 + $0x142] sm:$0xff]  ;;  %v14280_v4 = vld [vmem:[%s29018_s3] sm:$0x3] }
 0xc59   : > { %22731 = vmatprep.subr.bf16.mxu0 %v22730_v0  ;;  %v14288_v54 = vsub.s32 1, %v14283_v30 }
 0xc5b   : > { %21156 = vmatmul.mubr.f32.gmra.mrb[72].mxu0 %v28629_v62  ;;  %v22742_v62 = vpack.c.bf16 %v15438_v17, %v15437_v12 }
 0xc5c   : > { %21158 = vmatprep.mubr.f32.mxu0 %v29473_v46  ;;  %22733 = vmatpush3.bf16.msra.mxu0 %v22730_v0  ;;  %v13935_v0 = vld [vmem:[#allocation3 + $0x19a] sm:$0xff]  ;;  %v14289_v46 = vrot.slane %v14280_v4, %v14288_v54 }
 0xc5d   : > { %22735 = vmatprep.subr.bf16.mxu0 %v22734_v47 }
 0xc5e   : > { %14356 = vmatprep.mubr.f32.mxu1 %v14289_v46 }
 0xc5f   : > { %21159 = vmatmul.mubr.f32.gmra.mrb[74].mxu0 %v28641_v7  ;;  %v13618_v7 = vld [vmem:[#allocation3 + $0x111] sm:$0xff] }
 0xc60   : > { %21161 = vmatprep.mubr.f32.mxu0 %v13611_v40  ;;  %22737 = vmatpush3.bf16.msra.mxu0 %v22734_v47  ;;  %v14284_v47 = vsub.s32 0, %v14283_v30 }
 0xc61   : > { %22739 = vmatprep.subr.bf16.mxu0 %v22738_v8 }
 0xc62   : > { %v28892_v18 = vrot.slane %v14280_v4, %v14284_v47 }
 0xc63   : > { %21162 = vmatmul.mubr.f32.gmra.mrb[76].mxu0 %v13612_v2 }
 0xc64   : > { %21164 = vmatprep.mubr.f32.mxu0 %v13613_v43  ;;  %22741 = vmatpush3.bf16.msra.mxu0 %v22738_v8 }
 0xc65   : > { %22743 = vmatprep.subr.bf16.mxu0 %v22742_v62 }
 0xc67   : > { %21165 = vmatmul.mubr.f32.gmra.mrb[78].mxu0 %v13614_v9 }
 0xc68   : > { %21167 = vmatprep.mubr.f32.mxu0 %v13615_v52  ;;  %22745 = vmatpush3.bf16.msra.mxu0 %v22742_v62 }
 0xc6b   : > { %21168 = vmatmul.mubr.f32.gmra.mrb[80].mxu0 %v13616_v39 }
 0xc6c   : > { %21170 = vmatprep.mubr.f32.mxu0 %v13617_v29 }
 0xc6f   : > { %21171 = vmatmul.mubr.f32.gmra.mrb[82].mxu0 %v13618_v7 }
 0xc70   : > { %21173 = vmatprep.mubr.f32.mxu0 %v13619_v60 }
 0xc73   : > { %21174 = vmatmul.mubr.f32.gmra.mrb[84].mxu0 %v13620_v25 }
 0xc74   : > { %21176 = vmatprep.mubr.f32.mxu0 %v13621_v56 }
 0xc77   : > { %21177 = vmatmul.mubr.f32.gmra.mrb[86].mxu0 %v13622_v42 }
 0xc78   : > { %21179 = vmatprep.mubr.f32.mxu0 %v13623_v44 }
 0xc7b   : > { %21180 = vmatmul.mubr.f32.gmra.mrb[88].mxu0 %v13624_v59 }
 0xc7c   : > { %21182 = vmatprep.mubr.f32.mxu0 %v13625_v5 }
 0xc7f   : > { %21183 = vmatmul.mubr.f32.gmra.mrb[90].mxu0 %v13626_v19 }
 0xc80   : > { %21185 = vmatprep.mubr.f32.mxu0 %v13627_v35 }
 0xc83   : > { %21186 = vmatmul.mubr.f32.gmra.mrb[92].mxu0 %v13628_v63 }
 0xc84   : > { %21188 = vmatprep.mubr.f32.mxu0 %v13629_v21 }
 0xc87   : > { %21189 = vmatmul.mubr.f32.gmra.mrb[94].mxu0 %v13630_v41 }
 0xc88   : > { %21223 = vmatprep.mubr.f32.mxu0 %v13905_v37 }
 0xc8b   : > { %21224 = vmatmul.mubr.f32.vlgmr.msra.gmra.mrb[64].mxu0 %v13906_v20 }
 0xc8c   : > { %21226 = vmatprep.mubr.f32.mxu0 %v13907_v34 }
 0xc8f   : > { %21227 = vmatmul.mubr.f32.gmra.mrb[66].mxu0 %v13908_v28 }
 0xc90   : > { %21229 = vmatprep.mubr.f32.mxu0 %v13909_v58 }
 0xc93   : > { %21230 = vmatmul.mubr.f32.gmra.mrb[68].mxu0 %v13910_v10 }
 0xc94   : > { %21232 = vmatprep.mubr.f32.mxu0 %v13911_v50 }
 0xc97   : > { %21233 = vmatmul.mubr.f32.gmra.mrb[70].mxu0 %v13912_v3 }
 0xc98   : > { %21235 = vmatprep.mubr.f32.mxu0 %v13913_v6 }
 0xc9b   : > { %21236 = vmatmul.mubr.f32.gmra.mrb[72].mxu0 %v13914_v1 }
 0xc9c   : > { %21238 = vmatprep.mubr.f32.mxu0 %v13915_v15 }
 0xc9f   : > { %21239 = vmatmul.mubr.f32.gmra.mrb[74].mxu0 %v13916_v24 }
 0xca0   : > { %21241 = vmatprep.mubr.f32.mxu0 %v13917_v31 }
 0xca3   : > { %21242 = vmatmul.mubr.f32.gmra.mrb[76].mxu0 %v13918_v22 }
 0xca4   : > { %21244 = vmatprep.mubr.f32.mxu0 %v13919_v16 }
 0xca7   : > { %21245 = vmatmul.mubr.f32.gmra.mrb[78].mxu0 %v13920_v33 }
 0xca8   : > { %21247 = vmatprep.mubr.f32.mxu0 %v13921_v14 }
 0xcab   : > { %21248 = vmatmul.mubr.f32.gmra.mrb[80].mxu0 %v13922_v13 }
 0xcac   : > { %21250 = vmatprep.mubr.f32.mxu0 %v13923_v26 }
 0xcaf   : > { %21251 = vmatmul.mubr.f32.gmra.mrb[82].mxu0 %v13924_v51 }
 0xcb0   : > { %21253 = vmatprep.mubr.f32.mxu0 %v13925_v45 }
 0xcb3   : > { %21254 = vmatmul.mubr.f32.gmra.mrb[84].mxu0 %v13926_v23 }
 0xcb4   : > { %21256 = vmatprep.mubr.f32.mxu0 %v13927_v57 }
 0xcb7   : > { %21257 = vmatmul.mubr.f32.gmra.mrb[86].mxu0 %v13928_v49 }
 0xcb8   : > { %21259 = vmatprep.mubr.f32.mxu0 %v13929_v32 }
 0xcbb   : > { %21260 = vmatmul.mubr.f32.gmra.mrb[88].mxu0 %v13930_v55 }
 0xcbc   : > { %21262 = vmatprep.mubr.f32.mxu0 %v13931_v38 }
 0xcbf   : > { %21263 = vmatmul.mubr.f32.gmra.mrb[90].mxu0 %v13932_v27 }
 0xcc0   : > { %21265 = vmatprep.mubr.f32.mxu0 %v28746_v53  ;;  %v28897_v53 = vld [vmem:[%s29017_s2 + $0x4] ss:$0 sm:$0xff] }
 0xcc3   : > { %21266 = vmatmul.mubr.f32.gmra.mrb[92].mxu0 %v28749_v11 }
 0xcc4   : > { %21268 = vmatprep.mubr.f32.mxu0 %v13935_v0 }
 0xcc7   : > { %21269 = vmatmul.mubr.f32.gmra.mrb[94].mxu0 %v13936_v48 }
 0xd5e   : > { %v21225_v11 = vpop.f32.mrb[64].mxu0 }
 0xd5f   : > { %v14217_v8 = vadd.f32 %v21225_v11, %v28897_v53  ;;  %v14020_v12 = vpop.f32.mrb[65].mxu0 }
 0xd60   : > { %v14216_v17 = vadd.f32 %v28897_v53, %v14020_v12 }
 0xd61   : > { %v14249_v40 = vmax.f32 %v14217_v8, 0.0 }
 0xd62   : > { %v14248_v62 = vmax.f32 %v14216_v17, 0.0  ;;  %v21228_v2 = vpop.f32.mrb[66].mxu0 }
 0xd63   : > { %v14219_v43 = vadd.f32 %v21228_v2, %v28897_v53  ;;  %v14030_v9 = vpop.f32.mrb[67].mxu0 }
 0xd64   : > { %v28902_v52 = vpack.c.bf16 %v14249_v40, %v14248_v62  ;;  %v14218_v39 = vadd.f32 %v28897_v53, %v14030_v9 }
 0xd65   : > { %v14251_v29 = vmax.f32 %v14219_v43, 0.0 }
 0xd66   : > { %v14250_v7 = vmax.f32 %v14218_v39, 0.0  ;;  %v21231_v60 = vpop.f32.mrb[68].mxu0 }
 0xd67   : > { %v14221_v25 = vadd.f32 %v21231_v60, %v28897_v53  ;;  %v14040_v56 = vpop.f32.mrb[69].mxu0 }
 0xd68   : > { %v28906_v42 = vpack.c.bf16 %v14251_v29, %v14250_v7  ;;  %v14220_v44 = vadd.f32 %v28897_v53, %v14040_v56 }
 0xd69   : > { %v14253_v59 = vmax.f32 %v14221_v25, 0.0 }
 0xd6a   : > { %v14252_v5 = vmax.f32 %v14220_v44, 0.0  ;;  %v21234_v19 = vpop.f32.mrb[70].mxu0 }
 0xd6b   : > { %v14223_v35 = vadd.f32 %v21234_v19, %v28897_v53  ;;  %v14050_v21 = vpop.f32.mrb[71].mxu0 }
 0xd6c   : > { %v28910_v63 = vpack.c.bf16 %v14253_v59, %v14252_v5  ;;  %v14222_v41 = vadd.f32 %v28897_v53, %v14050_v21 }
 0xd6d   : > { %v14255_v37 = vmax.f32 %v14223_v35, 0.0 }
 0xd6e   : > { %v14254_v20 = vmax.f32 %v14222_v41, 0.0  ;;  %v21237_v34 = vpop.f32.mrb[72].mxu0 }
 0xd6f   : > { %v14225_v28 = vadd.f32 %v21237_v34, %v28897_v53  ;;  %v14060_v58 = vpop.f32.mrb[73].mxu0 }
 0xd70   : > { %v28914_v10 = vpack.c.bf16 %v14255_v37, %v14254_v20  ;;  %v14224_v50 = vadd.f32 %v28897_v53, %v14060_v58 }
 0xd71   : > { %v14257_v3 = vmax.f32 %v14225_v28, 0.0 }
 0xd72   : > { %v14256_v6 = vmax.f32 %v14224_v50, 0.0  ;;  %v21240_v1 = vpop.f32.mrb[74].mxu0 }
 0xd73   : > { %v14227_v15 = vadd.f32 %v21240_v1, %v28897_v53  ;;  %v14070_v24 = vpop.f32.mrb[75].mxu0 }
 0xd74   : > { %v28918_v31 = vpack.c.bf16 %v14257_v3, %v14256_v6  ;;  %v14226_v22 = vadd.f32 %v28897_v53, %v14070_v24 }
 0xd75   : > { %v14259_v16 = vmax.f32 %v14227_v15, 0.0 }
 0xd76   : > { %v14258_v33 = vmax.f32 %v14226_v22, 0.0  ;;  %v21243_v14 = vpop.f32.mrb[76].mxu0 }
 0xd77   : > { %v14229_v13 = vadd.f32 %v21243_v14, %v28897_v53  ;;  %v14080_v26 = vpop.f32.mrb[77].mxu0 }
 0xd78   : > { %v28922_v51 = vpack.c.bf16 %v14259_v16, %v14258_v33  ;;  %v14228_v45 = vadd.f32 %v28897_v53, %v14080_v26 }
 0xd79   : > { %v14261_v23 = vmax.f32 %v14229_v13, 0.0 }
 0xd7a   : > { %v14260_v57 = vmax.f32 %v14228_v45, 0.0  ;;  %v21246_v49 = vpop.f32.mrb[78].mxu0 }
 0xd7b   : > { %v14231_v32 = vadd.f32 %v21246_v49, %v28897_v53  ;;  %v14090_v55 = vpop.f32.mrb[79].mxu0 }
 0xd7c   : > { %v28926_v38 = vpack.c.bf16 %v14261_v23, %v14260_v57  ;;  %v14230_v27 = vadd.f32 %v28897_v53, %v14090_v55 }
 0xd7d   : > { %v14263_v0 = vmax.f32 %v14231_v32, 0.0 }
 0xd7e   : > { %v14262_v48 = vmax.f32 %v14230_v27, 0.0  ;;  %v21249_v61 = vpop.f32.mrb[80].mxu0 }
 0xd7f   : > { %v14233_v30 = vadd.f32 %v21249_v61, %v28897_v53  ;;  %v14100_v4 = vpop.f32.mrb[81].mxu0  ;;  %v24107_v61 = vmov 0.0|0.0  }
 0xd80   : > { %v28930_v47 = vpack.c.bf16 %v14263_v0, %v14262_v48  ;;  %v14232_v54 = vadd.f32 %v28897_v53, %v14100_v4  ;;  %v15440_v0 = vld [vmem:[%s29016_s1 + $0x1680] sm:$0xff]  ;;  %v15441_v48 = vld [vmem:[%s29016_s1 + $0x1688] sm:$0xff] }
 0xd81   : > { %v14265_v46 = vmax.f32 %v14233_v30, 0.0  ;;  %v15444_v4 = vld [vmem:[%s29016_s1 + $0x16a0] sm:$0xff] }
 0xd82   : > { %v14264_v11 = vmax.f32 %v14232_v54, 0.0  ;;  %v21252_v8 = vpop.f32.mrb[82].mxu0 }
 0xd83   : > { %v14235_v12 = vadd.f32 %v21252_v8, %v28897_v53  ;;  %v14110_v17 = vpop.f32.mrb[83].mxu0  ;;  %v15448_v8 = vld [vmem:[%s29016_s1 + $0x16c0] sm:$0xff] }
 0xd84   : > { %v22746_v40 = vpack.c.bf16 %v14265_v46, %v14264_v11  ;;  %v14234_v62 = vadd.f32 %v28897_v53, %v14110_v17  ;;  %v15446_v46 = vld [vmem:[%s29016_s1 + $0x16b0] sm:$0xff] }
 0xd85   : > { %v14267_v2 = vmax.f32 %v14235_v12, 0.0  ;;  %v15449_v12 = vld [vmem:[%s29016_s1 + $0x16c8] sm:$0xff] }
 0xd86   : > { %v14266_v43 = vmax.f32 %v14234_v62, 0.0  ;;  %v21255_v9 = vpop.f32.mrb[84].mxu0  ;;  %22747 = vmatprep.subr.bf16.mxu1 %v22746_v40  ;;  %v22791_v17 = vpack.c.bf16 %v15449_v12, %v15448_v8  ;;  %v15450_v40 = vld [vmem:[%s29016_s1 + $0x16d0] sm:$0xff]  ;;  %v15451_v62 = vld [vmem:[%s29016_s1 + $0x16d8] sm:$0xff] }
 0xd87   : > { %v14237_v39 = vadd.f32 %v21255_v9, %v28897_v53  ;;  %v14120_v29 = vpop.f32.mrb[85].mxu0  ;;  %22749 = vmatpush3.bf16.msra.mxu1 %v28902_v52  ;;  %v15453_v9 = vld [vmem:[%s29016_s1 + $0x16e8] sm:$0xff] }
 0xd88   : > { %v22750_v7 = vpack.c.bf16 %v14267_v2, %v14266_v43  ;;  %v14236_v60 = vadd.f32 %v28897_v53, %v14120_v29  ;;  %v22794_v2 = vpack.c.bf16 %v15451_v62, %v15450_v40  ;;  %v15452_v43 = vld [vmem:[%s29016_s1 + $0x16e0] sm:$0xff]  ;;  %v15454_v29 = vld [vmem:[%s29016_s1 + $0x16f0] sm:$0xff] }
 0xd89   : > { %v14269_v25 = vmax.f32 %v14237_v39, 0.0  ;;  %v22797_v39 = vpack.c.bf16 %v15453_v9, %v15452_v43 }
 0xd8a   : > { %v14268_v56 = vmax.f32 %v14236_v60, 0.0  ;;  %v21258_v44 = vpop.f32.mrb[86].mxu0  ;;  %22751 = vmatprep.subr.bf16.mxu1 %v22750_v7  ;;  %v15455_v7 = vld [vmem:[%s29016_s1 + $0x16f8] sm:$0xff] }
 0xd8b   : > { %v14239_v59 = vadd.f32 %v21258_v44, %v28897_v53  ;;  %v14130_v5 = vpop.f32.mrb[87].mxu0  ;;  %22753 = vmatpush3.bf16.msra.mxu1 %v28906_v42  ;;  %v22800_v60 = vpack.c.bf16 %v15455_v7, %v15454_v29 }
 0xd8c   : > { %v22754_v19 = vpack.c.bf16 %v14269_v25, %v14268_v56  ;;  %v14238_v35 = vadd.f32 %v28897_v53, %v14130_v5 }
 0xd8d   : > { %v14271_v21 = vmax.f32 %v14239_v59, 0.0  ;;  %v14379_v59 = vld [vmem:[%s29017_s2 + $0x5] sm:$0x1] }
 0xd8e   : > { %v14270_v41 = vmax.f32 %v14238_v35, 0.0  ;;  %v21261_v37 = vpop.f32.mrb[88].mxu0  ;;  %22755 = vmatprep.subr.bf16.mxu1 %v22754_v19 }
 0xd8f   : > { %v14241_v52 = vadd.f32 %v21261_v37, %v28897_v53  ;;  %v14140_v20 = vpop.f32.mrb[89].mxu0  ;;  %22757 = vmatpush3.bf16.msra.mxu1 %v28910_v63 }
 0xd90   : > { %v22758_v34 = vpack.c.bf16 %v14271_v21, %v14270_v41  ;;  %v14240_v28 = vadd.f32 %v28897_v53, %v14140_v20 }
 0xd91   : > { %v14273_v58 = vmax.f32 %v14241_v52, 0.0 }
 0xd92   : > { %v14272_v50 = vmax.f32 %v14240_v28, 0.0  ;;  %v21264_v3 = vpop.f32.mrb[90].mxu0  ;;  %22759 = vmatprep.subr.bf16.mxu1 %v22758_v34 }
 0xd93   : > { %v14243_v42 = vadd.f32 %v21264_v3, %v28897_v53  ;;  %v14150_v6 = vpop.f32.mrb[91].mxu0  ;;  %22761 = vmatpush3.bf16.msra.mxu1 %v28914_v10 }
 0xd94   : > { %v22762_v1 = vpack.c.bf16 %v14273_v58, %v14272_v50  ;;  %v14242_v15 = vadd.f32 %v28897_v53, %v14150_v6 }
 0xd95   : > { %v14275_v24 = vmax.f32 %v14243_v42, 0.0 }
 0xd96   : > { %v14274_v22 = vmax.f32 %v14242_v15, 0.0  ;;  %v21267_v16 = vpop.f32.mrb[92].mxu0  ;;  %22763 = vmatprep.subr.bf16.mxu1 %v22762_v1 }
 0xd97   : > { %v14245_v63 = vadd.f32 %v21267_v16, %v28897_v53  ;;  %v14160_v33 = vpop.f32.mrb[93].mxu0  ;;  %22765 = vmatpush3.bf16.msra.mxu1 %v28918_v31 }
 0xd98   : > { %v22766_v14 = vpack.c.bf16 %v14275_v24, %v14274_v22  ;;  %v14244_v13 = vadd.f32 %v28897_v53, %v14160_v33 }
 0xd99   : > { %v14277_v26 = vmax.f32 %v14245_v63, 0.0 }
 0xd9a   : > { %v14276_v45 = vmax.f32 %v14244_v13, 0.0  ;;  %v21270_v23 = vpop.f32.mrb[94].mxu0  ;;  %22767 = vmatprep.subr.bf16.mxu1 %v22766_v14 }
 0xd9b   : > { %v14247_v10 = vadd.f32 %v21270_v23, %v28897_v53  ;;  %v14170_v57 = vpop.f32.mrb[95].mxu0  ;;  %22769 = vmatpush3.bf16.msra.mxu1 %v28922_v51  ;;  %v22779_v51 = vpack.c.bf16 %v15441_v48, %v15440_v0 }
 0xd9c   : > { %v22770_v49 = vpack.c.bf16 %v14277_v26, %v14276_v45  ;;  %v14246_v32 = vadd.f32 %v28897_v53, %v14170_v57  ;;  %v15442_v53 = vld [vmem:[%s29016_s1 + $0x1690] sm:$0xff] }
 0xd9d   : > { %v14279_v55 = vmax.f32 %v14247_v10, 0.0 }
 0xd9e   : > { %v14278_v27 = vmax.f32 %v14246_v32, 0.0  ;;  %22771 = vmatprep.subr.bf16.mxu1 %v22770_v49 }
 0xd9f   : > { %22773 = vmatpush3.bf16.msra.mxu1 %v28926_v38  ;;  %v15443_v38 = vld [vmem:[%s29016_s1 + $0x1698] sm:$0xff] }
 0xda0   : > { %v22774_v31 = vpack.c.bf16 %v14279_v55, %v14278_v27  ;;  %v22782_v30 = vpack.c.bf16 %v15443_v38, %v15442_v53 }
 0xda2   : > { %22775 = vmatprep.subr.bf16.mxu1 %v22774_v31 }
 0xda3   : > { %22777 = vmatpush3.bf16.msra.mxu1 %v28930_v47  ;;  %v15445_v47 = vld [vmem:[%s29016_s1 + $0x16a8] sm:$0xff] }
 0xda4   : > { %22778 = vmatprep.subr.bf16.mxu1 %v24107_v61  ;;  %v22785_v54 = vpack.c.bf16 %v15445_v47, %v15444_v4 }
 0xda6   : > { %14357 = vmatmul.mubr.f32.vlgmr.msra.gmra.mrb[96].mxu1 %v28892_v18  ;;  %v15447_v18 = vld [vmem:[%s29016_s1 + $0x16b8] sm:$0xff] }
 0xda7   : > { %22780 = vmatpush3.bf16.msra.mxu1 %v22779_v51  ;;  %v22788_v11 = vpack.c.bf16 %v15447_v18, %v15446_v46  ;;  %21303 = vmatprep.mubr.msk.f32.mxu1 %vm24108_vm0, %v28836_v36 }
 0xda8   : > { %22781 = vmatprep.subr.bf16.mxu1 %v24107_v61 }
 0xdab   : > { %22783 = vmatpush3.bf16.msra.mxu1 %v22782_v30 }
 0xdac   : > { %22784 = vmatprep.subr.bf16.mxu1 %v24107_v61 }
 0xdaf   : > { %22786 = vmatpush3.bf16.msra.mxu1 %v22785_v54 }
 0xdb0   : > { %22787 = vmatprep.subr.bf16.mxu1 %v24107_v61 }
 0xdb3   : > { %22789 = vmatpush3.bf16.msra.mxu1 %v22788_v11 }
 0xdb4   : > { %22790 = vmatprep.subr.bf16.mxu1 %v24107_v61 }
 0xdb7   : > { %22792 = vmatpush3.bf16.msra.mxu1 %v22791_v17 }
 0xdb8   : > { %22793 = vmatprep.subr.bf16.mxu1 %v24107_v61 }
 0xdbb   : > { %22795 = vmatpush3.bf16.msra.mxu1 %v22794_v2 }
 0xdbc   : > { %22796 = vmatprep.subr.bf16.mxu1 %v24107_v61 }
 0xdbf   : > { %22798 = vmatpush3.bf16.msra.mxu1 %v22797_v39 }
 0xdc0   : > { %22799 = vmatprep.subr.bf16.mxu1 %v24107_v61 }
 0xdc3   : > { %22801 = vmatpush3.bf16.msra.mxu1 %v22800_v60 }
 0xe79   : > { %v17651_v25 = vpop.f32.mrb[96].mxu1 }
 0xe7a   : > { %v17652_v56 = vpop.f32.mrb[97].mxu1 }
 0xe7b   : > { %v17653_v44 = vadd.f32 %v17652_v56, %v17651_v25 }
 0xe7d   : > { %21304 = vmatmul.mubr.f32.vlgmr.msra.gmra.mrb[98].mxu1 %v17653_v44 }
 0xf50   : > { %v14446_v5 = vpop.f32.mrb[98].mxu1 }
 0xf51   : > { %v14447_v19 = vadd.f32 %v14446_v5, %v14379_v59  ;;  %v21305_v35 = vpop.f32.mrb[99].mxu1 }
 0xf53   : > { %14450 = vst [vmem:[%s228_s8] sm:$0x1] %v14447_v19 }
 0xf54 PF: > { %s16_s18 = sadd.s32 1, %s24104_s18  }
 0xf55   : > { %p13_p4 = scmp.ge.s32.totalorder %s16_s18, 4  }
 0xf57   :  { %15 = sbr.rel (!%p13_p4) target bundleno = 1 (0x1), region = 131 }

</bundles_post_ra>
